<compile_context>
chip_gen: v7x
topology: tpu7x:2x2x1
jax: 0.10.0
libtpu: 0.0.40
codegen_flags: <defaults>
</compile_context>

<pallas_src>
import functools
import math

import jax
import jax.numpy as jnp
from jax.experimental import pallas as pl
from jax.experimental.pallas import tpu as pltpu


_LAYER_ORDER = ("down1", "down2", "down3", "down4", "up1", "up2", "up3", "up4")
# Which layers take a concatenated att2 input (up1 consumes only `a`).
_HAS_ATT = (True, True, True, True, False, True, True, True)


# ----------------------------- Pallas kernel --------------------------------


def _make_fused_kernel(has_att):
    """Build the fused 8-layer kernel.

    Ref layout: [feature1, att2, (W_h, [W_a], b) per layer, x_out, a_out].
    """

    def kernel(*refs):
        feature1_ref, att2_ref = refs[0], refs[1]
        x_out_ref, a_out_ref = refs[-2], refs[-1]

        att2 = att2_ref[...]

        def mm(lhs, w_ref):
            # Cast lhs to the weight dtype (no-op for f32, enables native
            # bf16 MXU path for bf16 weights); accumulate in f32.
            return jnp.dot(
                lhs.astype(w_ref.dtype),
                w_ref[...],
                preferred_element_type=jnp.float32,
            )

        idx = 2
        h = feature1_ref[...]
        for li, ha in enumerate(has_att):
            wh_ref = refs[idx]
            idx += 1
            if ha:
                wa_ref = refs[idx]
                idx += 1
            b_ref = refs[idx]
            idx += 1

            y = mm(h, wh_ref)
            if ha:
                y = y + mm(att2, wa_ref)
            y = y + b_ref[...].astype(jnp.float32)
            h = jnp.maximum(y, 0.0)

            if li == 3:  # output of down4 is the bottleneck activation `a`
                a_out_ref[...] = h.astype(a_out_ref.dtype)

        x_out_ref[...] = h.astype(x_out_ref.dtype)

    return kernel


# ------------------------------ Forward pass ---------------------------------


def netcc3_forward(params, feature1, att2):
    """Pallas-fused mirror of _netCC_3.forward: returns (x, a)."""
    B = feature1.shape[0]
    att_dim = att2.shape[1]
    out_dim = params["up4"][1].shape[0]

    # Flatten inputs: split each weight into (activation rows, att2 rows) so
    # the kernel never needs a concatenated activation, and make biases 2-D.
    flat_inputs = [feature1, att2]
    for name, ha in zip(_LAYER_ORDER, _HAS_ATT):
        w, b = params[name]
        if ha:
            k_h = w.shape[0] - att_dim
            flat_inputs += [w[:k_h], w[k_h:], b.reshape(1, -1)]
        else:
            flat_inputs += [w, b.reshape(1, -1)]

    out_shapes = (
        jax.ShapeDtypeStruct((B, out_dim), feature1.dtype),
        jax.ShapeDtypeStruct((B, att_dim), feature1.dtype),
    )

    # Everything (weights + activations + outputs) is VMEM-resident for the
    # single step. Give 1.5x headroom, cap under v7x's 64 MiB physical VMEM.
    in_bytes = sum(a.size * jnp.dtype(a.dtype).itemsize for a in flat_inputs)
    out_bytes = sum(
        math.prod(s.shape) * jnp.dtype(s.dtype).itemsize for s in out_shapes
    )
    vmem_limit = min(int(1.5 * (in_bytes + out_bytes)) + (8 << 20), 60 << 20)

    x, a = pl.pallas_call(
        _make_fused_kernel(_HAS_ATT),
        out_shape=out_shapes,
        compiler_params=pltpu.CompilerParams(vmem_limit_bytes=vmem_limit),
    )(*flat_inputs)
    return x, a


# ------------------------------ Param init -----------------------------------


def init_linear_params(key, in_features, out_features, dtype=jnp.float32):
    """Deterministic init mimicking PyTorch nn.Linear defaults (uniform)."""
    kw, kb = jax.random.split(key)
    bound = 1.0 / math.sqrt(in_features)
    # Stored as [in, out] for y = x @ W + b.
    w = jax.random.uniform(
        kw, (in_features, out_features), dtype, minval=-bound, maxval=bound
    )
    b = jax.random.uniform(kb, (out_features,), dtype, minval=-bound, maxval=bound)
    return w, b


def init_netcc3_params(key, att_dim, in_dim, out_dim, dtype=jnp.float32):
    layer_dims = [
        ("down1", in_dim + att_dim, 1024),
        ("down2", 1024 + att_dim, 512),
        ("down3", 512 + att_dim, 256),
        ("down4", 256 + att_dim, att_dim),
        ("up1", att_dim, 256),
        ("up2", 256 + att_dim, 512),
        ("up3", 512 + att_dim, 1024),
        ("up4", 1024 + att_dim, out_dim),
    ]
    params = {}
    keys = jax.random.split(key, len(layer_dims))
    for k, (name, fin, fout) in zip(keys, layer_dims):
        params[name] = init_linear_params(k, fin, fout, dtype)
    return params


# ------------------------- Pure-JAX reference check ---------------------------


def netcc3_forward_ref(params, feature1, att2):
    def lr(h, w, b):
        return jnp.maximum(h @ w + b, 0.0)

    cat = lambda h: jnp.concatenate([h, att2], axis=1)
    x = lr(cat(feature1), *params["down1"])
    x = lr(cat(x), *params["down2"])
    x = lr(cat(x), *params["down3"])
    a = lr(cat(x), *params["down4"])
    x = lr(a, *params["up1"])
    x = lr(cat(x), *params["up2"])
    x = lr(cat(x), *params["up3"])
    x = lr(cat(x), *params["up4"])
    return x, a


# ---------------------------------- Main --------------------------------------


if __name__ == "__main__":
    B = 2
    ATT_DIM = 128
    IN_DIM = 512
    OUT_DIM = 512

    root = jax.random.PRNGKey(0)
    kp, kf, ka = jax.random.split(root, 3)

    params = init_netcc3_params(kp, ATT_DIM, IN_DIM, OUT_DIM)
    feature1 = jax.random.normal(kf, (B, IN_DIM), jnp.float32)
    att2 = jax.random.normal(ka, (B, ATT_DIM), jnp.float32)

    fwd = jax.jit(netcc3_forward)

    # f32 path: must match the pure-JAX reference.
    x_out, a_out = fwd(params, feature1, att2)
    jax.block_until_ready((x_out, a_out))

    x_ref, a_ref = netcc3_forward_ref(params, feature1, att2)
    assert x_out.shape == (B, OUT_DIM) and a_out.shape == (B, ATT_DIM)
    assert jnp.allclose(x_out, x_ref, atol=1e-3, rtol=1e-3)
    assert jnp.allclose(a_out, a_ref, atol=1e-3, rtol=1e-3)

    # bf16-weight path: halves HBM weight traffic (the actual bottleneck);
    # accumulation inside the kernel stays f32. Sanity-check only.
    params_bf16 = jax.tree_util.tree_map(
        lambda p: p.astype(jnp.bfloat16), params
    )
    x_bf, a_bf = fwd(params_bf16, feature1, att2)
    jax.block_until_ready((x_bf, a_bf))
    assert x_bf.shape == (B, OUT_DIM) and a_bf.shape == (B, ATT_DIM)
    assert bool(jnp.all(jnp.isfinite(x_bf))) and bool(jnp.all(jnp.isfinite(a_bf)))

    print("KERNEL_OK")
</pallas_src>

<mosaic_0001>
module attributes {stable_mosaic.version = 11 : i64} {
  func.func @kernel(%arg0: memref<2x512xf32, #tpu.memory_space<vmem>>, %arg1: memref<2x128xf32, #tpu.memory_space<vmem>>, %arg2: memref<512x1024xf32, #tpu.memory_space<vmem>>, %arg3: memref<128x1024xf32, #tpu.memory_space<vmem>>, %arg4: memref<1x1024xf32, #tpu.memory_space<vmem>>, %arg5: memref<1024x512xf32, #tpu.memory_space<vmem>>, %arg6: memref<128x512xf32, #tpu.memory_space<vmem>>, %arg7: memref<1x512xf32, #tpu.memory_space<vmem>>, %arg8: memref<512x256xf32, #tpu.memory_space<vmem>>, %arg9: memref<128x256xf32, #tpu.memory_space<vmem>>, %arg10: memref<1x256xf32, #tpu.memory_space<vmem>>, %arg11: memref<256x128xf32, #tpu.memory_space<vmem>>, %arg12: memref<128x128xf32, #tpu.memory_space<vmem>>, %arg13: memref<1x128xf32, #tpu.memory_space<vmem>>, %arg14: memref<128x256xf32, #tpu.memory_space<vmem>>, %arg15: memref<1x256xf32, #tpu.memory_space<vmem>>, %arg16: memref<256x512xf32, #tpu.memory_space<vmem>>, %arg17: memref<128x512xf32, #tpu.memory_space<vmem>>, %arg18: memref<1x512xf32, #tpu.memory_space<vmem>>, %arg19: memref<512x1024xf32, #tpu.memory_space<vmem>>, %arg20: memref<128x1024xf32, #tpu.memory_space<vmem>>, %arg21: memref<1x1024xf32, #tpu.memory_space<vmem>>, %arg22: memref<1024x512xf32, #tpu.memory_space<vmem>>, %arg23: memref<128x512xf32, #tpu.memory_space<vmem>>, %arg24: memref<1x512xf32, #tpu.memory_space<vmem>>, %arg25: memref<2x512xf32, #tpu.memory_space<vmem>>, %arg26: memref<2x128xf32, #tpu.memory_space<vmem>>) attributes {dimension_semantics = [], scalar_prefetch = 0 : i64, scratch_operands = 0 : i64, tpu.core_type = #tpu.core_type<tc>} {
    %c0 = arith.constant 0 : index
    %c0_0 = arith.constant 0 : index
    %0 = vector.load %arg1[%c0, %c0_0] : memref<2x128xf32, #tpu.memory_space<vmem>>, vector<2x128xf32>
    %c0_1 = arith.constant 0 : index
    %c0_2 = arith.constant 0 : index
    %1 = vector.load %arg0[%c0_1, %c0_2] : memref<2x512xf32, #tpu.memory_space<vmem>>, vector<2x512xf32>
    %c0_3 = arith.constant 0 : index
    %c0_4 = arith.constant 0 : index
    %2 = vector.load %arg2[%c0_3, %c0_4] : memref<512x1024xf32, #tpu.memory_space<vmem>>, vector<512x1024xf32>
    %cst = arith.constant dense<0.000000e+00> : vector<2x1024xf32>
    %3 = tpu.matmul %1, %2, %cst {dimension_numbers = #tpu.dot_dimension_numbers<[1], [0], [0], [1], [0, 0, 1, 1], [], []>} : vector<2x512xf32>, vector<512x1024xf32>, vector<2x1024xf32> -> vector<2x1024xf32>
    %c0_5 = arith.constant 0 : index
    %c0_6 = arith.constant 0 : index
    %4 = vector.load %arg3[%c0_5, %c0_6] : memref<128x1024xf32, #tpu.memory_space<vmem>>, vector<128x1024xf32>
    %cst_7 = arith.constant dense<0.000000e+00> : vector<2x1024xf32>
    %5 = tpu.matmul %0, %4, %cst_7 {dimension_numbers = #tpu.dot_dimension_numbers<[1], [0], [0], [1], [0, 0, 1, 1], [], []>} : vector<2x128xf32>, vector<128x1024xf32>, vector<2x1024xf32> -> vector<2x1024xf32>
    %6 = arith.addf %3, %5 : vector<2x1024xf32>
    %c0_8 = arith.constant 0 : index
    %c0_9 = arith.constant 0 : index
    %7 = vector.load %arg4[%c0_8, %c0_9] : memref<1x1024xf32, #tpu.memory_space<vmem>>, vector<1x1024xf32>
    %8 = vector.broadcast %7 : vector<1x1024xf32> to vector<2x1024xf32>
    %9 = arith.addf %6, %8 : vector<2x1024xf32>
    %cst_10 = arith.constant 0.000000e+00 : f32
    %10 = vector.broadcast %cst_10 : f32 to vector<2x1024xf32>
    %11 = arith.maximumf %9, %10 : vector<2x1024xf32>
    %c0_11 = arith.constant 0 : index
    %c0_12 = arith.constant 0 : index
    %12 = vector.load %arg5[%c0_11, %c0_12] : memref<1024x512xf32, #tpu.memory_space<vmem>>, vector<1024x512xf32>
    %cst_13 = arith.constant dense<0.000000e+00> : vector<2x512xf32>
    %13 = tpu.matmul %11, %12, %cst_13 {dimension_numbers = #tpu.dot_dimension_numbers<[1], [0], [0], [1], [0, 0, 1, 1], [], []>} : vector<2x1024xf32>, vector<1024x512xf32>, vector<2x512xf32> -> vector<2x512xf32>
    %c0_14 = arith.constant 0 : index
    %c0_15 = arith.constant 0 : index
    %14 = vector.load %arg6[%c0_14, %c0_15] : memref<128x512xf32, #tpu.memory_space<vmem>>, vector<128x512xf32>
    %cst_16 = arith.constant dense<0.000000e+00> : vector<2x512xf32>
    %15 = tpu.matmul %0, %14, %cst_16 {dimension_numbers = #tpu.dot_dimension_numbers<[1], [0], [0], [1], [0, 0, 1, 1], [], []>} : vector<2x128xf32>, vector<128x512xf32>, vector<2x512xf32> -> vector<2x512xf32>
    %16 = arith.addf %13, %15 : vector<2x512xf32>
    %c0_17 = arith.constant 0 : index
    %c0_18 = arith.constant 0 : index
    %17 = vector.load %arg7[%c0_17, %c0_18] : memref<1x512xf32, #tpu.memory_space<vmem>>, vector<1x512xf32>
    %18 = vector.broadcast %17 : vector<1x512xf32> to vector<2x512xf32>
    %19 = arith.addf %16, %18 : vector<2x512xf32>
    %cst_19 = arith.constant 0.000000e+00 : f32
    %20 = vector.broadcast %cst_19 : f32 to vector<2x512xf32>
    %21 = arith.maximumf %19, %20 : vector<2x512xf32>
    %c0_20 = arith.constant 0 : index
    %c0_21 = arith.constant 0 : index
    %22 = vector.load %arg8[%c0_20, %c0_21] : memref<512x256xf32, #tpu.memory_space<vmem>>, vector<512x256xf32>
    %cst_22 = arith.constant dense<0.000000e+00> : vector<2x256xf32>
    %23 = tpu.matmul %21, %22, %cst_22 {dimension_numbers = #tpu.dot_dimension_numbers<[1], [0], [0], [1], [0, 0, 1, 1], [], []>} : vector<2x512xf32>, vector<512x256xf32>, vector<2x256xf32> -> vector<2x256xf32>
    %c0_23 = arith.constant 0 : index
    %c0_24 = arith.constant 0 : index
    %24 = vector.load %arg9[%c0_23, %c0_24] : memref<128x256xf32, #tpu.memory_space<vmem>>, vector<128x256xf32>
    %cst_25 = arith.constant dense<0.000000e+00> : vector<2x256xf32>
    %25 = tpu.matmul %0, %24, %cst_25 {dimension_numbers = #tpu.dot_dimension_numbers<[1], [0], [0], [1], [0, 0, 1, 1], [], []>} : vector<2x128xf32>, vector<128x256xf32>, vector<2x256xf32> -> vector<2x256xf32>
    %26 = arith.addf %23, %25 : vector<2x256xf32>
    %c0_26 = arith.constant 0 : index
    %c0_27 = arith.constant 0 : index
    %27 = vector.load %arg10[%c0_26, %c0_27] : memref<1x256xf32, #tpu.memory_space<vmem>>, vector<1x256xf32>
    %28 = vector.broadcast %27 : vector<1x256xf32> to vector<2x256xf32>
    %29 = arith.addf %26, %28 : vector<2x256xf32>
    %cst_28 = arith.constant 0.000000e+00 : f32
    %30 = vector.broadcast %cst_28 : f32 to vector<2x256xf32>
    %31 = arith.maximumf %29, %30 : vector<2x256xf32>
    %c0_29 = arith.constant 0 : index
    %c0_30 = arith.constant 0 : index
    %32 = vector.load %arg11[%c0_29, %c0_30] : memref<256x128xf32, #tpu.memory_space<vmem>>, vector<256x128xf32>
    %cst_31 = arith.constant dense<0.000000e+00> : vector<2x128xf32>
    %33 = tpu.matmul %31, %32, %cst_31 {dimension_numbers = #tpu.dot_dimension_numbers<[1], [0], [0], [1], [0, 0, 1, 1], [], []>} : vector<2x256xf32>, vector<256x128xf32>, vector<2x128xf32> -> vector<2x128xf32>
    %c0_32 = arith.constant 0 : index
    %c0_33 = arith.constant 0 : index
    %34 = vector.load %arg12[%c0_32, %c0_33] : memref<128x128xf32, #tpu.memory_space<vmem>>, vector<128x128xf32>
    %cst_34 = arith.constant dense<0.000000e+00> : vector<2x128xf32>
    %35 = tpu.matmul %0, %34, %cst_34 {dimension_numbers = #tpu.dot_dimension_numbers<[1], [0], [0], [1], [0, 0, 1, 1], [], []>} : vector<2x128xf32>, vector<128x128xf32>, vector<2x128xf32> -> vector<2x128xf32>
    %36 = arith.addf %33, %35 : vector<2x128xf32>
    %c0_35 = arith.constant 0 : index
    %c0_36 = arith.constant 0 : index
    %37 = vector.load %arg13[%c0_35, %c0_36] : memref<1x128xf32, #tpu.memory_space<vmem>>, vector<1x128xf32>
    %38 = vector.broadcast %37 : vector<1x128xf32> to vector<2x128xf32>
    %39 = arith.addf %36, %38 : vector<2x128xf32>
    %cst_37 = arith.constant 0.000000e+00 : f32
    %40 = vector.broadcast %cst_37 : f32 to vector<2x128xf32>
    %41 = arith.maximumf %39, %40 : vector<2x128xf32>
    %c0_38 = arith.constant 0 : index
    %c0_39 = arith.constant 0 : index
    %42 = vector.load %arg26[%c0_38, %c0_39] : memref<2x128xf32, #tpu.memory_space<vmem>>, vector<2x128xf32>
    tpu.vector_store %arg26[%c0_38, %c0_39], %41 {strides = array<i32>} : memref<2x128xf32, #tpu.memory_space<vmem>>, vector<2x128xf32>,
    %c0_40 = arith.constant 0 : index
    %c0_41 = arith.constant 0 : index
    %43 = vector.load %arg14[%c0_40, %c0_41] : memref<128x256xf32, #tpu.memory_space<vmem>>, vector<128x256xf32>
    %cst_42 = arith.constant dense<0.000000e+00> : vector<2x256xf32>
    %44 = tpu.matmul %41, %43, %cst_42 {dimension_numbers = #tpu.dot_dimension_numbers<[1], [0], [0], [1], [0, 0, 1, 1], [], []>} : vector<2x128xf32>, vector<128x256xf32>, vector<2x256xf32> -> vector<2x256xf32>
    %c0_43 = arith.constant 0 : index
    %c0_44 = arith.constant 0 : index
    %45 = vector.load %arg15[%c0_43, %c0_44] : memref<1x256xf32, #tpu.memory_space<vmem>>, vector<1x256xf32>
    %46 = vector.broadcast %45 : vector<1x256xf32> to vector<2x256xf32>
    %47 = arith.addf %44, %46 : vector<2x256xf32>
    %cst_45 = arith.constant 0.000000e+00 : f32
    %48 = vector.broadcast %cst_45 : f32 to vector<2x256xf32>
    %49 = arith.maximumf %47, %48 : vector<2x256xf32>
    %c0_46 = arith.constant 0 : index
    %c0_47 = arith.constant 0 : index
    %50 = vector.load %arg16[%c0_46, %c0_47] : memref<256x512xf32, #tpu.memory_space<vmem>>, vector<256x512xf32>
    %cst_48 = arith.constant dense<0.000000e+00> : vector<2x512xf32>
    %51 = tpu.matmul %49, %50, %cst_48 {dimension_numbers = #tpu.dot_dimension_numbers<[1], [0], [0], [1], [0, 0, 1, 1], [], []>} : vector<2x256xf32>, vector<256x512xf32>, vector<2x512xf32> -> vector<2x512xf32>
    %c0_49 = arith.constant 0 : index
    %c0_50 = arith.constant 0 : index
    %52 = vector.load %arg17[%c0_49, %c0_50] : memref<128x512xf32, #tpu.memory_space<vmem>>, vector<128x512xf32>
    %cst_51 = arith.constant dense<0.000000e+00> : vector<2x512xf32>
    %53 = tpu.matmul %0, %52, %cst_51 {dimension_numbers = #tpu.dot_dimension_numbers<[1], [0], [0], [1], [0, 0, 1, 1], [], []>} : vector<2x128xf32>, vector<128x512xf32>, vector<2x512xf32> -> vector<2x512xf32>
    %54 = arith.addf %51, %53 : vector<2x512xf32>
    %c0_52 = arith.constant 0 : index
    %c0_53 = arith.constant 0 : index
    %55 = vector.load %arg18[%c0_52, %c0_53] : memref<1x512xf32, #tpu.memory_space<vmem>>, vector<1x512xf32>
    %56 = vector.broadcast %55 : vector<1x512xf32> to vector<2x512xf32>
    %57 = arith.addf %54, %56 : vector<2x512xf32>
    %cst_54 = arith.constant 0.000000e+00 : f32
    %58 = vector.broadcast %cst_54 : f32 to vector<2x512xf32>
    %59 = arith.maximumf %57, %58 : vector<2x512xf32>
    %c0_55 = arith.constant 0 : index
    %c0_56 = arith.constant 0 : index
    %60 = vector.load %arg19[%c0_55, %c0_56] : memref<512x1024xf32, #tpu.memory_space<vmem>>, vector<512x1024xf32>
    %cst_57 = arith.constant dense<0.000000e+00> : vector<2x1024xf32>
    %61 = tpu.matmul %59, %60, %cst_57 {dimension_numbers = #tpu.dot_dimension_numbers<[1], [0], [0], [1], [0, 0, 1, 1], [], []>} : vector<2x512xf32>, vector<512x1024xf32>, vector<2x1024xf32> -> vector<2x1024xf32>
    %c0_58 = arith.constant 0 : index
    %c0_59 = arith.constant 0 : index
    %62 = vector.load %arg20[%c0_58, %c0_59] : memref<128x1024xf32, #tpu.memory_space<vmem>>, vector<128x1024xf32>
    %cst_60 = arith.constant dense<0.000000e+00> : vector<2x1024xf32>
    %63 = tpu.matmul %0, %62, %cst_60 {dimension_numbers = #tpu.dot_dimension_numbers<[1], [0], [0], [1], [0, 0, 1, 1], [], []>} : vector<2x128xf32>, vector<128x1024xf32>, vector<2x1024xf32> -> vector<2x1024xf32>
    %64 = arith.addf %61, %63 : vector<2x1024xf32>
    %c0_61 = arith.constant 0 : index
    %c0_62 = arith.constant 0 : index
    %65 = vector.load %arg21[%c0_61, %c0_62] : memref<1x1024xf32, #tpu.memory_space<vmem>>, vector<1x1024xf32>
    %66 = vector.broadcast %65 : vector<1x1024xf32> to vector<2x1024xf32>
    %67 = arith.addf %64, %66 : vector<2x1024xf32>
    %cst_63 = arith.constant 0.000000e+00 : f32
    %68 = vector.broadcast %cst_63 : f32 to vector<2x1024xf32>
    %69 = arith.maximumf %67, %68 : vector<2x1024xf32>
    %c0_64 = arith.constant 0 : index
    %c0_65 = arith.constant 0 : index
    %70 = vector.load %arg22[%c0_64, %c0_65] : memref<1024x512xf32, #tpu.memory_space<vmem>>, vector<1024x512xf32>
    %cst_66 = arith.constant dense<0.000000e+00> : vector<2x512xf32>
    %71 = tpu.matmul %69, %70, %cst_66 {dimension_numbers = #tpu.dot_dimension_numbers<[1], [0], [0], [1], [0, 0, 1, 1], [], []>} : vector<2x1024xf32>, vector<1024x512xf32>, vector<2x512xf32> -> vector<2x512xf32>
    %c0_67 = arith.constant 0 : index
    %c0_68 = arith.constant 0 : index
    %72 = vector.load %arg23[%c0_67, %c0_68] : memref<128x512xf32, #tpu.memory_space<vmem>>, vector<128x512xf32>
    %cst_69 = arith.constant dense<0.000000e+00> : vector<2x512xf32>
    %73 = tpu.matmul %0, %72, %cst_69 {dimension_numbers = #tpu.dot_dimension_numbers<[1], [0], [0], [1], [0, 0, 1, 1], [], []>} : vector<2x128xf32>, vector<128x512xf32>, vector<2x512xf32> -> vector<2x512xf32>
    %74 = arith.addf %71, %73 : vector<2x512xf32>
    %c0_70 = arith.constant 0 : index
    %c0_71 = arith.constant 0 : index
    %75 = vector.load %arg24[%c0_70, %c0_71] : memref<1x512xf32, #tpu.memory_space<vmem>>, vector<1x512xf32>
    %76 = vector.broadcast %75 : vector<1x512xf32> to vector<2x512xf32>
    %77 = arith.addf %74, %76 : vector<2x512xf32>
    %cst_72 = arith.constant 0.000000e+00 : f32
    %78 = vector.broadcast %cst_72 : f32 to vector<2x512xf32>
    %79 = arith.maximumf %77, %78 : vector<2x512xf32>
    %c0_73 = arith.constant 0 : index
    %c0_74 = arith.constant 0 : index
    %80 = vector.load %arg25[%c0_73, %c0_74] : memref<2x512xf32, #tpu.memory_space<vmem>>, vector<2x512xf32>
    tpu.vector_store %arg25[%c0_73, %c0_74], %79 {strides = array<i32>} : memref<2x512xf32, #tpu.memory_space<vmem>>, vector<2x512xf32>,
    return
  }
}

</mosaic_0001>

<bundles_post_ra>
// kernel: netcc3_forward.1
= control target key start
LH: loop header
LB: loop body
LE: loop exit
PB: predicated region body
PF: predicated region fallthrough
CT: control target
= control target key end

     0   :  { %s19293_s0 = inlined_call_operand.vmem [shape: f32[2,512], index: 0, kind: input, shape index: {}]   ;;  %s19294_s1 = inlined_call_operand.vmem [shape: f32[2,128], index: 1, kind: input, shape index: {}]   ;;  %s19295_s2 = inlined_call_operand.vmem [shape: f32[512,1024], index: 2, kind: input, shape index: {}]   ;;  %s19296_s3 = inlined_call_operand.vmem [shape: f32[128,1024], index: 3, kind: input, shape index: {}]   ;;  %s19297_s4 = inlined_call_operand.vmem [shape: f32[1,1024], index: 4, kind: input, shape index: {}]   ;;  %s19298_s5 = inlined_call_operand.vmem [shape: f32[1024,512], index: 5, kind: input, shape index: {}]   ;;  %s19299_s6 = inlined_call_operand.vmem [shape: f32[128,512], index: 6, kind: input, shape index: {}]   ;;  %s19300_s7 = inlined_call_operand.vmem [shape: f32[1,512], index: 7, kind: input, shape index: {}]   ;;  %s19301_s8 = inlined_call_operand.vmem [shape: f32[512,256], index: 8, kind: input, shape index: {}]   ;;  %s19302_s9 = inlined_call_operand.vmem [shape: f32[128,256], index: 9, kind: input, shape index: {}]   ;;  %s19303_s10 = inlined_call_operand.vmem [shape: f32[1,256], index: 10, kind: input, shape index: {}]   ;;  %s19304_s11 = inlined_call_operand.vmem [shape: f32[256,128], index: 11, kind: input, shape index: {}]   ;;  %s19305_s12 = inlined_call_operand.vmem [shape: f32[128,128], index: 12, kind: input, shape index: {}]   ;;  %s19306_s13 = inlined_call_operand.vmem [shape: f32[1,128], index: 13, kind: input, shape index: {}]   ;;  %s19307_s14 = inlined_call_operand.vmem [shape: f32[128,256], index: 14, kind: input, shape index: {}]   ;;  %s19308_s15 = inlined_call_operand.vmem [shape: f32[1,256], index: 15, kind: input, shape index: {}]   ;;  %s19309_s16 = inlined_call_operand.vmem [shape: f32[256,512], index: 16, kind: input, shape index: {}]   ;;  %s19310_s17 = inlined_call_operand.vmem [shape: f32[128,512], index: 17, kind: input, shape index: {}]   ;;  %s19311_s18 = inlined_call_operand.vmem [shape: f32[1,512], index: 18, kind: input, shape index: {}]   ;;  %s19312_s19 = inlined_call_operand.vmem [shape: f32[512,1024], index: 19, kind: input, shape index: {}]   ;;  %s19313_s20 = inlined_call_operand.vmem [shape: f32[128,1024], index: 20, kind: input, shape index: {}]   ;;  %s19314_s21 = inlined_call_operand.vmem [shape: f32[1,1024], index: 21, kind: input, shape index: {}]   ;;  %s19315_s22 = inlined_call_operand.vmem [shape: f32[1024,512], index: 22, kind: input, shape index: {}]   ;;  %s19316_s23 = inlined_call_operand.vmem [shape: f32[128,512], index: 23, kind: input, shape index: {}]   ;;  %s19317_s24 = inlined_call_operand.vmem [shape: f32[1,512], index: 24, kind: input, shape index: {}]   ;;  %s19318_s25 = inlined_call_operand.hbm [shape: f32[2,512], index: 25, kind: output, shape index: {0}]   ;;  %s19319_s26 = inlined_call_operand.hbm [shape: f32[2,128], index: 26, kind: output, shape index: {1}]  }
   0x1   :  { %19328 = sst [smem:[#allocation8_spill]] %s19293_s0 }
   0x2   :  { %19329 = sst [smem:[#allocation9_spill]] %s19294_s1 }
   0x3   :  { %19330 = sst [smem:[#allocation10_spill]] %s19295_s2 }
   0x4   :  { %19331 = sst [smem:[#allocation11_spill]] %s19296_s3 }
   0x5   :  { %19332 = sst [smem:[#allocation12_spill]] %s19297_s4 }
   0x6   :  { %19333 = sst [smem:[#allocation13_spill]] %s19298_s5 }
   0x7   :  { %19334 = sst [smem:[#allocation14_spill]] %s19299_s6 }
   0x8   :  { %19335 = sst [smem:[#allocation15_spill]] %s19300_s7 }
   0x9   :  { %19336 = sst [smem:[#allocation16_spill]] %s19301_s8 }
   0xa   :  { %19337 = sst [smem:[#allocation17_spill]] %s19302_s9 }
   0xb   :  { %19338 = sst [smem:[#allocation18_spill]] %s19303_s10 }
   0xc   :  { %32 = vsyncpa [#allocation3], 0  ;;  %s19339_s7 = sld [smem:[#allocation11_spill]]  ;;  %v10195_v7 = vmov 0.0   ;;  %s19340_s30 = sld [smem:[#allocation10_spill]] }
   0xd   :  { %790 = vmatprep.mubr.f32.mxu0 %v10195_v7  ;;  %1003 = vmatprep.mubr.f32.mxu1 %v10195_v7  ;;  %s19341_s28 = sld [smem:[#allocation9_spill]]  ;;  %s19342_s9 = sld [smem:[#allocation8_spill]] }
  0x12   :  { %v599_v0 = vld [vmem:[%s19339_s7 + $0x8] sm:$0xff]  ;;  %v605_v2 = vld [vmem:[%s19339_s7 + $0x38] sm:$0xff]  ;;  %v598_v5 = vld [vmem:[%s19339_s7] sm:$0xff] }
  0x13   :  { %v607_v1 = vld [vmem:[%s19339_s7 + $0x48] sm:$0xff]  ;;  %v613_v4 = vld [vmem:[%s19339_s7 + $0x78] sm:$0xff]  ;;  %v606_v6 = vld [vmem:[%s19339_s7 + $0x40] sm:$0xff] }
  0x14   :  { %v7189_v3 = vpack.c.bf16 %v607_v1, %v599_v0  ;;  %v7285_v8 = vpack.c.bf16 %v613_v4, %v605_v2  ;;  %v7191_v9 = vpack.c.bf16 %v606_v6, %v598_v5  ;;  %v604_v10 = vld [vmem:[%s19339_s7 + $0x30] sm:$0xff]  ;;  %v615_v12 = vld [vmem:[%s19339_s7 + $0x88] sm:$0xff]  ;;  %v621_v15 = vld [vmem:[%s19339_s7 + $0xb8] sm:$0xff] }
  0x15   :  { %v612_v11 = vld [vmem:[%s19339_s7 + $0x70] sm:$0xff]  ;;  %v623_v14 = vld [vmem:[%s19339_s7 + $0xc8] sm:$0xff]  ;;  %v629_v16 = vld [vmem:[%s19339_s7 + $0xf8] sm:$0xff] }
  0x16   :  { %7190 = vmatprep.subr.bf16.mxu0 %v7189_v3  ;;  %v7287_v13 = vpack.c.bf16 %v612_v11, %v604_v10  ;;  %7286 = vmatprep.subr.bf16.mxu1 %v7285_v8  ;;  %v7193_v17 = vpack.c.bf16 %v623_v14, %v615_v12  ;;  %v7289_v18 = vpack.c.bf16 %v629_v16, %v621_v15  ;;  %v614_v19 = vld [vmem:[%s19339_s7 + $0x80] sm:$0xff]  ;;  %v620_v21 = vld [vmem:[%s19339_s7 + $0xb0] sm:$0xff]  ;;  %v631_v24 = vld [vmem:[%s19339_s7 + $0x108] sm:$0xff] }
  0x17   :  { %7192 = vmatpush1.bf16.msra.mxu0 %v7191_v9  ;;  %v622_v20 = vld [vmem:[%s19339_s7 + $0xc0] sm:$0xff]  ;;  %v628_v23 = vld [vmem:[%s19339_s7 + $0xf0] sm:$0xff]  ;;  %v639_v25 = vld [vmem:[%s19339_s7 + $0x148] sm:$0xff] }
  0x18   :  { %7288 = vmatpush1.bf16.msra.mxu1 %v7287_v13  ;;  %v7195_v22 = vpack.c.bf16 %v622_v20, %v614_v19  ;;  %7194 = vmatprep.subr.bf16.mxu0 %v7193_v17  ;;  %v7291_v26 = vpack.c.bf16 %v628_v23, %v620_v21  ;;  %v7197_v27 = vpack.c.bf16 %v639_v25, %v631_v24  ;;  %v637_v28 = vld [vmem:[%s19339_s7 + $0x138] sm:$0xff]  ;;  %v630_v30 = vld [vmem:[%s19339_s7 + $0x100] sm:$0xff]  ;;  %v636_v33 = vld [vmem:[%s19339_s7 + $0x130] sm:$0xff] }
  0x19   :  { %7290 = vmatprep.subr.bf16.mxu1 %v7289_v18  ;;  %v645_v29 = vld [vmem:[%s19339_s7 + $0x178] sm:$0xff]  ;;  %v638_v32 = vld [vmem:[%s19339_s7 + $0x140] sm:$0xff]  ;;  %v644_v34 = vld [vmem:[%s19339_s7 + $0x170] sm:$0xff] }
  0x1a   :  { %v7293_v31 = vpack.c.bf16 %v645_v29, %v637_v28  ;;  %v7199_v35 = vpack.c.bf16 %v638_v32, %v630_v30  ;;  %v647_v36 = vld [vmem:[%s19339_s7 + $0x188] sm:$0xff]  ;;  %v653_v38 = vld [vmem:[%s19339_s7 + $0x1b8] sm:$0xff]  ;;  %v7295_v39 = vpack.c.bf16 %v644_v34, %v636_v33  ;;  %v646_v42 = vld [vmem:[%s19339_s7 + $0x180] sm:$0xff] }
  0x1b   :  { %7196 = vmatpush1.bf16.msra.mxu0 %v7195_v22  ;;  %v655_v37 = vld [vmem:[%s19339_s7 + $0x1c8] sm:$0xff]  ;;  %v661_v41 = vld [vmem:[%s19339_s7 + $0x1f8] sm:$0xff]  ;;  %v654_v43 = vld [vmem:[%s19339_s7 + $0x1c0] sm:$0xff] }
  0x1c   :  { %7292 = vmatpush1.bf16.msra.mxu1 %v7291_v26  ;;  %7198 = vmatprep.subr.bf16.mxu0 %v7197_v27  ;;  %v7201_v40 = vpack.c.bf16 %v655_v37, %v647_v36  ;;  %v7297_v44 = vpack.c.bf16 %v661_v41, %v653_v38  ;;  %v652_v45 = vld [vmem:[%s19339_s7 + $0x1b0] sm:$0xff]  ;;  %v663_v47 = vld [vmem:[%s19339_s7 + $0x208] sm:$0xff]  ;;  %v669_v49 = vld [vmem:[%s19339_s7 + $0x238] sm:$0xff]  ;;  %v7203_v51 = vpack.c.bf16 %v654_v43, %v646_v42 }
  0x1d   :  { %7294 = vmatprep.subr.bf16.mxu1 %v7293_v31  ;;  %v660_v46 = vld [vmem:[%s19339_s7 + $0x1f0] sm:$0xff]  ;;  %v671_v48 = vld [vmem:[%s19339_s7 + $0x248] sm:$0xff]  ;;  %v677_v50 = vld [vmem:[%s19339_s7 + $0x278] sm:$0xff] }
  0x1e   :  { %v7299_v52 = vpack.c.bf16 %v660_v46, %v652_v45  ;;  %v7205_v53 = vpack.c.bf16 %v671_v48, %v663_v47  ;;  %v662_v54 = vld [vmem:[%s19339_s7 + $0x200] sm:$0xff]  ;;  %v668_v56 = vld [vmem:[%s19339_s7 + $0x230] sm:$0xff]  ;;  %v7301_v57 = vpack.c.bf16 %v677_v50, %v669_v49  ;;  %v679_v59 = vld [vmem:[%s19339_s7 + $0x288] sm:$0xff] }
  0x1f   :  { %7200 = vmatpush1.bf16.msra.mxu0 %v7199_v35  ;;  %v670_v55 = vld [vmem:[%s19339_s7 + $0x240] sm:$0xff]  ;;  %v676_v58 = vld [vmem:[%s19339_s7 + $0x270] sm:$0xff]  ;;  %v687_v60 = vld [vmem:[%s19339_s7 + $0x2c8] sm:$0xff] }
  0x20   :  { %7296 = vmatpush1.bf16.msra.mxu1 %v7295_v39  ;;  %7202 = vmatprep.subr.bf16.mxu0 %v7201_v40  ;;  %v685_v61 = vld [vmem:[%s19339_s7 + $0x2b8] sm:$0xff]  ;;  %v7207_v63 = vpack.c.bf16 %v670_v55, %v662_v54  ;;  %v7303_v0 = vpack.c.bf16 %v676_v58, %v668_v56  ;;  %v7209_v1 = vpack.c.bf16 %v687_v60, %v679_v59  ;;  %v678_v2 = vld [vmem:[%s19339_s7 + $0x280] sm:$0xff]  ;;  %v684_v4 = vld [vmem:[%s19339_s7 + $0x2b0] sm:$0xff] }
  0x21   :  { %7298 = vmatprep.subr.bf16.mxu1 %v7297_v44  ;;  %v693_v62 = vld [vmem:[%s19339_s7 + $0x2f8] sm:$0xff]  ;;  %v686_v3 = vld [vmem:[%s19339_s7 + $0x2c0] sm:$0xff]  ;;  %v692_v6 = vld [vmem:[%s19339_s7 + $0x2f0] sm:$0xff] }
  0x22   :  { %v7305_v5 = vpack.c.bf16 %v693_v62, %v685_v61  ;;  %v695_v8 = vld [vmem:[%s19339_s7 + $0x308] sm:$0xff]  ;;  %v701_v10 = vld [vmem:[%s19339_s7 + $0x338] sm:$0xff]  ;;  %v7211_v12 = vpack.c.bf16 %v686_v3, %v678_v2  ;;  %v7307_v13 = vpack.c.bf16 %v692_v6, %v684_v4  ;;  %v694_v15 = vld [vmem:[%s19339_s7 + $0x300] sm:$0xff] }
  0x23   :  { %7204 = vmatpush1.bf16.msra.mxu0 %v7203_v51  ;;  %v703_v9 = vld [vmem:[%s19339_s7 + $0x348] sm:$0xff]  ;;  %v709_v11 = vld [vmem:[%s19339_s7 + $0x378] sm:$0xff]  ;;  %v702_v16 = vld [vmem:[%s19339_s7 + $0x340] sm:$0xff] }
  0x24   :  { %7300 = vmatpush1.bf16.msra.mxu1 %v7299_v52  ;;  %7206 = vmatprep.subr.bf16.mxu0 %v7205_v53  ;;  %v7213_v14 = vpack.c.bf16 %v703_v9, %v695_v8  ;;  %v700_v17 = vld [vmem:[%s19339_s7 + $0x330] sm:$0xff]  ;;  %v7309_v18 = vpack.c.bf16 %v709_v11, %v701_v10  ;;  %v711_v20 = vld [vmem:[%s19339_s7 + $0x388] sm:$0xff]  ;;  %v717_v22 = vld [vmem:[%s19339_s7 + $0x3b8] sm:$0xff]  ;;  %v7215_v24 = vpack.c.bf16 %v702_v16, %v694_v15 }
  0x25   :  { %7302 = vmatprep.subr.bf16.mxu1 %v7301_v57  ;;  %v708_v19 = vld [vmem:[%s19339_s7 + $0x370] sm:$0xff]  ;;  %v719_v21 = vld [vmem:[%s19339_s7 + $0x3c8] sm:$0xff]  ;;  %v725_v23 = vld [vmem:[%s19339_s7 + $0x3f8] sm:$0xff] }
  0x26   :  { %v7311_v25 = vpack.c.bf16 %v708_v19, %v700_v17  ;;  %v7217_v26 = vpack.c.bf16 %v719_v21, %v711_v20  ;;  %v710_v27 = vld [vmem:[%s19339_s7 + $0x380] sm:$0xff]  ;;  %v716_v29 = vld [vmem:[%s19339_s7 + $0x3b0] sm:$0xff]  ;;  %v7313_v30 = vpack.c.bf16 %v725_v23, %v717_v22  ;;  %v601_v32 = vld [vmem:[%s19339_s7 + $0x18] sm:$0xff] }
  0x27   :  { %7208 = vmatpush1.bf16.msra.mxu0 %v7207_v63  ;;  %v718_v28 = vld [vmem:[%s19339_s7 + $0x3c0] sm:$0xff]  ;;  %v724_v31 = vld [vmem:[%s19339_s7 + $0x3f0] sm:$0xff]  ;;  %v609_v33 = vld [vmem:[%s19339_s7 + $0x58] sm:$0xff] }
  0x28   :  { %7304 = vmatpush1.bf16.msra.mxu1 %v7303_v0  ;;  %7210 = vmatprep.subr.bf16.mxu0 %v7209_v1  ;;  %v89_v34 = vld [vmem:[%s19340_s30 + $0x18] sm:$0xff]  ;;  %v7219_v36 = vpack.c.bf16 %v718_v28, %v710_v27  ;;  %v7315_v37 = vpack.c.bf16 %v724_v31, %v716_v29  ;;  %v7221_v38 = vpack.c.bf16 %v609_v33, %v601_v32  ;;  %v600_v39 = vld [vmem:[%s19339_s7 + $0x10] sm:$0xff]  ;;  %v10569_v48 = vld [vmem:[%s19341_s28] sm:$0x3] }
  0x29   :  { %7306 = vmatprep.subr.bf16.mxu1 %v7305_v5  ;;  %v97_v35 = vld [vmem:[%s19340_s30 + $0x58] sm:$0xff]  ;;  %v608_v40 = vld [vmem:[%s19339_s7 + $0x50] sm:$0xff] }
  0x2a   :  { %v88_v41 = vld [vmem:[%s19340_s30 + $0x10] sm:$0xff]  ;;  %v7445_v42 = vpack.c.bf16 %v97_v35, %v89_v34  ;;  %v617_v44 = vld [vmem:[%s19339_s7 + $0x98] sm:$0xff]  ;;  %v7223_v49 = vpack.c.bf16 %v608_v40, %v600_v39 }
  0x2b   :  { %7212 = vmatpush1.bf16.msra.mxu0 %v7211_v12  ;;  %v96_v43 = vld [vmem:[%s19340_s30 + $0x50] sm:$0xff]  ;;  %v625_v45 = vld [vmem:[%s19339_s7 + $0xd8] sm:$0xff] }
  0x2c   :  { %7308 = vmatpush1.bf16.msra.mxu1 %v7307_v13  ;;  %7214 = vmatprep.subr.bf16.mxu0 %v7213_v14  ;;  %v105_v46 = vld [vmem:[%s19340_s30 + $0x98] sm:$0xff]  ;;  %v7447_v50 = vpack.c.bf16 %v96_v43, %v88_v41  ;;  %v7225_v51 = vpack.c.bf16 %v625_v45, %v617_v44  ;;  %v616_v52 = vld [vmem:[%s19339_s7 + $0x90] sm:$0xff] }
  0x2d   :  { %7310 = vmatprep.subr.bf16.mxu1 %v7309_v18  ;;  %v113_v47 = vld [vmem:[%s19340_s30 + $0xd8] sm:$0xff]  ;;  %v624_v53 = vld [vmem:[%s19339_s7 + $0xd0] sm:$0xff] }
  0x2e   :  { %v104_v54 = vld [vmem:[%s19340_s30 + $0x90] sm:$0xff]  ;;  %v7449_v55 = vpack.c.bf16 %v113_v47, %v105_v46  ;;  %v633_v57 = vld [vmem:[%s19339_s7 + $0x118] sm:$0xff]  ;;  %v7227_v61 = vpack.c.bf16 %v624_v53, %v616_v52 }
  0x2f   :  { %7216 = vmatpush1.bf16.msra.mxu0 %v7215_v24  ;;  %v112_v56 = vld [vmem:[%s19340_s30 + $0xd0] sm:$0xff]  ;;  %v641_v58 = vld [vmem:[%s19339_s7 + $0x158] sm:$0xff] }
  0x30   :  { %7312 = vmatpush1.bf16.msra.mxu1 %v7311_v25  ;;  %7218 = vmatprep.subr.bf16.mxu0 %v7217_v26  ;;  %v121_v59 = vld [vmem:[%s19340_s30 + $0x118] sm:$0xff]  ;;  %v7451_v62 = vpack.c.bf16 %v112_v56, %v104_v54  ;;  %v7229_v63 = vpack.c.bf16 %v641_v58, %v633_v57  ;;  %v632_v0 = vld [vmem:[%s19339_s7 + $0x110] sm:$0xff]  ;;  %v10196_v57 = vmov 1983009808  }
  0x31   :  { %7314 = vmatprep.subr.bf16.mxu1 %v7313_v30  ;;  %v129_v60 = vld [vmem:[%s19340_s30 + $0x158] sm:$0xff]  ;;  %v640_v1 = vld [vmem:[%s19339_s7 + $0x150] sm:$0xff]  ;;  %v1013_v58 = vunpack.c.l.s4 %v10196_v57  ;;  %v650_v57 = vld [vmem:[%s19339_s7 + $0x1a0] sm:$0xff] }
  0x32   :  { %v120_v2 = vld [vmem:[%s19340_s30 + $0x110] sm:$0xff]  ;;  %v7453_v3 = vpack.c.bf16 %v129_v60, %v121_v59  ;;  %v649_v5 = vld [vmem:[%s19339_s7 + $0x198] sm:$0xff]  ;;  %v7231_v10 = vpack.c.bf16 %v640_v1, %v632_v0  ;;  %v1015_v59 = vlaneseq }
  0x33   :  { %7220 = vmatpush1.bf16.msra.mxu0 %v7219_v36  ;;  %v128_v4 = vld [vmem:[%s19340_s30 + $0x150] sm:$0xff]  ;;  %v657_v6 = vld [vmem:[%s19339_s7 + $0x1d8] sm:$0xff] }
  0x34   :  { %7316 = vmatpush1.bf16.msra.mxu1 %v7315_v37  ;;  %7222 = vmatprep.subr.bf16.mxu0 %v7221_v38  ;;  %v137_v8 = vld [vmem:[%s19340_s30 + $0x198] sm:$0xff]  ;;  %v7455_v11 = vpack.c.bf16 %v128_v4, %v120_v2  ;;  %v7233_v12 = vpack.c.bf16 %v657_v6, %v649_v5  ;;  %v648_v13 = vld [vmem:[%s19339_s7 + $0x190] sm:$0xff]  ;;  %v603_v6 = vld [vmem:[%s19339_s7 + $0x28] sm:$0xff] }
  0x35   :  { %7446 = vmatprep.subr.bf16.mxu1 %v7445_v42  ;;  %v145_v9 = vld [vmem:[%s19340_s30 + $0x1d8] sm:$0xff]  ;;  %v656_v14 = vld [vmem:[%s19339_s7 + $0x1d0] sm:$0xff] }
  0x36   :  { %791 = vmatmul.mubr.f32.vlgmr.msra.gmra.mrb[0].mxu0 %v10569_v48  ;;  %v136_v15 = vld [vmem:[%s19340_s30 + $0x190] sm:$0xff]  ;;  %v7457_v16 = vpack.c.bf16 %v145_v9, %v137_v8  ;;  %v665_v18 = vld [vmem:[%s19339_s7 + $0x218] sm:$0xff]  ;;  %v7235_v22 = vpack.c.bf16 %v656_v14, %v648_v13  ;;  %v611_v8 = vld [vmem:[%s19339_s7 + $0x68] sm:$0xff]  ;;  %v1014_v9 = vunpack.c.0.s8 %v1013_v58 }
  0x37   :  { %7224 = vmatpush1.bf16.msra.mxu0 %v7223_v49  ;;  %1004 = vmatmul.mubr.f32.vlgmr.msra.gmra.mrb[0].mxu1 %v10569_v48  ;;  %v144_v17 = vld [vmem:[%s19340_s30 + $0x1d0] sm:$0xff]  ;;  %v673_v19 = vld [vmem:[%s19339_s7 + $0x258] sm:$0xff]  ;;  %v658_v58 = vld [vmem:[%s19339_s7 + $0x1e0] sm:$0xff] }
  0x38   :  { %7448 = vmatpush1.bf16.msra.mxu1 %v7447_v50  ;;  %7226 = vmatprep.subr.bf16.mxu0 %v7225_v51  ;;  %v153_v20 = vld [vmem:[%s19340_s30 + $0x218] sm:$0xff]  ;;  %v7459_v23 = vpack.c.bf16 %v144_v17, %v136_v15  ;;  %v7237_v24 = vpack.c.bf16 %v673_v19, %v665_v18  ;;  %v664_v25 = vld [vmem:[%s19339_s7 + $0x210] sm:$0xff]  ;;  %v7253_v15 = vpack.c.bf16 %v611_v8, %v603_v6  ;;  %v610_v17 = vld [vmem:[%s19339_s7 + $0x60] sm:$0xff] }
  0x39   :  { %7450 = vmatprep.subr.bf16.mxu1 %v7449_v55  ;;  %861 = vmatprep.mubr.f32.mxu0 %v10195_v7  ;;  %v161_v21 = vld [vmem:[%s19340_s30 + $0x258] sm:$0xff]  ;;  %v672_v26 = vld [vmem:[%s19339_s7 + $0x250] sm:$0xff]  ;;  %v674_v6 = vld [vmem:[%s19339_s7 + $0x260] sm:$0xff] }
  0x3a   :  { %v152_v27 = vld [vmem:[%s19340_s30 + $0x210] sm:$0xff]  ;;  %v7461_v28 = vpack.c.bf16 %v161_v21, %v153_v20  ;;  %v681_v30 = vld [vmem:[%s19339_s7 + $0x298] sm:$0xff]  ;;  %v7239_v34 = vpack.c.bf16 %v672_v26, %v664_v25  ;;  %v619_v21 = vld [vmem:[%s19339_s7 + $0xa8] sm:$0xff] }
  0x3b   :  { %7228 = vmatpush1.bf16.msra.mxu0 %v7227_v61  ;;  %v160_v29 = vld [vmem:[%s19340_s30 + $0x250] sm:$0xff]  ;;  %v689_v31 = vld [vmem:[%s19339_s7 + $0x2d8] sm:$0xff] }
  0x3c   :  { %7452 = vmatpush1.bf16.msra.mxu1 %v7451_v62  ;;  %7230 = vmatprep.subr.bf16.mxu0 %v7229_v63  ;;  %v169_v32 = vld [vmem:[%s19340_s30 + $0x298] sm:$0xff]  ;;  %v7463_v35 = vpack.c.bf16 %v160_v29, %v152_v27  ;;  %v7241_v36 = vpack.c.bf16 %v689_v31, %v681_v30  ;;  %v680_v37 = vld [vmem:[%s19339_s7 + $0x290] sm:$0xff]  ;;  %v618_v27 = vld [vmem:[%s19339_s7 + $0xa0] sm:$0xff] }
  0x3d   :  { %7454 = vmatprep.subr.bf16.mxu1 %v7453_v3  ;;  %v177_v33 = vld [vmem:[%s19340_s30 + $0x2d8] sm:$0xff]  ;;  %v688_v38 = vld [vmem:[%s19339_s7 + $0x2d0] sm:$0xff]  ;;  %v626_v30 = vld [vmem:[%s19339_s7 + $0xe0] sm:$0xff] }
  0x3e   :  { %v168_v39 = vld [vmem:[%s19340_s30 + $0x290] sm:$0xff]  ;;  %v7465_v40 = vpack.c.bf16 %v177_v33, %v169_v32  ;;  %v697_v42 = vld [vmem:[%s19339_s7 + $0x318] sm:$0xff]  ;;  %v7243_v46 = vpack.c.bf16 %v688_v38, %v680_v37  ;;  %v10783_v32 = vld [vmem:[%s19342_s9] sm:$0xff] }
  0x3f   :  { %7232 = vmatpush1.bf16.msra.mxu0 %v7231_v10  ;;  %v176_v41 = vld [vmem:[%s19340_s30 + $0x2d0] sm:$0xff]  ;;  %v705_v43 = vld [vmem:[%s19339_s7 + $0x358] sm:$0xff]  ;;  %v10736_v10 = vshrl.u32 %v1015_v59, 7 }
  0x40   :  { %7456 = vmatpush1.bf16.msra.mxu1 %v7455_v11  ;;  %7234 = vmatprep.subr.bf16.mxu0 %v7233_v12  ;;  %v185_v44 = vld [vmem:[%s19340_s30 + $0x318] sm:$0xff]  ;;  %v7467_v47 = vpack.c.bf16 %v176_v41, %v168_v39  ;;  %v7245_v49 = vpack.c.bf16 %v705_v43, %v697_v42  ;;  %v696_v50 = vld [vmem:[%s19339_s7 + $0x310] sm:$0xff] }
  0x41   :  { %7458 = vmatprep.subr.bf16.mxu1 %v7457_v16  ;;  %v193_v45 = vld [vmem:[%s19340_s30 + $0x358] sm:$0xff]  ;;  %v704_v51 = vld [vmem:[%s19339_s7 + $0x350] sm:$0xff]  ;;  %v602_v16 = vld [vmem:[%s19339_s7 + $0x20] sm:$0xff] }
  0x42   :  { %v184_v52 = vld [vmem:[%s19340_s30 + $0x310] sm:$0xff]  ;;  %v7469_v53 = vpack.c.bf16 %v193_v45, %v185_v44  ;;  %v713_v55 = vld [vmem:[%s19339_s7 + $0x398] sm:$0xff]  ;;  %v7247_v62 = vpack.c.bf16 %v704_v51, %v696_v50  ;;  %v7255_v26 = vpack.c.bf16 %v610_v17, %v602_v16  ;;  %v634_v44 = vld [vmem:[%s19339_s7 + $0x120] sm:$0xff] }
  0x43   :  { %7236 = vmatpush1.bf16.msra.mxu0 %v7235_v22  ;;  %v192_v54 = vld [vmem:[%s19340_s30 + $0x350] sm:$0xff]  ;;  %v721_v56 = vld [vmem:[%s19339_s7 + $0x3d8] sm:$0xff]  ;;  %v627_v22 = vld [vmem:[%s19339_s7 + $0xe8] sm:$0xff] }
  0x44   :  { %7460 = vmatpush1.bf16.msra.mxu1 %v7459_v23  ;;  %7238 = vmatprep.subr.bf16.mxu0 %v7237_v24  ;;  %v201_v60 = vld [vmem:[%s19340_s30 + $0x398] sm:$0xff]  ;;  %v7471_v63 = vpack.c.bf16 %v192_v54, %v184_v52  ;;  %v7249_v0 = vpack.c.bf16 %v721_v56, %v713_v55  ;;  %v712_v1 = vld [vmem:[%s19339_s7 + $0x390] sm:$0xff]  ;;  %v10763_v23 = vsub.s32 %v1014_v9, %v10736_v10  ;;  %v642_v45 = vld [vmem:[%s19339_s7 + $0x160] sm:$0xff] }
  0x45   :  { %7462 = vmatprep.subr.bf16.mxu1 %v7461_v28  ;;  %v209_v61 = vld [vmem:[%s19340_s30 + $0x3d8] sm:$0xff]  ;;  %v720_v2 = vld [vmem:[%s19339_s7 + $0x3d0] sm:$0xff]  ;;  %v7257_v29 = vpack.c.bf16 %v627_v22, %v619_v21  ;;  %v651_v50 = vld [vmem:[%s19339_s7 + $0x1a8] sm:$0xff]  ;;  %v7263_v54 = vpack.c.bf16 %v642_v45, %v634_v44 }
  0x46   :  { %v200_v3 = vld [vmem:[%s19340_s30 + $0x390] sm:$0xff]  ;;  %v7473_v4 = vpack.c.bf16 %v209_v61, %v201_v60  ;;  %v217_v11 = vld [vmem:[%s19340_s30 + $0x418] sm:$0xff]  ;;  %v7251_v13 = vpack.c.bf16 %v720_v2, %v712_v1  ;;  %v10796_v37 = vrot.slane %v10783_v32, %v10763_v23  ;;  %v659_v51 = vld [vmem:[%s19339_s7 + $0x1e8] sm:$0xff]  ;;  %v7267_v2 = vpack.c.bf16 %v658_v58, %v650_v57 }
  0x47   :  { %7240 = vmatpush1.bf16.msra.mxu0 %v7239_v34  ;;  %v208_v5 = vld [vmem:[%s19340_s30 + $0x3d0] sm:$0xff]  ;;  %v225_v12 = vld [vmem:[%s19340_s30 + $0x458] sm:$0xff]  ;;  %v7265_v56 = vpack.c.bf16 %v659_v51, %v651_v50 }
  0x48   :  { %7464 = vmatpush1.bf16.msra.mxu1 %v7463_v35  ;;  %7242 = vmatprep.subr.bf16.mxu0 %v7241_v36  ;;  %v7475_v14 = vpack.c.bf16 %v208_v5, %v200_v3  ;;  %v216_v18 = vld [vmem:[%s19340_s30 + $0x410] sm:$0xff]  ;;  %v7477_v19 = vpack.c.bf16 %v225_v12, %v217_v11  ;;  %v233_v24 = vld [vmem:[%s19340_s30 + $0x498] sm:$0xff]  ;;  %v635_v35 = vld [vmem:[%s19339_s7 + $0x128] sm:$0xff]  ;;  %v10808_v41 = vcombine.high %v10796_v37, %v10796_v37 }
  0x49   :  { %7466 = vmatprep.subr.bf16.mxu1 %v7465_v40  ;;  %v224_v20 = vld [vmem:[%s19340_s30 + $0x450] sm:$0xff]  ;;  %v241_v25 = vld [vmem:[%s19340_s30 + $0x4d8] sm:$0xff]  ;;  %v643_v36 = vld [vmem:[%s19339_s7 + $0x168] sm:$0xff]  ;;  %v7259_v40 = vpack.c.bf16 %v626_v30, %v618_v27 }
  0x4a   :  { %v7479_v28 = vpack.c.bf16 %v224_v20, %v216_v18  ;;  %v232_v31 = vld [vmem:[%s19340_s30 + $0x490] sm:$0xff]  ;;  %v7481_v33 = vpack.c.bf16 %v241_v25, %v233_v24  ;;  %v249_v38 = vld [vmem:[%s19340_s30 + $0x518] sm:$0xff]  ;;  %v7261_v43 = vpack.c.bf16 %v643_v36, %v635_v35  ;;  %1238 = vmatprep.mubr.f32.mxu1 %v10808_v41  ;;  %v666_v5 = vld [vmem:[%s19339_s7 + $0x220] sm:$0xff] }
  0x4b   :  { %7244 = vmatpush1.bf16.msra.mxu0 %v7243_v46  ;;  %v240_v34 = vld [vmem:[%s19340_s30 + $0x4d0] sm:$0xff]  ;;  %v257_v39 = vld [vmem:[%s19340_s30 + $0x558] sm:$0xff]  ;;  %v683_v12 = vld [vmem:[%s19339_s7 + $0x2a8] sm:$0xff]  ;;  %v7271_v16 = vpack.c.bf16 %v674_v6, %v666_v5 }
  0x4c   :  { %7468 = vmatpush1.bf16.msra.mxu1 %v7467_v47  ;;  %7246 = vmatprep.subr.bf16.mxu0 %v7245_v49  ;;  %v7483_v42 = vpack.c.bf16 %v240_v34, %v232_v31  ;;  %v248_v46 = vld [vmem:[%s19340_s30 + $0x510] sm:$0xff]  ;;  %v7485_v47 = vpack.c.bf16 %v257_v39, %v249_v38  ;;  %v265_v52 = vld [vmem:[%s19340_s30 + $0x598] sm:$0xff]  ;;  %v690_v20 = vld [vmem:[%s19339_s7 + $0x2e0] sm:$0xff] }
  0x4d   :  { %7470 = vmatprep.subr.bf16.mxu1 %v7469_v53  ;;  %v256_v49 = vld [vmem:[%s19340_s30 + $0x550] sm:$0xff]  ;;  %v273_v53 = vld [vmem:[%s19340_s30 + $0x5d8] sm:$0xff]  ;;  %v699_v25 = vld [vmem:[%s19339_s7 + $0x328] sm:$0xff] }
  0x4e   :  { %v7487_v55 = vpack.c.bf16 %v256_v49, %v248_v46  ;;  %v264_v59 = vld [vmem:[%s19340_s30 + $0x590] sm:$0xff]  ;;  %v7489_v60 = vpack.c.bf16 %v273_v53, %v265_v52  ;;  %v289_v1 = vld [vmem:[%s19340_s30 + $0x658] sm:$0xff]  ;;  %v706_v34 = vld [vmem:[%s19339_s7 + $0x360] sm:$0xff] }
  0x4f   :  { %7248 = vmatpush1.bf16.msra.mxu0 %v7247_v62  ;;  %v272_v61 = vld [vmem:[%s19340_s30 + $0x5d0] sm:$0xff]  ;;  %v667_v62 = vld [vmem:[%s19339_s7 + $0x228] sm:$0xff]  ;;  %v313_v27 = vld [vmem:[%s19340_s30 + $0x718] sm:$0xff] }
  0x50   :  { %7472 = vmatpush1.bf16.msra.mxu1 %v7471_v63  ;;  %7250 = vmatprep.subr.bf16.mxu0 %v7249_v0  ;;  %v675_v63 = vld [vmem:[%s19339_s7 + $0x268] sm:$0xff]  ;;  %v281_v0 = vld [vmem:[%s19340_s30 + $0x618] sm:$0xff]  ;;  %v7491_v3 = vpack.c.bf16 %v272_v61, %v264_v59  ;;  %v280_v8 = vld [vmem:[%s19340_s30 + $0x610] sm:$0xff] }
  0x51   :  { %7474 = vmatprep.subr.bf16.mxu1 %v7473_v4  ;;  %v7269_v4 = vpack.c.bf16 %v675_v63, %v667_v62  ;;  %v7493_v9 = vpack.c.bf16 %v289_v1, %v281_v0  ;;  %v288_v11 = vld [vmem:[%s19340_s30 + $0x650] sm:$0xff]  ;;  %v715_v39 = vld [vmem:[%s19339_s7 + $0x3a8] sm:$0xff]  ;;  %v722_v49 = vld [vmem:[%s19339_s7 + $0x3e0] sm:$0xff] }
  0x52   :  { %v7495_v17 = vpack.c.bf16 %v288_v11, %v280_v8  ;;  %v296_v21 = vld [vmem:[%s19340_s30 + $0x690] sm:$0xff]  ;;  %v87_v53 = vld [vmem:[%s19340_s30 + $0x8] sm:$0xff]  ;;  %v353_v57 = vld [vmem:[%s19340_s30 + $0x858] sm:$0xff] }
  0x53   :  { %7252 = vmatpush1.bf16.msra.mxu0 %v7251_v13  ;;  %v691_v13 = vld [vmem:[%s19339_s7 + $0x2e8] sm:$0xff]  ;;  %v304_v24 = vld [vmem:[%s19340_s30 + $0x6d0] sm:$0xff]  ;;  %v86_v61 = vld [vmem:[%s19340_s30] sm:$0xff] }
  0x54   :  { %7476 = vmatpush1.bf16.msra.mxu1 %v7475_v14  ;;  %7254 = vmatprep.subr.bf16.mxu0 %v7253_v15  ;;  %v297_v14 = vld [vmem:[%s19340_s30 + $0x698] sm:$0xff]  ;;  %v7273_v18 = vpack.c.bf16 %v691_v13, %v683_v12  ;;  %v7499_v30 = vpack.c.bf16 %v304_v24, %v296_v21  ;;  %v312_v35 = vld [vmem:[%s19340_s30 + $0x710] sm:$0xff]  ;;  %v103_v1 = vld [vmem:[%s19340_s30 + $0x88] sm:$0xff] }
  0x55   :  { %7478 = vmatprep.subr.bf16.mxu1 %v7477_v19  ;;  %v305_v15 = vld [vmem:[%s19340_s30 + $0x6d8] sm:$0xff]  ;;  %v682_v19 = vld [vmem:[%s19339_s7 + $0x2a0] sm:$0xff]  ;;  %v320_v38 = vld [vmem:[%s19340_s30 + $0x750] sm:$0xff] }
  0x56   :  { %862 = vmatmul.mubr.f32.vlgmr.msra.gmra.mrb[2].mxu0 %v10569_v48  ;;  %v7497_v22 = vpack.c.bf16 %v305_v15, %v297_v14  ;;  %v7503_v45 = vpack.c.bf16 %v320_v38, %v312_v35  ;;  %v328_v50 = vld [vmem:[%s19340_s30 + $0x790] sm:$0xff]  ;;  %v369_v5 = vld [vmem:[%s19340_s30 + $0x8d8] sm:$0xff]  ;;  %v102_v11 = vld [vmem:[%s19340_s30 + $0x80] sm:$0xff] }
  0x57   :  { %7256 = vmatpush1.bf16.msra.mxu0 %v7255_v26  ;;  %932 = vmatprep.mubr.f32.mxu0 %v10195_v7  ;;  %v707_v26 = vld [vmem:[%s19339_s7 + $0x368] sm:$0xff]  ;;  %v336_v52 = vld [vmem:[%s19340_s30 + $0x7d0] sm:$0xff]  ;;  %v110_v12 = vld [vmem:[%s19340_s30 + $0xc0] sm:$0xff] }
  0x58   :  { %7480 = vmatpush1.bf16.msra.mxu1 %v7479_v28  ;;  %7258 = vmatprep.subr.bf16.mxu0 %v7257_v29  ;;  %v321_v28 = vld [vmem:[%s19340_s30 + $0x758] sm:$0xff]  ;;  %v7275_v29 = vpack.c.bf16 %v690_v20, %v682_v19  ;;  %v7277_v31 = vpack.c.bf16 %v707_v26, %v699_v25  ;;  %v7507_v59 = vpack.c.bf16 %v336_v52, %v328_v50  ;;  %v344_v62 = vld [vmem:[%s19340_s30 + $0x810] sm:$0xff]  ;;  %v126_v25 = vld [vmem:[%s19340_s30 + $0x140] sm:$0xff] }
  0x59   :  { %7482 = vmatprep.subr.bf16.mxu1 %v7481_v33  ;;  %v698_v33 = vld [vmem:[%s19339_s7 + $0x320] sm:$0xff]  ;;  %v7501_v36 = vpack.c.bf16 %v321_v28, %v313_v27  ;;  %v352_v0 = vld [vmem:[%s19340_s30 + $0x850] sm:$0xff]  ;;  %v377_v19 = vld [vmem:[%s19340_s30 + $0x918] sm:$0xff]  ;;  %v7323_v21 = vpack.c.bf16 %v110_v12, %v102_v11 }
  0x5a   :  { %v7279_v44 = vpack.c.bf16 %v706_v34, %v698_v33  ;;  %v7511_v8 = vpack.c.bf16 %v352_v0, %v344_v62  ;;  %v360_v13 = vld [vmem:[%s19340_s30 + $0x890] sm:$0xff]  ;;  %v385_v20 = vld [vmem:[%s19340_s30 + $0x958] sm:$0xff]  ;;  %v134_v38 = vld [vmem:[%s19340_s30 + $0x180] sm:$0xff] }
  0x5b   :  { %7260 = vmatpush1.bf16.msra.mxu0 %v7259_v40  ;;  %v723_v40 = vld [vmem:[%s19339_s7 + $0x3e8] sm:$0xff]  ;;  %v368_v15 = vld [vmem:[%s19340_s30 + $0x8d0] sm:$0xff]  ;;  %v7517_v27 = vpack.c.bf16 %v385_v20, %v377_v19  ;;  %v401_v33 = vld [vmem:[%s19340_s30 + $0x9d8] sm:$0xff] }
  0x5c   :  { %7484 = vmatpush1.bf16.msra.mxu1 %v7483_v42  ;;  %7262 = vmatprep.subr.bf16.mxu0 %v7261_v43  ;;  %v329_v42 = vld [vmem:[%s19340_s30 + $0x798] sm:$0xff]  ;;  %v7281_v46 = vpack.c.bf16 %v723_v40, %v715_v39  ;;  %v376_v26 = vld [vmem:[%s19340_s30 + $0x910] sm:$0xff]  ;;  %v142_v39 = vld [vmem:[%s19340_s30 + $0x1c0] sm:$0xff] }
  0x5d   :  { %7486 = vmatprep.subr.bf16.mxu1 %v7485_v47  ;;  %v337_v43 = vld [vmem:[%s19340_s30 + $0x7d8] sm:$0xff]  ;;  %v714_v47 = vld [vmem:[%s19339_s7 + $0x3a0] sm:$0xff]  ;;  %v384_v28 = vld [vmem:[%s19340_s30 + $0x950] sm:$0xff] }
  0x5e   :  { %v7505_v51 = vpack.c.bf16 %v337_v43, %v329_v42  ;;  %v7283_v58 = vpack.c.bf16 %v722_v49, %v714_v47  ;;  %v7519_v35 = vpack.c.bf16 %v384_v28, %v376_v26  ;;  %v392_v40 = vld [vmem:[%s19340_s30 + $0x990] sm:$0xff]  ;;  %v417_v47 = vld [vmem:[%s19340_s30 + $0xa58] sm:$0xff]  ;;  %v7331_v49 = vpack.c.bf16 %v142_v39, %v134_v38  ;;  %v150_v52 = vld [vmem:[%s19340_s30 + $0x200] sm:$0xff] }
  0x5f   :  { %7264 = vmatpush1.bf16.msra.mxu0 %v7263_v54  ;;  %v95_v54 = vld [vmem:[%s19340_s30 + $0x48] sm:$0xff]  ;;  %v400_v43 = vld [vmem:[%s19340_s30 + $0x9d0] sm:$0xff]  ;;  %v174_v0 = vld [vmem:[%s19340_s30 + $0x2c0] sm:$0xff] }
  0x60   :  { %7488 = vmatpush1.bf16.msra.mxu1 %v7487_v55  ;;  %7266 = vmatprep.subr.bf16.mxu0 %v7265_v56  ;;  %v1011_v55 = vcombine.high %v10783_v32, %v10783_v32  ;;  %v345_v56 = vld [vmem:[%s19340_s30 + $0x818] sm:$0xff]  ;;  %v94_v32 = vld [vmem:[%s19340_s30 + $0x40] sm:$0xff]  ;;  %v7523_v50 = vpack.c.bf16 %v400_v43, %v392_v40  ;;  %v448_v19 = vld [vmem:[%s19340_s30 + $0xb50] sm:$0xff] }
  0x61   :  { %7490 = vmatprep.subr.bf16.mxu1 %v7489_v60  ;;  %v7317_v60 = vpack.c.bf16 %v95_v54, %v87_v53  ;;  %v7509_v63 = vpack.c.bf16 %v353_v57, %v345_v56  ;;  %v7319_v6 = vpack.c.bf16 %v94_v32, %v86_v61  ;;  %v158_v53 = vld [vmem:[%s19340_s30 + $0x240] sm:$0xff]  ;;  %v408_v54 = vld [vmem:[%s19340_s30 + $0xa10] sm:$0xff]  ;;  %v167_v57 = vld [vmem:[%s19340_s30 + $0x288] sm:$0xff] }
  0x62   :  { %v416_v56 = vld [vmem:[%s19340_s30 + $0xa50] sm:$0xff]  ;;  %v7335_v61 = vpack.c.bf16 %v158_v53, %v150_v52  ;;  %v199_v20 = vld [vmem:[%s19340_s30 + $0x388] sm:$0xff]  ;;  %v206_v28 = vld [vmem:[%s19340_s30 + $0x3c0] sm:$0xff] }
  0x63   :  { %7268 = vmatpush1.bf16.msra.mxu0 %v7267_v2  ;;  %v111_v2 = vld [vmem:[%s19340_s30 + $0xc8] sm:$0xff]  ;;  %v7527_v32 = vpack.c.bf16 %v416_v56, %v408_v54  ;;  %v222_v43 = vld [vmem:[%s19340_s30 + $0x440] sm:$0xff] }
  0x64   :  { %7492 = vmatpush1.bf16.msra.mxu1 %v7491_v3  ;;  %7270 = vmatprep.subr.bf16.mxu0 %v7269_v4  ;;  %v10976_v3 = vrot.slane %v1011_v55, %v10763_v23  ;;  %v361_v4 = vld [vmem:[%s19340_s30 + $0x898] sm:$0xff]  ;;  %v238_v56 = vld [vmem:[%s19340_s30 + $0x4c0] sm:$0xff] }
  0x65   :  { %7494 = vmatprep.subr.bf16.mxu1 %v7493_v9  ;;  %v7321_v9 = vpack.c.bf16 %v111_v2, %v103_v1  ;;  %v7513_v14 = vpack.c.bf16 %v369_v5, %v361_v4  ;;  %v424_v1 = vld [vmem:[%s19340_s30 + $0xa90] sm:$0xff]  ;;  %v183_v5 = vld [vmem:[%s19340_s30 + $0x308] sm:$0xff] }
  0x66   :  { %v432_v4 = vld [vmem:[%s19340_s30 + $0xad0] sm:$0xff] }
  0x67   :  { %7272 = vmatpush1.bf16.msra.mxu0 %v7271_v16  ;;  %v119_v16 = vld [vmem:[%s19340_s30 + $0x108] sm:$0xff]  ;;  %v7531_v12 = vpack.c.bf16 %v432_v4, %v424_v1  ;;  %v254_v4 = vld [vmem:[%s19340_s30 + $0x540] sm:$0xff] }
  0x68   :  { %7496 = vmatpush1.bf16.msra.mxu1 %v7495_v17  ;;  %7274 = vmatprep.subr.bf16.mxu0 %v7273_v18  ;;  %v127_v17 = vld [vmem:[%s19340_s30 + $0x148] sm:$0xff]  ;;  %v11004_v18 = vcombine.high %v10976_v3, %v10976_v3 }
  0x69   :  { %7498 = vmatprep.subr.bf16.mxu1 %v7497_v22  ;;  %v7515_v22 = vpack.c.bf16 %v368_v15, %v360_v13  ;;  %v7325_v24 = vpack.c.bf16 %v127_v17, %v119_v16  ;;  %v190_v15 = vld [vmem:[%s19340_s30 + $0x340] sm:$0xff]  ;;  %v440_v16 = vld [vmem:[%s19340_s30 + $0xb10] sm:$0xff] }
  0x6b   :  { %7276 = vmatpush1.bf16.msra.mxu0 %v7275_v29  ;;  %v135_v29 = vld [vmem:[%s19340_s30 + $0x188] sm:$0xff] }
  0x6c   :  { %7500 = vmatpush1.bf16.msra.mxu1 %v7499_v30  ;;  %7278 = vmatprep.subr.bf16.mxu0 %v7277_v31  ;;  %v143_v30 = vld [vmem:[%s19340_s30 + $0x1c8] sm:$0xff]  ;;  %v393_v31 = vld [vmem:[%s19340_s30 + $0x998] sm:$0xff] }
  0x6d   :  { %7502 = vmatprep.subr.bf16.mxu1 %v7501_v36  ;;  %v7329_v36 = vpack.c.bf16 %v143_v30, %v135_v29  ;;  %v7521_v42 = vpack.c.bf16 %v401_v33, %v393_v31  ;;  %v456_v29 = vld [vmem:[%s19340_s30 + $0xb90] sm:$0xff]  ;;  %v215_v33 = vld [vmem:[%s19340_s30 + $0x408] sm:$0xff] }
  0x6e   :  { %v464_v31 = vld [vmem:[%s19340_s30 + $0xbd0] sm:$0xff] }
  0x6f   :  { %7280 = vmatpush1.bf16.msra.mxu0 %v7279_v44  ;;  %v151_v44 = vld [vmem:[%s19340_s30 + $0x208] sm:$0xff]  ;;  %v7539_v39 = vpack.c.bf16 %v464_v31, %v456_v29  ;;  %v286_v31 = vld [vmem:[%s19340_s30 + $0x640] sm:$0xff] }
  0x70   :  { %7504 = vmatpush1.bf16.msra.mxu1 %v7503_v45  ;;  %7282 = vmatprep.subr.bf16.mxu0 %v7281_v46  ;;  %v159_v45 = vld [vmem:[%s19340_s30 + $0x248] sm:$0xff]  ;;  %v409_v46 = vld [vmem:[%s19340_s30 + $0xa18] sm:$0xff] }
  0x71   :  { %7506 = vmatprep.subr.bf16.mxu1 %v7505_v51  ;;  %v7333_v51 = vpack.c.bf16 %v159_v45, %v151_v44  ;;  %v7525_v55 = vpack.c.bf16 %v417_v47, %v409_v46  ;;  %v472_v44 = vld [vmem:[%s19340_s30 + $0xc10] sm:$0xff]  ;;  %v231_v47 = vld [vmem:[%s19340_s30 + $0x488] sm:$0xff] }
  0x72   :  { %v480_v46 = vld [vmem:[%s19340_s30 + $0xc50] sm:$0xff] }
  0x73   :  { %7284 = vmatpush1.bf16.msra.mxu0 %v7283_v58  ;;  %v175_v58 = vld [vmem:[%s19340_s30 + $0x2c8] sm:$0xff]  ;;  %v7543_v53 = vpack.c.bf16 %v480_v46, %v472_v44  ;;  %v302_v46 = vld [vmem:[%s19340_s30 + $0x6c0] sm:$0xff] }
  0x74   :  { %7508 = vmatpush1.bf16.msra.mxu1 %v7507_v59  ;;  %7318 = vmatprep.subr.bf16.mxu0 %v7317_v60  ;;  %v425_v59 = vld [vmem:[%s19340_s30 + $0xa98] sm:$0xff]  ;;  %v7337_v62 = vpack.c.bf16 %v175_v58, %v167_v57  ;;  %v488_v57 = vld [vmem:[%s19340_s30 + $0xc90] sm:$0xff] }
  0x75   :  { %7510 = vmatprep.subr.bf16.mxu1 %v7509_v63  ;;  %v433_v60 = vld [vmem:[%s19340_s30 + $0xad8] sm:$0xff]  ;;  %v166_v63 = vld [vmem:[%s19340_s30 + $0x280] sm:$0xff] }
  0x76   :  { %933 = vmatmul.mubr.f32.vlgmr.msra.gmra.mrb[4].mxu0 %v10569_v48  ;;  %v118_v48 = vld [vmem:[%s19340_s30 + $0x100] sm:$0xff]  ;;  %v7529_v2 = vpack.c.bf16 %v433_v60, %v425_v59  ;;  %v7339_v11 = vpack.c.bf16 %v174_v0, %v166_v63  ;;  %v496_v59 = vld [vmem:[%s19340_s30 + $0xcd0] sm:$0xff]  ;;  %v247_v60 = vld [vmem:[%s19340_s30 + $0x508] sm:$0xff] }
  0x77   :  { %7320 = vmatpush1.bf16.msra.mxu0 %v7319_v6  ;;  %1239 = vmatmul.mubr.f32.vlgmr.msra.gmra.mrb[2].mxu1 %v10796_v37  ;;  %v7327_v34 = vpack.c.bf16 %v126_v25, %v118_v48  ;;  %v191_v6 = vld [vmem:[%s19340_s30 + $0x348] sm:$0xff]  ;;  %v7535_v25 = vpack.c.bf16 %v448_v19, %v440_v16  ;;  %v7547_v0 = vpack.c.bf16 %v496_v59, %v488_v57  ;;  %v270_v19 = vld [vmem:[%s19340_s30 + $0x5c0] sm:$0xff] }
  0x78   :  { %7512 = vmatpush1.bf16.msra.mxu1 %v7511_v8  ;;  %7322 = vmatprep.subr.bf16.mxu0 %v7321_v9  ;;  %v441_v8 = vld [vmem:[%s19340_s30 + $0xb18] sm:$0xff]  ;;  %v7341_v13 = vpack.c.bf16 %v191_v6, %v183_v5  ;;  %v504_v5 = vld [vmem:[%s19340_s30 + $0xd10] sm:$0xff]  ;;  %v318_v59 = vld [vmem:[%s19340_s30 + $0x740] sm:$0xff] }
  0x79   :  { %7514 = vmatprep.subr.bf16.mxu1 %v7513_v14  ;;  %1309 = vmatprep.mubr.f32.mxu1 %v11004_v18  ;;  %v449_v9 = vld [vmem:[%s19340_s30 + $0xb58] sm:$0xff]  ;;  %v182_v14 = vld [vmem:[%s19340_s30 + $0x300] sm:$0xff] }
  0x7a   :  { %1096 = vmatprep.mubr.f32.mxu0 %v10808_v41  ;;  %v7533_v17 = vpack.c.bf16 %v449_v9, %v441_v8  ;;  %v7343_v48 = vpack.c.bf16 %v190_v15, %v182_v14  ;;  %v512_v8 = vld [vmem:[%s19340_s30 + $0xd50] sm:$0xff]  ;;  %v263_v9 = vld [vmem:[%s19340_s30 + $0x588] sm:$0xff] }
  0x7b   :  { %7324 = vmatpush1.bf16.msra.mxu0 %v7323_v21  ;;  %v207_v21 = vld [vmem:[%s19340_s30 + $0x3c8] sm:$0xff]  ;;  %v7551_v15 = vpack.c.bf16 %v512_v8, %v504_v5  ;;  %v334_v8 = vld [vmem:[%s19340_s30 + $0x7c0] sm:$0xff] }
  0x7c   :  { %7516 = vmatpush1.bf16.msra.mxu1 %v7515_v22  ;;  %7326 = vmatprep.subr.bf16.mxu0 %v7325_v24  ;;  %v457_v22 = vld [vmem:[%s19340_s30 + $0xb98] sm:$0xff]  ;;  %v7345_v26 = vpack.c.bf16 %v207_v21, %v199_v20  ;;  %v520_v20 = vld [vmem:[%s19340_s30 + $0xd90] sm:$0xff] }
  0x7d   :  { %7518 = vmatprep.subr.bf16.mxu1 %v7517_v27  ;;  %v465_v24 = vld [vmem:[%s19340_s30 + $0xbd8] sm:$0xff]  ;;  %v198_v27 = vld [vmem:[%s19340_s30 + $0x380] sm:$0xff] }
  0x7e   :  { %v7537_v30 = vpack.c.bf16 %v465_v24, %v457_v22  ;;  %v7347_v38 = vpack.c.bf16 %v206_v28, %v198_v27  ;;  %v528_v22 = vld [vmem:[%s19340_s30 + $0xdd0] sm:$0xff]  ;;  %v279_v24 = vld [vmem:[%s19340_s30 + $0x608] sm:$0xff] }
  0x7f   :  { %7328 = vmatpush1.bf16.msra.mxu0 %v7327_v34  ;;  %v223_v34 = vld [vmem:[%s19340_s30 + $0x448] sm:$0xff]  ;;  %v7555_v28 = vpack.c.bf16 %v528_v22, %v520_v20  ;;  %v350_v22 = vld [vmem:[%s19340_s30 + $0x840] sm:$0xff] }
  0x80   :  { %7520 = vmatpush1.bf16.msra.mxu1 %v7519_v35  ;;  %7330 = vmatprep.subr.bf16.mxu0 %v7329_v36  ;;  %v473_v35 = vld [vmem:[%s19340_s30 + $0xc18] sm:$0xff]  ;;  %v7349_v40 = vpack.c.bf16 %v223_v34, %v215_v33  ;;  %v536_v33 = vld [vmem:[%s19340_s30 + $0xe10] sm:$0xff] }
  0x81   :  { %7522 = vmatprep.subr.bf16.mxu1 %v7521_v42  ;;  %v481_v36 = vld [vmem:[%s19340_s30 + $0xc58] sm:$0xff]  ;;  %v214_v42 = vld [vmem:[%s19340_s30 + $0x400] sm:$0xff] }
  0x82   :  { %v7541_v45 = vpack.c.bf16 %v481_v36, %v473_v35  ;;  %v7351_v52 = vpack.c.bf16 %v222_v43, %v214_v42  ;;  %v544_v35 = vld [vmem:[%s19340_s30 + $0xe50] sm:$0xff]  ;;  %v295_v36 = vld [vmem:[%s19340_s30 + $0x688] sm:$0xff] }
  0x83   :  { %7332 = vmatpush1.bf16.msra.mxu0 %v7331_v49  ;;  %v239_v49 = vld [vmem:[%s19340_s30 + $0x4c8] sm:$0xff]  ;;  %v7559_v43 = vpack.c.bf16 %v544_v35, %v536_v33  ;;  %v366_v35 = vld [vmem:[%s19340_s30 + $0x8c0] sm:$0xff] }
  0x84   :  { %7524 = vmatpush1.bf16.msra.mxu1 %v7523_v50  ;;  %7334 = vmatprep.subr.bf16.mxu0 %v7333_v51  ;;  %v489_v50 = vld [vmem:[%s19340_s30 + $0xc98] sm:$0xff]  ;;  %v7353_v54 = vpack.c.bf16 %v239_v49, %v231_v47  ;;  %v552_v47 = vld [vmem:[%s19340_s30 + $0xe90] sm:$0xff] }
  0x85   :  { %7526 = vmatprep.subr.bf16.mxu1 %v7525_v55  ;;  %v497_v51 = vld [vmem:[%s19340_s30 + $0xcd8] sm:$0xff]  ;;  %v230_v55 = vld [vmem:[%s19340_s30 + $0x480] sm:$0xff] }
  0x86   :  { %v7545_v58 = vpack.c.bf16 %v497_v51, %v489_v50  ;;  %v7355_v63 = vpack.c.bf16 %v238_v56, %v230_v55  ;;  %v560_v50 = vld [vmem:[%s19340_s30 + $0xed0] sm:$0xff]  ;;  %v311_v51 = vld [vmem:[%s19340_s30 + $0x708] sm:$0xff] }
  0x87   :  { %7336 = vmatpush1.bf16.msra.mxu0 %v7335_v61  ;;  %v255_v61 = vld [vmem:[%s19340_s30 + $0x548] sm:$0xff]  ;;  %v7563_v56 = vpack.c.bf16 %v560_v50, %v552_v47  ;;  %v382_v50 = vld [vmem:[%s19340_s30 + $0x940] sm:$0xff] }
  0x88   :  { %7528 = vmatpush1.bf16.msra.mxu1 %v7527_v32  ;;  %7338 = vmatprep.subr.bf16.mxu0 %v7337_v62  ;;  %v505_v32 = vld [vmem:[%s19340_s30 + $0xd18] sm:$0xff]  ;;  %v7357_v1 = vpack.c.bf16 %v255_v61, %v247_v60  ;;  %v568_v60 = vld [vmem:[%s19340_s30 + $0xf10] sm:$0xff] }
  0x89   :  { %7530 = vmatprep.subr.bf16.mxu1 %v7529_v2  ;;  %v513_v62 = vld [vmem:[%s19340_s30 + $0xd58] sm:$0xff]  ;;  %v246_v2 = vld [vmem:[%s19340_s30 + $0x500] sm:$0xff] }
  0x8a   :  { %v7549_v6 = vpack.c.bf16 %v513_v62, %v505_v32  ;;  %v7359_v14 = vpack.c.bf16 %v254_v4, %v246_v2  ;;  %v576_v32 = vld [vmem:[%s19340_s30 + $0xf50] sm:$0xff]  ;;  %v327_v62 = vld [vmem:[%s19340_s30 + $0x788] sm:$0xff] }
  0x8b   :  { %7340 = vmatpush1.bf16.msra.mxu0 %v7339_v11  ;;  %v271_v11 = vld [vmem:[%s19340_s30 + $0x5c8] sm:$0xff]  ;;  %v7567_v4 = vpack.c.bf16 %v576_v32, %v568_v60  ;;  %v398_v32 = vld [vmem:[%s19340_s30 + $0x9c0] sm:$0xff] }
  0x8c   :  { %7532 = vmatpush1.bf16.msra.mxu1 %v7531_v12  ;;  %7342 = vmatprep.subr.bf16.mxu0 %v7341_v13  ;;  %v521_v12 = vld [vmem:[%s19340_s30 + $0xd98] sm:$0xff]  ;;  %v7361_v16 = vpack.c.bf16 %v271_v11, %v263_v9  ;;  %v584_v9 = vld [vmem:[%s19340_s30 + $0xf90] sm:$0xff] }
  0x8d   :  { %7534 = vmatprep.subr.bf16.mxu1 %v7533_v17  ;;  %v529_v13 = vld [vmem:[%s19340_s30 + $0xdd8] sm:$0xff]  ;;  %v262_v17 = vld [vmem:[%s19340_s30 + $0x580] sm:$0xff] }
  0x8e   :  { %v7553_v21 = vpack.c.bf16 %v529_v13, %v521_v12  ;;  %v7363_v27 = vpack.c.bf16 %v270_v19, %v262_v17  ;;  %v592_v12 = vld [vmem:[%s19340_s30 + $0xfd0] sm:$0xff]  ;;  %v343_v13 = vld [vmem:[%s19340_s30 + $0x808] sm:$0xff] }
  0x8f   :  { %7344 = vmatpush1.bf16.msra.mxu0 %v7343_v48  ;;  %v287_v48 = vld [vmem:[%s19340_s30 + $0x648] sm:$0xff]  ;;  %v7571_v19 = vpack.c.bf16 %v592_v12, %v584_v9  ;;  %v414_v12 = vld [vmem:[%s19340_s30 + $0xa40] sm:$0xff] }
  0x90   :  { %7536 = vmatpush1.bf16.msra.mxu1 %v7535_v25  ;;  %7346 = vmatprep.subr.bf16.mxu0 %v7345_v26  ;;  %v537_v25 = vld [vmem:[%s19340_s30 + $0xe18] sm:$0xff]  ;;  %v7365_v29 = vpack.c.bf16 %v287_v48, %v279_v24  ;;  %v92_v24 = vld [vmem:[%s19340_s30 + $0x30] sm:$0xff] }
  0x91   :  { %7538 = vmatprep.subr.bf16.mxu1 %v7537_v30  ;;  %v545_v26 = vld [vmem:[%s19340_s30 + $0xe58] sm:$0xff]  ;;  %v278_v30 = vld [vmem:[%s19340_s30 + $0x600] sm:$0xff] }
  0x92   :  { %v7557_v34 = vpack.c.bf16 %v545_v26, %v537_v25  ;;  %v7367_v42 = vpack.c.bf16 %v286_v31, %v278_v30  ;;  %v100_v25 = vld [vmem:[%s19340_s30 + $0x70] sm:$0xff]  ;;  %v359_v26 = vld [vmem:[%s19340_s30 + $0x888] sm:$0xff] }
  0x93   :  { %7348 = vmatpush1.bf16.msra.mxu0 %v7347_v38  ;;  %v303_v38 = vld [vmem:[%s19340_s30 + $0x6c8] sm:$0xff]  ;;  %v7703_v31 = vpack.c.bf16 %v100_v25, %v92_v24  ;;  %v430_v25 = vld [vmem:[%s19340_s30 + $0xac0] sm:$0xff] }
  0x94   :  { %7540 = vmatpush1.bf16.msra.mxu1 %v7539_v39  ;;  %7350 = vmatprep.subr.bf16.mxu0 %v7349_v40  ;;  %v553_v39 = vld [vmem:[%s19340_s30 + $0xe98] sm:$0xff]  ;;  %v7369_v44 = vpack.c.bf16 %v303_v38, %v295_v36  ;;  %v108_v36 = vld [vmem:[%s19340_s30 + $0xb0] sm:$0xff] }
  0x95   :  { %7542 = vmatprep.subr.bf16.mxu1 %v7541_v45  ;;  %v561_v40 = vld [vmem:[%s19340_s30 + $0xed8] sm:$0xff]  ;;  %v294_v45 = vld [vmem:[%s19340_s30 + $0x680] sm:$0xff] }
  0x96   :  { %v7561_v49 = vpack.c.bf16 %v561_v40, %v553_v39  ;;  %v7371_v55 = vpack.c.bf16 %v302_v46, %v294_v45  ;;  %v116_v39 = vld [vmem:[%s19340_s30 + $0xf0] sm:$0xff]  ;;  %v375_v40 = vld [vmem:[%s19340_s30 + $0x908] sm:$0xff] }
  0x97   :  { %7352 = vmatpush1.bf16.msra.mxu0 %v7351_v52  ;;  %v319_v52 = vld [vmem:[%s19340_s30 + $0x748] sm:$0xff]  ;;  %v7707_v46 = vpack.c.bf16 %v116_v39, %v108_v36  ;;  %v446_v39 = vld [vmem:[%s19340_s30 + $0xb40] sm:$0xff] }
  0x98   :  { %7544 = vmatpush1.bf16.msra.mxu1 %v7543_v53  ;;  %7354 = vmatprep.subr.bf16.mxu0 %v7353_v54  ;;  %v569_v53 = vld [vmem:[%s19340_s30 + $0xf18] sm:$0xff]  ;;  %v7373_v57 = vpack.c.bf16 %v319_v52, %v311_v51  ;;  %v124_v51 = vld [vmem:[%s19340_s30 + $0x130] sm:$0xff] }
  0x99   :  { %7546 = vmatprep.subr.bf16.mxu1 %v7545_v58  ;;  %v577_v54 = vld [vmem:[%s19340_s30 + $0xf58] sm:$0xff]  ;;  %v310_v58 = vld [vmem:[%s19340_s30 + $0x700] sm:$0xff] }
  0x9a   :  { %v7565_v61 = vpack.c.bf16 %v577_v54, %v569_v53  ;;  %v7375_v2 = vpack.c.bf16 %v318_v59, %v310_v58  ;;  %v132_v53 = vld [vmem:[%s19340_s30 + $0x170] sm:$0xff]  ;;  %v391_v54 = vld [vmem:[%s19340_s30 + $0x988] sm:$0xff] }
  0x9b   :  { %7356 = vmatpush1.bf16.msra.mxu0 %v7355_v63  ;;  %v335_v63 = vld [vmem:[%s19340_s30 + $0x7c8] sm:$0xff]  ;;  %v7711_v59 = vpack.c.bf16 %v132_v53, %v124_v51  ;;  %v462_v53 = vld [vmem:[%s19340_s30 + $0xbc0] sm:$0xff] }
  0x9c   :  { %7548 = vmatpush1.bf16.msra.mxu1 %v7547_v0  ;;  %7358 = vmatprep.subr.bf16.mxu0 %v7357_v1  ;;  %v585_v0 = vld [vmem:[%s19340_s30 + $0xf98] sm:$0xff]  ;;  %v7377_v5 = vpack.c.bf16 %v335_v63, %v327_v62  ;;  %v140_v62 = vld [vmem:[%s19340_s30 + $0x1b0] sm:$0xff] }
  0x9d   :  { %7550 = vmatprep.subr.bf16.mxu1 %v7549_v6  ;;  %v593_v1 = vld [vmem:[%s19340_s30 + $0xfd8] sm:$0xff]  ;;  %v326_v6 = vld [vmem:[%s19340_s30 + $0x780] sm:$0xff] }
  0x9e   :  { %v7569_v11 = vpack.c.bf16 %v593_v1, %v585_v0  ;;  %v7379_v17 = vpack.c.bf16 %v334_v8, %v326_v6  ;;  %v148_v0 = vld [vmem:[%s19340_s30 + $0x1f0] sm:$0xff]  ;;  %v407_v1 = vld [vmem:[%s19340_s30 + $0xa08] sm:$0xff] }
  0x9f   :  { %7360 = vmatpush1.bf16.msra.mxu0 %v7359_v14  ;;  %v351_v14 = vld [vmem:[%s19340_s30 + $0x848] sm:$0xff]  ;;  %v7715_v8 = vpack.c.bf16 %v148_v0, %v140_v62  ;;  %v478_v0 = vld [vmem:[%s19340_s30 + $0xc40] sm:$0xff] }
  0xa0   :  { %7552 = vmatpush1.bf16.msra.mxu1 %v7551_v15  ;;  %7362 = vmatprep.subr.bf16.mxu0 %v7361_v16  ;;  %v93_v15 = vld [vmem:[%s19340_s30 + $0x38] sm:$0xff]  ;;  %v7381_v20 = vpack.c.bf16 %v351_v14, %v343_v13  ;;  %v156_v13 = vld [vmem:[%s19340_s30 + $0x230] sm:$0xff] }
  0xa1   :  { %7554 = vmatprep.subr.bf16.mxu1 %v7553_v21  ;;  %v101_v16 = vld [vmem:[%s19340_s30 + $0x78] sm:$0xff]  ;;  %v342_v21 = vld [vmem:[%s19340_s30 + $0x800] sm:$0xff] }
  0xa2   :  { %v7701_v48 = vpack.c.bf16 %v101_v16, %v93_v15  ;;  %v7383_v30 = vpack.c.bf16 %v350_v22, %v342_v21  ;;  %v164_v15 = vld [vmem:[%s19340_s30 + $0x270] sm:$0xff]  ;;  %v423_v16 = vld [vmem:[%s19340_s30 + $0xa88] sm:$0xff] }
  0xa3   :  { %7364 = vmatpush1.bf16.msra.mxu0 %v7363_v27  ;;  %v367_v27 = vld [vmem:[%s19340_s30 + $0x8c8] sm:$0xff]  ;;  %v7719_v22 = vpack.c.bf16 %v164_v15, %v156_v13  ;;  %v494_v15 = vld [vmem:[%s19340_s30 + $0xcc0] sm:$0xff] }
  0xa4   :  { %7556 = vmatpush1.bf16.msra.mxu1 %v7555_v28  ;;  %7366 = vmatprep.subr.bf16.mxu0 %v7365_v29  ;;  %v109_v28 = vld [vmem:[%s19340_s30 + $0xb8] sm:$0xff]  ;;  %v7385_v33 = vpack.c.bf16 %v367_v27, %v359_v26  ;;  %v172_v26 = vld [vmem:[%s19340_s30 + $0x2b0] sm:$0xff] }
  0xa5   :  { %7558 = vmatprep.subr.bf16.mxu1 %v7557_v34  ;;  %v117_v29 = vld [vmem:[%s19340_s30 + $0xf8] sm:$0xff]  ;;  %v358_v34 = vld [vmem:[%s19340_s30 + $0x880] sm:$0xff] }
  0xa6   :  { %v7705_v38 = vpack.c.bf16 %v117_v29, %v109_v28  ;;  %v7387_v45 = vpack.c.bf16 %v366_v35, %v358_v34  ;;  %v180_v28 = vld [vmem:[%s19340_s30 + $0x2f0] sm:$0xff]  ;;  %v439_v29 = vld [vmem:[%s19340_s30 + $0xb08] sm:$0xff] }
  0xa7   :  { %7368 = vmatpush1.bf16.msra.mxu0 %v7367_v42  ;;  %v383_v42 = vld [vmem:[%s19340_s30 + $0x948] sm:$0xff]  ;;  %v7723_v35 = vpack.c.bf16 %v180_v28, %v172_v26  ;;  %v510_v28 = vld [vmem:[%s19340_s30 + $0xd40] sm:$0xff] }
  0xa8   :  { %7560 = vmatpush1.bf16.msra.mxu1 %v7559_v43  ;;  %7370 = vmatprep.subr.bf16.mxu0 %v7369_v44  ;;  %v125_v43 = vld [vmem:[%s19340_s30 + $0x138] sm:$0xff]  ;;  %v7389_v47 = vpack.c.bf16 %v383_v42, %v375_v40  ;;  %v188_v40 = vld [vmem:[%s19340_s30 + $0x330] sm:$0xff] }
  0xa9   :  { %7562 = vmatprep.subr.bf16.mxu1 %v7561_v49  ;;  %v133_v44 = vld [vmem:[%s19340_s30 + $0x178] sm:$0xff]  ;;  %v374_v49 = vld [vmem:[%s19340_s30 + $0x900] sm:$0xff] }
  0xaa   :  { %v7709_v52 = vpack.c.bf16 %v133_v44, %v125_v43  ;;  %v7391_v58 = vpack.c.bf16 %v382_v50, %v374_v49  ;;  %v196_v43 = vld [vmem:[%s19340_s30 + $0x370] sm:$0xff]  ;;  %v455_v44 = vld [vmem:[%s19340_s30 + $0xb88] sm:$0xff] }
  0xab   :  { %7372 = vmatpush1.bf16.msra.mxu0 %v7371_v55  ;;  %v399_v55 = vld [vmem:[%s19340_s30 + $0x9c8] sm:$0xff]  ;;  %v7727_v50 = vpack.c.bf16 %v196_v43, %v188_v40  ;;  %v526_v43 = vld [vmem:[%s19340_s30 + $0xdc0] sm:$0xff] }
  0xac   :  { %7564 = vmatpush1.bf16.msra.mxu1 %v7563_v56  ;;  %7374 = vmatprep.subr.bf16.mxu0 %v7373_v57  ;;  %v141_v56 = vld [vmem:[%s19340_s30 + $0x1b8] sm:$0xff]  ;;  %v7393_v60 = vpack.c.bf16 %v399_v55, %v391_v54  ;;  %v204_v54 = vld [vmem:[%s19340_s30 + $0x3b0] sm:$0xff] }
  0xad   :  { %7566 = vmatprep.subr.bf16.mxu1 %v7565_v61  ;;  %v149_v57 = vld [vmem:[%s19340_s30 + $0x1f8] sm:$0xff]  ;;  %v390_v61 = vld [vmem:[%s19340_s30 + $0x980] sm:$0xff] }
  0xae   :  { %v7713_v63 = vpack.c.bf16 %v149_v57, %v141_v56  ;;  %v7395_v6 = vpack.c.bf16 %v398_v32, %v390_v61  ;;  %v212_v56 = vld [vmem:[%s19340_s30 + $0x3f0] sm:$0xff]  ;;  %v471_v57 = vld [vmem:[%s19340_s30 + $0xc08] sm:$0xff] }
  0xaf   :  { %7376 = vmatpush1.bf16.msra.mxu0 %v7375_v2  ;;  %v415_v2 = vld [vmem:[%s19340_s30 + $0xa48] sm:$0xff]  ;;  %v7731_v32 = vpack.c.bf16 %v212_v56, %v204_v54  ;;  %v542_v56 = vld [vmem:[%s19340_s30 + $0xe40] sm:$0xff] }
  0xb0   :  { %7568 = vmatpush1.bf16.msra.mxu1 %v7567_v4  ;;  %7378 = vmatprep.subr.bf16.mxu0 %v7377_v5  ;;  %v157_v4 = vld [vmem:[%s19340_s30 + $0x238] sm:$0xff]  ;;  %v7397_v9 = vpack.c.bf16 %v415_v2, %v407_v1  ;;  %v220_v1 = vld [vmem:[%s19340_s30 + $0x430] sm:$0xff] }
  0xb1   :  { %7570 = vmatprep.subr.bf16.mxu1 %v7569_v11  ;;  %v165_v5 = vld [vmem:[%s19340_s30 + $0x278] sm:$0xff]  ;;  %v406_v11 = vld [vmem:[%s19340_s30 + $0xa00] sm:$0xff] }
  0xb2   :  { %v7717_v14 = vpack.c.bf16 %v165_v5, %v157_v4  ;;  %v7399_v21 = vpack.c.bf16 %v414_v12, %v406_v11  ;;  %v228_v4 = vld [vmem:[%s19340_s30 + $0x470] sm:$0xff]  ;;  %v487_v5 = vld [vmem:[%s19340_s30 + $0xc88] sm:$0xff] }
  0xb3   :  { %7380 = vmatpush1.bf16.msra.mxu0 %v7379_v17  ;;  %v431_v17 = vld [vmem:[%s19340_s30 + $0xac8] sm:$0xff]  ;;  %v7735_v12 = vpack.c.bf16 %v228_v4, %v220_v1  ;;  %v558_v4 = vld [vmem:[%s19340_s30 + $0xec0] sm:$0xff] }
  0xb4   :  { %7572 = vmatpush1.bf16.msra.mxu1 %v7571_v19  ;;  %7382 = vmatprep.subr.bf16.mxu0 %v7381_v20  ;;  %v173_v19 = vld [vmem:[%s19340_s30 + $0x2b8] sm:$0xff]  ;;  %v7401_v24 = vpack.c.bf16 %v431_v17, %v423_v16  ;;  %v236_v16 = vld [vmem:[%s19340_s30 + $0x4b0] sm:$0xff] }
  0xb5   :  { %7702 = vmatprep.subr.bf16.mxu1 %v7701_v48  ;;  %v181_v20 = vld [vmem:[%s19340_s30 + $0x2f8] sm:$0xff]  ;;  %v422_v48 = vld [vmem:[%s19340_s30 + $0xa80] sm:$0xff] }
  0xb6   :  { %1097 = vmatmul.mubr.f32.vlgmr.msra.gmra.mrb[0].mxu0 %v10796_v37  ;;  %v7721_v27 = vpack.c.bf16 %v181_v20, %v173_v19  ;;  %v7403_v34 = vpack.c.bf16 %v430_v25, %v422_v48  ;;  %v244_v19 = vld [vmem:[%s19340_s30 + $0x4f0] sm:$0xff]  ;;  %v503_v20 = vld [vmem:[%s19340_s30 + $0xd08] sm:$0xff] }
  0xb7   :  { %1310 = vmatmul.mubr.f32.vlgmr.msra.gmra.mrb[2].mxu1 %v10976_v3  ;;  %7384 = vmatpush1.bf16.msra.mxu0 %v7383_v30  ;;  %v447_v30 = vld [vmem:[%s19340_s30 + $0xb48] sm:$0xff]  ;;  %v7739_v25 = vpack.c.bf16 %v244_v19, %v236_v16 }
  0xb8   :  { %7704 = vmatpush1.bf16.msra.mxu1 %v7703_v31  ;;  %7386 = vmatprep.subr.bf16.mxu0 %v7385_v33  ;;  %v189_v31 = vld [vmem:[%s19340_s30 + $0x338] sm:$0xff]  ;;  %v7405_v36 = vpack.c.bf16 %v447_v30, %v439_v29  ;;  %v252_v29 = vld [vmem:[%s19340_s30 + $0x530] sm:$0xff] }
  0xb9   :  { %7706 = vmatprep.subr.bf16.mxu1 %v7705_v38  ;;  %1167 = vmatprep.mubr.f32.mxu0 %v11004_v18  ;;  %v197_v33 = vld [vmem:[%s19340_s30 + $0x378] sm:$0xff]  ;;  %v438_v38 = vld [vmem:[%s19340_s30 + $0xb00] sm:$0xff] }
  0xba   :  { %1522 = vmatprep.mubr.f32.mxu1 %v10808_v41  ;;  %v7725_v42 = vpack.c.bf16 %v197_v33, %v189_v31  ;;  %v7407_v49 = vpack.c.bf16 %v446_v39, %v438_v38  ;;  %v260_v31 = vld [vmem:[%s19340_s30 + $0x570] sm:$0xff]  ;;  %v519_v33 = vld [vmem:[%s19340_s30 + $0xd88] sm:$0xff] }
  0xbb   :  { %7388 = vmatpush1.bf16.msra.mxu0 %v7387_v45  ;;  %v463_v45 = vld [vmem:[%s19340_s30 + $0xbc8] sm:$0xff]  ;;  %v7743_v39 = vpack.c.bf16 %v260_v31, %v252_v29 }
  0xbc   :  { %7708 = vmatpush1.bf16.msra.mxu1 %v7707_v46  ;;  %7390 = vmatprep.subr.bf16.mxu0 %v7389_v47  ;;  %v205_v46 = vld [vmem:[%s19340_s30 + $0x3b8] sm:$0xff]  ;;  %v7409_v51 = vpack.c.bf16 %v463_v45, %v455_v44  ;;  %v268_v44 = vld [vmem:[%s19340_s30 + $0x5b0] sm:$0xff] }
  0xbd   :  { %7710 = vmatprep.subr.bf16.mxu1 %v7709_v52  ;;  %v213_v47 = vld [vmem:[%s19340_s30 + $0x3f8] sm:$0xff]  ;;  %v454_v52 = vld [vmem:[%s19340_s30 + $0xb80] sm:$0xff] }
  0xbe   :  { %v7729_v55 = vpack.c.bf16 %v213_v47, %v205_v46  ;;  %v7411_v61 = vpack.c.bf16 %v462_v53, %v454_v52  ;;  %v276_v46 = vld [vmem:[%s19340_s30 + $0x5f0] sm:$0xff]  ;;  %v535_v47 = vld [vmem:[%s19340_s30 + $0xe08] sm:$0xff] }
  0xbf   :  { %7392 = vmatpush1.bf16.msra.mxu0 %v7391_v58  ;;  %v479_v58 = vld [vmem:[%s19340_s30 + $0xc48] sm:$0xff]  ;;  %v7747_v53 = vpack.c.bf16 %v276_v46, %v268_v44 }
  0xc0   :  { %7712 = vmatpush1.bf16.msra.mxu1 %v7711_v59  ;;  %7394 = vmatprep.subr.bf16.mxu0 %v7393_v60  ;;  %v221_v59 = vld [vmem:[%s19340_s30 + $0x438] sm:$0xff]  ;;  %v7413_v62 = vpack.c.bf16 %v479_v58, %v471_v57  ;;  %v284_v57 = vld [vmem:[%s19340_s30 + $0x630] sm:$0xff] }
  0xc1   :  { %7714 = vmatprep.subr.bf16.mxu1 %v7713_v63  ;;  %v229_v60 = vld [vmem:[%s19340_s30 + $0x478] sm:$0xff]  ;;  %v470_v63 = vld [vmem:[%s19340_s30 + $0xc00] sm:$0xff] }
  0xc2   :  { %v7733_v2 = vpack.c.bf16 %v229_v60, %v221_v59  ;;  %v7415_v11 = vpack.c.bf16 %v478_v0, %v470_v63  ;;  %v292_v59 = vld [vmem:[%s19340_s30 + $0x670] sm:$0xff]  ;;  %v551_v60 = vld [vmem:[%s19340_s30 + $0xe88] sm:$0xff]  ;;  %v550_v0 = vld [vmem:[%s19340_s30 + $0xe80] sm:$0xff] }
  0xc3   :  { %7396 = vmatpush1.bf16.msra.mxu0 %v7395_v6  ;;  %v495_v6 = vld [vmem:[%s19340_s30 + $0xcc8] sm:$0xff]  ;;  %v7751_v1 = vpack.c.bf16 %v292_v59, %v284_v57 }
  0xc4   :  { %7716 = vmatpush1.bf16.msra.mxu1 %v7715_v8  ;;  %7398 = vmatprep.subr.bf16.mxu0 %v7397_v9  ;;  %v237_v8 = vld [vmem:[%s19340_s30 + $0x4b8] sm:$0xff]  ;;  %v7417_v13 = vpack.c.bf16 %v495_v6, %v487_v5  ;;  %v300_v5 = vld [vmem:[%s19340_s30 + $0x6b0] sm:$0xff] }
  0xc5   :  { %7718 = vmatprep.subr.bf16.mxu1 %v7717_v14  ;;  %v245_v9 = vld [vmem:[%s19340_s30 + $0x4f8] sm:$0xff]  ;;  %v486_v14 = vld [vmem:[%s19340_s30 + $0xc80] sm:$0xff]  ;;  %v308_v6 = vld [vmem:[%s19340_s30 + $0x6f0] sm:$0xff] }
  0xc6   :  { %v7737_v17 = vpack.c.bf16 %v245_v9, %v237_v8  ;;  %v7419_v48 = vpack.c.bf16 %v494_v15, %v486_v14  ;;  %v567_v9 = vld [vmem:[%s19340_s30 + $0xf08] sm:$0xff] }
  0xc7   :  { %7400 = vmatpush1.bf16.msra.mxu0 %v7399_v21  ;;  %v511_v21 = vld [vmem:[%s19340_s30 + $0xd48] sm:$0xff] }
  0xc8   :  { %7720 = vmatpush1.bf16.msra.mxu1 %v7719_v22  ;;  %7402 = vmatprep.subr.bf16.mxu0 %v7401_v24  ;;  %v253_v22 = vld [vmem:[%s19340_s30 + $0x538] sm:$0xff]  ;;  %v7421_v26 = vpack.c.bf16 %v511_v21, %v503_v20 }
  0xc9   :  { %7722 = vmatprep.subr.bf16.mxu1 %v7721_v27  ;;  %v261_v24 = vld [vmem:[%s19340_s30 + $0x578] sm:$0xff]  ;;  %v502_v27 = vld [vmem:[%s19340_s30 + $0xd00] sm:$0xff] }
  0xca   :  { %v7741_v30 = vpack.c.bf16 %v261_v24, %v253_v22  ;;  %v7423_v38 = vpack.c.bf16 %v510_v28, %v502_v27 }
  0xcb   :  { %7404 = vmatpush1.bf16.msra.mxu0 %v7403_v34  ;;  %v527_v34 = vld [vmem:[%s19340_s30 + $0xdc8] sm:$0xff] }
  0xcc   :  { %7724 = vmatpush1.bf16.msra.mxu1 %v7723_v35  ;;  %7406 = vmatprep.subr.bf16.mxu0 %v7405_v36  ;;  %v269_v35 = vld [vmem:[%s19340_s30 + $0x5b8] sm:$0xff]  ;;  %v7425_v40 = vpack.c.bf16 %v527_v34, %v519_v33 }
  0xcd   :  { %7726 = vmatprep.subr.bf16.mxu1 %v7725_v42  ;;  %v277_v36 = vld [vmem:[%s19340_s30 + $0x5f8] sm:$0xff]  ;;  %v518_v42 = vld [vmem:[%s19340_s30 + $0xd80] sm:$0xff] }
  0xce   :  { %v7745_v45 = vpack.c.bf16 %v277_v36, %v269_v35  ;;  %v7427_v52 = vpack.c.bf16 %v526_v43, %v518_v42 }
  0xcf   :  { %7408 = vmatpush1.bf16.msra.mxu0 %v7407_v49  ;;  %v543_v49 = vld [vmem:[%s19340_s30 + $0xe48] sm:$0xff] }
  0xd0   :  { %7728 = vmatpush1.bf16.msra.mxu1 %v7727_v50  ;;  %7410 = vmatprep.subr.bf16.mxu0 %v7409_v51  ;;  %v285_v50 = vld [vmem:[%s19340_s30 + $0x638] sm:$0xff]  ;;  %v7429_v54 = vpack.c.bf16 %v543_v49, %v535_v47 }
  0xd1   :  { %7730 = vmatprep.subr.bf16.mxu1 %v7729_v55  ;;  %v293_v51 = vld [vmem:[%s19340_s30 + $0x678] sm:$0xff]  ;;  %v534_v55 = vld [vmem:[%s19340_s30 + $0xe00] sm:$0xff] }
  0xd2   :  { %v7749_v58 = vpack.c.bf16 %v293_v51, %v285_v50  ;;  %v7431_v63 = vpack.c.bf16 %v542_v56, %v534_v55 }
  0xd3   :  { %7412 = vmatpush1.bf16.msra.mxu0 %v7411_v61  ;;  %v559_v61 = vld [vmem:[%s19340_s30 + $0xec8] sm:$0xff] }
  0xd4   :  { %7732 = vmatpush1.bf16.msra.mxu1 %v7731_v32  ;;  %7414 = vmatprep.subr.bf16.mxu0 %v7413_v62  ;;  %v301_v32 = vld [vmem:[%s19340_s30 + $0x6b8] sm:$0xff] }
  0xd5   :  { %7734 = vmatprep.subr.bf16.mxu1 %v7733_v2  ;;  %v309_v62 = vld [vmem:[%s19340_s30 + $0x6f8] sm:$0xff]  ;;  %v7433_v2 = vpack.c.bf16 %v559_v61, %v551_v60 }
  0xd6   :  { %v7753_v8 = vpack.c.bf16 %v309_v62, %v301_v32 }
  0xd7   :  { %7416 = vmatpush1.bf16.msra.mxu0 %v7415_v11  ;;  %v575_v11 = vld [vmem:[%s19340_s30 + $0xf48] sm:$0xff] }
  0xd8   :  { %7736 = vmatpush1.bf16.msra.mxu1 %v7735_v12  ;;  %7418 = vmatprep.subr.bf16.mxu0 %v7417_v13 }
  0xd9   :  { %7738 = vmatprep.subr.bf16.mxu1 %v7737_v17 }
  0xdb   :  { %7420 = vmatpush1.bf16.msra.mxu0 %v7419_v48 }
  0xdc   :  { %7740 = vmatpush1.bf16.msra.mxu1 %v7739_v25  ;;  %7422 = vmatprep.subr.bf16.mxu0 %v7421_v26 }
  0xdd   :  { %7742 = vmatprep.subr.bf16.mxu1 %v7741_v30 }
  0xdf   :  { %7424 = vmatpush1.bf16.msra.mxu0 %v7423_v38 }
  0xe0   :  { %7744 = vmatpush1.bf16.msra.mxu1 %v7743_v39  ;;  %7426 = vmatprep.subr.bf16.mxu0 %v7425_v40 }
  0xe1   :  { %7746 = vmatprep.subr.bf16.mxu1 %v7745_v45 }
  0xe3   :  { %7428 = vmatpush1.bf16.msra.mxu0 %v7427_v52 }
  0xe4   :  { %7748 = vmatpush1.bf16.msra.mxu1 %v7747_v53  ;;  %7430 = vmatprep.subr.bf16.mxu0 %v7429_v54 }
  0xe5   :  { %7750 = vmatprep.subr.bf16.mxu1 %v7749_v58 }
  0xe6   :  { %33 = vsyncpa [#allocation5], 0  ;;  %v317_v12 = vld [vmem:[%s19340_s30 + $0x738] sm:$0xff]  ;;  %v7435_v14 = vpack.c.bf16 %v558_v4, %v550_v0  ;;  %v7755_v15 = vpack.c.bf16 %v308_v6, %v300_v5  ;;  %v7437_v16 = vpack.c.bf16 %v575_v11, %v567_v9  ;;  %v566_v17 = vld [vmem:[%s19340_s30 + $0xf00] sm:$0xff]  ;;  %s19343_s4 = sld [smem:[#allocation14_spill]]  ;;  %s19344_s27 = sld [smem:[#allocation13_spill]] }
  0xe7   :  { %v325_v13 = vld [vmem:[%s19340_s30 + $0x778] sm:$0xff]  ;;  %7432 = vmatpush1.bf16.msra.mxu0 %v7431_v63  ;;  %v574_v19 = vld [vmem:[%s19340_s30 + $0xf40] sm:$0xff]  ;;  %v316_v20 = vld [vmem:[%s19340_s30 + $0x730] sm:$0xff]  ;;  %s19345_s7 = sld [smem:[#allocation12_spill]]  ;;  %s19347_s2 = sld [smem:[#allocation16_spill]]  ;;  %vm10198_vm0 = vmmov 0  }
  0xe8   :  { %7752 = vmatpush1.bf16.msra.mxu1 %v7751_v1  ;;  %7434 = vmatprep.subr.bf16.mxu0 %v7433_v2  ;;  %v7757_v21 = vpack.c.bf16 %v325_v13, %v317_v12  ;;  %v324_v22 = vld [vmem:[%s19340_s30 + $0x770] sm:$0xff]  ;;  %v583_v24 = vld [vmem:[%s19340_s30 + $0xf88] sm:$0xff]  ;;  %v333_v25 = vld [vmem:[%s19340_s30 + $0x7b8] sm:$0xff]  ;;  %v7439_v27 = vpack.c.bf16 %v574_v19, %v566_v17  ;;  %s19348_s9 = sld [smem:[#allocation15_spill]]  ;;  %s19349_s8 = sld [smem:[#allocation18_spill]] }
  0xe9   :  { %7754 = vmatprep.subr.bf16.mxu1 %v7753_v8  ;;  %v591_v48 = vld [vmem:[%s19340_s30 + $0xfc8] sm:$0xff]  ;;  %v341_v26 = vld [vmem:[%s19340_s30 + $0x7f8] sm:$0xff]  ;;  %v7759_v28 = vpack.c.bf16 %v324_v22, %v316_v20  ;;  %v582_v30 = vld [vmem:[%s19340_s30 + $0xf80] sm:$0xff] }
  0xea   :  { %v7441_v29 = vpack.c.bf16 %v591_v48, %v583_v24  ;;  %v590_v31 = vld [vmem:[%s19340_s30 + $0xfc0] sm:$0xff]  ;;  %v332_v33 = vld [vmem:[%s19340_s30 + $0x7b0] sm:$0xff]  ;;  %v7761_v34 = vpack.c.bf16 %v341_v26, %v333_v25  ;;  %v91_v36 = vld [vmem:[%s19340_s30 + $0x28] sm:$0xff] }
  0xeb   :  { %7436 = vmatpush1.bf16.msra.mxu0 %v7435_v14  ;;  %v340_v35 = vld [vmem:[%s19340_s30 + $0x7f0] sm:$0xff]  ;;  %v99_v38 = vld [vmem:[%s19340_s30 + $0x68] sm:$0xff]  ;;  %v349_v39 = vld [vmem:[%s19340_s30 + $0x838] sm:$0xff]  ;;  %v7443_v42 = vpack.c.bf16 %v590_v31, %v582_v30 }
  0xec   :  { %7756 = vmatpush1.bf16.msra.mxu1 %v7755_v15  ;;  %7438 = vmatprep.subr.bf16.mxu0 %v7437_v16  ;;  %v357_v40 = vld [vmem:[%s19340_s30 + $0x878] sm:$0xff]  ;;  %v7763_v43 = vpack.c.bf16 %v340_v35, %v332_v33  ;;  %v7573_v44 = vpack.c.bf16 %v99_v38, %v91_v36  ;;  %v90_v45 = vld [vmem:[%s19340_s30 + $0x20] sm:$0xff]  ;;  %v348_v47 = vld [vmem:[%s19340_s30 + $0x830] sm:$0xff] }
  0xed   :  { %7758 = vmatprep.subr.bf16.mxu1 %v7757_v21  ;;  %v98_v46 = vld [vmem:[%s19340_s30 + $0x60] sm:$0xff]  ;;  %v7765_v49 = vpack.c.bf16 %v357_v40, %v349_v39  ;;  %v356_v50 = vld [vmem:[%s19340_s30 + $0x870] sm:$0xff]  ;;  %v107_v51 = vld [vmem:[%s19340_s30 + $0xa8] sm:$0xff] }
  0xee   :  { %v115_v52 = vld [vmem:[%s19340_s30 + $0xe8] sm:$0xff]  ;;  %v365_v53 = vld [vmem:[%s19340_s30 + $0x8b8] sm:$0xff]  ;;  %v7575_v55 = vpack.c.bf16 %v98_v46, %v90_v45  ;;  %v7767_v56 = vpack.c.bf16 %v356_v50, %v348_v47  ;;  %v106_v58 = vld [vmem:[%s19340_s30 + $0xa0] sm:$0xff] }
  0xef   :  { %7440 = vmatpush1.bf16.msra.mxu0 %v7439_v27  ;;  %v373_v54 = vld [vmem:[%s19340_s30 + $0x8f8] sm:$0xff]  ;;  %v7577_v57 = vpack.c.bf16 %v115_v52, %v107_v51  ;;  %v114_v59 = vld [vmem:[%s19340_s30 + $0xe0] sm:$0xff]  ;;  %v364_v60 = vld [vmem:[%s19340_s30 + $0x8b0] sm:$0xff] }
  0xf0   :  { %7760 = vmatpush1.bf16.msra.mxu1 %v7759_v28  ;;  %7442 = vmatprep.subr.bf16.mxu0 %v7441_v29  ;;  %v7769_v61 = vpack.c.bf16 %v373_v54, %v365_v53  ;;  %v372_v32 = vld [vmem:[%s19340_s30 + $0x8f0] sm:$0xff]  ;;  %v123_v62 = vld [vmem:[%s19340_s30 + $0x128] sm:$0xff]  ;;  %v381_v0 = vld [vmem:[%s19340_s30 + $0x938] sm:$0xff]  ;;  %v7579_v2 = vpack.c.bf16 %v114_v59, %v106_v58 }
  0xf1   :  { %7762 = vmatprep.subr.bf16.mxu1 %v7761_v34  ;;  %v131_v63 = vld [vmem:[%s19340_s30 + $0x168] sm:$0xff]  ;;  %v389_v1 = vld [vmem:[%s19340_s30 + $0x978] sm:$0xff]  ;;  %v7771_v4 = vpack.c.bf16 %v372_v32, %v364_v60  ;;  %v122_v6 = vld [vmem:[%s19340_s30 + $0x120] sm:$0xff] }
  0xf2   :  { %v7581_v5 = vpack.c.bf16 %v131_v63, %v123_v62  ;;  %v130_v8 = vld [vmem:[%s19340_s30 + $0x160] sm:$0xff]  ;;  %v380_v9 = vld [vmem:[%s19340_s30 + $0x930] sm:$0xff]  ;;  %v7773_v11 = vpack.c.bf16 %v389_v1, %v381_v0  ;;  %v139_v13 = vld [vmem:[%s19340_s30 + $0x1a8] sm:$0xff] }
  0xf3   :  { %7444 = vmatpush1.bf16.msra.mxu0 %v7443_v42  ;;  %v388_v12 = vld [vmem:[%s19340_s30 + $0x970] sm:$0xff]  ;;  %v147_v14 = vld [vmem:[%s19340_s30 + $0x1e8] sm:$0xff]  ;;  %v397_v15 = vld [vmem:[%s19340_s30 + $0x9b8] sm:$0xff]  ;;  %v7583_v17 = vpack.c.bf16 %v130_v8, %v122_v6 }
  0xf4   :  { %7764 = vmatpush1.bf16.msra.mxu1 %v7763_v43  ;;  %7574 = vmatprep.subr.bf16.mxu0 %v7573_v44  ;;  %v405_v16 = vld [vmem:[%s19340_s30 + $0x9f8] sm:$0xff]  ;;  %v7775_v19 = vpack.c.bf16 %v388_v12, %v380_v9  ;;  %v7585_v20 = vpack.c.bf16 %v147_v14, %v139_v13  ;;  %v138_v21 = vld [vmem:[%s19340_s30 + $0x1a0] sm:$0xff]  ;;  %v396_v24 = vld [vmem:[%s19340_s30 + $0x9b0] sm:$0xff] }
  0xf5   :  { %7766 = vmatprep.subr.bf16.mxu1 %v7765_v49  ;;  %v146_v22 = vld [vmem:[%s19340_s30 + $0x1e0] sm:$0xff]  ;;  %v404_v48 = vld [vmem:[%s19340_s30 + $0x9f0] sm:$0xff]  ;;  %v155_v25 = vld [vmem:[%s19340_s30 + $0x228] sm:$0xff] }
  0xf6   :  { %1168 = vmatmul.mubr.f32.vlgmr.msra.gmra.mrb[0].mxu0 %v10976_v3  ;;  %v163_v26 = vld [vmem:[%s19340_s30 + $0x268] sm:$0xff]  ;;  %v413_v27 = vld [vmem:[%s19340_s30 + $0xa38] sm:$0xff]  ;;  %v7587_v29 = vpack.c.bf16 %v146_v22, %v138_v21  ;;  %v7779_v30 = vpack.c.bf16 %v404_v48, %v396_v24  ;;  %v154_v33 = vld [vmem:[%s19340_s30 + $0x220] sm:$0xff] }
  0xf7   :  { %7576 = vmatpush1.bf16.msra.mxu0 %v7575_v55  ;;  %1523 = vmatmul.mubr.f32.vlgmr.msra.gmra.mrb[0].mxu1 %v10796_v37  ;;  %v421_v28 = vld [vmem:[%s19340_s30 + $0xa78] sm:$0xff]  ;;  %v7589_v31 = vpack.c.bf16 %v163_v26, %v155_v25  ;;  %v162_v34 = vld [vmem:[%s19340_s30 + $0x260] sm:$0xff]  ;;  %v412_v35 = vld [vmem:[%s19340_s30 + $0xa30] sm:$0xff] }
  0xf8   :  { %7768 = vmatpush1.bf16.msra.mxu1 %v7767_v56  ;;  %7578 = vmatprep.subr.bf16.mxu0 %v7577_v57  ;;  %v7781_v36 = vpack.c.bf16 %v421_v28, %v413_v27  ;;  %v420_v38 = vld [vmem:[%s19340_s30 + $0xa70] sm:$0xff]  ;;  %v171_v39 = vld [vmem:[%s19340_s30 + $0x2a8] sm:$0xff]  ;;  %v429_v42 = vld [vmem:[%s19340_s30 + $0xab8] sm:$0xff]  ;;  %v7591_v44 = vpack.c.bf16 %v162_v34, %v154_v33 }
  0xf9   :  { %7770 = vmatprep.subr.bf16.mxu1 %v7769_v61  ;;  %1593 = vmatprep.mubr.f32.mxu1 %v11004_v18  ;;  %v179_v40 = vld [vmem:[%s19340_s30 + $0x2e8] sm:$0xff]  ;;  %v437_v43 = vld [vmem:[%s19340_s30 + $0xaf8] sm:$0xff]  ;;  %v7783_v45 = vpack.c.bf16 %v420_v38, %v412_v35  ;;  %v170_v47 = vld [vmem:[%s19340_s30 + $0x2a0] sm:$0xff] }
  0xfa   :  { %1380 = vmatprep.mubr.f32.mxu0 %v10808_v41  ;;  %v7777_v41 = vpack.c.bf16 %v405_v16, %v397_v15  ;;  %v7593_v46 = vpack.c.bf16 %v179_v40, %v171_v39  ;;  %v178_v49 = vld [vmem:[%s19340_s30 + $0x2e0] sm:$0xff]  ;;  %v428_v50 = vld [vmem:[%s19340_s30 + $0xab0] sm:$0xff]  ;;  %v7785_v51 = vpack.c.bf16 %v437_v43, %v429_v42  ;;  %v187_v53 = vld [vmem:[%s19340_s30 + $0x328] sm:$0xff] }
  0xfb   :  { %7580 = vmatpush1.bf16.msra.mxu0 %v7579_v2  ;;  %v436_v52 = vld [vmem:[%s19340_s30 + $0xaf0] sm:$0xff]  ;;  %v195_v54 = vld [vmem:[%s19340_s30 + $0x368] sm:$0xff]  ;;  %v445_v55 = vld [vmem:[%s19340_s30 + $0xb38] sm:$0xff]  ;;  %v7595_v57 = vpack.c.bf16 %v178_v49, %v170_v47 }
  0xfc   :  { %7772 = vmatpush1.bf16.msra.mxu1 %v7771_v4  ;;  %7582 = vmatprep.subr.bf16.mxu0 %v7581_v5  ;;  %v453_v56 = vld [vmem:[%s19340_s30 + $0xb78] sm:$0xff]  ;;  %v7787_v58 = vpack.c.bf16 %v436_v52, %v428_v50  ;;  %v7597_v59 = vpack.c.bf16 %v195_v54, %v187_v53  ;;  %v186_v60 = vld [vmem:[%s19340_s30 + $0x320] sm:$0xff]  ;;  %v444_v32 = vld [vmem:[%s19340_s30 + $0xb30] sm:$0xff] }
  0xfd   :  { %7774 = vmatprep.subr.bf16.mxu1 %v7773_v11  ;;  %v194_v61 = vld [vmem:[%s19340_s30 + $0x360] sm:$0xff]  ;;  %v7789_v62 = vpack.c.bf16 %v453_v56, %v445_v55  ;;  %v452_v63 = vld [vmem:[%s19340_s30 + $0xb70] sm:$0xff]  ;;  %v203_v0 = vld [vmem:[%s19340_s30 + $0x3a8] sm:$0xff] }
  0xfe   :  { %v211_v1 = vld [vmem:[%s19340_s30 + $0x3e8] sm:$0xff]  ;;  %v461_v2 = vld [vmem:[%s19340_s30 + $0xbb8] sm:$0xff]  ;;  %v7599_v5 = vpack.c.bf16 %v194_v61, %v186_v60  ;;  %v7791_v6 = vpack.c.bf16 %v452_v63, %v444_v32  ;;  %v202_v9 = vld [vmem:[%s19340_s30 + $0x3a0] sm:$0xff] }
  0xff   :  { %7584 = vmatpush1.bf16.msra.mxu0 %v7583_v17  ;;  %v469_v4 = vld [vmem:[%s19340_s30 + $0xbf8] sm:$0xff]  ;;  %v7601_v8 = vpack.c.bf16 %v211_v1, %v203_v0  ;;  %v210_v11 = vld [vmem:[%s19340_s30 + $0x3e0] sm:$0xff]  ;;  %v460_v12 = vld [vmem:[%s19340_s30 + $0xbb0] sm:$0xff] }
 0x100   :  { %7776 = vmatpush1.bf16.msra.mxu1 %v7775_v19  ;;  %7586 = vmatprep.subr.bf16.mxu0 %v7585_v20  ;;  %v7793_v13 = vpack.c.bf16 %v469_v4, %v461_v2  ;;  %v468_v14 = vld [vmem:[%s19340_s30 + $0xbf0] sm:$0xff]  ;;  %v219_v15 = vld [vmem:[%s19340_s30 + $0x428] sm:$0xff]  ;;  %v477_v17 = vld [vmem:[%s19340_s30 + $0xc38] sm:$0xff]  ;;  %v7603_v20 = vpack.c.bf16 %v210_v11, %v202_v9 }
 0x101   :  { %7778 = vmatprep.subr.bf16.mxu1 %v7777_v41  ;;  %v227_v16 = vld [vmem:[%s19340_s30 + $0x468] sm:$0xff]  ;;  %v485_v19 = vld [vmem:[%s19340_s30 + $0xc78] sm:$0xff]  ;;  %v7795_v21 = vpack.c.bf16 %v468_v14, %v460_v12  ;;  %v218_v24 = vld [vmem:[%s19340_s30 + $0x420] sm:$0xff] }
 0x102   :  { %v7605_v22 = vpack.c.bf16 %v227_v16, %v219_v15  ;;  %v226_v41 = vld [vmem:[%s19340_s30 + $0x460] sm:$0xff]  ;;  %v476_v48 = vld [vmem:[%s19340_s30 + $0xc30] sm:$0xff]  ;;  %v7797_v25 = vpack.c.bf16 %v485_v19, %v477_v17  ;;  %v235_v27 = vld [vmem:[%s19340_s30 + $0x4a8] sm:$0xff] }
 0x103   :  { %7588 = vmatpush1.bf16.msra.mxu0 %v7587_v29  ;;  %v484_v26 = vld [vmem:[%s19340_s30 + $0xc70] sm:$0xff]  ;;  %v243_v28 = vld [vmem:[%s19340_s30 + $0x4e8] sm:$0xff]  ;;  %v493_v29 = vld [vmem:[%s19340_s30 + $0xcb8] sm:$0xff] }
 0x104   :  { %7780 = vmatpush1.bf16.msra.mxu1 %v7779_v30  ;;  %7590 = vmatprep.subr.bf16.mxu0 %v7589_v31  ;;  %v501_v30 = vld [vmem:[%s19340_s30 + $0xcf8] sm:$0xff]  ;;  %v7607_v31 = vpack.c.bf16 %v226_v41, %v218_v24  ;;  %v7799_v33 = vpack.c.bf16 %v484_v26, %v476_v48  ;;  %v7609_v34 = vpack.c.bf16 %v243_v28, %v235_v27  ;;  %v234_v35 = vld [vmem:[%s19340_s30 + $0x4a0] sm:$0xff]  ;;  %v492_v38 = vld [vmem:[%s19340_s30 + $0xcb0] sm:$0xff] }
 0x105   :  { %7782 = vmatprep.subr.bf16.mxu1 %v7781_v36  ;;  %v242_v36 = vld [vmem:[%s19340_s30 + $0x4e0] sm:$0xff]  ;;  %v7801_v39 = vpack.c.bf16 %v501_v30, %v493_v29  ;;  %v500_v40 = vld [vmem:[%s19340_s30 + $0xcf0] sm:$0xff]  ;;  %v251_v42 = vld [vmem:[%s19340_s30 + $0x528] sm:$0xff] }
 0x106   :  { %v259_v43 = vld [vmem:[%s19340_s30 + $0x568] sm:$0xff]  ;;  %v7803_v47 = vpack.c.bf16 %v500_v40, %v492_v38  ;;  %v250_v50 = vld [vmem:[%s19340_s30 + $0x520] sm:$0xff]  ;;  %v508_v52 = vld [vmem:[%s19340_s30 + $0xd30] sm:$0xff] }
 0x107   :  { %7592 = vmatpush1.bf16.msra.mxu0 %v7591_v44  ;;  %v509_v44 = vld [vmem:[%s19340_s30 + $0xd38] sm:$0xff]  ;;  %v7613_v49 = vpack.c.bf16 %v259_v43, %v251_v42  ;;  %v516_v54 = vld [vmem:[%s19340_s30 + $0xd70] sm:$0xff]  ;;  %v267_v55 = vld [vmem:[%s19340_s30 + $0x5a8] sm:$0xff] }
 0x108   :  { %7784 = vmatpush1.bf16.msra.mxu1 %v7783_v45  ;;  %7594 = vmatprep.subr.bf16.mxu0 %v7593_v46  ;;  %v517_v45 = vld [vmem:[%s19340_s30 + $0xd78] sm:$0xff]  ;;  %v7611_v46 = vpack.c.bf16 %v242_v36, %v234_v35  ;;  %v275_v56 = vld [vmem:[%s19340_s30 + $0x5e8] sm:$0xff]  ;;  %v7807_v60 = vpack.c.bf16 %v516_v54, %v508_v52  ;;  %v266_v32 = vld [vmem:[%s19340_s30 + $0x5a0] sm:$0xff] }
 0x109   :  { %7786 = vmatprep.subr.bf16.mxu1 %v7785_v51  ;;  %v258_v51 = vld [vmem:[%s19340_s30 + $0x560] sm:$0xff]  ;;  %v7805_v53 = vpack.c.bf16 %v517_v45, %v509_v44  ;;  %v7617_v61 = vpack.c.bf16 %v275_v56, %v267_v55  ;;  %v524_v63 = vld [vmem:[%s19340_s30 + $0xdb0] sm:$0xff]  ;;  %v283_v2 = vld [vmem:[%s19340_s30 + $0x628] sm:$0xff] }
 0x10a   :  { %v532_v1 = vld [vmem:[%s19340_s30 + $0xdf0] sm:$0xff]  ;;  %v291_v4 = vld [vmem:[%s19340_s30 + $0x668] sm:$0xff]  ;;  %v282_v12 = vld [vmem:[%s19340_s30 + $0x620] sm:$0xff] }
 0x10b   :  { %7596 = vmatpush1.bf16.msra.mxu0 %v7595_v57  ;;  %v525_v57 = vld [vmem:[%s19340_s30 + $0xdb8] sm:$0xff]  ;;  %v7811_v9 = vpack.c.bf16 %v532_v1, %v524_v63  ;;  %v7621_v11 = vpack.c.bf16 %v291_v4, %v283_v2  ;;  %v540_v14 = vld [vmem:[%s19340_s30 + $0xe30] sm:$0xff]  ;;  %v299_v17 = vld [vmem:[%s19340_s30 + $0x6a8] sm:$0xff] }
 0x10c   :  { %7788 = vmatpush1.bf16.msra.mxu1 %v7787_v58  ;;  %7598 = vmatprep.subr.bf16.mxu0 %v7597_v59  ;;  %v533_v58 = vld [vmem:[%s19340_s30 + $0xdf8] sm:$0xff]  ;;  %v7615_v59 = vpack.c.bf16 %v258_v51, %v250_v50  ;;  %v548_v16 = vld [vmem:[%s19340_s30 + $0xe70] sm:$0xff]  ;;  %v307_v19 = vld [vmem:[%s19340_s30 + $0x6e8] sm:$0xff] }
 0x10d   :  { %7790 = vmatprep.subr.bf16.mxu1 %v7789_v62  ;;  %v274_v62 = vld [vmem:[%s19340_s30 + $0x5e0] sm:$0xff]  ;;  %v7809_v0 = vpack.c.bf16 %v533_v58, %v525_v57  ;;  %v7815_v24 = vpack.c.bf16 %v548_v16, %v540_v14  ;;  %v7625_v41 = vpack.c.bf16 %v307_v19, %v299_v17  ;;  %v556_v26 = vld [vmem:[%s19340_s30 + $0xeb0] sm:$0xff]  ;;  %v315_v29 = vld [vmem:[%s19340_s30 + $0x728] sm:$0xff] }
 0x10e   :  { %v298_v48 = vld [vmem:[%s19340_s30 + $0x6a0] sm:$0xff]  ;;  %v564_v28 = vld [vmem:[%s19340_s30 + $0xef0] sm:$0xff]  ;;  %v323_v30 = vld [vmem:[%s19340_s30 + $0x768] sm:$0xff] }
 0x10f   :  { %7600 = vmatpush1.bf16.msra.mxu0 %v7599_v5  ;;  %v541_v5 = vld [vmem:[%s19340_s30 + $0xe38] sm:$0xff]  ;;  %v7819_v35 = vpack.c.bf16 %v564_v28, %v556_v26  ;;  %v7629_v36 = vpack.c.bf16 %v323_v30, %v315_v29  ;;  %v314_v38 = vld [vmem:[%s19340_s30 + $0x720] sm:$0xff]  ;;  %v572_v40 = vld [vmem:[%s19340_s30 + $0xf30] sm:$0xff] }
 0x110   :  { %7792 = vmatpush1.bf16.msra.mxu1 %v7791_v6  ;;  %7602 = vmatprep.subr.bf16.mxu0 %v7601_v8  ;;  %v549_v6 = vld [vmem:[%s19340_s30 + $0xe78] sm:$0xff]  ;;  %v7619_v8 = vpack.c.bf16 %v274_v62, %v266_v32  ;;  %v580_v44 = vld [vmem:[%s19340_s30 + $0xf70] sm:$0xff]  ;;  %v331_v45 = vld [vmem:[%s19340_s30 + $0x7a8] sm:$0xff] }
 0x111   :  { %7794 = vmatprep.subr.bf16.mxu1 %v7793_v13  ;;  %v290_v13 = vld [vmem:[%s19340_s30 + $0x660] sm:$0xff]  ;;  %v7813_v15 = vpack.c.bf16 %v549_v6, %v541_v5  ;;  %v597_v50 = vld [vmem:[%s19340_s30 + $0xff8] sm:$0xff]  ;;  %v7823_v52 = vpack.c.bf16 %v580_v44, %v572_v40  ;;  %v588_v56 = vld [vmem:[%s19340_s30 + $0xfb0] sm:$0xff] }
 0x112   :  { %v330_v54 = vld [vmem:[%s19340_s30 + $0x7a0] sm:$0xff]  ;;  %v596_v58 = vld [vmem:[%s19340_s30 + $0xff0] sm:$0xff]  ;;  %v2177_v32 = vld [vmem:[%s19343_s4 + $0x38] sm:$0xff] }
 0x113   :  { %7604 = vmatpush1.bf16.msra.mxu0 %v7603_v20  ;;  %v557_v20 = vld [vmem:[%s19340_s30 + $0xeb8] sm:$0xff]  ;;  %v338_v55 = vld [vmem:[%s19340_s30 + $0x7e0] sm:$0xff]  ;;  %v7827_v63 = vpack.c.bf16 %v596_v58, %v588_v56  ;;  %v363_v4 = vld [vmem:[%s19340_s30 + $0x8a8] sm:$0xff] }
 0x114   :  { %7796 = vmatpush1.bf16.msra.mxu1 %v7795_v21  ;;  %7606 = vmatprep.subr.bf16.mxu0 %v7605_v22  ;;  %v565_v21 = vld [vmem:[%s19340_s30 + $0xef8] sm:$0xff]  ;;  %v7623_v22 = vpack.c.bf16 %v290_v13, %v282_v12  ;;  %v7635_v62 = vpack.c.bf16 %v338_v55, %v330_v54  ;;  %v346_v1 = vld [vmem:[%s19340_s30 + $0x820] sm:$0xff]  ;;  %v371_v5 = vld [vmem:[%s19340_s30 + $0x8e8] sm:$0xff] }
 0x115   :  { %7798 = vmatprep.subr.bf16.mxu1 %v7797_v25  ;;  %v306_v25 = vld [vmem:[%s19340_s30 + $0x6e0] sm:$0xff]  ;;  %v7817_v27 = vpack.c.bf16 %v565_v21, %v557_v20  ;;  %v2185_v12 = vld [vmem:[%s19343_s4 + $0x78] sm:$0xff]  ;;  %v7641_v14 = vpack.c.bf16 %v371_v5, %v363_v4  ;;  %v379_v17 = vld [vmem:[%s19340_s30 + $0x928] sm:$0xff] }
 0x116   :  { %v354_v2 = vld [vmem:[%s19340_s30 + $0x860] sm:$0xff]  ;;  %v387_v20 = vld [vmem:[%s19340_s30 + $0x968] sm:$0xff] }
 0x117   :  { %7608 = vmatpush1.bf16.msra.mxu0 %v7607_v31  ;;  %v573_v31 = vld [vmem:[%s19340_s30 + $0xf38] sm:$0xff]  ;;  %v7639_v13 = vpack.c.bf16 %v354_v2, %v346_v1  ;;  %v370_v16 = vld [vmem:[%s19340_s30 + $0x8e0] sm:$0xff]  ;;  %v7645_v26 = vpack.c.bf16 %v387_v20, %v379_v17  ;;  %v395_v28 = vld [vmem:[%s19340_s30 + $0x9a8] sm:$0xff] }
 0x118   :  { %7800 = vmatpush1.bf16.msra.mxu1 %v7799_v33  ;;  %7610 = vmatprep.subr.bf16.mxu0 %v7609_v34  ;;  %v581_v33 = vld [vmem:[%s19340_s30 + $0xf78] sm:$0xff]  ;;  %v7627_v34 = vpack.c.bf16 %v306_v25, %v298_v48  ;;  %v403_v30 = vld [vmem:[%s19340_s30 + $0x9e8] sm:$0xff]  ;;  %v402_v40 = vld [vmem:[%s19340_s30 + $0x9e0] sm:$0xff] }
 0x119   :  { %7802 = vmatprep.subr.bf16.mxu1 %v7801_v39  ;;  %v322_v39 = vld [vmem:[%s19340_s30 + $0x760] sm:$0xff]  ;;  %v7821_v43 = vpack.c.bf16 %v581_v33, %v573_v31  ;;  %v2193_v48 = vld [vmem:[%s19343_s4 + $0xb8] sm:$0xff]  ;;  %v2188_v33 = vld [vmem:[%s19343_s4 + $0x90] sm:$0xff] }
 0x11a   :  { %v7631_v51 = vpack.c.bf16 %v322_v39, %v314_v38  ;;  %v7649_v38 = vpack.c.bf16 %v403_v30, %v395_v28  ;;  %v394_v39 = vld [vmem:[%s19340_s30 + $0x9a0] sm:$0xff]  ;;  %v443_v5 = vld [vmem:[%s19340_s30 + $0xb28] sm:$0xff] }
 0x11b   :  { %7612 = vmatpush1.bf16.msra.mxu0 %v7611_v46  ;;  %v339_v46 = vld [vmem:[%s19340_s30 + $0x7e8] sm:$0xff]  ;;  %v410_v55 = vld [vmem:[%s19340_s30 + $0xa20] sm:$0xff] }
 0x11c   :  { %7804 = vmatpush1.bf16.msra.mxu1 %v7803_v47  ;;  %7614 = vmatprep.subr.bf16.mxu0 %v7613_v49  ;;  %v589_v49 = vld [vmem:[%s19340_s30 + $0xfb8] sm:$0xff]  ;;  %v418_v56 = vld [vmem:[%s19340_s30 + $0xa60] sm:$0xff]  ;;  %v459_v20 = vld [vmem:[%s19340_s30 + $0xba8] sm:$0xff] }
 0x11d   :  { %7806 = vmatprep.subr.bf16.mxu1 %v7805_v53  ;;  %v7633_v53 = vpack.c.bf16 %v339_v46, %v331_v45  ;;  %v7825_v57 = vpack.c.bf16 %v597_v50, %v589_v49  ;;  %v419_v45 = vld [vmem:[%s19340_s30 + $0xa68] sm:$0xff]  ;;  %v2196_v49 = vld [vmem:[%s19343_s4 + $0xd0] sm:$0xff]  ;;  %v426_v2 = vld [vmem:[%s19340_s30 + $0xaa0] sm:$0xff] }
 0x11e   :  { %v2200_v50 = vld [vmem:[%s19343_s4 + $0xf0] sm:$0xff]  ;;  %v434_v4 = vld [vmem:[%s19340_s30 + $0xae0] sm:$0xff]  ;;  %v475_v30 = vld [vmem:[%s19340_s30 + $0xc28] sm:$0xff] }
 0x11f   :  { %7616 = vmatpush1.bf16.msra.mxu0 %v7615_v59  ;;  %v347_v59 = vld [vmem:[%s19340_s30 + $0x828] sm:$0xff]  ;;  %v7875_v58 = vpack.c.bf16 %v2200_v50, %v2196_v49  ;;  %v442_v17 = vld [vmem:[%s19340_s30 + $0xb20] sm:$0xff] }
 0x120   :  { %7808 = vmatpush1.bf16.msra.mxu1 %v7807_v60  ;;  %7618 = vmatprep.subr.bf16.mxu0 %v7617_v61  ;;  %v355_v60 = vld [vmem:[%s19340_s30 + $0x868] sm:$0xff]  ;;  %v2173_v61 = vld [vmem:[%s19343_s4 + $0x18] sm:$0xff]  ;;  %v458_v28 = vld [vmem:[%s19340_s30 + $0xba0] sm:$0xff] }
 0x121   :  { %7810 = vmatprep.subr.bf16.mxu1 %v7809_v0  ;;  %v7637_v0 = vpack.c.bf16 %v355_v60, %v347_v59  ;;  %v7861_v6 = vpack.c.bf16 %v2177_v32, %v2173_v61  ;;  %v435_v59 = vld [vmem:[%s19340_s30 + $0xae8] sm:$0xff]  ;;  %v2204_v61 = vld [vmem:[%s19343_s4 + $0x110] sm:$0xff] }
 0x122   :  { %v2208_v32 = vld [vmem:[%s19343_s4 + $0x130] sm:$0xff]  ;;  %v499_v49 = vld [vmem:[%s19340_s30 + $0xce8] sm:$0xff] }
 0x123   :  { %7620 = vmatpush1.bf16.msra.mxu0 %v7619_v8  ;;  %v2172_v8 = vld [vmem:[%s19343_s4 + $0x10] sm:$0xff] }
 0x124   :  { %7812 = vmatpush1.bf16.msra.mxu1 %v7811_v9  ;;  %7622 = vmatprep.subr.bf16.mxu0 %v7621_v11  ;;  %v2176_v9 = vld [vmem:[%s19343_s4 + $0x30] sm:$0xff]  ;;  %v2181_v11 = vld [vmem:[%s19343_s4 + $0x58] sm:$0xff] }
 0x125   :  { %7814 = vmatprep.subr.bf16.mxu1 %v7813_v15  ;;  %v362_v15 = vld [vmem:[%s19340_s30 + $0x8a0] sm:$0xff]  ;;  %v7863_v19 = vpack.c.bf16 %v2176_v9, %v2172_v8  ;;  %v7865_v21 = vpack.c.bf16 %v2185_v12, %v2181_v11  ;;  %v451_v8 = vld [vmem:[%s19340_s30 + $0xb68] sm:$0xff]  ;;  %v2212_v11 = vld [vmem:[%s19343_s4 + $0x150] sm:$0xff] }
 0x126   :  { %v7643_v25 = vpack.c.bf16 %v370_v16, %v362_v15  ;;  %v2216_v12 = vld [vmem:[%s19343_s4 + $0x170] sm:$0xff]  ;;  %v7659_v15 = vpack.c.bf16 %v434_v4, %v426_v2  ;;  %v7661_v16 = vpack.c.bf16 %v451_v8, %v443_v5  ;;  %v12379_v4 = vld [vmem:[%s19341_s28] sm:$0x3] }
 0x127   :  { %7624 = vmatpush1.bf16.msra.mxu0 %v7623_v22  ;;  %v2180_v22 = vld [vmem:[%s19343_s4 + $0x50] sm:$0xff]  ;;  %v514_v8 = vld [vmem:[%s19340_s30 + $0xd60] sm:$0xff] }
 0x128   :  { %7816 = vmatpush1.bf16.msra.mxu1 %v7815_v24  ;;  %7626 = vmatprep.subr.bf16.mxu0 %v7625_v41  ;;  %v2184_v24 = vld [vmem:[%s19343_s4 + $0x70] sm:$0xff]  ;;  %v2189_v41 = vld [vmem:[%s19343_s4 + $0x98] sm:$0xff] }
 0x129   :  { %v12089_v42 = vpop.f32.mrb[2].mxu0  ;;  %7818 = vmatprep.subr.bf16.mxu1 %v7817_v27  ;;  %v378_v27 = vld [vmem:[%s19340_s30 + $0x920] sm:$0xff]  ;;  %v7867_v29 = vpack.c.bf16 %v2184_v24, %v2180_v22  ;;  %v7869_v31 = vpack.c.bf16 %v2193_v48, %v2189_v41  ;;  %v467_v22 = vld [vmem:[%s19340_s30 + $0xbe8] sm:$0xff]  ;;  %v2220_v41 = vld [vmem:[%s19343_s4 + $0x190] sm:$0xff] }
 0x12a   :  { %v12100_v47 = vpop.f32.mrb[3].mxu0  ;;  %v2224_v48 = vld [vmem:[%s19343_s4 + $0x1b0] sm:$0xff] }
 0x12b   :  { %7628 = vmatpush1.bf16.msra.mxu0 %v7627_v34  ;;  %v2192_v34 = vld [vmem:[%s19343_s4 + $0xb0] sm:$0xff] }
 0x12c   :  { %7820 = vmatpush1.bf16.msra.mxu1 %v7819_v35  ;;  %7630 = vmatprep.subr.bf16.mxu0 %v7629_v36  ;;  %v2197_v35 = vld [vmem:[%s19343_s4 + $0xd8] sm:$0xff]  ;;  %v7871_v44 = vpack.c.bf16 %v2192_v34, %v2188_v33  ;;  %v483_v33 = vld [vmem:[%s19340_s30 + $0xc68] sm:$0xff] }
 0x12d   :  { %7822 = vmatprep.subr.bf16.mxu1 %v7821_v43  ;;  %v2201_v36 = vld [vmem:[%s19343_s4 + $0xf8] sm:$0xff]  ;;  %v411_v43 = vld [vmem:[%s19340_s30 + $0xa28] sm:$0xff] }
 0x12e   :  { %v7873_v46 = vpack.c.bf16 %v2201_v36, %v2197_v35  ;;  %v7653_v54 = vpack.c.bf16 %v419_v45, %v411_v43  ;;  %v2228_v35 = vld [vmem:[%s19343_s4 + $0x1d0] sm:$0xff]  ;;  %v474_v43 = vld [vmem:[%s19340_s30 + $0xc20] sm:$0xff]  ;;  %v491_v45 = vld [vmem:[%s19340_s30 + $0xca8] sm:$0xff] }
 0x12f   :  { %7632 = vmatpush1.bf16.msra.mxu0 %v7631_v51  ;;  %v2205_v51 = vld [vmem:[%s19343_s4 + $0x118] sm:$0xff]  ;;  %v2232_v36 = vld [vmem:[%s19343_s4 + $0x1f0] sm:$0xff] }
 0x130   :  { %7824 = vmatpush1.bf16.msra.mxu1 %v7823_v52  ;;  %7634 = vmatprep.subr.bf16.mxu0 %v7633_v53  ;;  %v2209_v52 = vld [vmem:[%s19343_s4 + $0x138] sm:$0xff]  ;;  %v7651_v53 = vpack.c.bf16 %v402_v40, %v394_v39  ;;  %v7669_v40 = vpack.c.bf16 %v483_v33, %v475_v30  ;;  %v546_v33 = vld [vmem:[%s19340_s30 + $0xe60] sm:$0xff] }
 0x131   :  { %7826 = vmatprep.subr.bf16.mxu1 %v7825_v57  ;;  %v427_v57 = vld [vmem:[%s19340_s30 + $0xaa8] sm:$0xff]  ;;  %v7877_v60 = vpack.c.bf16 %v2209_v52, %v2205_v51  ;;  %v1660_v51 = vld [vmem:[%s19344_s27 + $0x10] sm:$0xff] }
 0x132   :  { %v7657_v1 = vpack.c.bf16 %v435_v59, %v427_v57  ;;  %v1664_v52 = vld [vmem:[%s19344_s27 + $0x30] sm:$0xff]  ;;  %v490_v57 = vld [vmem:[%s19340_s30 + $0xca0] sm:$0xff]  ;;  %v507_v59 = vld [vmem:[%s19340_s30 + $0xd28] sm:$0xff] }
 0x133   :  { %7636 = vmatpush1.bf16.msra.mxu0 %v7635_v62  ;;  %v2213_v62 = vld [vmem:[%s19343_s4 + $0x158] sm:$0xff] }
 0x134   :  { %7828 = vmatpush1.bf16.msra.mxu1 %v7827_v63  ;;  %7638 = vmatprep.subr.bf16.mxu0 %v7637_v0  ;;  %v2217_v63 = vld [vmem:[%s19343_s4 + $0x178] sm:$0xff]  ;;  %v7655_v0 = vpack.c.bf16 %v418_v56, %v410_v55  ;;  %v7673_v56 = vpack.c.bf16 %v499_v49, %v491_v45  ;;  %v562_v49 = vld [vmem:[%s19340_s30 + $0xee0] sm:$0xff] }
 0x135   :  { %7862 = vmatprep.subr.bf16.mxu1 %v7861_v6  ;;  %v7879_v6 = vpack.c.bf16 %v2208_v32, %v2204_v61  ;;  %v7881_v9 = vpack.c.bf16 %v2217_v63, %v2213_v62  ;;  %v515_v61 = vld [vmem:[%s19340_s30 + $0xd68] sm:$0xff]  ;;  %v1668_v62 = vld [vmem:[%s19344_s27 + $0x50] sm:$0xff] }
 0x136   :  { %1381 = vmatmul.mubr.f32.vlgmr.msra.gmra.mrb[4].mxu0 %v10796_v37  ;;  %v386_v37 = vld [vmem:[%s19340_s30 + $0x960] sm:$0xff]  ;;  %v1672_v63 = vld [vmem:[%s19344_s27 + $0x70] sm:$0xff]  ;;  %v7677_v5 = vpack.c.bf16 %v515_v61, %v507_v59 }
 0x137   :  { %1594 = vmatmul.mubr.f32.vlgmr.msra.gmra.mrb[0].mxu1 %v10976_v3  ;;  %7640 = vmatpush1.bf16.msra.mxu0 %v7639_v13  ;;  %v2221_v13 = vld [vmem:[%s19343_s4 + $0x198] sm:$0xff]  ;;  %v578_v61 = vld [vmem:[%s19340_s30 + $0xf60] sm:$0xff] }
 0x138   :  { %7642 = vmatprep.subr.bf16.mxu0 %v7641_v14  ;;  %7864 = vmatpush1.bf16.msra.mxu1 %v7863_v19  ;;  %v2225_v14 = vld [vmem:[%s19343_s4 + $0x1b8] sm:$0xff]  ;;  %v450_v19 = vld [vmem:[%s19340_s30 + $0xb60] sm:$0xff] }
 0x139   :  { %7866 = vmatprep.subr.bf16.mxu1 %v7865_v21  ;;  %1451 = vmatprep.mubr.f32.mxu0 %v11004_v18  ;;  %v7647_v18 = vpack.c.bf16 %v386_v37, %v378_v27  ;;  %v7883_v21 = vpack.c.bf16 %v2216_v12, %v2212_v11  ;;  %v7885_v24 = vpack.c.bf16 %v2225_v14, %v2221_v13  ;;  %v531_v12 = vld [vmem:[%s19340_s30 + $0xde8] sm:$0xff]  ;;  %v1676_v14 = vld [vmem:[%s19344_s27 + $0x90] sm:$0xff] }
 0x13a   :  { %2369 = vmatprep.mubr.f32.mxu1 %v10195_v7  ;;  %v7663_v27 = vpack.c.bf16 %v450_v19, %v442_v17  ;;  %v7665_v37 = vpack.c.bf16 %v467_v22, %v459_v20  ;;  %v8155_v11 = vpack.c.bf16 %v1672_v63, %v1668_v62  ;;  %v1689_v17 = vld [vmem:[%s19344_s27 + $0xf8] sm:$0xff]  ;;  %v530_v22 = vld [vmem:[%s19340_s30 + $0xde0] sm:$0xff]  ;;  %v595_v63 = vld [vmem:[%s19340_s30 + $0xfe8] sm:$0xff] }
 0x13b   :  { %7644 = vmatpush1.bf16.msra.mxu0 %v7643_v25  ;;  %v2229_v25 = vld [vmem:[%s19343_s4 + $0x1d8] sm:$0xff] }
 0x13c   :  { %7646 = vmatprep.subr.bf16.mxu0 %v7645_v26  ;;  %7868 = vmatpush1.bf16.msra.mxu1 %v7867_v29  ;;  %v2233_v26 = vld [vmem:[%s19343_s4 + $0x1f8] sm:$0xff]  ;;  %v466_v29 = vld [vmem:[%s19340_s30 + $0xbe0] sm:$0xff] }
 0x13d   :  { %7870 = vmatprep.subr.bf16.mxu1 %v7869_v31  ;;  %v7887_v31 = vpack.c.bf16 %v2224_v48, %v2220_v41  ;;  %v7889_v34 = vpack.c.bf16 %v2233_v26, %v2229_v25  ;;  %v7667_v39 = vpack.c.bf16 %v466_v29, %v458_v28  ;;  %v547_v48 = vld [vmem:[%s19340_s30 + $0xe68] sm:$0xff]  ;;  %v1684_v26 = vld [vmem:[%s19344_s27 + $0xd0] sm:$0xff]  ;;  %v1697_v28 = vld [vmem:[%s19344_s27 + $0x138] sm:$0xff] }
 0x13f   :  { %7648 = vmatpush1.bf16.msra.mxu0 %v7647_v18  ;;  %v1661_v18 = vld [vmem:[%s19344_s27 + $0x18] sm:$0xff] }
 0x140   :  { %7650 = vmatprep.subr.bf16.mxu0 %v7649_v38  ;;  %7872 = vmatpush1.bf16.msra.mxu1 %v7871_v44  ;;  %v1665_v38 = vld [vmem:[%s19344_s27 + $0x38] sm:$0xff]  ;;  %v482_v44 = vld [vmem:[%s19340_s30 + $0xc60] sm:$0xff] }
 0x141   :  { %7874 = vmatprep.subr.bf16.mxu1 %v7873_v46  ;;  %v7891_v46 = vpack.c.bf16 %v2232_v36, %v2228_v35  ;;  %v8149_v50 = vpack.c.bf16 %v1665_v38, %v1661_v18  ;;  %v7671_v55 = vpack.c.bf16 %v482_v44, %v474_v43  ;;  %v563_v36 = vld [vmem:[%s19340_s30 + $0xee8] sm:$0xff]  ;;  %v1692_v38 = vld [vmem:[%s19344_s27 + $0x110] sm:$0xff]  ;;  %v1705_v43 = vld [vmem:[%s19344_s27 + $0x178] sm:$0xff] }
 0x143   :  { %7652 = vmatpush1.bf16.msra.mxu0 %v7651_v53  ;;  %v1669_v53 = vld [vmem:[%s19344_s27 + $0x58] sm:$0xff] }
 0x144   :  { %7654 = vmatprep.subr.bf16.mxu0 %v7653_v54  ;;  %7876 = vmatpush1.bf16.msra.mxu1 %v7875_v58  ;;  %v1673_v54 = vld [vmem:[%s19344_s27 + $0x78] sm:$0xff]  ;;  %v498_v58 = vld [vmem:[%s19340_s30 + $0xce0] sm:$0xff] }
 0x145   :  { %7878 = vmatprep.subr.bf16.mxu1 %v7877_v60  ;;  %v8151_v60 = vpack.c.bf16 %v1664_v52, %v1660_v51  ;;  %v8153_v32 = vpack.c.bf16 %v1673_v54, %v1669_v53  ;;  %v7675_v2 = vpack.c.bf16 %v498_v58, %v490_v57  ;;  %v579_v52 = vld [vmem:[%s19340_s30 + $0xf68] sm:$0xff]  ;;  %v1700_v54 = vld [vmem:[%s19344_s27 + $0x150] sm:$0xff]  ;;  %v1713_v57 = vld [vmem:[%s19344_s27 + $0x1b8] sm:$0xff] }
 0x147   :  { %7656 = vmatpush1.bf16.msra.mxu0 %v7655_v0  ;;  %v1677_v0 = vld [vmem:[%s19344_s27 + $0x98] sm:$0xff] }
 0x148   :  { %7658 = vmatprep.subr.bf16.mxu0 %v7657_v1  ;;  %7880 = vmatpush1.bf16.msra.mxu1 %v7879_v6  ;;  %v1681_v1 = vld [vmem:[%s19344_s27 + $0xb8] sm:$0xff]  ;;  %v506_v6 = vld [vmem:[%s19340_s30 + $0xd20] sm:$0xff] }
 0x149   :  { %7882 = vmatprep.subr.bf16.mxu1 %v7881_v9  ;;  %v523_v9 = vld [vmem:[%s19340_s30 + $0xda8] sm:$0xff]  ;;  %v8157_v13 = vpack.c.bf16 %v1681_v1, %v1677_v0  ;;  %v7679_v19 = vpack.c.bf16 %v514_v8, %v506_v6  ;;  %v1708_v1 = vld [vmem:[%s19344_s27 + $0x190] sm:$0xff]  ;;  %v1721_v6 = vld [vmem:[%s19344_s27 + $0x1f8] sm:$0xff] }
 0x14a   :  { %v7681_v20 = vpack.c.bf16 %v531_v12, %v523_v9  ;;  %v594_v12 = vld [vmem:[%s19340_s30 + $0xfe0] sm:$0xff] }
 0x14b   :  { %7660 = vmatpush1.bf16.msra.mxu0 %v7659_v15  ;;  %v1680_v15 = vld [vmem:[%s19344_s27 + $0xb0] sm:$0xff] }
 0x14c   :  { %7662 = vmatprep.subr.bf16.mxu0 %v7661_v16  ;;  %7884 = vmatpush1.bf16.msra.mxu1 %v7883_v21  ;;  %v1685_v16 = vld [vmem:[%s19344_s27 + $0xd8] sm:$0xff]  ;;  %v522_v21 = vld [vmem:[%s19340_s30 + $0xda0] sm:$0xff]  ;;  %v8159_v41 = vpack.c.bf16 %v1680_v15, %v1676_v14  ;;  %v2175_v15 = vld [vmem:[%s19343_s4 + $0x28] sm:$0xff] }
 0x14d   :  { %7886 = vmatprep.subr.bf16.mxu1 %v7885_v24  ;;  %v539_v24 = vld [vmem:[%s19340_s30 + $0xe28] sm:$0xff]  ;;  %v8161_v25 = vpack.c.bf16 %v1689_v17, %v1685_v16  ;;  %v7683_v29 = vpack.c.bf16 %v530_v22, %v522_v21  ;;  %v1716_v17 = vld [vmem:[%s19344_s27 + $0x1d0] sm:$0xff]  ;;  %v1729_v21 = vld [vmem:[%s19344_s27 + $0x238] sm:$0xff] }
 0x14e   :  { %v7685_v30 = vpack.c.bf16 %v547_v48, %v539_v24  ;;  %v2174_v48 = vld [vmem:[%s19343_s4 + $0x20] sm:$0xff] }
 0x14f   :  { %7664 = vmatpush1.bf16.msra.mxu0 %v7663_v27  ;;  %v1688_v27 = vld [vmem:[%s19344_s27 + $0xf0] sm:$0xff] }
 0x150   :  { %7666 = vmatprep.subr.bf16.mxu0 %v7665_v37  ;;  %7888 = vmatpush1.bf16.msra.mxu1 %v7887_v31  ;;  %v1693_v37 = vld [vmem:[%s19344_s27 + $0x118] sm:$0xff]  ;;  %v538_v31 = vld [vmem:[%s19340_s30 + $0xe20] sm:$0xff]  ;;  %v8163_v35 = vpack.c.bf16 %v1688_v27, %v1684_v26  ;;  %v2183_v27 = vld [vmem:[%s19343_s4 + $0x68] sm:$0xff] }
 0x151   :  { %7890 = vmatprep.subr.bf16.mxu1 %v7889_v34  ;;  %v555_v34 = vld [vmem:[%s19340_s30 + $0xea8] sm:$0xff]  ;;  %v8165_v18 = vpack.c.bf16 %v1697_v28, %v1693_v37  ;;  %v7687_v44 = vpack.c.bf16 %v546_v33, %v538_v31  ;;  %v1724_v28 = vld [vmem:[%s19344_s27 + $0x210] sm:$0xff]  ;;  %v1737_v31 = vld [vmem:[%s19344_s27 + $0x278] sm:$0xff] }
 0x152   :  { %v7689_v45 = vpack.c.bf16 %v563_v36, %v555_v34  ;;  %v2182_v36 = vld [vmem:[%s19343_s4 + $0x60] sm:$0xff] }
 0x153   :  { %7668 = vmatpush1.bf16.msra.mxu0 %v7667_v39  ;;  %v1696_v39 = vld [vmem:[%s19344_s27 + $0x130] sm:$0xff] }
 0x154   :  { %7670 = vmatprep.subr.bf16.mxu0 %v7669_v40  ;;  %7892 = vmatpush1.bf16.msra.mxu1 %v7891_v46  ;;  %v1701_v40 = vld [vmem:[%s19344_s27 + $0x158] sm:$0xff]  ;;  %v554_v46 = vld [vmem:[%s19340_s30 + $0xea0] sm:$0xff]  ;;  %v8167_v51 = vpack.c.bf16 %v1696_v39, %v1692_v38  ;;  %v2191_v39 = vld [vmem:[%s19343_s4 + $0xa8] sm:$0xff] }
 0x155   :  { %8150 = vmatprep.subr.bf16.mxu1 %v8149_v50  ;;  %v571_v50 = vld [vmem:[%s19340_s30 + $0xf28] sm:$0xff]  ;;  %v8169_v53 = vpack.c.bf16 %v1705_v43, %v1701_v40  ;;  %v7691_v58 = vpack.c.bf16 %v562_v49, %v554_v46  ;;  %v1732_v43 = vld [vmem:[%s19344_s27 + $0x250] sm:$0xff]  ;;  %v1745_v46 = vld [vmem:[%s19344_s27 + $0x2b8] sm:$0xff] }
 0x156   :  { %v7693_v59 = vpack.c.bf16 %v579_v52, %v571_v50  ;;  %v2195_v52 = vld [vmem:[%s19343_s4 + $0xc8] sm:$0xff] }
 0x157   :  { %7672 = vmatpush1.bf16.msra.mxu0 %v7671_v55  ;;  %2370 = vmatmul.mubr.f32.vlgmr.msra.gmra.mrb[4].mxu1 %v12379_v4  ;;  %v1704_v55 = vld [vmem:[%s19344_s27 + $0x170] sm:$0xff] }
 0x158   :  { %7674 = vmatprep.subr.bf16.mxu0 %v7673_v56  ;;  %8152 = vmatpush1.bf16.msra.mxu1 %v8151_v60  ;;  %v1709_v56 = vld [vmem:[%s19344_s27 + $0x198] sm:$0xff]  ;;  %v570_v60 = vld [vmem:[%s19340_s30 + $0xf20] sm:$0xff]  ;;  %v8171_v62 = vpack.c.bf16 %v1704_v55, %v1700_v54  ;;  %v2199_v54 = vld [vmem:[%s19343_s4 + $0xe8] sm:$0xff] }
 0x159   :  { %8154 = vmatprep.subr.bf16.mxu1 %v8153_v32  ;;  %v587_v32 = vld [vmem:[%s19340_s30 + $0xfa8] sm:$0xff]  ;;  %v8173_v0 = vpack.c.bf16 %v1713_v57, %v1709_v56  ;;  %v7695_v8 = vpack.c.bf16 %v578_v61, %v570_v60  ;;  %v1740_v56 = vld [vmem:[%s19344_s27 + $0x290] sm:$0xff]  ;;  %v7841_v61 = vpack.c.bf16 %v2199_v54, %v2195_v52 }
 0x15a   :  { %v7697_v9 = vpack.c.bf16 %v595_v63, %v587_v32  ;;  %v1744_v57 = vld [vmem:[%s19344_s27 + $0x2b0] sm:$0xff]  ;;  %v2194_v32 = vld [vmem:[%s19343_s4 + $0xc0] sm:$0xff]  ;;  %v2203_v63 = vld [vmem:[%s19343_s4 + $0x108] sm:$0xff] }
 0x15b   :  { %7676 = vmatpush1.bf16.msra.mxu0 %v7675_v2  ;;  %v1712_v2 = vld [vmem:[%s19344_s27 + $0x1b0] sm:$0xff] }
 0x15c   :  { %7678 = vmatprep.subr.bf16.mxu0 %v7677_v5  ;;  %8156 = vmatpush1.bf16.msra.mxu1 %v8155_v11  ;;  %v1717_v5 = vld [vmem:[%s19344_s27 + $0x1d8] sm:$0xff]  ;;  %v586_v11 = vld [vmem:[%s19340_s30 + $0xfa0] sm:$0xff]  ;;  %v8175_v14 = vpack.c.bf16 %v1712_v2, %v1708_v1  ;;  %v2207_v1 = vld [vmem:[%s19343_s4 + $0x128] sm:$0xff]  ;;  %s19346_s30 = sld [smem:[#allocation17_spill]] }
 0x15d   :  { %8158 = vmatprep.subr.bf16.mxu1 %v8157_v13  ;;  %v2171_v13 = vld [vmem:[%s19343_s4 + $0x8] sm:$0xff]  ;;  %v8177_v16 = vpack.c.bf16 %v1721_v6, %v1717_v5  ;;  %v7699_v22 = vpack.c.bf16 %v594_v12, %v586_v11  ;;  %v1748_v5 = vld [vmem:[%s19344_s27 + $0x2d0] sm:$0xff]  ;;  %v7845_v12 = vpack.c.bf16 %v2207_v1, %v2203_v63  ;;  %v1658_v1 = vld [vmem:[%s19344_s27] sm:$0xff] }
 0x15e   :  { %v7829_v24 = vpack.c.bf16 %v2175_v15, %v2171_v13  ;;  %v1752_v6 = vld [vmem:[%s19344_s27 + $0x2f0] sm:$0xff]  ;;  %v2202_v13 = vld [vmem:[%s19343_s4 + $0x100] sm:$0xff]  ;;  %v2211_v15 = vld [vmem:[%s19343_s4 + $0x148] sm:$0xff] }
 0x15f   :  { %7680 = vmatpush1.bf16.msra.mxu0 %v7679_v19  ;;  %v1720_v19 = vld [vmem:[%s19344_s27 + $0x1f0] sm:$0xff] }
 0x160   :  { %7682 = vmatprep.subr.bf16.mxu0 %v7681_v20  ;;  %8160 = vmatpush1.bf16.msra.mxu1 %v8159_v41  ;;  %v1725_v20 = vld [vmem:[%s19344_s27 + $0x218] sm:$0xff]  ;;  %v2170_v41 = vld [vmem:[%s19343_s4] sm:$0xff]  ;;  %v8179_v26 = vpack.c.bf16 %v1720_v19, %v1716_v17  ;;  %v2215_v17 = vld [vmem:[%s19343_s4 + $0x168] sm:$0xff] }
 0x161   :  { %8162 = vmatprep.subr.bf16.mxu1 %v8161_v25  ;;  %v2179_v25 = vld [vmem:[%s19343_s4 + $0x48] sm:$0xff]  ;;  %v8181_v37 = vpack.c.bf16 %v1729_v21, %v1725_v20  ;;  %v7831_v33 = vpack.c.bf16 %v2174_v48, %v2170_v41  ;;  %v1756_v20 = vld [vmem:[%s19344_s27 + $0x310] sm:$0xff]  ;;  %v7849_v48 = vpack.c.bf16 %v2215_v17, %v2211_v15 }
 0x162   :  { %v7833_v34 = vpack.c.bf16 %v2183_v27, %v2179_v25  ;;  %v1760_v21 = vld [vmem:[%s19344_s27 + $0x330] sm:$0xff]  ;;  %v2210_v25 = vld [vmem:[%s19343_s4 + $0x140] sm:$0xff]  ;;  %v2219_v27 = vld [vmem:[%s19343_s4 + $0x188] sm:$0xff] }
 0x163   :  { %7684 = vmatpush1.bf16.msra.mxu0 %v7683_v29  ;;  %v1728_v29 = vld [vmem:[%s19344_s27 + $0x230] sm:$0xff]  ;;  %v1675_v15 = vld [vmem:[%s19344_s27 + $0x88] sm:$0xff] }
 0x164   :  { %7686 = vmatprep.subr.bf16.mxu0 %v7685_v30  ;;  %8164 = vmatpush1.bf16.msra.mxu1 %v8163_v35  ;;  %v1733_v30 = vld [vmem:[%s19344_s27 + $0x258] sm:$0xff]  ;;  %v2178_v35 = vld [vmem:[%s19343_s4 + $0x40] sm:$0xff]  ;;  %v8183_v38 = vpack.c.bf16 %v1728_v29, %v1724_v28  ;;  %v2223_v28 = vld [vmem:[%s19343_s4 + $0x1a8] sm:$0xff] }
 0x165   :  { %8166 = vmatprep.subr.bf16.mxu1 %v8165_v18  ;;  %v2187_v18 = vld [vmem:[%s19343_s4 + $0x88] sm:$0xff]  ;;  %v8185_v40 = vpack.c.bf16 %v1737_v31, %v1733_v30  ;;  %v7835_v49 = vpack.c.bf16 %v2182_v36, %v2178_v35  ;;  %v1764_v30 = vld [vmem:[%s19344_s27 + $0x350] sm:$0xff]  ;;  %v7853_v36 = vpack.c.bf16 %v2223_v28, %v2219_v27 }
 0x166   :  { %v7837_v50 = vpack.c.bf16 %v2191_v39, %v2187_v18  ;;  %v1768_v31 = vld [vmem:[%s19344_s27 + $0x370] sm:$0xff]  ;;  %v2218_v18 = vld [vmem:[%s19343_s4 + $0x180] sm:$0xff]  ;;  %v2227_v39 = vld [vmem:[%s19343_s4 + $0x1c8] sm:$0xff] }
 0x167   :  { %7688 = vmatpush1.bf16.msra.mxu0 %v7687_v44  ;;  %v1736_v44 = vld [vmem:[%s19344_s27 + $0x270] sm:$0xff]  ;;  %v1695_v27 = vld [vmem:[%s19344_s27 + $0x128] sm:$0xff] }
 0x168   :  { %7690 = vmatprep.subr.bf16.mxu0 %v7689_v45  ;;  %8168 = vmatpush1.bf16.msra.mxu1 %v8167_v51  ;;  %v1741_v45 = vld [vmem:[%s19344_s27 + $0x298] sm:$0xff]  ;;  %v2186_v51 = vld [vmem:[%s19343_s4 + $0x80] sm:$0xff] }
 0x169   :  { %8170 = vmatprep.subr.bf16.mxu1 %v8169_v53  ;;  %v8187_v53 = vpack.c.bf16 %v1736_v44, %v1732_v43  ;;  %v8189_v55 = vpack.c.bf16 %v1745_v46, %v1741_v45  ;;  %v2231_v43 = vld [vmem:[%s19343_s4 + $0x1e8] sm:$0xff]  ;;  %v1772_v45 = vld [vmem:[%s19344_s27 + $0x390] sm:$0xff] }
 0x16a   :  { %v1776_v46 = vld [vmem:[%s19344_s27 + $0x3b0] sm:$0xff] }
 0x16b   :  { %7692 = vmatpush1.bf16.msra.mxu0 %v7691_v58  ;;  %v1749_v58 = vld [vmem:[%s19344_s27 + $0x2d8] sm:$0xff] }
 0x16c   :  { %7694 = vmatprep.subr.bf16.mxu0 %v7693_v59  ;;  %8172 = vmatpush1.bf16.msra.mxu1 %v8171_v62  ;;  %v1753_v59 = vld [vmem:[%s19344_s27 + $0x2f8] sm:$0xff]  ;;  %v2198_v62 = vld [vmem:[%s19343_s4 + $0xe0] sm:$0xff] }
 0x16d   :  { %8174 = vmatprep.subr.bf16.mxu1 %v8173_v0  ;;  %v8191_v0 = vpack.c.bf16 %v1744_v57, %v1740_v56  ;;  %v8193_v2 = vpack.c.bf16 %v1753_v59, %v1749_v58  ;;  %v7843_v11 = vpack.c.bf16 %v2198_v62, %v2194_v32  ;;  %v2226_v56 = vld [vmem:[%s19343_s4 + $0x1c0] sm:$0xff]  ;;  %v8207_v58 = vpack.c.bf16 %v1776_v46, %v1772_v45  ;;  %v1789_v32 = vld [vmem:[%s19344_s27 + $0x418] sm:$0xff]  ;;  %v1715_v46 = vld [vmem:[%s19344_s27 + $0x1c8] sm:$0xff] }
 0x16e   :  { %v2230_v57 = vld [vmem:[%s19343_s4 + $0x1e0] sm:$0xff]  ;;  %v1793_v62 = vld [vmem:[%s19344_s27 + $0x438] sm:$0xff] }
 0x16f   :  { %7696 = vmatpush1.bf16.msra.mxu0 %v7695_v8  ;;  %v1757_v8 = vld [vmem:[%s19344_s27 + $0x318] sm:$0xff]  ;;  %v7859_v63 = vpack.c.bf16 %v2230_v57, %v2226_v56  ;;  %v1710_v45 = vld [vmem:[%s19344_s27 + $0x1a0] sm:$0xff]  ;;  %v1727_v56 = vld [vmem:[%s19344_s27 + $0x228] sm:$0xff] }
 0x170   :  { %7698 = vmatprep.subr.bf16.mxu0 %v7697_v9  ;;  %8176 = vmatpush1.bf16.msra.mxu1 %v8175_v14  ;;  %v1761_v9 = vld [vmem:[%s19344_s27 + $0x338] sm:$0xff]  ;;  %v2206_v14 = vld [vmem:[%s19343_s4 + $0x120] sm:$0xff] }
 0x171   :  { %8178 = vmatprep.subr.bf16.mxu1 %v8177_v16  ;;  %v8195_v16 = vpack.c.bf16 %v1752_v6, %v1748_v5  ;;  %v8197_v19 = vpack.c.bf16 %v1761_v9, %v1757_v8  ;;  %v7847_v41 = vpack.c.bf16 %v2206_v14, %v2202_v13  ;;  %v1667_v6 = vld [vmem:[%s19344_s27 + $0x48] sm:$0xff]  ;;  %v8213_v9 = vpack.c.bf16 %v1793_v62, %v1789_v32  ;;  %v1666_v13 = vld [vmem:[%s19344_s27 + $0x40] sm:$0xff] }
 0x172   :  { %v1671_v8 = vld [vmem:[%s19344_s27 + $0x68] sm:$0xff]  ;;  %v1670_v14 = vld [vmem:[%s19344_s27 + $0x60] sm:$0xff] }
 0x173   :  { %7700 = vmatpush1.bf16.msra.mxu0 %v7699_v22  ;;  %v1765_v22 = vld [vmem:[%s19344_s27 + $0x358] sm:$0xff]  ;;  %v7899_v17 = vpack.c.bf16 %v1670_v14, %v1666_v13  ;;  %v1730_v62 = vld [vmem:[%s19344_s27 + $0x240] sm:$0xff] }
 0x174   :  { %7830 = vmatprep.subr.bf16.mxu0 %v7829_v24  ;;  %8180 = vmatpush1.bf16.msra.mxu1 %v8179_v26  ;;  %v1769_v24 = vld [vmem:[%s19344_s27 + $0x378] sm:$0xff]  ;;  %v2214_v26 = vld [vmem:[%s19343_s4 + $0x160] sm:$0xff] }
 0x175   :  { %8182 = vmatprep.subr.bf16.mxu1 %v8181_v37  ;;  %v8199_v37 = vpack.c.bf16 %v1760_v21, %v1756_v20  ;;  %v8201_v29 = vpack.c.bf16 %v1769_v24, %v1765_v22  ;;  %v7851_v35 = vpack.c.bf16 %v2214_v26, %v2210_v25  ;;  %v1674_v20 = vld [vmem:[%s19344_s27 + $0x80] sm:$0xff]  ;;  %v1683_v22 = vld [vmem:[%s19344_s27 + $0xc8] sm:$0xff] }
 0x176   :  { %1452 = vmatmul.mubr.f32.vlgmr.msra.gmra.mrb[4].mxu0 %v10976_v3  ;;  %v2190_v3 = vld [vmem:[%s19343_s4 + $0xa0] sm:$0xff]  ;;  %v1691_v26 = vld [vmem:[%s19344_s27 + $0x108] sm:$0xff] }
 0x177   :  { %7832 = vmatpush1.bf16.msra.mxu0 %v7831_v33  ;;  %2298 = vmatprep.mubr.f32.mxu0 %v10195_v7  ;;  %v7839_v60 = vpack.c.bf16 %v2190_v3, %v2186_v51  ;;  %v1773_v33 = vld [vmem:[%s19344_s27 + $0x398] sm:$0xff]  ;;  %v1678_v21 = vld [vmem:[%s19344_s27 + $0xa0] sm:$0xff]  ;;  %v7909_v28 = vpack.c.bf16 %v1695_v27, %v1691_v26  ;;  %v12890_v26 = vsub.s32 3, %v10736_v10 }
 0x178   :  { %7834 = vmatprep.subr.bf16.mxu0 %v7833_v34  ;;  %8184 = vmatpush1.bf16.msra.mxu1 %v8183_v38  ;;  %v1777_v34 = vld [vmem:[%s19344_s27 + $0x3b8] sm:$0xff]  ;;  %v2222_v38 = vld [vmem:[%s19343_s4 + $0x1a0] sm:$0xff]  ;;  %v7903_v24 = vpack.c.bf16 %v1678_v21, %v1674_v20 }
 0x179   :  { %8186 = vmatprep.subr.bf16.mxu1 %v8185_v40  ;;  %v8203_v40 = vpack.c.bf16 %v1768_v31, %v1764_v30  ;;  %v8205_v44 = vpack.c.bf16 %v1777_v34, %v1773_v33  ;;  %v1785_v51 = vld [vmem:[%s19344_s27 + $0x3f8] sm:$0xff]  ;;  %v1686_v25 = vld [vmem:[%s19344_s27 + $0xe0] sm:$0xff]  ;;  %v1699_v31 = vld [vmem:[%s19344_s27 + $0x148] sm:$0xff] }
 0x17a   :  { %v1694_v30 = vld [vmem:[%s19344_s27 + $0x120] sm:$0xff]  ;;  %v1703_v33 = vld [vmem:[%s19344_s27 + $0x168] sm:$0xff] }
 0x17b   :  { %7836 = vmatpush1.bf16.msra.mxu0 %v7835_v49  ;;  %v1746_v14 = vld [vmem:[%s19344_s27 + $0x2c0] sm:$0xff] }
 0x17c   :  { %7838 = vmatprep.subr.bf16.mxu0 %v7837_v50  ;;  %8188 = vmatpush1.bf16.msra.mxu1 %v8187_v53  ;;  %v1781_v50 = vld [vmem:[%s19344_s27 + $0x3d8] sm:$0xff]  ;;  %v7855_v53 = vpack.c.bf16 %v2222_v38, %v2218_v18  ;;  %v1702_v18 = vld [vmem:[%s19344_s27 + $0x160] sm:$0xff]  ;;  %v1707_v38 = vld [vmem:[%s19344_s27 + $0x188] sm:$0xff] }
 0x17d   :  { %8190 = vmatprep.subr.bf16.mxu1 %v8189_v55  ;;  %v7857_v55 = vpack.c.bf16 %v2231_v43, %v2227_v39  ;;  %v8209_v59 = vpack.c.bf16 %v1785_v51, %v1781_v50  ;;  %v1711_v39 = vld [vmem:[%s19344_s27 + $0x1a8] sm:$0xff]  ;;  %v1754_v21 = vld [vmem:[%s19344_s27 + $0x300] sm:$0xff] }
 0x17e   :  { %v7917_v43 = vpack.c.bf16 %v1711_v39, %v1707_v38  ;;  %v1770_v38 = vld [vmem:[%s19344_s27 + $0x380] sm:$0xff] }
 0x17f   :  { %7840 = vmatpush1.bf16.msra.mxu0 %v7839_v60  ;;  %v1780_v60 = vld [vmem:[%s19344_s27 + $0x3d0] sm:$0xff]  ;;  %v1774_v39 = vld [vmem:[%s19344_s27 + $0x3a0] sm:$0xff] }
 0x180   :  { %7842 = vmatprep.subr.bf16.mxu0 %v7841_v61  ;;  %8192 = vmatpush1.bf16.msra.mxu1 %v8191_v0  ;;  %v1784_v61 = vld [vmem:[%s19344_s27 + $0x3f0] sm:$0xff] }
 0x181   :  { %8194 = vmatprep.subr.bf16.mxu1 %v8193_v2  ;;  %v1662_v2 = vld [vmem:[%s19344_s27 + $0x20] sm:$0xff]  ;;  %v8211_v5 = vpack.c.bf16 %v1784_v61, %v1780_v60  ;;  %v1735_v60 = vld [vmem:[%s19344_s27 + $0x268] sm:$0xff] }
 0x183   :  { %7844 = vmatpush1.bf16.msra.mxu0 %v7843_v11  ;;  %v7895_v11 = vpack.c.bf16 %v1662_v2, %v1658_v1  ;;  %v1743_v1 = vld [vmem:[%s19344_s27 + $0x2a8] sm:$0xff] }
 0x184   :  { %7846 = vmatprep.subr.bf16.mxu0 %v7845_v12  ;;  %8196 = vmatpush1.bf16.msra.mxu1 %v8195_v16  ;;  %v7897_v12 = vpack.c.bf16 %v1671_v8, %v1667_v6  ;;  %v1679_v16 = vld [vmem:[%s19344_s27 + $0xa8] sm:$0xff]  ;;  %v1738_v6 = vld [vmem:[%s19344_s27 + $0x280] sm:$0xff] }
 0x185   :  { %8198 = vmatprep.subr.bf16.mxu1 %v8197_v19  ;;  %v7901_v19 = vpack.c.bf16 %v1679_v16, %v1675_v15  ;;  %v1742_v8 = vld [vmem:[%s19344_s27 + $0x2a0] sm:$0xff]  ;;  %v1755_v16 = vld [vmem:[%s19344_s27 + $0x308] sm:$0xff] }
 0x186   :  { %v1750_v15 = vld [vmem:[%s19344_s27 + $0x2e0] sm:$0xff] }
 0x187   :  { %7848 = vmatpush1.bf16.msra.mxu0 %v7847_v41 }
 0x188   :  { %7850 = vmatprep.subr.bf16.mxu0 %v7849_v48  ;;  %8200 = vmatpush1.bf16.msra.mxu1 %v8199_v37  ;;  %v1682_v48 = vld [vmem:[%s19344_s27 + $0xc0] sm:$0xff] }
 0x189   :  { %8202 = vmatprep.subr.bf16.mxu1 %v8201_v29  ;;  %v7907_v37 = vpack.c.bf16 %v1686_v25, %v1682_v48  ;;  %v1690_v29 = vld [vmem:[%s19344_s27 + $0x100] sm:$0xff]  ;;  %v12884_v48 = vsub.s32 0, %v10736_v10  ;;  %v12887_v25 = vsub.s32 1, %v10736_v10 }
 0x18a   :  { %v1311_v49 = vpop.f32.mrb[2].mxu1  ;;  %v7911_v34 = vpack.c.bf16 %v1694_v30, %v1690_v29  ;;  %v12901_v29 = vld [vmem:[%s19345_s7] sm:$0xff]  ;;  %v1771_v30 = vld [vmem:[%s19344_s27 + $0x388] sm:$0xff] }
 0x18b   :  { %v12697_v3 = vadd.f32 %v1311_v49, %v12089_v42  ;;  %v1313_v52 = vpop.f32.mrb[3].mxu1  ;;  %7852 = vmatpush1.bf16.msra.mxu0 %v7851_v35  ;;  %v1659_v42 = vld [vmem:[%s19344_s27 + $0x8] sm:$0xff]  ;;  %v7913_v35 = vpack.c.bf16 %v1703_v33, %v1699_v31  ;;  %v1605_v33 = vrot.slane %v12901_v29, %v12884_v48 }
 0x18c   :  { %v12700_v54 = vadd.f32 %v1313_v52, %v12100_v47  ;;  %7854 = vmatprep.subr.bf16.mxu0 %v7853_v36  ;;  %8204 = vmatpush1.bf16.msra.mxu1 %v8203_v40  ;;  %v1663_v47 = vld [vmem:[%s19344_s27 + $0x28] sm:$0xff]  ;;  %v1698_v36 = vld [vmem:[%s19344_s27 + $0x140] sm:$0xff] }
 0x18d   :  { %8206 = vmatprep.subr.bf16.mxu1 %v8205_v44  ;;  %v7893_v0 = vpack.c.bf16 %v1663_v47, %v1659_v42  ;;  %v7915_v40 = vpack.c.bf16 %v1702_v18, %v1698_v36  ;;  %v1706_v44 = vld [vmem:[%s19344_s27 + $0x180] sm:$0xff]  ;;  %v1719_v49 = vld [vmem:[%s19344_s27 + $0x1e8] sm:$0xff]  ;;  %v1617_v36 = vrot.slane %v12901_v29, %v12890_v26 }
 0x18e   :  { %v7919_v50 = vpack.c.bf16 %v1710_v45, %v1706_v44  ;;  %v7921_v51 = vpack.c.bf16 %v1719_v49, %v1715_v46  ;;  %v1714_v52 = vld [vmem:[%s19344_s27 + $0x1c0] sm:$0xff]  ;;  %v1775_v31 = vld [vmem:[%s19344_s27 + $0x3a8] sm:$0xff] }
 0x18f   :  { %7856 = vmatpush1.bf16.msra.mxu0 %v7855_v53  ;;  %v1718_v53 = vld [vmem:[%s19344_s27 + $0x1e0] sm:$0xff]  ;;  %v7949_v18 = vpack.c.bf16 %v1775_v31, %v1771_v30  ;;  %v1783_v44 = vld [vmem:[%s19344_s27 + $0x3e8] sm:$0xff]  ;;  %v1812_v30 = vld [vmem:[%s19344_s27 + $0x4d0] sm:$0xff] }
 0x190   :  { %7858 = vmatprep.subr.bf16.mxu0 %v7857_v55  ;;  %8208 = vmatpush1.bf16.msra.mxu1 %v8207_v58  ;;  %v1723_v55 = vld [vmem:[%s19344_s27 + $0x208] sm:$0xff]  ;;  %v7923_v57 = vpack.c.bf16 %v1718_v53, %v1714_v52  ;;  %v1722_v58 = vld [vmem:[%s19344_s27 + $0x200] sm:$0xff]  ;;  %v1792_v52 = vld [vmem:[%s19344_s27 + $0x430] sm:$0xff] }
 0x191   :  { %8210 = vmatprep.subr.bf16.mxu1 %v8209_v59  ;;  %v7925_v42 = vpack.c.bf16 %v1727_v56, %v1723_v55  ;;  %v1726_v47 = vld [vmem:[%s19344_s27 + $0x220] sm:$0xff]  ;;  %v1731_v59 = vld [vmem:[%s19344_s27 + $0x248] sm:$0xff]  ;;  %v1645_v55 = vadd.f32 %v12700_v54, %v1617_v36  ;;  %v1816_v31 = vld [vmem:[%s19344_s27 + $0x4f0] sm:$0xff] }
 0x192   :  { %v7927_v61 = vpack.c.bf16 %v1726_v47, %v1722_v58  ;;  %v7929_v32 = vpack.c.bf16 %v1735_v60, %v1731_v59  ;;  %v1778_v53 = vld [vmem:[%s19344_s27 + $0x3c0] sm:$0xff]  ;;  %v1801_v58 = vld [vmem:[%s19344_s27 + $0x478] sm:$0xff]  ;;  %v1787_v59 = vld [vmem:[%s19344_s27 + $0x408] sm:$0xff] }
 0x193   :  { %7860 = vmatpush1.bf16.msra.mxu0 %v7859_v63  ;;  %v1734_v63 = vld [vmem:[%s19344_s27 + $0x260] sm:$0xff]  ;;  %v1791_v54 = vld [vmem:[%s19344_s27 + $0x428] sm:$0xff]  ;;  %v1821_v36 = vld [vmem:[%s19344_s27 + $0x518] sm:$0xff] }
 0x194   :  { %7894 = vmatprep.subr.bf16.mxu0 %v7893_v0  ;;  %8212 = vmatpush1.bf16.msra.mxu1 %v8211_v5  ;;  %v1739_v0 = vld [vmem:[%s19344_s27 + $0x288] sm:$0xff]  ;;  %v7931_v2 = vpack.c.bf16 %v1734_v63, %v1730_v62  ;;  %v1796_v63 = vld [vmem:[%s19344_s27 + $0x450] sm:$0xff] }
 0x195   :  { %8214 = vmatprep.subr.bf16.mxu1 %v8213_v9  ;;  %v7933_v5 = vpack.c.bf16 %v1743_v1, %v1739_v0  ;;  %v1747_v9 = vld [vmem:[%s19344_s27 + $0x2c8] sm:$0xff]  ;;  %v1800_v0 = vld [vmem:[%s19344_s27 + $0x470] sm:$0xff]  ;;  %v1653_v1 = vmax.f32 %v1645_v55, 0.0 }
 0x196   :  { %2299 = vmatmul.mubr.f32.vlgmr.msra.gmra.mrb[6].mxu0 %v12379_v4  ;;  %v1687_v4 = vld [vmem:[%s19344_s27 + $0xe8] sm:$0xff] }
 0x197   :  { %7896 = vmatpush1.bf16.msra.mxu0 %v7895_v11  ;;  %v7905_v41 = vpack.c.bf16 %v1687_v4, %v1683_v22  ;;  %v1751_v11 = vld [vmem:[%s19344_s27 + $0x2e8] sm:$0xff]  ;;  %v1758_v22 = vld [vmem:[%s19344_s27 + $0x320] sm:$0xff] }
 0x198   :  { %7898 = vmatprep.subr.bf16.mxu0 %v7897_v12  ;;  %v7935_v12 = vpack.c.bf16 %v1742_v8, %v1738_v6  ;;  %v7937_v13 = vpack.c.bf16 %v1751_v11, %v1747_v9  ;;  %v1763_v4 = vld [vmem:[%s19344_s27 + $0x348] sm:$0xff]  ;;  %v1790_v6 = vld [vmem:[%s19344_s27 + $0x420] sm:$0xff]  ;;  %v1805_v8 = vld [vmem:[%s19344_s27 + $0x498] sm:$0xff] }
 0x199   :  { %v1809_v9 = vld [vmem:[%s19344_s27 + $0x4b8] sm:$0xff]  ;;  %v1795_v11 = vld [vmem:[%s19344_s27 + $0x448] sm:$0xff] }
 0x19a   :  { %v1819_v55 = vld [vmem:[%s19344_s27 + $0x508] sm:$0xff] }
 0x19b   :  { %7900 = vmatpush1.bf16.msra.mxu0 %v7899_v17  ;;  %v1759_v17 = vld [vmem:[%s19344_s27 + $0x328] sm:$0xff] }
 0x19c   :  { %7902 = vmatprep.subr.bf16.mxu0 %v7901_v19  ;;  %v7939_v19 = vpack.c.bf16 %v1750_v15, %v1746_v14  ;;  %v7941_v20 = vpack.c.bf16 %v1759_v17, %v1755_v16  ;;  %v1804_v15 = vld [vmem:[%s19344_s27 + $0x490] sm:$0xff]  ;;  %v1794_v17 = vld [vmem:[%s19344_s27 + $0x440] sm:$0xff] }
 0x19d   :  { %v1808_v16 = vld [vmem:[%s19344_s27 + $0x4b0] sm:$0xff] }
 0x19f   :  { %7904 = vmatpush1.bf16.msra.mxu0 %v7903_v24  ;;  %v1767_v24 = vld [vmem:[%s19344_s27 + $0x368] sm:$0xff] }
 0x1a0   :  { %7906 = vmatprep.subr.bf16.mxu0 %v7905_v41  ;;  %v7943_v41 = vpack.c.bf16 %v1758_v22, %v1754_v21  ;;  %v7945_v27 = vpack.c.bf16 %v1767_v24, %v1763_v4  ;;  %v1798_v21 = vld [vmem:[%s19344_s27 + $0x460] sm:$0xff]  ;;  %v1813_v22 = vld [vmem:[%s19344_s27 + $0x4d8] sm:$0xff]  ;;  %v1803_v24 = vld [vmem:[%s19344_s27 + $0x488] sm:$0xff] }
 0x1a1   :  { %v1817_v4 = vld [vmem:[%s19344_s27 + $0x4f8] sm:$0xff] }
 0x1a3   :  { %7908 = vmatpush1.bf16.msra.mxu0 %v7907_v37  ;;  %v1762_v37 = vld [vmem:[%s19344_s27 + $0x340] sm:$0xff] }
 0x1a4   :  { %7910 = vmatprep.subr.bf16.mxu0 %v7909_v28  ;;  %v1766_v28 = vld [vmem:[%s19344_s27 + $0x360] sm:$0xff] }
 0x1a7   :  { %7912 = vmatpush1.bf16.msra.mxu0 %v7911_v34  ;;  %v1609_v34 = vrot.slane %v12901_v29, %v12887_v25 }
 0x1a8   :  { %7914 = vmatprep.subr.bf16.mxu0 %v7913_v35  ;;  %v7947_v35 = vpack.c.bf16 %v1766_v28, %v1762_v37  ;;  %v7963_v37 = vpack.c.bf16 %v1798_v21, %v1794_v17  ;;  %v8225_v28 = vpack.c.bf16 %v1817_v4, %v1813_v22  ;;  %v1844_v21 = vld [vmem:[%s19344_s27 + $0x5d0] sm:$0xff]  ;;  %v1834_v4 = vld [vmem:[%s19344_s27 + $0x580] sm:$0xff] }
 0x1a9   :  { %v1848_v22 = vld [vmem:[%s19344_s27 + $0x5f0] sm:$0xff] }
 0x1ab   :  { %7916 = vmatpush1.bf16.msra.mxu0 %v7915_v40 }
 0x1ac   :  { %7918 = vmatprep.subr.bf16.mxu0 %v7917_v43  ;;  %v1779_v43 = vld [vmem:[%s19344_s27 + $0x3c8] sm:$0xff] }
 0x1ad   :  { %v7953_v56 = vpack.c.bf16 %v1783_v44, %v1779_v43 }
 0x1af   :  { %7920 = vmatpush1.bf16.msra.mxu0 %v7919_v50  ;;  %v7951_v50 = vpack.c.bf16 %v1774_v39, %v1770_v38  ;;  %v1811_v38 = vld [vmem:[%s19344_s27 + $0x4c8] sm:$0xff] }
 0x1b0   :  { %7922 = vmatprep.subr.bf16.mxu0 %v7921_v51  ;;  %v1788_v51 = vld [vmem:[%s19344_s27 + $0x410] sm:$0xff]  ;;  %v1815_v39 = vld [vmem:[%s19344_s27 + $0x4e8] sm:$0xff] }
 0x1b1   :  { %v8215_v60 = vpack.c.bf16 %v1792_v52, %v1788_v51  ;;  %v1814_v51 = vld [vmem:[%s19344_s27 + $0x4e0] sm:$0xff]  ;;  %v1829_v52 = vld [vmem:[%s19344_s27 + $0x558] sm:$0xff] }
 0x1b3   :  { %7924 = vmatpush1.bf16.msra.mxu0 %v7923_v57  ;;  %v1782_v57 = vld [vmem:[%s19344_s27 + $0x3e0] sm:$0xff] }
 0x1b4   :  { %7926 = vmatprep.subr.bf16.mxu0 %v7925_v42  ;;  %v1797_v42 = vld [vmem:[%s19344_s27 + $0x458] sm:$0xff] }
 0x1b5   :  { %v8217_v62 = vpack.c.bf16 %v1801_v58, %v1797_v42 }
 0x1b7   :  { %7928 = vmatpush1.bf16.msra.mxu0 %v7927_v61 }
 0x1b8   :  { %7930 = vmatprep.subr.bf16.mxu0 %v7929_v32  ;;  %v7955_v32 = vpack.c.bf16 %v1782_v57, %v1778_v53  ;;  %v1833_v53 = vld [vmem:[%s19344_s27 + $0x578] sm:$0xff] }
 0x1b9   :  { %v8233_v58 = vpack.c.bf16 %v1833_v53, %v1829_v52  ;;  %v1864_v52 = vld [vmem:[%s19344_s27 + $0x670] sm:$0xff]  ;;  %v1850_v53 = vld [vmem:[%s19344_s27 + $0x600] sm:$0xff] }
 0x1bb   :  { %7932 = vmatpush1.bf16.msra.mxu0 %v7931_v2  ;;  %v7957_v2 = vpack.c.bf16 %v1791_v54, %v1787_v59  ;;  %v1832_v59 = vld [vmem:[%s19344_s27 + $0x570] sm:$0xff]  ;;  %v1818_v54 = vld [vmem:[%s19344_s27 + $0x500] sm:$0xff] }
 0x1bc   :  { %7934 = vmatprep.subr.bf16.mxu0 %v7933_v5  ;;  %v1786_v5 = vld [vmem:[%s19344_s27 + $0x400] sm:$0xff] }
 0x1bd   :  { %v7959_v14 = vpack.c.bf16 %v1790_v6, %v1786_v5  ;;  %v1836_v6 = vld [vmem:[%s19344_s27 + $0x590] sm:$0xff] }
 0x1bf   :  { %7936 = vmatpush1.bf16.msra.mxu0 %v7935_v12  ;;  %v1799_v12 = vld [vmem:[%s19344_s27 + $0x468] sm:$0xff] }
 0x1c0   :  { %7938 = vmatprep.subr.bf16.mxu0 %v7937_v13  ;;  %v8219_v13 = vpack.c.bf16 %v1800_v0, %v1796_v63  ;;  %v1827_v63 = vld [vmem:[%s19344_s27 + $0x548] sm:$0xff] }
 0x1c1   :  { %v1831_v0 = vld [vmem:[%s19344_s27 + $0x568] sm:$0xff] }
 0x1c3   :  { %7940 = vmatpush1.bf16.msra.mxu0 %v7939_v19  ;;  %v8221_v19 = vpack.c.bf16 %v1809_v9, %v1805_v8  ;;  %v1840_v8 = vld [vmem:[%s19344_s27 + $0x5b0] sm:$0xff]  ;;  %v1826_v9 = vld [vmem:[%s19344_s27 + $0x540] sm:$0xff] }
 0x1c4   :  { %7942 = vmatprep.subr.bf16.mxu0 %v7941_v20  ;;  %v7961_v20 = vpack.c.bf16 %v1799_v12, %v1795_v11  ;;  %v7977_v11 = vpack.c.bf16 %v1831_v0, %v1827_v63  ;;  %v1830_v12 = vld [vmem:[%s19344_s27 + $0x560] sm:$0xff]  ;;  %v8239_v17 = vpack.c.bf16 %v1840_v8, %v1836_v6  ;;  %v1871_v6 = vld [vmem:[%s19344_s27 + $0x6a8] sm:$0xff] }
 0x1c5   :  { %v1862_v0 = vld [vmem:[%s19344_s27 + $0x660] sm:$0xff] }
 0x1c7   :  { %7944 = vmatpush1.bf16.msra.mxu0 %v7943_v41  ;;  %v1807_v41 = vld [vmem:[%s19344_s27 + $0x4a8] sm:$0xff] }
 0x1c8   :  { %7946 = vmatprep.subr.bf16.mxu0 %v7945_v27  ;;  %v8223_v27 = vpack.c.bf16 %v1808_v16, %v1804_v15  ;;  %v1835_v15 = vld [vmem:[%s19344_s27 + $0x588] sm:$0xff] }
 0x1c9   :  { %v1169_v40 = vpop.f32.mrb[0].mxu0  ;;  %v1839_v16 = vld [vmem:[%s19344_s27 + $0x5a8] sm:$0xff] }
 0x1ca   :  { %v1171_v45 = vpop.f32.mrb[1].mxu0  ;;  %v1642_v46 = vadd.f32 %v1605_v33, %v1169_v40  ;;  %v1802_v33 = vld [vmem:[%s19344_s27 + $0x480] sm:$0xff]  ;;  %v8227_v40 = vpack.c.bf16 %v1816_v31, %v1812_v30  ;;  %v1847_v30 = vld [vmem:[%s19344_s27 + $0x5e8] sm:$0xff]  ;;  %v8243_v31 = vpack.c.bf16 %v1848_v22, %v1844_v21 }
 0x1cb   :  { %v1643_v49 = vadd.f32 %v1609_v34, %v1171_v45  ;;  %7948 = vmatpush1.bf16.msra.mxu0 %v7947_v35  ;;  %v7965_v34 = vpack.c.bf16 %v1807_v41, %v1803_v24  ;;  %v1806_v35 = vld [vmem:[%s19344_s27 + $0x4a0] sm:$0xff]  ;;  %v1820_v45 = vld [vmem:[%s19344_s27 + $0x510] sm:$0xff]  ;;  %v7981_v24 = vpack.c.bf16 %v1839_v16, %v1835_v15  ;;  %v1879_v21 = vld [vmem:[%s19344_s27 + $0x6e8] sm:$0xff] }
 0x1cc   :  { %7950 = vmatprep.subr.bf16.mxu0 %v7949_v18  ;;  %v1650_v61 = vmax.f32 %v1642_v46, 0.0  ;;  %v1825_v18 = vld [vmem:[%s19344_s27 + $0x538] sm:$0xff]  ;;  %v7967_v43 = vpack.c.bf16 %v1806_v35, %v1802_v33  ;;  %v1824_v46 = vld [vmem:[%s19344_s27 + $0x530] sm:$0xff]  ;;  %v1838_v41 = vld [vmem:[%s19344_s27 + $0x5a0] sm:$0xff] }
 0x1cd   :  { %v1651_v47 = vmax.f32 %v1643_v49, 0.0  ;;  %v8229_v44 = vpack.c.bf16 %v1825_v18, %v1821_v36  ;;  %v1810_v49 = vld [vmem:[%s19344_s27 + $0x4c0] sm:$0xff]  ;;  %v8231_v57 = vpack.c.bf16 %v1824_v46, %v1820_v45  ;;  %v7983_v33 = vpack.c.bf16 %v1838_v41, %v1834_v4  ;;  %v1852_v35 = vld [vmem:[%s19344_s27 + $0x610] sm:$0xff]  ;;  %v1855_v45 = vld [vmem:[%s19344_s27 + $0x628] sm:$0xff] }
 0x1ce   :  { %v7971_v42 = vpack.c.bf16 %v1814_v51, %v1810_v49  ;;  %v1856_v36 = vld [vmem:[%s19344_s27 + $0x630] sm:$0xff]  ;;  %v1842_v18 = vld [vmem:[%s19344_s27 + $0x5c0] sm:$0xff] }
 0x1cf   :  { %7952 = vmatpush1.bf16.msra.mxu0 %v7951_v50  ;;  %2440 = vmatprep.mubr.f32.mxu0 %v1651_v47  ;;  %v7969_v50 = vpack.c.bf16 %v1815_v39, %v1811_v38  ;;  %v1846_v39 = vld [vmem:[%s19344_s27 + $0x5e0] sm:$0xff]  ;;  %v8247_v46 = vpack.c.bf16 %v1856_v36, %v1852_v35  ;;  %v1860_v51 = vld [vmem:[%s19344_s27 + $0x650] sm:$0xff]  ;;  %v1887_v35 = vld [vmem:[%s19344_s27 + $0x728] sm:$0xff] }
 0x1d0   :  { %2724 = vmatprep.mubr.f32.mxu1 %v1651_v47  ;;  %7954 = vmatprep.subr.bf16.mxu0 %v7953_v56  ;;  %v1823_v56 = vld [vmem:[%s19344_s27 + $0x528] sm:$0xff]  ;;  %v1828_v47 = vld [vmem:[%s19344_s27 + $0x550] sm:$0xff]  ;;  %v7987_v49 = vpack.c.bf16 %v1846_v39, %v1842_v18  ;;  %v1870_v16 = vld [vmem:[%s19344_s27 + $0x6a0] sm:$0xff] }
 0x1d1   :  { %2725 = vmatmul.mubr.f32.vlgmr.msra.gmra.mrb[4].mxu1 %v1650_v61  ;;  %v1884_v41 = vld [vmem:[%s19344_s27 + $0x710] sm:$0xff] }
 0x1d2   :  { %8216 = vmatpush1.bf16.msra.mxu1 %v8215_v60  ;;  %2795 = vmatprep.mubr.f32.mxu1 %v1653_v1  ;;  %v7973_v60 = vpack.c.bf16 %v1823_v56, %v1819_v55  ;;  %v1854_v56 = vld [vmem:[%s19344_s27 + $0x620] sm:$0xff]  ;;  %v1892_v39 = vld [vmem:[%s19344_s27 + $0x750] sm:$0xff] }
 0x1d3   :  { %7956 = vmatpush1.bf16.msra.mxu0 %v7955_v32  ;;  %8218 = vmatprep.subr.bf16.mxu1 %v8217_v62  ;;  %v1837_v32 = vld [vmem:[%s19344_s27 + $0x598] sm:$0xff] }
 0x1d4   :  { %7958 = vmatprep.subr.bf16.mxu0 %v7957_v2  ;;  %v1841_v62 = vld [vmem:[%s19344_s27 + $0x5b8] sm:$0xff] }
 0x1d5   :  { %v8237_v5 = vpack.c.bf16 %v1841_v62, %v1837_v32  ;;  %v1872_v32 = vld [vmem:[%s19344_s27 + $0x6b0] sm:$0xff]  ;;  %v1858_v62 = vld [vmem:[%s19344_s27 + $0x640] sm:$0xff] }
 0x1d6   :  { %8220 = vmatpush1.bf16.msra.mxu1 %v8219_v13  ;;  %2441 = vmatmul.mubr.f32.vlgmr.msra.gmra.mrb[6].mxu0 %v1650_v61  ;;  %v1822_v61 = vld [vmem:[%s19344_s27 + $0x520] sm:$0xff]  ;;  %v1845_v13 = vld [vmem:[%s19344_s27 + $0x5d8] sm:$0xff] }
 0x1d7   :  { %7960 = vmatpush1.bf16.msra.mxu0 %v7959_v14  ;;  %2511 = vmatprep.mubr.f32.mxu0 %v1653_v1  ;;  %v8235_v1 = vpack.c.bf16 %v1832_v59, %v1828_v47  ;;  %v7975_v2 = vpack.c.bf16 %v1822_v61, %v1818_v54  ;;  %v1849_v14 = vld [vmem:[%s19344_s27 + $0x5f8] sm:$0xff]  ;;  %v1863_v47 = vld [vmem:[%s19344_s27 + $0x668] sm:$0xff]  ;;  %v8251_v59 = vpack.c.bf16 %v1864_v52, %v1860_v51  ;;  %v1868_v61 = vld [vmem:[%s19344_s27 + $0x690] sm:$0xff] }
 0x1d8   :  { %8222 = vmatprep.subr.bf16.mxu1 %v8221_v19  ;;  %7962 = vmatprep.subr.bf16.mxu0 %v7961_v20  ;;  %v7979_v19 = vpack.c.bf16 %v1830_v12, %v1826_v9  ;;  %v8241_v20 = vpack.c.bf16 %v1849_v14, %v1845_v13  ;;  %v7991_v54 = vpack.c.bf16 %v1854_v56, %v1850_v53  ;;  %v1876_v12 = vld [vmem:[%s19344_s27 + $0x6d0] sm:$0xff]  ;;  %v1866_v14 = vld [vmem:[%s19344_s27 + $0x680] sm:$0xff]  ;;  %v1895_v51 = vld [vmem:[%s19344_s27 + $0x768] sm:$0xff]  ;;  %v13265_v53 = vsub.s32 2, %v10736_v10 }
 0x1d9   :  { %v8255_v8 = vpack.c.bf16 %v1872_v32, %v1868_v61  ;;  %v7995_v9 = vpack.c.bf16 %v1862_v0, %v1858_v62  ;;  %v1880_v13 = vld [vmem:[%s19344_s27 + $0x6f0] sm:$0xff]  ;;  %v7999_v4 = vpack.c.bf16 %v1870_v16, %v1866_v14  ;;  %v1899_v61 = vld [vmem:[%s19344_s27 + $0x788] sm:$0xff] }
 0x1da   :  { %8224 = vmatpush1.bf16.msra.mxu1 %v8223_v27  ;;  %v1853_v27 = vld [vmem:[%s19344_s27 + $0x618] sm:$0xff]  ;;  %v8259_v22 = vpack.c.bf16 %v1880_v13, %v1876_v12  ;;  %v1903_v32 = vld [vmem:[%s19344_s27 + $0x7a8] sm:$0xff] }
 0x1db   :  { %7964 = vmatpush1.bf16.msra.mxu0 %v7963_v37  ;;  %8226 = vmatprep.subr.bf16.mxu1 %v8225_v28  ;;  %v1857_v37 = vld [vmem:[%s19344_s27 + $0x638] sm:$0xff]  ;;  %v1843_v28 = vld [vmem:[%s19344_s27 + $0x5c8] sm:$0xff] }
 0x1dc   :  { %7966 = vmatprep.subr.bf16.mxu0 %v7965_v34  ;;  %v8245_v34 = vpack.c.bf16 %v1857_v37, %v1853_v27  ;;  %v7985_v38 = vpack.c.bf16 %v1847_v30, %v1843_v28  ;;  %v1888_v27 = vld [vmem:[%s19344_s27 + $0x730] sm:$0xff]  ;;  %v1874_v37 = vld [vmem:[%s19344_s27 + $0x6c0] sm:$0xff]  ;;  %v1907_v12 = vld [vmem:[%s19344_s27 + $0x7c8] sm:$0xff] }
 0x1dd   :  { %v1878_v30 = vld [vmem:[%s19344_s27 + $0x6e0] sm:$0xff]  ;;  %v8263_v36 = vpack.c.bf16 %v1888_v27, %v1884_v41  ;;  %v1911_v13 = vld [vmem:[%s19344_s27 + $0x7e8] sm:$0xff]  ;;  %v1925_v41 = vld [vmem:[%s19344_s27 + $0x858] sm:$0xff] }
 0x1de   :  { %8228 = vmatpush1.bf16.msra.mxu1 %v8227_v40  ;;  %v1861_v40 = vld [vmem:[%s19344_s27 + $0x658] sm:$0xff]  ;;  %v8003_v18 = vpack.c.bf16 %v1878_v30, %v1874_v37  ;;  %v1915_v37 = vld [vmem:[%s19344_s27 + $0x808] sm:$0xff] }
 0x1df   :  { %7968 = vmatpush1.bf16.msra.mxu0 %v7967_v43  ;;  %8230 = vmatprep.subr.bf16.mxu1 %v8229_v44  ;;  %v1865_v43 = vld [vmem:[%s19344_s27 + $0x678] sm:$0xff]  ;;  %v1851_v44 = vld [vmem:[%s19344_s27 + $0x608] sm:$0xff] }
 0x1e0   :  { %7970 = vmatprep.subr.bf16.mxu0 %v7969_v50  ;;  %v8249_v50 = vpack.c.bf16 %v1865_v43, %v1861_v40  ;;  %v7989_v55 = vpack.c.bf16 %v1855_v45, %v1851_v44  ;;  %v1896_v40 = vld [vmem:[%s19344_s27 + $0x770] sm:$0xff]  ;;  %v1882_v43 = vld [vmem:[%s19344_s27 + $0x700] sm:$0xff]  ;;  %v1929_v27 = vld [vmem:[%s19344_s27 + $0x878] sm:$0xff] }
 0x1e1   :  { %v1886_v45 = vld [vmem:[%s19344_s27 + $0x720] sm:$0xff]  ;;  %v8267_v52 = vpack.c.bf16 %v1896_v40, %v1892_v39  ;;  %v1933_v40 = vld [vmem:[%s19344_s27 + $0x898] sm:$0xff] }
 0x1e2   :  { %8232 = vmatpush1.bf16.msra.mxu1 %v8231_v57  ;;  %v1869_v57 = vld [vmem:[%s19344_s27 + $0x698] sm:$0xff]  ;;  %v1918_v39 = vld [vmem:[%s19344_s27 + $0x820] sm:$0xff] }
 0x1e3   :  { %7972 = vmatpush1.bf16.msra.mxu0 %v7971_v42  ;;  %8234 = vmatprep.subr.bf16.mxu1 %v8233_v58  ;;  %v1873_v42 = vld [vmem:[%s19344_s27 + $0x6b8] sm:$0xff]  ;;  %v1859_v58 = vld [vmem:[%s19344_s27 + $0x648] sm:$0xff] }
 0x1e4   :  { %7974 = vmatprep.subr.bf16.mxu0 %v7973_v60  ;;  %v8253_v60 = vpack.c.bf16 %v1873_v42, %v1869_v57  ;;  %v7993_v63 = vpack.c.bf16 %v1863_v47, %v1859_v58  ;;  %v1900_v57 = vld [vmem:[%s19344_s27 + $0x790] sm:$0xff]  ;;  %v1890_v58 = vld [vmem:[%s19344_s27 + $0x740] sm:$0xff] }
 0x1e5   :  { %v1904_v42 = vld [vmem:[%s19344_s27 + $0x7b0] sm:$0xff] }
 0x1e6   :  { %8236 = vmatpush1.bf16.msra.mxu1 %v8235_v1  ;;  %v1877_v1 = vld [vmem:[%s19344_s27 + $0x6d8] sm:$0xff]  ;;  %v8271_v62 = vpack.c.bf16 %v1904_v42, %v1900_v57  ;;  %v1926_v57 = vld [vmem:[%s19344_s27 + $0x860] sm:$0xff] }
 0x1e7   :  { %7976 = vmatpush1.bf16.msra.mxu0 %v7975_v2  ;;  %8238 = vmatprep.subr.bf16.mxu1 %v8237_v5  ;;  %v1881_v2 = vld [vmem:[%s19344_s27 + $0x6f8] sm:$0xff]  ;;  %v1867_v5 = vld [vmem:[%s19344_s27 + $0x688] sm:$0xff] }
 0x1e8   :  { %7978 = vmatprep.subr.bf16.mxu0 %v7977_v11  ;;  %v8257_v11 = vpack.c.bf16 %v1881_v2, %v1877_v1  ;;  %v7997_v15 = vpack.c.bf16 %v1871_v6, %v1867_v5  ;;  %v1908_v2 = vld [vmem:[%s19344_s27 + $0x7d0] sm:$0xff]  ;;  %v1898_v6 = vld [vmem:[%s19344_s27 + $0x780] sm:$0xff]  ;;  %v1941_v42 = vld [vmem:[%s19344_s27 + $0x8d8] sm:$0xff] }
 0x1e9   :  { %v1912_v5 = vld [vmem:[%s19344_s27 + $0x7f0] sm:$0xff] }
 0x1ea   :  { %8240 = vmatpush1.bf16.msra.mxu1 %v8239_v17  ;;  %v1885_v17 = vld [vmem:[%s19344_s27 + $0x718] sm:$0xff] }
 0x1eb   :  { %7980 = vmatpush1.bf16.msra.mxu0 %v7979_v19  ;;  %8242 = vmatprep.subr.bf16.mxu1 %v8241_v20  ;;  %v1889_v19 = vld [vmem:[%s19344_s27 + $0x738] sm:$0xff]  ;;  %v1875_v20 = vld [vmem:[%s19344_s27 + $0x6c8] sm:$0xff] }
 0x1ec   :  { %7982 = vmatprep.subr.bf16.mxu0 %v7981_v24  ;;  %v8261_v24 = vpack.c.bf16 %v1889_v19, %v1885_v17  ;;  %v8001_v28 = vpack.c.bf16 %v1879_v21, %v1875_v20  ;;  %v1916_v21 = vld [vmem:[%s19344_s27 + $0x810] sm:$0xff] }
 0x1ee   :  { %8244 = vmatpush1.bf16.msra.mxu1 %v8243_v31  ;;  %v1893_v31 = vld [vmem:[%s19344_s27 + $0x758] sm:$0xff] }
 0x1ef   :  { %7984 = vmatpush1.bf16.msra.mxu0 %v7983_v33  ;;  %8246 = vmatprep.subr.bf16.mxu1 %v8245_v34  ;;  %v1897_v33 = vld [vmem:[%s19344_s27 + $0x778] sm:$0xff]  ;;  %v1883_v34 = vld [vmem:[%s19344_s27 + $0x708] sm:$0xff] }
 0x1f0   :  { %7986 = vmatprep.subr.bf16.mxu0 %v7985_v38  ;;  %v8265_v38 = vpack.c.bf16 %v1897_v33, %v1893_v31  ;;  %v8005_v44 = vpack.c.bf16 %v1887_v35, %v1883_v34  ;;  %v8281_v34 = vpack.c.bf16 %v1929_v27, %v1925_v41  ;;  %v1924_v35 = vld [vmem:[%s19344_s27 + $0x850] sm:$0xff] }
 0x1f1   :  { %v1956_v27 = vld [vmem:[%s19344_s27 + $0x950] sm:$0xff] }
 0x1f2   :  { %8248 = vmatpush1.bf16.msra.mxu1 %v8247_v46  ;;  %v1901_v46 = vld [vmem:[%s19344_s27 + $0x798] sm:$0xff] }
 0x1f3   :  { %7988 = vmatpush1.bf16.msra.mxu0 %v7987_v49  ;;  %8250 = vmatprep.subr.bf16.mxu1 %v8249_v50  ;;  %v1905_v49 = vld [vmem:[%s19344_s27 + $0x7b8] sm:$0xff]  ;;  %v1891_v50 = vld [vmem:[%s19344_s27 + $0x748] sm:$0xff] }
 0x1f4   :  { %7990 = vmatprep.subr.bf16.mxu0 %v7989_v55  ;;  %v8007_v55 = vpack.c.bf16 %v1886_v45, %v1882_v43  ;;  %v8269_v56 = vpack.c.bf16 %v1905_v49, %v1901_v46  ;;  %v8009_v47 = vpack.c.bf16 %v1895_v51, %v1891_v50  ;;  %v1937_v43 = vld [vmem:[%s19344_s27 + $0x8b8] sm:$0xff]  ;;  %v1927_v45 = vld [vmem:[%s19344_s27 + $0x868] sm:$0xff]  ;;  %v1932_v51 = vld [vmem:[%s19344_s27 + $0x890] sm:$0xff] }
 0x1f5   :  { %v8285_v50 = vpack.c.bf16 %v1937_v43, %v1933_v40  ;;  %v1964_v40 = vld [vmem:[%s19344_s27 + $0x990] sm:$0xff] }
 0x1f6   :  { %8252 = vmatpush1.bf16.msra.mxu1 %v8251_v59  ;;  %v1894_v59 = vld [vmem:[%s19344_s27 + $0x760] sm:$0xff]  ;;  %v1968_v43 = vld [vmem:[%s19344_s27 + $0x9b0] sm:$0xff] }
 0x1f7   :  { %7992 = vmatpush1.bf16.msra.mxu0 %v7991_v54  ;;  %8254 = vmatprep.subr.bf16.mxu1 %v8253_v60  ;;  %v1909_v54 = vld [vmem:[%s19344_s27 + $0x7d8] sm:$0xff]  ;;  %v8011_v0 = vpack.c.bf16 %v1894_v59, %v1890_v58  ;;  %v1935_v59 = vld [vmem:[%s19344_s27 + $0x8a8] sm:$0xff] }
 0x1f8   :  { %7994 = vmatprep.subr.bf16.mxu0 %v7993_v63  ;;  %v1913_v60 = vld [vmem:[%s19344_s27 + $0x7f8] sm:$0xff]  ;;  %v1613_v63 = vrot.slane %v12901_v29, %v13265_v53  ;;  %v1902_v29 = vld [vmem:[%s19344_s27 + $0x7a0] sm:$0xff] }
 0x1f9   :  { %v8273_v1 = vpack.c.bf16 %v1913_v60, %v1909_v54  ;;  %v8015_v19 = vpack.c.bf16 %v1902_v29, %v1898_v6  ;;  %v1945_v58 = vld [vmem:[%s19344_s27 + $0x8f8] sm:$0xff]  ;;  %v1939_v6 = vld [vmem:[%s19344_s27 + $0x8c8] sm:$0xff] }
 0x1fa   :  { %8256 = vmatpush1.bf16.msra.mxu1 %v8255_v8  ;;  %v8013_v8 = vpack.c.bf16 %v1903_v32, %v1899_v61  ;;  %v1644_v16 = vadd.f32 %v12697_v3, %v1613_v63  ;;  %v8017_v3 = vpack.c.bf16 %v1911_v13, %v1907_v12  ;;  %v8289_v61 = vpack.c.bf16 %v1945_v58, %v1941_v42  ;;  %v1940_v32 = vld [vmem:[%s19344_s27 + $0x8d0] sm:$0xff]  ;;  %v1930_v63 = vld [vmem:[%s19344_s27 + $0x880] sm:$0xff] }
 0x1fb   :  { %7996 = vmatpush1.bf16.msra.mxu0 %v7995_v9  ;;  %8258 = vmatprep.subr.bf16.mxu1 %v8257_v11  ;;  %v1917_v9 = vld [vmem:[%s19344_s27 + $0x818] sm:$0xff]  ;;  %v1948_v12 = vld [vmem:[%s19344_s27 + $0x910] sm:$0xff] }
 0x1fc   :  { %7998 = vmatprep.subr.bf16.mxu0 %v7997_v15  ;;  %v1921_v11 = vld [vmem:[%s19344_s27 + $0x838] sm:$0xff]  ;;  %v8275_v15 = vpack.c.bf16 %v1912_v5, %v1908_v2  ;;  %v1652_v31 = vmax.f32 %v1644_v16, 0.0  ;;  %v1952_v13 = vld [vmem:[%s19344_s27 + $0x930] sm:$0xff] }
 0x1fd   :  { %v8277_v20 = vpack.c.bf16 %v1921_v11, %v1917_v9  ;;  %v1949_v2 = vld [vmem:[%s19344_s27 + $0x918] sm:$0xff]  ;;  %v1972_v42 = vld [vmem:[%s19344_s27 + $0x9d0] sm:$0xff] }
 0x1fe   :  { %8260 = vmatpush1.bf16.msra.mxu1 %v8259_v22  ;;  %v1920_v22 = vld [vmem:[%s19344_s27 + $0x830] sm:$0xff]  ;;  %v1953_v5 = vld [vmem:[%s19344_s27 + $0x938] sm:$0xff] }
 0x1ff   :  { %8000 = vmatpush1.bf16.msra.mxu0 %v7999_v4  ;;  %8262 = vmatprep.subr.bf16.mxu1 %v8261_v24  ;;  %v1906_v4 = vld [vmem:[%s19344_s27 + $0x7c0] sm:$0xff]  ;;  %v8279_v30 = vpack.c.bf16 %v1920_v22, %v1916_v21  ;;  %v8293_v11 = vpack.c.bf16 %v1953_v5, %v1949_v2  ;;  %v1961_v21 = vld [vmem:[%s19344_s27 + $0x978] sm:$0xff]  ;;  %v1947_v22 = vld [vmem:[%s19344_s27 + $0x908] sm:$0xff] }
 0x200   :  { %8002 = vmatprep.subr.bf16.mxu0 %v8001_v28  ;;  %v1910_v24 = vld [vmem:[%s19344_s27 + $0x7e0] sm:$0xff]  ;;  %v1919_v28 = vld [vmem:[%s19344_s27 + $0x828] sm:$0xff]  ;;  %v1976_v58 = vld [vmem:[%s19344_s27 + $0x9f0] sm:$0xff] }
 0x201   :  { %v8019_v33 = vpack.c.bf16 %v1910_v24, %v1906_v4  ;;  %v1951_v4 = vld [vmem:[%s19344_s27 + $0x928] sm:$0xff]  ;;  %v1980_v2 = vld [vmem:[%s19344_s27 + $0xa10] sm:$0xff] }
 0x202   :  { %8264 = vmatpush1.bf16.msra.mxu1 %v8263_v36  ;;  %v1928_v36 = vld [vmem:[%s19344_s27 + $0x870] sm:$0xff] }
 0x203   :  { %8004 = vmatpush1.bf16.msra.mxu0 %v8003_v18  ;;  %8266 = vmatprep.subr.bf16.mxu1 %v8265_v38  ;;  %v1914_v18 = vld [vmem:[%s19344_s27 + $0x800] sm:$0xff]  ;;  %v8021_v38 = vpack.c.bf16 %v1919_v28, %v1915_v37  ;;  %v8283_v46 = vpack.c.bf16 %v1928_v36, %v1924_v35  ;;  %v1960_v37 = vld [vmem:[%s19344_s27 + $0x970] sm:$0xff]  ;;  %v1955_v35 = vld [vmem:[%s19344_s27 + $0x948] sm:$0xff] }
 0x204   :  { %8006 = vmatprep.subr.bf16.mxu0 %v8005_v44  ;;  %v1923_v44 = vld [vmem:[%s19344_s27 + $0x848] sm:$0xff]  ;;  %v8023_v49 = vpack.c.bf16 %v1918_v39, %v1914_v18  ;;  %v1946_v28 = vld [vmem:[%s19344_s27 + $0x900] sm:$0xff]  ;;  %v8299_v18 = vpack.c.bf16 %v1960_v37, %v1956_v27  ;;  %v1984_v5 = vld [vmem:[%s19344_s27 + $0xa30] sm:$0xff] }
 0x205   :  { %v1959_v36 = vld [vmem:[%s19344_s27 + $0x968] sm:$0xff] }
 0x206   :  { %8268 = vmatpush1.bf16.msra.mxu1 %v8267_v52  ;;  %v1936_v52 = vld [vmem:[%s19344_s27 + $0x8b0] sm:$0xff]  ;;  %v1987_v27 = vld [vmem:[%s19344_s27 + $0xa48] sm:$0xff] }
 0x207   :  { %8008 = vmatpush1.bf16.msra.mxu0 %v8007_v55  ;;  %8270 = vmatprep.subr.bf16.mxu1 %v8269_v56  ;;  %v1922_v55 = vld [vmem:[%s19344_s27 + $0x840] sm:$0xff]  ;;  %v8025_v56 = vpack.c.bf16 %v1927_v45, %v1923_v44  ;;  %v8287_v54 = vpack.c.bf16 %v1936_v52, %v1932_v51  ;;  %v8041_v45 = vpack.c.bf16 %v1959_v36, %v1955_v35  ;;  %v1963_v51 = vld [vmem:[%s19344_s27 + $0x988] sm:$0xff] }
 0x208   :  { %8010 = vmatprep.subr.bf16.mxu0 %v8009_v47  ;;  %v1931_v47 = vld [vmem:[%s19344_s27 + $0x888] sm:$0xff]  ;;  %v8027_v60 = vpack.c.bf16 %v1926_v57, %v1922_v55  ;;  %v1954_v44 = vld [vmem:[%s19344_s27 + $0x940] sm:$0xff]  ;;  %v8303_v55 = vpack.c.bf16 %v1968_v43, %v1964_v40 }
 0x209   :  { %v1967_v52 = vld [vmem:[%s19344_s27 + $0x9a8] sm:$0xff]  ;;  %v1986_v35 = vld [vmem:[%s19344_s27 + $0xa40] sm:$0xff] }
 0x20a   :  { %8272 = vmatpush1.bf16.msra.mxu1 %v8271_v62  ;;  %v13317_v14 = vpop.f32.mrb[0].mxu1  ;;  %v1944_v62 = vld [vmem:[%s19344_s27 + $0x8f0] sm:$0xff]  ;;  %v1991_v37 = vld [vmem:[%s19344_s27 + $0xa68] sm:$0xff] }
 0x20b   :  { %v13320_v17 = vpop.f32.mrb[1].mxu1  ;;  %8012 = vmatpush1.bf16.msra.mxu0 %v8011_v0  ;;  %8274 = vmatprep.subr.bf16.mxu1 %v8273_v1  ;;  %v8029_v0 = vpack.c.bf16 %v1935_v59, %v1931_v47  ;;  %v1934_v1 = vld [vmem:[%s19344_s27 + $0x8a0] sm:$0xff]  ;;  %v8291_v29 = vpack.c.bf16 %v1944_v62, %v1940_v32  ;;  %v8045_v59 = vpack.c.bf16 %v1967_v52, %v1963_v51  ;;  %v1971_v32 = vld [vmem:[%s19344_s27 + $0x9c8] sm:$0xff] }
 0x20c   :  { %8014 = vmatprep.subr.bf16.mxu0 %v8013_v8  ;;  %v1943_v8 = vld [vmem:[%s19344_s27 + $0x8e8] sm:$0xff]  ;;  %v8031_v9 = vpack.c.bf16 %v1934_v1, %v1930_v63  ;;  %v1962_v47 = vld [vmem:[%s19344_s27 + $0x980] sm:$0xff]  ;;  %v8307_v63 = vpack.c.bf16 %v1976_v58, %v1972_v42  ;;  %v8057_v36 = vpack.c.bf16 %v1991_v37, %v1987_v27  ;;  %v2032_v27 = vld [vmem:[%s19344_s27 + $0xbb0] sm:$0xff]  ;;  %v1624_v37 = vsub.s32 5, %v10736_v10 }
 0x20d   :  { %v8033_v16 = vpack.c.bf16 %v1943_v8, %v1939_v6  ;;  %v1975_v62 = vld [vmem:[%s19344_s27 + $0x9e8] sm:$0xff]  ;;  %v1970_v6 = vld [vmem:[%s19344_s27 + $0x9c0] sm:$0xff] }
 0x20e   :  { %8276 = vmatpush1.bf16.msra.mxu1 %v8275_v15  ;;  %v1938_v15 = vld [vmem:[%s19344_s27 + $0x8c0] sm:$0xff]  ;;  %v8049_v8 = vpack.c.bf16 %v1975_v62, %v1971_v32  ;;  %v1995_v40 = vld [vmem:[%s19344_s27 + $0xa88] sm:$0xff] }
 0x20f   :  { %8016 = vmatpush1.bf16.msra.mxu0 %v8015_v19  ;;  %8278 = vmatprep.subr.bf16.mxu1 %v8277_v20  ;;  %v1942_v19 = vld [vmem:[%s19344_s27 + $0x8e0] sm:$0xff]  ;;  %v1957_v20 = vld [vmem:[%s19344_s27 + $0x958] sm:$0xff]  ;;  %v1999_v43 = vld [vmem:[%s19344_s27 + $0xaa8] sm:$0xff] }
 0x210   :  { %8018 = vmatprep.subr.bf16.mxu0 %v8017_v3  ;;  %v8295_v3 = vpack.c.bf16 %v1952_v13, %v1948_v12  ;;  %v8035_v24 = vpack.c.bf16 %v1942_v19, %v1938_v15  ;;  %v8297_v41 = vpack.c.bf16 %v1961_v21, %v1957_v20  ;;  %v1979_v12 = vld [vmem:[%s19344_s27 + $0xa08] sm:$0xff]  ;;  %v8311_v15 = vpack.c.bf16 %v1984_v5, %v1980_v2  ;;  %v1988_v20 = vld [vmem:[%s19344_s27 + $0xa50] sm:$0xff]  ;;  %v1994_v51 = vld [vmem:[%s19344_s27 + $0xa80] sm:$0xff] }
 0x211   :  { %2796 = vmatmul.mubr.f32.vlgmr.msra.gmra.mrb[4].mxu1 %v1652_v31  ;;  %v1983_v13 = vld [vmem:[%s19344_s27 + $0xa28] sm:$0xff]  ;;  %v1992_v21 = vld [vmem:[%s19344_s27 + $0xa70] sm:$0xff]  ;;  %v8061_v52 = vpack.c.bf16 %v1999_v43, %v1995_v40  ;;  %v2002_v32 = vld [vmem:[%s19344_s27 + $0xac0] sm:$0xff] }
 0x212   :  { %8280 = vmatpush1.bf16.msra.mxu1 %v8279_v30  ;;  %v8037_v30 = vpack.c.bf16 %v1951_v4, %v1947_v22  ;;  %v1978_v22 = vld [vmem:[%s19344_s27 + $0xa00] sm:$0xff]  ;;  %v8053_v4 = vpack.c.bf16 %v1983_v13, %v1979_v12  ;;  %v2003_v42 = vld [vmem:[%s19344_s27 + $0xac8] sm:$0xff] }
 0x213   :  { %8020 = vmatpush1.bf16.msra.mxu0 %v8019_v33  ;;  %8282 = vmatprep.subr.bf16.mxu1 %v8281_v34  ;;  %v1965_v33 = vld [vmem:[%s19344_s27 + $0x998] sm:$0xff]  ;;  %v2007_v58 = vld [vmem:[%s19344_s27 + $0xae8] sm:$0xff]  ;;  %v2010_v12 = vld [vmem:[%s19344_s27 + $0xb00] sm:$0xff] }
 0x214   :  { %8022 = vmatprep.subr.bf16.mxu0 %v8021_v38  ;;  %v1969_v34 = vld [vmem:[%s19344_s27 + $0x9b8] sm:$0xff]  ;;  %v8065_v62 = vpack.c.bf16 %v2007_v58, %v2003_v42  ;;  %v2011_v2 = vld [vmem:[%s19344_s27 + $0xb08] sm:$0xff] }
 0x215   :  { %v8301_v39 = vpack.c.bf16 %v1969_v34, %v1965_v33  ;;  %v1996_v33 = vld [vmem:[%s19344_s27 + $0xa90] sm:$0xff]  ;;  %v2015_v5 = vld [vmem:[%s19344_s27 + $0xb28] sm:$0xff]  ;;  %v2049_v42 = vld [vmem:[%s19344_s27 + $0xc38] sm:$0xff] }
 0x216   :  { %8284 = vmatpush1.bf16.msra.mxu1 %v8283_v46  ;;  %2512 = vmatmul.mubr.f32.vlgmr.msra.gmra.mrb[6].mxu0 %v1652_v31  ;;  %v1950_v31 = vld [vmem:[%s19344_s27 + $0x920] sm:$0xff]  ;;  %v2000_v34 = vld [vmem:[%s19344_s27 + $0xab0] sm:$0xff]  ;;  %v8069_v13 = vpack.c.bf16 %v2015_v5, %v2011_v2 }
 0x217   :  { %8024 = vmatpush1.bf16.msra.mxu0 %v8023_v49  ;;  %8286 = vmatprep.subr.bf16.mxu1 %v8285_v50  ;;  %v8039_v38 = vpack.c.bf16 %v1950_v31, %v1946_v28  ;;  %v1958_v46 = vld [vmem:[%s19344_s27 + $0x960] sm:$0xff]  ;;  %v1973_v49 = vld [vmem:[%s19344_s27 + $0x9d8] sm:$0xff]  ;;  %v8315_v28 = vpack.c.bf16 %v1992_v21, %v1988_v20  ;;  %v2019_v20 = vld [vmem:[%s19344_s27 + $0xb48] sm:$0xff] }
 0x218   :  { %8026 = vmatprep.subr.bf16.mxu0 %v8025_v56  ;;  %v1977_v50 = vld [vmem:[%s19344_s27 + $0x9f8] sm:$0xff]  ;;  %v8043_v56 = vpack.c.bf16 %v1958_v46, %v1954_v44  ;;  %v8319_v44 = vpack.c.bf16 %v2000_v34, %v1996_v33  ;;  %v2023_v21 = vld [vmem:[%s19344_s27 + $0xb68] sm:$0xff]  ;;  %v2022_v33 = vld [vmem:[%s19344_s27 + $0xb60] sm:$0xff] }
 0x219   :  { %v8305_v57 = vpack.c.bf16 %v1977_v50, %v1973_v49  ;;  %v2004_v49 = vld [vmem:[%s19344_s27 + $0xad0] sm:$0xff]  ;;  %v2037_v34 = vld [vmem:[%s19344_s27 + $0xbd8] sm:$0xff]  ;;  %v2038_v5 = vld [vmem:[%s19344_s27 + $0xbe0] sm:$0xff] }
 0x21a   :  { %8288 = vmatpush1.bf16.msra.mxu1 %v8287_v54  ;;  %v1966_v54 = vld [vmem:[%s19344_s27 + $0x9a0] sm:$0xff]  ;;  %v2008_v50 = vld [vmem:[%s19344_s27 + $0xaf0] sm:$0xff] }
 0x21b   :  { %8028 = vmatpush1.bf16.msra.mxu0 %v8027_v60  ;;  %8290 = vmatprep.subr.bf16.mxu1 %v8289_v61  ;;  %v1981_v60 = vld [vmem:[%s19344_s27 + $0xa18] sm:$0xff] }
 0x21c   :  { %8030 = vmatprep.subr.bf16.mxu0 %v8029_v0  ;;  %v1985_v61 = vld [vmem:[%s19344_s27 + $0xa38] sm:$0xff]  ;;  %v8047_v0 = vpack.c.bf16 %v1966_v54, %v1962_v47  ;;  %v8323_v47 = vpack.c.bf16 %v2008_v50, %v2004_v49  ;;  %v2040_v49 = vld [vmem:[%s19344_s27 + $0xbf0] sm:$0xff] }
 0x21d   :  { %v8309_v1 = vpack.c.bf16 %v1985_v61, %v1981_v60  ;;  %v2012_v60 = vld [vmem:[%s19344_s27 + $0xb10] sm:$0xff] }
 0x21e   :  { %8292 = vmatpush1.bf16.msra.mxu1 %v8291_v29  ;;  %v1974_v29 = vld [vmem:[%s19344_s27 + $0x9e0] sm:$0xff]  ;;  %v2016_v61 = vld [vmem:[%s19344_s27 + $0xb30] sm:$0xff] }
 0x21f   :  { %8032 = vmatpush1.bf16.msra.mxu0 %v8031_v9  ;;  %8294 = vmatprep.subr.bf16.mxu1 %v8293_v11  ;;  %v1989_v9 = vld [vmem:[%s19344_s27 + $0xa58] sm:$0xff] }
 0x220   :  { %8034 = vmatprep.subr.bf16.mxu0 %v8033_v16  ;;  %v1993_v11 = vld [vmem:[%s19344_s27 + $0xa78] sm:$0xff]  ;;  %v8051_v16 = vpack.c.bf16 %v1974_v29, %v1970_v6  ;;  %v8327_v6 = vpack.c.bf16 %v2016_v61, %v2012_v60 }
 0x221   :  { %v8313_v19 = vpack.c.bf16 %v1993_v11, %v1989_v9  ;;  %v2020_v9 = vld [vmem:[%s19344_s27 + $0xb50] sm:$0xff] }
 0x222   :  { %8296 = vmatpush1.bf16.msra.mxu1 %v8295_v3  ;;  %v1982_v3 = vld [vmem:[%s19344_s27 + $0xa20] sm:$0xff]  ;;  %v2024_v11 = vld [vmem:[%s19344_s27 + $0xb70] sm:$0xff] }
 0x223   :  { %8036 = vmatpush1.bf16.msra.mxu0 %v8035_v24  ;;  %8298 = vmatprep.subr.bf16.mxu1 %v8297_v41  ;;  %v1997_v24 = vld [vmem:[%s19344_s27 + $0xa98] sm:$0xff] }
 0x224   :  { %8038 = vmatprep.subr.bf16.mxu0 %v8037_v30  ;;  %v2001_v41 = vld [vmem:[%s19344_s27 + $0xab8] sm:$0xff]  ;;  %v8055_v30 = vpack.c.bf16 %v1982_v3, %v1978_v22  ;;  %v8331_v22 = vpack.c.bf16 %v2024_v11, %v2020_v9  ;;  %v2047_v11 = vld [vmem:[%s19344_s27 + $0xc28] sm:$0xff] }
 0x225   :  { %v8317_v31 = vpack.c.bf16 %v2001_v41, %v1997_v24  ;;  %v2028_v41 = vld [vmem:[%s19344_s27 + $0xb90] sm:$0xff] }
 0x226   :  { %8300 = vmatpush1.bf16.msra.mxu1 %v8299_v18  ;;  %v1990_v18 = vld [vmem:[%s19344_s27 + $0xa60] sm:$0xff] }
 0x227   :  { %8040 = vmatpush1.bf16.msra.mxu0 %v8039_v38  ;;  %8302 = vmatprep.subr.bf16.mxu1 %v8301_v39  ;;  %v2005_v38 = vld [vmem:[%s19344_s27 + $0xad8] sm:$0xff] }
 0x228   :  { %8042 = vmatprep.subr.bf16.mxu0 %v8041_v45  ;;  %v2009_v39 = vld [vmem:[%s19344_s27 + $0xaf8] sm:$0xff]  ;;  %v8059_v45 = vpack.c.bf16 %v1990_v18, %v1986_v35  ;;  %v2031_v18 = vld [vmem:[%s19344_s27 + $0xba8] sm:$0xff] }
 0x229   :  { %v8321_v46 = vpack.c.bf16 %v2009_v39, %v2005_v38  ;;  %v2041_v35 = vld [vmem:[%s19344_s27 + $0xbf8] sm:$0xff]  ;;  %v8335_v38 = vpack.c.bf16 %v2032_v27, %v2028_v41  ;;  %v13688_v39 = vld [vmem:[%s19345_s7] sm:$0xff] }
 0x22a   :  { %8304 = vmatpush1.bf16.msra.mxu1 %v8303_v55  ;;  %v1998_v55 = vld [vmem:[%s19344_s27 + $0xaa0] sm:$0xff]  ;;  %v1625_v43 = vrot.slane %v13688_v39, %v1624_v37  ;;  %v2061_v41 = vld [vmem:[%s19344_s27 + $0xc98] sm:$0xff] }
 0x22b   :  { %8044 = vmatpush1.bf16.msra.mxu0 %v8043_v56  ;;  %8306 = vmatprep.subr.bf16.mxu1 %v8305_v57  ;;  %v2013_v56 = vld [vmem:[%s19344_s27 + $0xb18] sm:$0xff] }
 0x22c   :  { %8046 = vmatprep.subr.bf16.mxu0 %v8045_v59  ;;  %v2017_v57 = vld [vmem:[%s19344_s27 + $0xb38] sm:$0xff]  ;;  %v8063_v59 = vpack.c.bf16 %v1998_v55, %v1994_v51  ;;  %v2030_v55 = vld [vmem:[%s19344_s27 + $0xba0] sm:$0xff] }
 0x22d   :  { %v8325_v54 = vpack.c.bf16 %v2017_v57, %v2013_v56  ;;  %v2045_v57 = vld [vmem:[%s19344_s27 + $0xc18] sm:$0xff] }
 0x22e   :  { %8308 = vmatpush1.bf16.msra.mxu1 %v8307_v63  ;;  %v2006_v63 = vld [vmem:[%s19344_s27 + $0xae0] sm:$0xff]  ;;  %v8341_v2 = vpack.c.bf16 %v2049_v42, %v2045_v57  ;;  %v2065_v27 = vld [vmem:[%s19344_s27 + $0xcb8] sm:$0xff] }
 0x22f   :  { %8048 = vmatpush1.bf16.msra.mxu0 %v8047_v0  ;;  %8310 = vmatprep.subr.bf16.mxu1 %v8309_v1  ;;  %v2021_v0 = vld [vmem:[%s19344_s27 + $0xb58] sm:$0xff]  ;;  %v2058_v57 = vld [vmem:[%s19344_s27 + $0xc80] sm:$0xff] }
 0x230   :  { %8050 = vmatprep.subr.bf16.mxu0 %v8049_v8  ;;  %v2025_v1 = vld [vmem:[%s19344_s27 + $0xb78] sm:$0xff]  ;;  %v8067_v8 = vpack.c.bf16 %v2006_v63, %v2002_v32  ;;  %v2048_v63 = vld [vmem:[%s19344_s27 + $0xc30] sm:$0xff] }
 0x231   :  { %v8329_v29 = vpack.c.bf16 %v2025_v1, %v2021_v0  ;;  %v2034_v0 = vld [vmem:[%s19344_s27 + $0xbc0] sm:$0xff] }
 0x232   :  { %8312 = vmatpush1.bf16.msra.mxu1 %v8311_v15  ;;  %v2014_v15 = vld [vmem:[%s19344_s27 + $0xb20] sm:$0xff] }
 0x233   :  { %8052 = vmatpush1.bf16.msra.mxu0 %v8051_v16  ;;  %8314 = vmatprep.subr.bf16.mxu1 %v8313_v19  ;;  %v2029_v16 = vld [vmem:[%s19344_s27 + $0xb98] sm:$0xff]  ;;  %v8071_v3 = vpack.c.bf16 %v2014_v15, %v2010_v12  ;;  %v8083_v15 = vpack.c.bf16 %v2038_v5, %v2034_v0  ;;  %v2080_v0 = vld [vmem:[%s19344_s27 + $0xd30] sm:$0xff]  ;;  %v2070_v5 = vld [vmem:[%s19344_s27 + $0xce0] sm:$0xff] }
 0x234   :  { %8054 = vmatprep.subr.bf16.mxu0 %v8053_v4  ;;  %v2033_v19 = vld [vmem:[%s19344_s27 + $0xbb8] sm:$0xff]  ;;  %v1620_v4 = vsub.s32 4, %v10736_v10 }
 0x235   :  { %v8333_v24 = vpack.c.bf16 %v2033_v19, %v2029_v16  ;;  %v2052_v19 = vld [vmem:[%s19344_s27 + $0xc50] sm:$0xff] }
 0x236   :  { %8316 = vmatpush1.bf16.msra.mxu1 %v8315_v28  ;;  %v2018_v28 = vld [vmem:[%s19344_s27 + $0xb40] sm:$0xff]  ;;  %v1621_v40 = vrot.slane %v13688_v39, %v1620_v4 }
 0x237   :  { %8056 = vmatpush1.bf16.msra.mxu0 %v8055_v30  ;;  %8318 = vmatprep.subr.bf16.mxu1 %v8317_v31  ;;  %v1632_v30 = vsub.s32 7, %v10736_v10  ;;  %v8073_v31 = vpack.c.bf16 %v2023_v21, %v2019_v20  ;;  %v2056_v20 = vld [vmem:[%s19344_s27 + $0xc70] sm:$0xff] }
 0x238   :  { %8058 = vmatprep.subr.bf16.mxu0 %v8057_v36  ;;  %v2027_v36 = vld [vmem:[%s19344_s27 + $0xb88] sm:$0xff] }
 0x239   :  { %v1633_v50 = vrot.slane %v13688_v39, %v1632_v30  ;;  %v8077_v51 = vpack.c.bf16 %v2031_v18, %v2027_v36  ;;  %v2064_v36 = vld [vmem:[%s19344_s27 + $0xcb0] sm:$0xff]  ;;  %v2050_v18 = vld [vmem:[%s19344_s27 + $0xc40] sm:$0xff] }
 0x23a   :  { %8320 = vmatpush1.bf16.msra.mxu1 %v8319_v44  ;;  %v8075_v44 = vpack.c.bf16 %v2022_v33, %v2018_v28  ;;  %v2051_v28 = vld [vmem:[%s19344_s27 + $0xc48] sm:$0xff]  ;;  %v8347_v33 = vpack.c.bf16 %v2056_v20, %v2052_v19  ;;  %v2078_v20 = vld [vmem:[%s19344_s27 + $0xd20] sm:$0xff] }
 0x23b   :  { %8060 = vmatpush1.bf16.msra.mxu0 %v8059_v45  ;;  %8322 = vmatprep.subr.bf16.mxu1 %v8321_v46  ;;  %v8337_v45 = vpack.c.bf16 %v2041_v35, %v2037_v34  ;;  %v2036_v46 = vld [vmem:[%s19344_s27 + $0xbd0] sm:$0xff]  ;;  %v1649_v1 = vadd.f32 %v1633_v50, %v13320_v17  ;;  %v2043_v17 = vld [vmem:[%s19344_s27 + $0xc08] sm:$0xff] }
 0x23c   :  { %8062 = vmatprep.subr.bf16.mxu0 %v8061_v52  ;;  %v2026_v52 = vld [vmem:[%s19344_s27 + $0xb80] sm:$0xff]  ;;  %v2060_v35 = vld [vmem:[%s19344_s27 + $0xc90] sm:$0xff] }
 0x23d   :  { %v8079_v32 = vpack.c.bf16 %v2030_v55, %v2026_v52  ;;  %v1657_v21 = vmax.f32 %v1649_v1, 0.0  ;;  %v8351_v50 = vpack.c.bf16 %v2064_v36, %v2060_v35  ;;  %v2068_v55 = vld [vmem:[%s19344_s27 + $0xcd0] sm:$0xff]  ;;  %v2066_v1 = vld [vmem:[%s19344_s27 + $0xcc0] sm:$0xff] }
 0x23e   :  { %8324 = vmatpush1.bf16.msra.mxu1 %v8323_v47  ;;  %v8339_v47 = vpack.c.bf16 %v2040_v49, %v2036_v46  ;;  %v2059_v46 = vld [vmem:[%s19344_s27 + $0xc88] sm:$0xff]  ;;  %v2086_v36 = vld [vmem:[%s19344_s27 + $0xd60] sm:$0xff] }
 0x23f   :  { %8064 = vmatpush1.bf16.msra.mxu0 %v8063_v59  ;;  %8326 = vmatprep.subr.bf16.mxu1 %v8325_v54  ;;  %v2035_v59 = vld [vmem:[%s19344_s27 + $0xbc8] sm:$0xff] }
 0x240   :  { %8066 = vmatprep.subr.bf16.mxu0 %v8065_v62  ;;  %v2039_v54 = vld [vmem:[%s19344_s27 + $0xbe8] sm:$0xff]  ;;  %v2044_v62 = vld [vmem:[%s19344_s27 + $0xc10] sm:$0xff] }
 0x241   :  { %v8081_v9 = vpack.c.bf16 %v2039_v54, %v2035_v59  ;;  %v8343_v12 = vpack.c.bf16 %v2048_v63, %v2044_v62  ;;  %v2063_v49 = vld [vmem:[%s19344_s27 + $0xca8] sm:$0xff]  ;;  %v2081_v59 = vld [vmem:[%s19344_s27 + $0xd38] sm:$0xff]  ;;  %v2076_v63 = vld [vmem:[%s19344_s27 + $0xd10] sm:$0xff] }
 0x242   :  { %8328 = vmatpush1.bf16.msra.mxu1 %v8327_v6  ;;  %v2053_v6 = vld [vmem:[%s19344_s27 + $0xc58] sm:$0xff]  ;;  %v8093_v42 = vpack.c.bf16 %v2063_v49, %v2059_v46  ;;  %v2067_v54 = vld [vmem:[%s19344_s27 + $0xcc8] sm:$0xff]  ;;  %v2100_v49 = vld [vmem:[%s19344_s27 + $0xdd0] sm:$0xff] }
 0x243   :  { %8068 = vmatpush1.bf16.msra.mxu0 %v8067_v8  ;;  %8330 = vmatprep.subr.bf16.mxu1 %v8329_v29  ;;  %v2057_v8 = vld [vmem:[%s19344_s27 + $0xc78] sm:$0xff] }
 0x244   :  { %8070 = vmatprep.subr.bf16.mxu0 %v8069_v13  ;;  %v8345_v16 = vpack.c.bf16 %v2057_v8, %v2053_v6  ;;  %v2085_v6 = vld [vmem:[%s19344_s27 + $0xd58] sm:$0xff] }
 0x245   :  { %v2089_v8 = vld [vmem:[%s19344_s27 + $0xd78] sm:$0xff] }
 0x246   :  { %8332 = vmatpush1.bf16.msra.mxu1 %v8331_v22  ;;  %v8085_v22 = vpack.c.bf16 %v2047_v11, %v2043_v17  ;;  %v8359_v17 = vpack.c.bf16 %v2080_v0, %v2076_v63  ;;  %v8099_v11 = vpack.c.bf16 %v2070_v5, %v2066_v1  ;;  %v2102_v63 = vld [vmem:[%s19344_s27 + $0xde0] sm:$0xff]  ;;  %v2117_v0 = vld [vmem:[%s19344_s27 + $0xe58] sm:$0xff]  ;;  %v2111_v5 = vld [vmem:[%s19344_s27 + $0xe28] sm:$0xff] }
 0x247   :  { %8072 = vmatpush1.bf16.msra.mxu0 %v8071_v3  ;;  %8334 = vmatprep.subr.bf16.mxu1 %v8333_v24  ;;  %v2042_v3 = vld [vmem:[%s19344_s27 + $0xc00] sm:$0xff]  ;;  %v2121_v1 = vld [vmem:[%s19344_s27 + $0xe78] sm:$0xff] }
 0x248   :  { %8074 = vmatprep.subr.bf16.mxu0 %v8073_v31  ;;  %v2046_v24 = vld [vmem:[%s19344_s27 + $0xc20] sm:$0xff]  ;;  %v2055_v31 = vld [vmem:[%s19344_s27 + $0xc68] sm:$0xff] }
 0x249   :  { %v1453_v56 = vpop.f32.mrb[4].mxu0  ;;  %v8087_v34 = vpack.c.bf16 %v2046_v24, %v2042_v3  ;;  %v2083_v3 = vld [vmem:[%s19344_s27 + $0xd48] sm:$0xff] }
 0x24a   :  { %8336 = vmatpush1.bf16.msra.mxu1 %v8335_v38  ;;  %v1455_v58 = vpop.f32.mrb[5].mxu0  ;;  %v1646_v60 = vadd.f32 %v1621_v40, %v1453_v56  ;;  %v8349_v38 = vpack.c.bf16 %v2065_v27, %v2061_v41  ;;  %v8089_v40 = vpack.c.bf16 %v2055_v31, %v2051_v28  ;;  %v2072_v56 = vld [vmem:[%s19344_s27 + $0xcf0] sm:$0xff]  ;;  %v2087_v24 = vld [vmem:[%s19344_s27 + $0xd68] sm:$0xff] }
 0x24b   :  { %v1647_v61 = vadd.f32 %v1625_v43, %v1455_v58  ;;  %8076 = vmatpush1.bf16.msra.mxu0 %v8075_v44  ;;  %8338 = vmatprep.subr.bf16.mxu1 %v8337_v45  ;;  %v2054_v43 = vld [vmem:[%s19344_s27 + $0xc60] sm:$0xff]  ;;  %v2069_v44 = vld [vmem:[%s19344_s27 + $0xcd8] sm:$0xff]  ;;  %v2092_v31 = vld [vmem:[%s19344_s27 + $0xd90] sm:$0xff]  ;;  %v8105_v35 = vpack.c.bf16 %v2087_v24, %v2083_v3 }
 0x24c   :  { %8078 = vmatprep.subr.bf16.mxu0 %v8077_v51  ;;  %v1654_v13 = vmax.f32 %v1646_v60, 0.0  ;;  %v2073_v45 = vld [vmem:[%s19344_s27 + $0xcf8] sm:$0xff]  ;;  %v8091_v51 = vpack.c.bf16 %v2054_v43, %v2050_v18  ;;  %v2062_v58 = vld [vmem:[%s19344_s27 + $0xca0] sm:$0xff]  ;;  %v2071_v60 = vld [vmem:[%s19344_s27 + $0xce8] sm:$0xff] }
 0x24d   :  { %v1655_v29 = vmax.f32 %v1647_v61, 0.0  ;;  %v8353_v52 = vpack.c.bf16 %v2073_v45, %v2069_v44  ;;  %v8355_v61 = vpack.c.bf16 %v2072_v56, %v2068_v55  ;;  %v2101_v18 = vld [vmem:[%s19344_s27 + $0xdd8] sm:$0xff]  ;;  %v2095_v43 = vld [vmem:[%s19344_s27 + $0xda8] sm:$0xff]  ;;  %v2094_v55 = vld [vmem:[%s19344_s27 + $0xda0] sm:$0xff] }
 0x24e   :  { %8340 = vmatpush1.bf16.msra.mxu1 %v8339_v47  ;;  %v2077_v47 = vld [vmem:[%s19344_s27 + $0xd18] sm:$0xff]  ;;  %v2124_v24 = vld [vmem:[%s19344_s27 + $0xe90] sm:$0xff] }
 0x24f   :  { %8080 = vmatpush1.bf16.msra.mxu0 %v8079_v32  ;;  %2582 = vmatprep.mubr.f32.mxu0 %v1655_v29  ;;  %v8095_v32 = vpack.c.bf16 %v2062_v58, %v2058_v57  ;;  %v8357_v62 = vpack.c.bf16 %v2081_v59, %v2077_v47  ;;  %v2109_v56 = vld [vmem:[%s19344_s27 + $0xe18] sm:$0xff]  ;;  %v2103_v58 = vld [vmem:[%s19344_s27 + $0xde8] sm:$0xff] }
 0x250   :  { %2866 = vmatprep.mubr.f32.mxu1 %v1655_v29  ;;  %8342 = vmatprep.subr.bf16.mxu1 %v8341_v2  ;;  %v8097_v2 = vpack.c.bf16 %v2071_v60, %v2067_v54  ;;  %v2075_v29 = vld [vmem:[%s19344_s27 + $0xd08] sm:$0xff]  ;;  %v2113_v57 = vld [vmem:[%s19344_s27 + $0xe38] sm:$0xff]  ;;  %v2108_v60 = vld [vmem:[%s19344_s27 + $0xe10] sm:$0xff] }
 0x251   :  { %2867 = vmatmul.mubr.f32.vlgmr.msra.gmra.mrb[4].mxu1 %v1654_v13  ;;  %8082 = vmatprep.subr.bf16.mxu0 %v8081_v9  ;;  %v2079_v9 = vld [vmem:[%s19344_s27 + $0xd28] sm:$0xff]  ;;  %v8373_v54 = vpack.c.bf16 %v2113_v57, %v2109_v56 }
 0x252   :  { %8344 = vmatpush1.bf16.msra.mxu1 %v8343_v12  ;;  %2937 = vmatprep.mubr.f32.mxu1 %v1657_v21  ;;  %v8361_v12 = vpack.c.bf16 %v2089_v8, %v2085_v6  ;;  %v8101_v19 = vpack.c.bf16 %v2079_v9, %v2075_v29  ;;  %v8377_v29 = vpack.c.bf16 %v2121_v1, %v2117_v0  ;;  %v2116_v9 = vld [vmem:[%s19344_s27 + $0xe50] sm:$0xff] }
 0x253   :  { %8084 = vmatpush1.bf16.msra.mxu0 %v8083_v15  ;;  %8346 = vmatprep.subr.bf16.mxu1 %v8345_v16  ;;  %v2088_v15 = vld [vmem:[%s19344_s27 + $0xd70] sm:$0xff]  ;;  %v2074_v16 = vld [vmem:[%s19344_s27 + $0xd00] sm:$0xff] }
 0x254   :  { %8086 = vmatprep.subr.bf16.mxu0 %v8085_v22  ;;  %v2097_v22 = vld [vmem:[%s19344_s27 + $0xdb8] sm:$0xff]  ;;  %v8103_v27 = vpack.c.bf16 %v2078_v20, %v2074_v16  ;;  %v2119_v20 = vld [vmem:[%s19344_s27 + $0xe68] sm:$0xff] }
 0x255   :  { %v2129_v16 = vld [vmem:[%s19344_s27 + $0xeb8] sm:$0xff] }
 0x256   :  { %8348 = vmatpush1.bf16.msra.mxu1 %v8347_v33  ;;  %2583 = vmatmul.mubr.f32.vlgmr.msra.gmra.mrb[6].mxu0 %v1654_v13  ;;  %v2084_v13 = vld [vmem:[%s19344_s27 + $0xd50] sm:$0xff] }
 0x257   :  { %8088 = vmatpush1.bf16.msra.mxu0 %v8087_v34  ;;  %2653 = vmatprep.mubr.f32.mxu0 %v1657_v21  ;;  %v2093_v21 = vld [vmem:[%s19344_s27 + $0xd98] sm:$0xff]  ;;  %v8363_v41 = vpack.c.bf16 %v2088_v15, %v2084_v13  ;;  %v2096_v33 = vld [vmem:[%s19344_s27 + $0xdb0] sm:$0xff]  ;;  %v2082_v34 = vld [vmem:[%s19344_s27 + $0xd40] sm:$0xff] }
 0x258   :  { %8350 = vmatprep.subr.bf16.mxu1 %v8349_v38  ;;  %8090 = vmatprep.subr.bf16.mxu0 %v8089_v40  ;;  %v8365_v28 = vpack.c.bf16 %v2097_v22, %v2093_v21  ;;  %v2105_v38 = vld [vmem:[%s19344_s27 + $0xdf8] sm:$0xff]  ;;  %v2091_v40 = vld [vmem:[%s19344_s27 + $0xd88] sm:$0xff]  ;;  %v8367_v44 = vpack.c.bf16 %v2096_v33, %v2092_v31  ;;  %v8107_v45 = vpack.c.bf16 %v2086_v36, %v2082_v34  ;;  %v2110_v13 = vld [vmem:[%s19344_s27 + $0xe20] sm:$0xff] }
 0x259   :  { %v8369_v46 = vpack.c.bf16 %v2105_v38, %v2101_v18  ;;  %v2125_v15 = vld [vmem:[%s19344_s27 + $0xe98] sm:$0xff]  ;;  %v2118_v31 = vld [vmem:[%s19344_s27 + $0xe60] sm:$0xff]  ;;  %v2127_v36 = vld [vmem:[%s19344_s27 + $0xea8] sm:$0xff] }
 0x25a   :  { %8352 = vmatpush1.bf16.msra.mxu1 %v8351_v50  ;;  %v2104_v50 = vld [vmem:[%s19344_s27 + $0xdf0] sm:$0xff]  ;;  %v8381_v3 = vpack.c.bf16 %v2129_v16, %v2125_v15  ;;  %v2133_v33 = vld [vmem:[%s19344_s27 + $0xed8] sm:$0xff]  ;;  %v1628_v16 = vsub.s32 6, %v10736_v10 }
 0x25b   :  { %8092 = vmatpush1.bf16.msra.mxu0 %v8091_v51  ;;  %8354 = vmatprep.subr.bf16.mxu1 %v8353_v52  ;;  %v2090_v51 = vld [vmem:[%s19344_s27 + $0xd80] sm:$0xff]  ;;  %v8109_v52 = vpack.c.bf16 %v2095_v43, %v2091_v40  ;;  %v8371_v47 = vpack.c.bf16 %v2104_v50, %v2100_v49  ;;  %v2137_v34 = vld [vmem:[%s19344_s27 + $0xef8] sm:$0xff]  ;;  %v2132_v43 = vld [vmem:[%s19344_s27 + $0xed0] sm:$0xff] }
 0x25c   :  { %8094 = vmatprep.subr.bf16.mxu0 %v8093_v42  ;;  %v2099_v42 = vld [vmem:[%s19344_s27 + $0xdc8] sm:$0xff]  ;;  %v8111_v59 = vpack.c.bf16 %v2094_v55, %v2090_v51  ;;  %v8385_v40 = vpack.c.bf16 %v2137_v34, %v2133_v33  ;;  %v2126_v49 = vld [vmem:[%s19344_s27 + $0xea0] sm:$0xff]  ;;  %v2141_v50 = vld [vmem:[%s19344_s27 + $0xf18] sm:$0xff] }
 0x25d   :  { %v2145_v51 = vld [vmem:[%s19344_s27 + $0xf38] sm:$0xff]  ;;  %v2135_v55 = vld [vmem:[%s19344_s27 + $0xee8] sm:$0xff] }
 0x25e   :  { %8356 = vmatpush1.bf16.msra.mxu1 %v8355_v61  ;;  %v2112_v61 = vld [vmem:[%s19344_s27 + $0xe30] sm:$0xff]  ;;  %v2159_v33 = vld [vmem:[%s19344_s27 + $0xfa8] sm:$0xff]  ;;  %v5745_v10 = vld [vmem:[%s19315_s22 + $0x58] sm:$0xff] }
 0x25f   :  { %8096 = vmatpush1.bf16.msra.mxu0 %v8095_v32  ;;  %8358 = vmatprep.subr.bf16.mxu1 %v8357_v62  ;;  %v2098_v32 = vld [vmem:[%s19344_s27 + $0xdc0] sm:$0xff]  ;;  %v8113_v62 = vpack.c.bf16 %v2103_v58, %v2099_v42  ;;  %v8375_v6 = vpack.c.bf16 %v2112_v61, %v2108_v60  ;;  %v8389_v42 = vpack.c.bf16 %v2145_v51, %v2141_v50  ;;  %v2140_v58 = vld [vmem:[%s19344_s27 + $0xf10] sm:$0xff]  ;;  %v2149_v61 = vld [vmem:[%s19344_s27 + $0xf58] sm:$0xff] }
 0x260   :  { %8098 = vmatprep.subr.bf16.mxu0 %v8097_v2  ;;  %v2107_v2 = vld [vmem:[%s19344_s27 + $0xe08] sm:$0xff]  ;;  %v8115_v8 = vpack.c.bf16 %v2102_v63, %v2098_v32  ;;  %v2134_v60 = vld [vmem:[%s19344_s27 + $0xee0] sm:$0xff]  ;;  %v2153_v32 = vld [vmem:[%s19344_s27 + $0xf78] sm:$0xff] }
 0x261   :  { %v2143_v63 = vld [vmem:[%s19344_s27 + $0xf28] sm:$0xff] }
 0x262   :  { %8360 = vmatpush1.bf16.msra.mxu1 %v8359_v17  ;;  %v2120_v17 = vld [vmem:[%s19344_s27 + $0xe70] sm:$0xff] }
 0x263   :  { %8100 = vmatpush1.bf16.msra.mxu0 %v8099_v11  ;;  %8362 = vmatprep.subr.bf16.mxu1 %v8361_v12  ;;  %v2106_v11 = vld [vmem:[%s19344_s27 + $0xe00] sm:$0xff]  ;;  %v8117_v12 = vpack.c.bf16 %v2111_v5, %v2107_v2  ;;  %v8379_v21 = vpack.c.bf16 %v2120_v17, %v2116_v9  ;;  %v8393_v2 = vpack.c.bf16 %v2153_v32, %v2149_v61  ;;  %v2148_v5 = vld [vmem:[%s19344_s27 + $0xf50] sm:$0xff]  ;;  %v2157_v17 = vld [vmem:[%s19344_s27 + $0xf98] sm:$0xff] }
 0x264   :  { %8102 = vmatprep.subr.bf16.mxu0 %v8101_v19  ;;  %v2115_v19 = vld [vmem:[%s19344_s27 + $0xe48] sm:$0xff]  ;;  %v8119_v22 = vpack.c.bf16 %v2110_v13, %v2106_v11  ;;  %v2142_v9 = vld [vmem:[%s19344_s27 + $0xf20] sm:$0xff]  ;;  %v2161_v11 = vld [vmem:[%s19344_s27 + $0xfb8] sm:$0xff] }
 0x265   :  { %v2151_v13 = vld [vmem:[%s19344_s27 + $0xf68] sm:$0xff]  ;;  %v3109_v61 = vld [vmem:[%s19346_s30 + $0x38] sm:$0xff] }
 0x266   :  { %8364 = vmatpush1.bf16.msra.mxu1 %v8363_v41  ;;  %v2128_v41 = vld [vmem:[%s19344_s27 + $0xeb0] sm:$0xff] }
 0x267   :  { %8104 = vmatpush1.bf16.msra.mxu0 %v8103_v27  ;;  %8366 = vmatprep.subr.bf16.mxu1 %v8365_v28  ;;  %v2114_v27 = vld [vmem:[%s19344_s27 + $0xe40] sm:$0xff]  ;;  %v8121_v28 = vpack.c.bf16 %v2119_v20, %v2115_v19  ;;  %v8383_v18 = vpack.c.bf16 %v2128_v41, %v2124_v24  ;;  %v8397_v20 = vpack.c.bf16 %v2161_v11, %v2157_v17  ;;  %v3117_v17 = vld [vmem:[%s19346_s30 + $0x78] sm:$0xff] }
 0x268   :  { %8106 = vmatprep.subr.bf16.mxu0 %v8105_v35  ;;  %v2123_v35 = vld [vmem:[%s19344_s27 + $0xe88] sm:$0xff]  ;;  %v8123_v38 = vpack.c.bf16 %v2118_v31, %v2114_v27  ;;  %v2150_v41 = vld [vmem:[%s19344_s27 + $0xf60] sm:$0xff]  ;;  %v2165_v27 = vld [vmem:[%s19344_s27 + $0xfd8] sm:$0xff] }
 0x269   :  { %v2155_v31 = vld [vmem:[%s19344_s27 + $0xf88] sm:$0xff] }
 0x26a   :  { %8368 = vmatpush1.bf16.msra.mxu1 %v8367_v44  ;;  %v2136_v44 = vld [vmem:[%s19344_s27 + $0xef0] sm:$0xff] }
 0x26b   :  { %8108 = vmatpush1.bf16.msra.mxu0 %v8107_v45  ;;  %8370 = vmatprep.subr.bf16.mxu1 %v8369_v46  ;;  %v2122_v45 = vld [vmem:[%s19344_s27 + $0xe80] sm:$0xff]  ;;  %v8125_v46 = vpack.c.bf16 %v2127_v36, %v2123_v35  ;;  %v8387_v56 = vpack.c.bf16 %v2136_v44, %v2132_v43  ;;  %v1629_v35 = vrot.slane %v13688_v39, %v1628_v16 }
 0x26c   :  { %8110 = vmatprep.subr.bf16.mxu0 %v8109_v52  ;;  %v2131_v52 = vld [vmem:[%s19344_s27 + $0xec8] sm:$0xff]  ;;  %v8127_v57 = vpack.c.bf16 %v2126_v49, %v2122_v45  ;;  %v8141_v43 = vpack.c.bf16 %v2159_v33, %v2155_v31  ;;  %v2154_v44 = vld [vmem:[%s19344_s27 + $0xf80] sm:$0xff] }
 0x26d   :  { %v2158_v39 = vld [vmem:[%s19344_s27 + $0xfa0] sm:$0xff]  ;;  %v2163_v45 = vld [vmem:[%s19344_s27 + $0xfc8] sm:$0xff]  ;;  %v1648_v50 = vadd.f32 %v1629_v35, %v13317_v14  ;;  %v3105_v14 = vld [vmem:[%s19346_s30 + $0x18] sm:$0xff] }
 0x26e   :  { %8372 = vmatpush1.bf16.msra.mxu1 %v8371_v47  ;;  %v2144_v47 = vld [vmem:[%s19344_s27 + $0xf30] sm:$0xff]  ;;  %v8143_v51 = vpack.c.bf16 %v2158_v39, %v2154_v44  ;;  %v3122_v33 = vld [vmem:[%s19346_s30 + $0xa0] sm:$0xff]  ;;  %v3127_v35 = vld [vmem:[%s19346_s30 + $0xc8] sm:$0xff] }
 0x26f   :  { %8112 = vmatpush1.bf16.msra.mxu0 %v8111_v59  ;;  %8374 = vmatprep.subr.bf16.mxu1 %v8373_v54  ;;  %v2130_v59 = vld [vmem:[%s19344_s27 + $0xec0] sm:$0xff]  ;;  %v8129_v54 = vpack.c.bf16 %v2135_v55, %v2131_v52  ;;  %v8391_v0 = vpack.c.bf16 %v2144_v47, %v2140_v58  ;;  %v3131_v44 = vld [vmem:[%s19346_s30 + $0xe8] sm:$0xff]  ;;  %v3133_v39 = vld [vmem:[%s19346_s30 + $0xf8] sm:$0xff] }
 0x270   :  { %8114 = vmatprep.subr.bf16.mxu0 %v8113_v62  ;;  %v2139_v62 = vld [vmem:[%s19344_s27 + $0xf08] sm:$0xff]  ;;  %v8131_v1 = vpack.c.bf16 %v2134_v60, %v2130_v59  ;;  %v2162_v55 = vld [vmem:[%s19344_s27 + $0xfc0] sm:$0xff] }
 0x271   :  { %v3102_v59 = vld [vmem:[%s19346_s30] sm:$0xff]  ;;  %v3107_v60 = vld [vmem:[%s19346_s30 + $0x28] sm:$0xff] }
 0x272   :  { %8376 = vmatpush1.bf16.msra.mxu1 %v8375_v6  ;;  %v2152_v6 = vld [vmem:[%s19344_s27 + $0xf70] sm:$0xff] }
 0x273   :  { %8116 = vmatpush1.bf16.msra.mxu0 %v8115_v8  ;;  %8378 = vmatprep.subr.bf16.mxu1 %v8377_v29  ;;  %v2138_v8 = vld [vmem:[%s19344_s27 + $0xf00] sm:$0xff]  ;;  %v8133_v29 = vpack.c.bf16 %v2143_v63, %v2139_v62  ;;  %v8395_v15 = vpack.c.bf16 %v2152_v6, %v2148_v5  ;;  %v8409_v62 = vpack.c.bf16 %v3109_v61, %v3107_v60  ;;  %v2980_v60 = vld [vmem:[%s19347_s2 + $0x30] sm:$0xff]  ;;  %v2983_v61 = vld [vmem:[%s19347_s2 + $0x48] sm:$0xff] }
 0x274   :  { %8118 = vmatprep.subr.bf16.mxu0 %v8117_v12  ;;  %v2147_v12 = vld [vmem:[%s19344_s27 + $0xf48] sm:$0xff]  ;;  %v8135_v19 = vpack.c.bf16 %v2142_v9, %v2138_v8  ;;  %v3106_v63 = vld [vmem:[%s19346_s30 + $0x20] sm:$0xff] }
 0x275   :  { %v8137_v24 = vpack.c.bf16 %v2151_v13, %v2147_v12  ;;  %v3110_v8 = vld [vmem:[%s19346_s30 + $0x40] sm:$0xff]  ;;  %v3115_v9 = vld [vmem:[%s19346_s30 + $0x68] sm:$0xff] }
 0x276   :  { %8380 = vmatpush1.bf16.msra.mxu1 %v8379_v21  ;;  %v2156_v21 = vld [vmem:[%s19344_s27 + $0xf90] sm:$0xff]  ;;  %v8417_v12 = vpack.c.bf16 %v3117_v17, %v3115_v9  ;;  %v3114_v13 = vld [vmem:[%s19346_s30 + $0x60] sm:$0xff] }
 0x277   :  { %8120 = vmatpush1.bf16.msra.mxu0 %v8119_v22  ;;  %8382 = vmatprep.subr.bf16.mxu1 %v8381_v3  ;;  %v2160_v22 = vld [vmem:[%s19344_s27 + $0xfb0] sm:$0xff]  ;;  %v2146_v3 = vld [vmem:[%s19344_s27 + $0xf40] sm:$0xff] }
 0x278   :  { %8122 = vmatprep.subr.bf16.mxu0 %v8121_v28  ;;  %v2169_v28 = vld [vmem:[%s19344_s27 + $0xff8] sm:$0xff]  ;;  %v8399_v34 = vpack.c.bf16 %v2160_v22, %v2156_v21  ;;  %v8139_v36 = vpack.c.bf16 %v2150_v41, %v2146_v3  ;;  %v3118_v3 = vld [vmem:[%s19346_s30 + $0x80] sm:$0xff]  ;;  %v3123_v41 = vld [vmem:[%s19346_s30 + $0xa8] sm:$0xff] }
 0x279   :  { %v2986_v9 = vld [vmem:[%s19347_s2 + $0x60] sm:$0xff]  ;;  %v2988_v17 = vld [vmem:[%s19347_s2 + $0x70] sm:$0xff] }
 0x27a   :  { %8384 = vmatpush1.bf16.msra.mxu1 %v8383_v18  ;;  %v8401_v18 = vpack.c.bf16 %v2169_v28, %v2165_v27  ;;  %v3125_v27 = vld [vmem:[%s19346_s30 + $0xb8] sm:$0xff] }
 0x27b   :  { %8124 = vmatpush1.bf16.msra.mxu0 %v8123_v38  ;;  %8386 = vmatprep.subr.bf16.mxu1 %v8385_v40  ;;  %v2164_v38 = vld [vmem:[%s19344_s27 + $0xfd0] sm:$0xff]  ;;  %v8425_v31 = vpack.c.bf16 %v3125_v27, %v3123_v41  ;;  %v2994_v41 = vld [vmem:[%s19347_s2 + $0xa0] sm:$0xff] }
 0x27c   :  { %8126 = vmatprep.subr.bf16.mxu0 %v8125_v46  ;;  %v2168_v40 = vld [vmem:[%s19344_s27 + $0xff0] sm:$0xff]  ;;  %v2167_v46 = vld [vmem:[%s19344_s27 + $0xfe8] sm:$0xff] }
 0x27d   :  { %v8403_v49 = vpack.c.bf16 %v2168_v40, %v2164_v38  ;;  %v8145_v52 = vpack.c.bf16 %v2167_v46, %v2163_v45  ;;  %v3126_v40 = vld [vmem:[%s19346_s30 + $0xc0] sm:$0xff]  ;;  %v8433_v46 = vpack.c.bf16 %v3133_v39, %v3131_v44  ;;  %v2996_v27 = vld [vmem:[%s19347_s2 + $0xb0] sm:$0xff] }
 0x27e   :  { %8388 = vmatpush1.bf16.msra.mxu1 %v8387_v56  ;;  %v2166_v56 = vld [vmem:[%s19344_s27 + $0xfe0] sm:$0xff]  ;;  %v3004_v39 = vld [vmem:[%s19347_s2 + $0xf0] sm:$0xff] }
 0x27f   :  { %8128 = vmatpush1.bf16.msra.mxu0 %v8127_v57  ;;  %8390 = vmatprep.subr.bf16.mxu1 %v8389_v42  ;;  %v3103_v57 = vld [vmem:[%s19346_s30 + $0x8] sm:$0xff]  ;;  %v1656_v42 = vmax.f32 %v1648_v50, 0.0  ;;  %v8147_v58 = vpack.c.bf16 %v2166_v56, %v2162_v55  ;;  %v3132_v50 = vld [vmem:[%s19346_s30 + $0xf0] sm:$0xff]  ;;  %v3002_v44 = vld [vmem:[%s19347_s2 + $0xe0] sm:$0xff] }
 0x280   :  { %8130 = vmatprep.subr.bf16.mxu0 %v8129_v54  ;;  %v8405_v47 = vpack.c.bf16 %v3105_v14, %v3103_v57  ;;  %v3104_v54 = vld [vmem:[%s19346_s30 + $0x10] sm:$0xff]  ;;  %v2974_v57 = vld [vmem:[%s19347_s2] sm:$0xff] }
 0x281   :  { %v8407_v32 = vpack.c.bf16 %v3104_v54, %v3102_v59  ;;  %v2976_v14 = vld [vmem:[%s19347_s2 + $0x10] sm:$0xff]  ;;  %v2978_v54 = vld [vmem:[%s19347_s2 + $0x20] sm:$0xff] }
 0x282   :  { %8392 = vmatpush1.bf16.msra.mxu1 %v8391_v0  ;;  %v3108_v0 = vld [vmem:[%s19346_s30 + $0x30] sm:$0xff] }
 0x283   :  { %8132 = vmatpush1.bf16.msra.mxu0 %v8131_v1  ;;  %8394 = vmatprep.subr.bf16.mxu1 %v8393_v2  ;;  %v3111_v1 = vld [vmem:[%s19346_s30 + $0x48] sm:$0xff]  ;;  %v3113_v2 = vld [vmem:[%s19346_s30 + $0x58] sm:$0xff]  ;;  %v8411_v5 = vpack.c.bf16 %v3108_v0, %v3106_v63  ;;  %v8443_v63 = vpack.c.bf16 %v2980_v60, %v2978_v54 }
 0x284   :  { %8134 = vmatprep.subr.bf16.mxu0 %v8133_v29  ;;  %v8413_v6 = vpack.c.bf16 %v3113_v2, %v3111_v1  ;;  %v3112_v29 = vld [vmem:[%s19346_s30 + $0x50] sm:$0xff]  ;;  %v2982_v1 = vld [vmem:[%s19347_s2 + $0x40] sm:$0xff] }
 0x285   :  { %v8415_v11 = vpack.c.bf16 %v3112_v29, %v3110_v8  ;;  %v2984_v2 = vld [vmem:[%s19347_s2 + $0x50] sm:$0xff] }
 0x286   :  { %8396 = vmatpush1.bf16.msra.mxu1 %v8395_v15  ;;  %v3116_v15 = vld [vmem:[%s19346_s30 + $0x70] sm:$0xff]  ;;  %v8447_v8 = vpack.c.bf16 %v2984_v2, %v2982_v1 }
 0x287   :  { %8136 = vmatpush1.bf16.msra.mxu0 %v8135_v19  ;;  %8398 = vmatprep.subr.bf16.mxu1 %v8397_v20  ;;  %v3119_v19 = vld [vmem:[%s19346_s30 + $0x88] sm:$0xff]  ;;  %v3121_v20 = vld [vmem:[%s19346_s30 + $0x98] sm:$0xff]  ;;  %v8419_v21 = vpack.c.bf16 %v3116_v15, %v3114_v13  ;;  %v8451_v13 = vpack.c.bf16 %v2988_v17, %v2986_v9 }
 0x288   :  { %8138 = vmatprep.subr.bf16.mxu0 %v8137_v24  ;;  %v8421_v22 = vpack.c.bf16 %v3121_v20, %v3119_v19  ;;  %v3120_v24 = vld [vmem:[%s19346_s30 + $0x90] sm:$0xff]  ;;  %v2990_v19 = vld [vmem:[%s19347_s2 + $0x80] sm:$0xff] }
 0x289   :  { %v8423_v28 = vpack.c.bf16 %v3120_v24, %v3118_v3  ;;  %v2992_v20 = vld [vmem:[%s19347_s2 + $0x90] sm:$0xff] }
 0x28a   :  { %8400 = vmatpush1.bf16.msra.mxu1 %v8399_v34  ;;  %v3124_v34 = vld [vmem:[%s19346_s30 + $0xb0] sm:$0xff]  ;;  %v8455_v3 = vpack.c.bf16 %v2992_v20, %v2990_v19 }
 0x28b   :  { %8140 = vmatpush1.bf16.msra.mxu0 %v8139_v36  ;;  %8402 = vmatprep.subr.bf16.mxu1 %v8401_v18  ;;  %v3129_v36 = vld [vmem:[%s19346_s30 + $0xd8] sm:$0xff]  ;;  %v8427_v18 = vpack.c.bf16 %v3124_v34, %v3122_v33  ;;  %v8459_v33 = vpack.c.bf16 %v2996_v27, %v2994_v41 }
 0x28c   :  { %8142 = vmatprep.subr.bf16.mxu0 %v8141_v43  ;;  %v8429_v38 = vpack.c.bf16 %v3129_v36, %v3127_v35  ;;  %v3128_v43 = vld [vmem:[%s19346_s30 + $0xd0] sm:$0xff]  ;;  %v2998_v35 = vld [vmem:[%s19347_s2 + $0xc0] sm:$0xff] }
 0x28d   :  { %v8431_v45 = vpack.c.bf16 %v3128_v43, %v3126_v40  ;;  %v3000_v36 = vld [vmem:[%s19347_s2 + $0xd0] sm:$0xff] }
 0x28e   :  { %8404 = vmatpush1.bf16.msra.mxu1 %v8403_v49  ;;  %v3130_v49 = vld [vmem:[%s19346_s30 + $0xe0] sm:$0xff]  ;;  %v8463_v40 = vpack.c.bf16 %v3000_v36, %v2998_v35 }
 0x28f   :  { %8144 = vmatpush1.bf16.msra.mxu0 %v8143_v51  ;;  %v2975_v51 = vld [vmem:[%s19347_s2 + $0x8] sm:$0xff]  ;;  %v8435_v55 = vpack.c.bf16 %v3132_v50, %v3130_v49  ;;  %v8467_v49 = vpack.c.bf16 %v3004_v39, %v3002_v44 }
 0x290   :  { %8146 = vmatprep.subr.bf16.mxu0 %v8145_v52  ;;  %v2977_v52 = vld [vmem:[%s19347_s2 + $0x18] sm:$0xff] }
 0x291   :  { %2938 = vmatmul.mubr.f32.vlgmr.msra.gmra.mrb[4].mxu1 %v1656_v42  ;;  %v8437_v56 = vpack.c.bf16 %v2977_v52, %v2975_v51  ;;  %v3006_v51 = vld [vmem:[%s19347_s2 + $0x100] sm:$0xff]  ;;  %v3008_v52 = vld [vmem:[%s19347_s2 + $0x110] sm:$0xff] }
 0x292   :  { %7186 = vmatprep.mubr.msk.f32.mxu1 %vm10198_vm0, %v10195_v7 }
 0x293   :  { %8148 = vmatpush1.bf16.msra.mxu0 %v8147_v58  ;;  %v2981_v58 = vld [vmem:[%s19347_s2 + $0x38] sm:$0xff] }
 0x294   :  { %8406 = vmatprep.subr.bf16.mxu0 %v8405_v47  ;;  %v8439_v47 = vpack.c.bf16 %v2976_v14, %v2974_v57  ;;  %v8471_v57 = vpack.c.bf16 %v3008_v52, %v3006_v51  ;;  %v3398_v52 = vld [vmem:[%s19305_s12 + $0x18] sm:$0xff] }
 0x296   :  { %2654 = vmatmul.mubr.f32.vlgmr.msra.gmra.mrb[6].mxu0 %v1656_v42  ;;  %v2979_v42 = vld [vmem:[%s19347_s2 + $0x28] sm:$0xff] }
 0x297   :  { %8408 = vmatpush1.bf16.msra.mxu0 %v8407_v32  ;;  %3198 = vmatprep.mubr.f32.mxu0 %v10195_v7  ;;  %v8441_v59 = vpack.c.bf16 %v2981_v58, %v2979_v42  ;;  %v2985_v32 = vld [vmem:[%s19347_s2 + $0x58] sm:$0xff]  ;;  %v3010_v42 = vld [vmem:[%s19347_s2 + $0x120] sm:$0xff]  ;;  %v3012_v58 = vld [vmem:[%s19347_s2 + $0x130] sm:$0xff] }
 0x298   :  { %8410 = vmatprep.subr.bf16.mxu0 %v8409_v62  ;;  %v14243_v62 = vld [vmem:[%s19341_s28] sm:$0x3]  ;;  %v8445_v0 = vpack.c.bf16 %v2985_v32, %v2983_v61  ;;  %v8475_v54 = vpack.c.bf16 %v3012_v58, %v3010_v42  ;;  %v3016_v32 = vld [vmem:[%s19347_s2 + $0x150] sm:$0xff]  ;;  %v3402_v58 = vld [vmem:[%s19305_s12 + $0x38] sm:$0xff] }
 0x299   :  { %v3014_v61 = vld [vmem:[%s19347_s2 + $0x140] sm:$0xff]  ;;  %v3401_v42 = vld [vmem:[%s19305_s12 + $0x30] sm:$0xff] }
 0x29a   :  { %v8479_v1 = vpack.c.bf16 %v3016_v32, %v3014_v61  ;;  %v3405_v61 = vld [vmem:[%s19305_s12 + $0x50] sm:$0xff]  ;;  %v3406_v32 = vld [vmem:[%s19305_s12 + $0x58] sm:$0xff] }
 0x29b   :  { %8412 = vmatpush1.bf16.msra.mxu0 %v8411_v5  ;;  %v2987_v5 = vld [vmem:[%s19347_s2 + $0x68] sm:$0xff] }
 0x29c   :  { %8414 = vmatprep.subr.bf16.mxu0 %v8413_v6  ;;  %v2989_v6 = vld [vmem:[%s19347_s2 + $0x78] sm:$0xff] }
 0x29d   :  { %v8449_v29 = vpack.c.bf16 %v2989_v6, %v2987_v5  ;;  %v3018_v5 = vld [vmem:[%s19347_s2 + $0x160] sm:$0xff]  ;;  %v3020_v6 = vld [vmem:[%s19347_s2 + $0x170] sm:$0xff] }
 0x29e   :  { %v8483_v9 = vpack.c.bf16 %v3020_v6, %v3018_v5  ;;  %v3409_v5 = vld [vmem:[%s19305_s12 + $0x70] sm:$0xff]  ;;  %v3410_v6 = vld [vmem:[%s19305_s12 + $0x78] sm:$0xff] }
 0x29f   :  { %8416 = vmatpush1.bf16.msra.mxu0 %v8415_v11  ;;  %v2991_v11 = vld [vmem:[%s19347_s2 + $0x88] sm:$0xff] }
 0x2a0   :  { %8418 = vmatprep.subr.bf16.mxu0 %v8417_v12  ;;  %v2993_v12 = vld [vmem:[%s19347_s2 + $0x98] sm:$0xff] }
 0x2a1   :  { %v8453_v15 = vpack.c.bf16 %v2993_v12, %v2991_v11  ;;  %v3022_v11 = vld [vmem:[%s19347_s2 + $0x180] sm:$0xff]  ;;  %v3024_v12 = vld [vmem:[%s19347_s2 + $0x190] sm:$0xff] }
 0x2a2   :  { %v8487_v19 = vpack.c.bf16 %v3024_v12, %v3022_v11  ;;  %v3363_v11 = vld [vmem:[%s19304_s11] sm:$0xff]  ;;  %v3364_v12 = vld [vmem:[%s19304_s11 + $0x8] sm:$0xff] }
 0x2a3   :  { %8420 = vmatpush1.bf16.msra.mxu0 %v8419_v21  ;;  %v2995_v21 = vld [vmem:[%s19347_s2 + $0xa8] sm:$0xff] }
 0x2a4   :  { %8422 = vmatprep.subr.bf16.mxu0 %v8421_v22  ;;  %v2997_v22 = vld [vmem:[%s19347_s2 + $0xb8] sm:$0xff] }
 0x2a5   :  { %v8457_v24 = vpack.c.bf16 %v2997_v22, %v2995_v21  ;;  %v3026_v21 = vld [vmem:[%s19347_s2 + $0x1a0] sm:$0xff]  ;;  %v3028_v22 = vld [vmem:[%s19347_s2 + $0x1b0] sm:$0xff] }
 0x2a6   :  { %v8491_v41 = vpack.c.bf16 %v3028_v22, %v3026_v21  ;;  %v3365_v21 = vld [vmem:[%s19304_s11 + $0x10] sm:$0xff]  ;;  %v3366_v22 = vld [vmem:[%s19304_s11 + $0x18] sm:$0xff] }
 0x2a7   :  { %8424 = vmatpush1.bf16.msra.mxu0 %v8423_v28  ;;  %v2999_v28 = vld [vmem:[%s19347_s2 + $0xc8] sm:$0xff] }
 0x2a8   :  { %8426 = vmatprep.subr.bf16.mxu0 %v8425_v31  ;;  %v3001_v31 = vld [vmem:[%s19347_s2 + $0xd8] sm:$0xff] }
 0x2a9   :  { %v8461_v34 = vpack.c.bf16 %v3001_v31, %v2999_v28  ;;  %v3030_v28 = vld [vmem:[%s19347_s2 + $0x1c0] sm:$0xff]  ;;  %v3032_v31 = vld [vmem:[%s19347_s2 + $0x1d0] sm:$0xff] }
 0x2aa   :  { %v8495_v35 = vpack.c.bf16 %v3032_v31, %v3030_v28  ;;  %v3367_v28 = vld [vmem:[%s19304_s11 + $0x20] sm:$0xff]  ;;  %v3368_v31 = vld [vmem:[%s19304_s11 + $0x28] sm:$0xff] }
 0x2ab   :  { %8428 = vmatpush1.bf16.msra.mxu0 %v8427_v18  ;;  %v3003_v18 = vld [vmem:[%s19347_s2 + $0xe8] sm:$0xff] }
 0x2ac   :  { %8430 = vmatprep.subr.bf16.mxu0 %v8429_v38  ;;  %v3005_v38 = vld [vmem:[%s19347_s2 + $0xf8] sm:$0xff] }
 0x2ad   :  { %v8465_v43 = vpack.c.bf16 %v3005_v38, %v3003_v18  ;;  %v3034_v18 = vld [vmem:[%s19347_s2 + $0x1e0] sm:$0xff]  ;;  %v3036_v38 = vld [vmem:[%s19347_s2 + $0x1f0] sm:$0xff] }
 0x2ae   :  { %v8499_v44 = vpack.c.bf16 %v3036_v38, %v3034_v18  ;;  %v3370_v18 = vld [vmem:[%s19304_s11 + $0x38] sm:$0xff]  ;;  %v3387_v38 = vld [vmem:[%s19304_s11 + $0xc0] sm:$0xff] }
 0x2af   :  { %8432 = vmatpush1.bf16.msra.mxu0 %v8431_v45  ;;  %v3007_v45 = vld [vmem:[%s19347_s2 + $0x108] sm:$0xff] }
 0x2b0   :  { %8434 = vmatprep.subr.bf16.mxu0 %v8433_v46  ;;  %v3009_v46 = vld [vmem:[%s19347_s2 + $0x118] sm:$0xff] }
 0x2b1   :  { %v8469_v50 = vpack.c.bf16 %v3009_v46, %v3007_v45  ;;  %v3395_v45 = vld [vmem:[%s19305_s12] sm:$0xff]  ;;  %v3396_v46 = vld [vmem:[%s19305_s12 + $0x8] sm:$0xff] }
 0x2b2   :  { %v8566_v51 = vpack.c.bf16 %v3396_v46, %v3395_v45  ;;  %v3372_v45 = vld [vmem:[%s19304_s11 + $0x48] sm:$0xff]  ;;  %v3389_v46 = vld [vmem:[%s19304_s11 + $0xd0] sm:$0xff] }
 0x2b3   :  { %8436 = vmatpush1.bf16.msra.mxu0 %v8435_v55  ;;  %v3011_v55 = vld [vmem:[%s19347_s2 + $0x128] sm:$0xff] }
 0x2b4   :  { %8438 = vmatprep.subr.bf16.mxu0 %v8437_v56  ;;  %v3013_v56 = vld [vmem:[%s19347_s2 + $0x138] sm:$0xff] }
 0x2b5   :  { %v8473_v14 = vpack.c.bf16 %v3013_v56, %v3011_v55  ;;  %v3399_v56 = vld [vmem:[%s19305_s12 + $0x20] sm:$0xff] }
 0x2b6   :  { %3199 = vmatmul.mubr.f32.vlgmr.msra.gmra.mrb[8].mxu0 %v14243_v62 }
 0x2b7   :  { %8440 = vmatpush1.bf16.msra.mxu0 %v8439_v47  ;;  %v3015_v47 = vld [vmem:[%s19347_s2 + $0x148] sm:$0xff] }
 0x2b8   :  { %8442 = vmatprep.subr.bf16.mxu0 %v8441_v59  ;;  %v3017_v59 = vld [vmem:[%s19347_s2 + $0x158] sm:$0xff] }
 0x2b9   :  { %v8477_v60 = vpack.c.bf16 %v3017_v59, %v3015_v47  ;;  %v8575_v47 = vpack.c.bf16 %v3402_v58, %v3401_v42  ;;  %v3403_v59 = vld [vmem:[%s19305_s12 + $0x40] sm:$0xff]  ;;  %v3392_v42 = vld [vmem:[%s19304_s11 + $0xe8] sm:$0xff] }
 0x2bb   :  { %8444 = vmatpush1.bf16.msra.mxu0 %v8443_v63  ;;  %v3019_v63 = vld [vmem:[%s19347_s2 + $0x168] sm:$0xff] }
 0x2bc   :  { %8446 = vmatprep.subr.bf16.mxu0 %v8445_v0  ;;  %v3021_v0 = vld [vmem:[%s19347_s2 + $0x178] sm:$0xff] }
 0x2bd   :  { %v8481_v2 = vpack.c.bf16 %v3021_v0, %v3019_v63  ;;  %v8581_v63 = vpack.c.bf16 %v3406_v32, %v3405_v61  ;;  %v3407_v0 = vld [vmem:[%s19305_s12 + $0x60] sm:$0xff] }
 0x2bf   :  { %8448 = vmatpush1.bf16.msra.mxu0 %v8447_v8  ;;  %v3023_v8 = vld [vmem:[%s19347_s2 + $0x188] sm:$0xff] }
 0x2c0   :  { %8450 = vmatprep.subr.bf16.mxu0 %v8449_v29  ;;  %v3025_v29 = vld [vmem:[%s19347_s2 + $0x198] sm:$0xff] }
 0x2c1   :  { %v8485_v17 = vpack.c.bf16 %v3025_v29, %v3023_v8  ;;  %v3379_v8 = vld [vmem:[%s19304_s11 + $0x80] sm:$0xff]  ;;  %v3380_v29 = vld [vmem:[%s19304_s11 + $0x88] sm:$0xff] }
 0x2c3   :  { %8452 = vmatpush1.bf16.msra.mxu0 %v8451_v13  ;;  %v3027_v13 = vld [vmem:[%s19347_s2 + $0x1a8] sm:$0xff] }
 0x2c4   :  { %8454 = vmatprep.subr.bf16.mxu0 %v8453_v15  ;;  %v3029_v15 = vld [vmem:[%s19347_s2 + $0x1b8] sm:$0xff] }
 0x2c5   :  { %v8489_v20 = vpack.c.bf16 %v3029_v15, %v3027_v13  ;;  %v3381_v13 = vld [vmem:[%s19304_s11 + $0x90] sm:$0xff]  ;;  %v3382_v15 = vld [vmem:[%s19304_s11 + $0x98] sm:$0xff] }
 0x2c7   :  { %8456 = vmatpush1.bf16.msra.mxu0 %v8455_v3  ;;  %v3031_v3 = vld [vmem:[%s19347_s2 + $0x1c8] sm:$0xff] }
 0x2c8   :  { %8458 = vmatprep.subr.bf16.mxu0 %v8457_v24  ;;  %v3033_v24 = vld [vmem:[%s19347_s2 + $0x1d8] sm:$0xff] }
 0x2c9   :  { %v8493_v27 = vpack.c.bf16 %v3033_v24, %v3031_v3  ;;  %v3383_v3 = vld [vmem:[%s19304_s11 + $0xa0] sm:$0xff]  ;;  %v3384_v24 = vld [vmem:[%s19304_s11 + $0xa8] sm:$0xff] }
 0x2cb   :  { %8460 = vmatpush1.bf16.msra.mxu0 %v8459_v33  ;;  %v3035_v33 = vld [vmem:[%s19347_s2 + $0x1e8] sm:$0xff] }
 0x2cc   :  { %8462 = vmatprep.subr.bf16.mxu0 %v8461_v34  ;;  %v3037_v34 = vld [vmem:[%s19347_s2 + $0x1f8] sm:$0xff] }
 0x2cd   :  { %v8497_v36 = vpack.c.bf16 %v3037_v34, %v3035_v33  ;;  %v3385_v33 = vld [vmem:[%s19304_s11 + $0xb0] sm:$0xff]  ;;  %v8599_v34 = vpack.c.bf16 %v3368_v31, %v3367_v28  ;;  %v3051_v31 = vld [vmem:[%s19347_s2 + $0x268] sm:$0xff] }
 0x2ce   :  { %v3048_v28 = vld [vmem:[%s19347_s2 + $0x250] sm:$0xff] }
 0x2cf   :  { %8464 = vmatpush1.bf16.msra.mxu0 %v8463_v40  ;;  %v3039_v40 = vld [vmem:[%s19347_s2 + $0x208] sm:$0xff] }
 0x2d0   :  { %8466 = vmatprep.subr.bf16.mxu0 %v8465_v43  ;;  %v3041_v43 = vld [vmem:[%s19347_s2 + $0x218] sm:$0xff] }
 0x2d1   :  { %v8501_v39 = vpack.c.bf16 %v3041_v43, %v3039_v40  ;;  %v3388_v40 = vld [vmem:[%s19304_s11 + $0xc8] sm:$0xff] }
 0x2d3   :  { %8468 = vmatpush1.bf16.msra.mxu0 %v8467_v49  ;;  %v3397_v49 = vld [vmem:[%s19305_s12 + $0x10] sm:$0xff] }
 0x2d4   :  { %8470 = vmatprep.subr.bf16.mxu0 %v8469_v50  ;;  %v10197_v50 = vmov 0.0|0.0   ;;  %v8569_v55 = vpack.c.bf16 %v3398_v52, %v3397_v49  ;;  %v3390_v49 = vld [vmem:[%s19304_s11 + $0xd8] sm:$0xff] }
 0x2d5   :  { %8565 = vmatprep.subr.bf16.mxu1 %v10197_v50  ;;  %v8609_v52 = vpack.c.bf16 %v3390_v49, %v3389_v46  ;;  %v3061_v46 = vld [vmem:[%s19347_s2 + $0x2b8] sm:$0xff] }
 0x2d6   :  { %8567 = vmatpush3.bf16.msra.mxu1 %v8566_v51 }
 0x2d7   :  { %8472 = vmatpush1.bf16.msra.mxu0 %v8471_v57  ;;  %8568 = vmatprep.subr.bf16.mxu1 %v10197_v50  ;;  %v3400_v57 = vld [vmem:[%s19305_s12 + $0x28] sm:$0xff] }
 0x2d8   :  { %8474 = vmatprep.subr.bf16.mxu0 %v8473_v14  ;;  %v8572_v14 = vpack.c.bf16 %v3400_v57, %v3399_v56  ;;  %v3374_v56 = vld [vmem:[%s19304_s11 + $0x58] sm:$0xff] }
 0x2da   :  { %8570 = vmatpush3.bf16.msra.mxu1 %v8569_v55  ;;  %v3373_v55 = vld [vmem:[%s19304_s11 + $0x50] sm:$0xff] }
 0x2db   :  { %8476 = vmatpush1.bf16.msra.mxu0 %v8475_v54  ;;  %8571 = vmatprep.subr.bf16.mxu1 %v10197_v50  ;;  %v3404_v54 = vld [vmem:[%s19305_s12 + $0x48] sm:$0xff]  ;;  %v8611_v58 = vpack.c.bf16 %v3374_v56, %v3373_v55  ;;  %v3065_v56 = vld [vmem:[%s19347_s2 + $0x2d8] sm:$0xff] }
 0x2dc   :  { %8478 = vmatprep.subr.bf16.mxu0 %v8477_v60  ;;  %v8578_v60 = vpack.c.bf16 %v3404_v54, %v3403_v59  ;;  %v3063_v55 = vld [vmem:[%s19347_s2 + $0x2c8] sm:$0xff] }
 0x2de   :  { %8573 = vmatpush3.bf16.msra.mxu1 %v8572_v14  ;;  %v3391_v14 = vld [vmem:[%s19304_s11 + $0xe0] sm:$0xff] }
 0x2df   :  { %8480 = vmatpush1.bf16.msra.mxu0 %v8479_v1  ;;  %8574 = vmatprep.subr.bf16.mxu1 %v10197_v50  ;;  %v3408_v1 = vld [vmem:[%s19305_s12 + $0x68] sm:$0xff]  ;;  %v8613_v59 = vpack.c.bf16 %v3392_v42, %v3391_v14  ;;  %v8525_v14 = vpack.c.bf16 %v3065_v56, %v3063_v55  ;;  %v3062_v42 = vld [vmem:[%s19347_s2 + $0x2c0] sm:$0xff]  ;;  %v3096_v56 = vld [vmem:[%s19347_s2 + $0x3d0] sm:$0xff] }
 0x2e0   :  { %8482 = vmatprep.subr.bf16.mxu0 %v8481_v2  ;;  %v8584_v2 = vpack.c.bf16 %v3408_v1, %v3407_v0  ;;  %v3094_v55 = vld [vmem:[%s19347_s2 + $0x3c0] sm:$0xff] }
 0x2e2   :  { %8576 = vmatpush3.bf16.msra.mxu1 %v8575_v47 }
 0x2e3   :  { %8484 = vmatpush1.bf16.msra.mxu0 %v8483_v9  ;;  %8577 = vmatprep.subr.bf16.mxu1 %v10197_v50  ;;  %v8587_v9 = vpack.c.bf16 %v3410_v6, %v3409_v5  ;;  %v3038_v5 = vld [vmem:[%s19347_s2 + $0x200] sm:$0xff]  ;;  %v3040_v6 = vld [vmem:[%s19347_s2 + $0x210] sm:$0xff] }
 0x2e4   :  { %8486 = vmatprep.subr.bf16.mxu0 %v8485_v17  ;;  %v8589_v17 = vpack.c.bf16 %v3380_v29, %v3379_v8 }
 0x2e6   :  { %8579 = vmatpush3.bf16.msra.mxu1 %v8578_v60 }
 0x2e7   :  { %8488 = vmatpush1.bf16.msra.mxu0 %v8487_v19  ;;  %8580 = vmatprep.subr.bf16.mxu1 %v10197_v50  ;;  %v8591_v19 = vpack.c.bf16 %v3364_v12, %v3363_v11  ;;  %v8503_v12 = vpack.c.bf16 %v3040_v6, %v3038_v5  ;;  %v3070_v6 = vld [vmem:[%s19347_s2 + $0x300] sm:$0xff] }
 0x2e8   :  { %8490 = vmatprep.subr.bf16.mxu0 %v8489_v20  ;;  %v8593_v20 = vpack.c.bf16 %v3382_v15, %v3381_v13 }
 0x2ea   :  { %8582 = vmatpush3.bf16.msra.mxu1 %v8581_v63 }
 0x2eb   :  { %8492 = vmatpush1.bf16.msra.mxu0 %v8491_v41  ;;  %8583 = vmatprep.subr.bf16.mxu1 %v10197_v50  ;;  %v8595_v41 = vpack.c.bf16 %v3366_v22, %v3365_v21  ;;  %v3047_v22 = vld [vmem:[%s19347_s2 + $0x248] sm:$0xff] }
 0x2ec   :  { %8494 = vmatprep.subr.bf16.mxu0 %v8493_v27  ;;  %v8597_v27 = vpack.c.bf16 %v3384_v24, %v3383_v3  ;;  %v3049_v3 = vld [vmem:[%s19347_s2 + $0x258] sm:$0xff] }
 0x2ee   :  { %8585 = vmatpush3.bf16.msra.mxu1 %v8584_v2 }
 0x2ef   :  { %8496 = vmatpush1.bf16.msra.mxu0 %v8495_v35  ;;  %8586 = vmatprep.subr.bf16.mxu1 %v10197_v50  ;;  %v2944_v50 = vld [vmem:[%s19348_s9] sm:$0xf] }
 0x2f0   :  { %8498 = vmatprep.subr.bf16.mxu0 %v8497_v36  ;;  %v3369_v36 = vld [vmem:[%s19304_s11 + $0x30] sm:$0xff]  ;;  %v2957_v57 = vrot.slane %v2944_v50, %v13265_v53  ;;  %v2949_v61 = vrot.slane %v2944_v50, %v12884_v48  ;;  %v2961_v32 = vrot.slane %v2944_v50, %v12890_v26  ;;  %v2953_v63 = vrot.slane %v2944_v50, %v12887_v25 }
 0x2f1   :  { %v8603_v43 = vpack.c.bf16 %v3370_v18, %v3369_v36  ;;  %v3052_v36 = vld [vmem:[%s19347_s2 + $0x270] sm:$0xff]  ;;  %v3055_v18 = vld [vmem:[%s19347_s2 + $0x288] sm:$0xff] }
 0x2f2   :  { %8588 = vmatpush3.bf16.msra.mxu1 %v8587_v9  ;;  %v3043_v9 = vld [vmem:[%s19347_s2 + $0x228] sm:$0xff] }
 0x2f3   :  { %8500 = vmatpush1.bf16.msra.mxu0 %v8499_v44  ;;  %8590 = vmatprep.subr.bf16.mxu1 %v8589_v17  ;;  %v8605_v44 = vpack.c.bf16 %v3388_v40, %v3387_v38  ;;  %v3045_v17 = vld [vmem:[%s19347_s2 + $0x238] sm:$0xff] }
 0x2f4   :  { %8502 = vmatprep.subr.bf16.mxu0 %v8501_v39  ;;  %v3371_v39 = vld [vmem:[%s19304_s11 + $0x40] sm:$0xff]  ;;  %v8505_v15 = vpack.c.bf16 %v3045_v17, %v3043_v9  ;;  %v3057_v38 = vld [vmem:[%s19347_s2 + $0x298] sm:$0xff] }
 0x2f5   :  { %7187 = vmatmul.mubr.f32.vlgmr.msra.gmra.mrb[6].mxu1 %v14243_v62  ;;  %v3386_v62 = vld [vmem:[%s19304_s11 + $0xb8] sm:$0xff]  ;;  %v8607_v51 = vpack.c.bf16 %v3372_v45, %v3371_v39  ;;  %v3056_v39 = vld [vmem:[%s19347_s2 + $0x290] sm:$0xff]  ;;  %v3059_v45 = vld [vmem:[%s19347_s2 + $0x2a8] sm:$0xff] }
 0x2f6   :  { %8592 = vmatpush3.bf16.msra.mxu1 %v8591_v19  ;;  %v8601_v35 = vpack.c.bf16 %v3386_v62, %v3385_v33  ;;  %v3042_v19 = vld [vmem:[%s19347_s2 + $0x220] sm:$0xff]  ;;  %v3053_v33 = vld [vmem:[%s19347_s2 + $0x278] sm:$0xff]  ;;  %v8521_v50 = vpack.c.bf16 %v3061_v46, %v3059_v45  ;;  %v3092_v46 = vld [vmem:[%s19347_s2 + $0x3b0] sm:$0xff] }
 0x2f7   :  { %8594 = vmatprep.subr.bf16.mxu1 %v8593_v20  ;;  %v3044_v20 = vld [vmem:[%s19347_s2 + $0x230] sm:$0xff]  ;;  %v3077_v9 = vld [vmem:[%s19347_s2 + $0x338] sm:$0xff]  ;;  %v3090_v45 = vld [vmem:[%s19347_s2 + $0x3a0] sm:$0xff] }
 0x2f8   :  { %v8507_v24 = vpack.c.bf16 %v3044_v20, %v3042_v19  ;;  %v3081_v19 = vld [vmem:[%s19347_s2 + $0x358] sm:$0xff] }
 0x2fa   :  { %8596 = vmatpush3.bf16.msra.mxu1 %v8595_v41  ;;  %v8509_v41 = vpack.c.bf16 %v3049_v3, %v3047_v22  ;;  %v3078_v22 = vld [vmem:[%s19347_s2 + $0x340] sm:$0xff]  ;;  %v3080_v3 = vld [vmem:[%s19347_s2 + $0x350] sm:$0xff] }
 0x2fb   :  { %8598 = vmatprep.subr.bf16.mxu1 %v8597_v27  ;;  %v3046_v27 = vld [vmem:[%s19347_s2 + $0x240] sm:$0xff] }
 0x2fc   :  { %v8511_v62 = vpack.c.bf16 %v3048_v28, %v3046_v27  ;;  %v8543_v27 = vpack.c.bf16 %v3080_v3, %v3078_v22  ;;  %v3561_v3 = vld [vmem:[%s19307_s14] sm:$0xff] }
 0x2fe   :  { %8600 = vmatpush3.bf16.msra.mxu1 %v8599_v34  ;;  %v8513_v34 = vpack.c.bf16 %v3053_v33, %v3051_v31  ;;  %v3082_v31 = vld [vmem:[%s19347_s2 + $0x360] sm:$0xff]  ;;  %v3084_v33 = vld [vmem:[%s19347_s2 + $0x370] sm:$0xff] }
 0x2ff   :  { %8602 = vmatprep.subr.bf16.mxu1 %v8601_v35  ;;  %v3050_v35 = vld [vmem:[%s19347_s2 + $0x260] sm:$0xff] }
 0x300   :  { %v8515_v40 = vpack.c.bf16 %v3052_v36, %v3050_v35  ;;  %v8547_v35 = vpack.c.bf16 %v3084_v33, %v3082_v31 }
 0x302   :  { %8604 = vmatpush3.bf16.msra.mxu1 %v8603_v43  ;;  %v8517_v43 = vpack.c.bf16 %v3057_v38, %v3055_v18  ;;  %v3086_v18 = vld [vmem:[%s19347_s2 + $0x380] sm:$0xff]  ;;  %v3088_v38 = vld [vmem:[%s19347_s2 + $0x390] sm:$0xff] }
 0x303   :  { %8606 = vmatprep.subr.bf16.mxu1 %v8605_v44  ;;  %v3054_v44 = vld [vmem:[%s19347_s2 + $0x280] sm:$0xff] }
 0x304   :  { %v8519_v49 = vpack.c.bf16 %v3056_v39, %v3054_v44  ;;  %v8551_v44 = vpack.c.bf16 %v3088_v38, %v3086_v18  ;;  %v3570_v18 = vld [vmem:[%s19307_s14 + $0x48] sm:$0xff]  ;;  %v3572_v38 = vld [vmem:[%s19307_s14 + $0x58] sm:$0xff] }
 0x306   :  { %8608 = vmatpush3.bf16.msra.mxu1 %v8607_v51  ;;  %v3058_v51 = vld [vmem:[%s19347_s2 + $0x2a0] sm:$0xff] }
 0x307   :  { %8610 = vmatprep.subr.bf16.mxu1 %v8609_v52  ;;  %v3060_v52 = vld [vmem:[%s19347_s2 + $0x2b0] sm:$0xff] }
 0x30a   :  { %8612 = vmatpush3.bf16.msra.mxu1 %v8611_v58  ;;  %v3064_v58 = vld [vmem:[%s19347_s2 + $0x2d0] sm:$0xff] }
 0x30b   :  { %8614 = vmatprep.subr.bf16.mxu1 %v8613_v59  ;;  %v3069_v59 = vld [vmem:[%s19347_s2 + $0x2f8] sm:$0xff] }
 0x364   :  { %v2939_v47 = vpop.f32.mrb[4].mxu1 }
 0x365   :  { %v14546_v54 = vadd.f32 %v2957_v57, %v2939_v47  ;;  %v2941_v60 = vpop.f32.mrb[5].mxu1  ;;  %v8523_v57 = vpack.c.bf16 %v3060_v52, %v3058_v51  ;;  %v3067_v47 = vld [vmem:[%s19347_s2 + $0x2e8] sm:$0xff]  ;;  %v8555_v51 = vpack.c.bf16 %v3092_v46, %v3090_v45  ;;  %v3576_v46 = vld [vmem:[%s19307_s14 + $0x78] sm:$0xff] }
 0x366   :  { %v2969_v8 = vadd.f32 %v2961_v32, %v2941_v60  ;;  %v8527_v60 = vpack.c.bf16 %v3064_v58, %v3062_v42  ;;  %v3066_v32 = vld [vmem:[%s19347_s2 + $0x2e0] sm:$0xff]  ;;  %v8559_v42 = vpack.c.bf16 %v3096_v56, %v3094_v55  ;;  %v3574_v45 = vld [vmem:[%s19307_s14 + $0x68] sm:$0xff]  ;;  %v3580_v56 = vld [vmem:[%s19307_s14 + $0x98] sm:$0xff] }
 0x367   :  { %v3578_v55 = vld [vmem:[%s19307_s14 + $0x88] sm:$0xff] }
 0x368   :  { %v2973_v21 = vmax.f32 %v2969_v8, 0.0  ;;  %v3072_v8 = vld [vmem:[%s19347_s2 + $0x310] sm:$0xff] }
 0x369   :  { %v2655_v0 = vpop.f32.mrb[6].mxu0  ;;  %v8535_v17 = vpack.c.bf16 %v3072_v8, %v3070_v6  ;;  %v3378_v6 = vld [vmem:[%s19304_s11 + $0x78] sm:$0xff] }
 0x36a   :  { %v2966_v1 = vadd.f32 %v2949_v61, %v2655_v0  ;;  %v2657_v2 = vpop.f32.mrb[7].mxu0  ;;  %v8529_v61 = vpack.c.bf16 %v3069_v59, %v3067_v47  ;;  %v3071_v0 = vld [vmem:[%s19347_s2 + $0x308] sm:$0xff]  ;;  %v3098_v47 = vld [vmem:[%s19347_s2 + $0x3e0] sm:$0xff]  ;;  %v3100_v59 = vld [vmem:[%s19347_s2 + $0x3f0] sm:$0xff] }
 0x36b   :  { %v2967_v29 = vadd.f32 %v2953_v63, %v2657_v2  ;;  %v3068_v63 = vld [vmem:[%s19347_s2 + $0x2f0] sm:$0xff] }
 0x36c   :  { %v2970_v13 = vmax.f32 %v2966_v1, 0.0  ;;  %v3073_v1 = vld [vmem:[%s19347_s2 + $0x318] sm:$0xff]  ;;  %v8531_v2 = vpack.c.bf16 %v3068_v63, %v3066_v32  ;;  %v3375_v32 = vld [vmem:[%s19304_s11 + $0x60] sm:$0xff]  ;;  %v3376_v63 = vld [vmem:[%s19304_s11 + $0x68] sm:$0xff] }
 0x36d   :  { %v2971_v11 = vmax.f32 %v2967_v29, 0.0  ;;  %v8533_v5 = vpack.c.bf16 %v3073_v1, %v3071_v0  ;;  %v3075_v29 = vld [vmem:[%s19347_s2 + $0x328] sm:$0xff]  ;;  %v8615_v0 = vpack.c.bf16 %v3376_v63, %v3375_v32  ;;  %v3393_v1 = vld [vmem:[%s19304_s11 + $0xf0] sm:$0xff]  ;;  %v3581_v32 = vld [vmem:[%s19307_s14 + $0xa0] sm:$0xff] }
 0x36e   :  { %v3583_v63 = vld [vmem:[%s19307_s14 + $0xb0] sm:$0xff] }
 0x36f   :  { %3269 = vmatprep.mubr.f32.mxu0 %v2971_v11  ;;  %v8537_v11 = vpack.c.bf16 %v3077_v9, %v3075_v29  ;;  %8616 = vmatpush3.bf16.msra.mxu1 %v8615_v0  ;;  %v3562_v29 = vld [vmem:[%s19307_s14 + $0x8] sm:$0xff]  ;;  %v3564_v9 = vld [vmem:[%s19307_s14 + $0x18] sm:$0xff]  ;;  %v8643_v0 = vpack.c.bf16 %v3583_v63, %v3581_v32 }
 0x370   :  { %3270 = vmatmul.mubr.f32.vlgmr.msra.gmra.mrb[8].mxu0 %v2970_v13  ;;  %v3076_v13 = vld [vmem:[%s19347_s2 + $0x330] sm:$0xff] }
 0x371   :  { %8504 = vmatpush1.bf16.msra.mxu0 %v8503_v12  ;;  %3340 = vmatprep.mubr.f32.mxu0 %v2973_v21  ;;  %v3074_v12 = vld [vmem:[%s19347_s2 + $0x320] sm:$0xff] }
 0x372   :  { %8506 = vmatprep.subr.bf16.mxu0 %v8505_v15  ;;  %v3079_v15 = vld [vmem:[%s19347_s2 + $0x348] sm:$0xff]  ;;  %v8539_v20 = vpack.c.bf16 %v3076_v13, %v3074_v12  ;;  %v3347_v13 = vld [vmem:[%s19349_s8] sm:$0x3] }
 0x373   :  { %v8541_v21 = vpack.c.bf16 %v3081_v19, %v3079_v15  ;;  %v3352_v15 = vrot.slane %v3347_v13, %v12884_v48  ;;  %v3356_v19 = vrot.slane %v3347_v13, %v12887_v25  ;;  %v3591_v13 = vld [vmem:[%s19307_s14 + $0xf0] sm:$0xff] }
 0x375   :  { %8508 = vmatpush1.bf16.msra.mxu0 %v8507_v24  ;;  %v3083_v24 = vld [vmem:[%s19347_s2 + $0x368] sm:$0xff] }
 0x376   :  { %8510 = vmatprep.subr.bf16.mxu0 %v8509_v41  ;;  %v3085_v41 = vld [vmem:[%s19347_s2 + $0x378] sm:$0xff] }
 0x377   :  { %v8545_v28 = vpack.c.bf16 %v3085_v41, %v3083_v24  ;;  %v3563_v24 = vld [vmem:[%s19307_s14 + $0x10] sm:$0xff] }
 0x378   :  { %v8623_v33 = vpack.c.bf16 %v3563_v24, %v3561_v3 }
 0x379   :  { %8512 = vmatpush1.bf16.msra.mxu0 %v8511_v62  ;;  %v3087_v62 = vld [vmem:[%s19347_s2 + $0x388] sm:$0xff] }
 0x37a   :  { %8514 = vmatprep.subr.bf16.mxu0 %v8513_v34  ;;  %v3089_v34 = vld [vmem:[%s19347_s2 + $0x398] sm:$0xff] }
 0x37b   :  { %v8549_v36 = vpack.c.bf16 %v3089_v34, %v3087_v62 }
 0x37d   :  { %8516 = vmatpush1.bf16.msra.mxu0 %v8515_v40  ;;  %v3091_v40 = vld [vmem:[%s19347_s2 + $0x3a8] sm:$0xff] }
 0x37e   :  { %8518 = vmatprep.subr.bf16.mxu0 %v8517_v43  ;;  %v3093_v43 = vld [vmem:[%s19347_s2 + $0x3b8] sm:$0xff] }
 0x37f   :  { %v8553_v39 = vpack.c.bf16 %v3093_v43, %v3091_v40  ;;  %v8629_v43 = vpack.c.bf16 %v3572_v38, %v3570_v18  ;;  %v3814_v18 = vld [vmem:[%s19310_s17 + $0x40] sm:$0xff] }
 0x380   :  { %v3818_v38 = vld [vmem:[%s19310_s17 + $0x60] sm:$0xff] }
 0x381   :  { %8520 = vmatpush1.bf16.msra.mxu0 %v8519_v49  ;;  %v3095_v49 = vld [vmem:[%s19347_s2 + $0x3c8] sm:$0xff] }
 0x382   :  { %8522 = vmatprep.subr.bf16.mxu0 %v8521_v50  ;;  %v3097_v50 = vld [vmem:[%s19347_s2 + $0x3d8] sm:$0xff] }
 0x383   :  { %v8557_v52 = vpack.c.bf16 %v3097_v50, %v3095_v49  ;;  %v8633_v50 = vpack.c.bf16 %v3576_v46, %v3574_v45  ;;  %v3822_v45 = vld [vmem:[%s19310_s17 + $0x80] sm:$0xff] }
 0x384   :  { %v3826_v46 = vld [vmem:[%s19310_s17 + $0xa0] sm:$0xff] }
 0x385   :  { %8524 = vmatpush1.bf16.msra.mxu0 %v8523_v57  ;;  %v3099_v57 = vld [vmem:[%s19347_s2 + $0x3e8] sm:$0xff] }
 0x386   :  { %8526 = vmatprep.subr.bf16.mxu0 %v8525_v14  ;;  %v3101_v14 = vld [vmem:[%s19347_s2 + $0x3f8] sm:$0xff] }
 0x387   :  { %v8561_v58 = vpack.c.bf16 %v3101_v14, %v3099_v57  ;;  %v8637_v14 = vpack.c.bf16 %v3580_v56, %v3578_v55  ;;  %v3830_v55 = vld [vmem:[%s19310_s17 + $0xc0] sm:$0xff] }
 0x388   :  { %v3834_v56 = vld [vmem:[%s19310_s17 + $0xe0] sm:$0xff] }
 0x389   :  { %8528 = vmatpush1.bf16.msra.mxu0 %v8527_v60  ;;  %v8563_v60 = vpack.c.bf16 %v3100_v59, %v3098_v47  ;;  %v3582_v47 = vld [vmem:[%s19307_s14 + $0xa8] sm:$0xff]  ;;  %v3584_v59 = vld [vmem:[%s19307_s14 + $0xb8] sm:$0xff] }
 0x38a   :  { %8530 = vmatprep.subr.bf16.mxu0 %v8529_v61  ;;  %v2972_v61 = vmax.f32 %v14546_v54, 0.0  ;;  %v3394_v54 = vld [vmem:[%s19304_s11 + $0xf8] sm:$0xff] }
 0x38d   :  { %8532 = vmatpush1.bf16.msra.mxu0 %v8531_v2  ;;  %v8617_v2 = vpack.c.bf16 %v3394_v54, %v3393_v1  ;;  %v3586_v1 = vld [vmem:[%s19307_s14 + $0xc8] sm:$0xff]  ;;  %v3588_v54 = vld [vmem:[%s19307_s14 + $0xd8] sm:$0xff] }
 0x38e   :  { %8534 = vmatprep.subr.bf16.mxu0 %v8533_v5  ;;  %v3377_v5 = vld [vmem:[%s19304_s11 + $0x70] sm:$0xff] }
 0x38f   :  { %v8619_v8 = vpack.c.bf16 %v3378_v6, %v3377_v5  ;;  %8618 = vmatprep.subr.bf16.mxu1 %v8617_v2  ;;  %v8645_v2 = vpack.c.bf16 %v3588_v54, %v3586_v1  ;;  %v3585_v5 = vld [vmem:[%s19307_s14 + $0xc0] sm:$0xff]  ;;  %v3587_v6 = vld [vmem:[%s19307_s14 + $0xd0] sm:$0xff]  ;;  %v3855_v54 = vld [vmem:[%s19310_s17 + $0x188] sm:$0xff] }
 0x390   :  { %v3850_v1 = vld [vmem:[%s19310_s17 + $0x160] sm:$0xff] }
 0x391   :  { %8536 = vmatpush1.bf16.msra.mxu0 %v8535_v17  ;;  %8620 = vmatpush3.bf16.msra.mxu1 %v8619_v8  ;;  %v8621_v17 = vpack.c.bf16 %v3564_v9, %v3562_v29  ;;  %v8647_v8 = vpack.c.bf16 %v3587_v6, %v3585_v5  ;;  %v3590_v29 = vld [vmem:[%s19307_s14 + $0xe8] sm:$0xff]  ;;  %v3592_v9 = vld [vmem:[%s19307_s14 + $0xf8] sm:$0xff] }
 0x392   :  { %8538 = vmatprep.subr.bf16.mxu0 %v8537_v11 }
 0x393   :  { %8622 = vmatprep.subr.bf16.mxu1 %v8621_v17  ;;  %v8649_v17 = vpack.c.bf16 %v3592_v9, %v3590_v29  ;;  %v3858_v29 = vld [vmem:[%s19310_s17 + $0x1a0] sm:$0xff]  ;;  %v3863_v9 = vld [vmem:[%s19310_s17 + $0x1c8] sm:$0xff] }
 0x395   :  { %8540 = vmatpush1.bf16.msra.mxu0 %v8539_v20 }
 0x396   :  { %8542 = vmatprep.subr.bf16.mxu0 %v8541_v21 }
 0x399   :  { %8544 = vmatpush1.bf16.msra.mxu0 %v8543_v27  ;;  %v3566_v27 = vld [vmem:[%s19307_s14 + $0x28] sm:$0xff] }
 0x39a   :  { %8546 = vmatprep.subr.bf16.mxu0 %v8545_v28  ;;  %v3568_v28 = vld [vmem:[%s19307_s14 + $0x38] sm:$0xff] }
 0x39b   :  { %v8625_v34 = vpack.c.bf16 %v3568_v28, %v3566_v27  ;;  %v3806_v28 = vld [vmem:[%s19310_s17] sm:$0xff] }
 0x39d   :  { %8548 = vmatpush1.bf16.msra.mxu0 %v8547_v35  ;;  %v3565_v35 = vld [vmem:[%s19307_s14 + $0x20] sm:$0xff] }
 0x39e   :  { %8550 = vmatprep.subr.bf16.mxu0 %v8549_v36  ;;  %v3567_v36 = vld [vmem:[%s19307_s14 + $0x30] sm:$0xff] }
 0x39f   :  { %v8627_v40 = vpack.c.bf16 %v3567_v36, %v3565_v35 }
 0x3a1   :  { %8552 = vmatpush1.bf16.msra.mxu0 %v8551_v44  ;;  %v3569_v44 = vld [vmem:[%s19307_s14 + $0x40] sm:$0xff] }
 0x3a2   :  { %8554 = vmatprep.subr.bf16.mxu0 %v8553_v39  ;;  %v3571_v39 = vld [vmem:[%s19307_s14 + $0x50] sm:$0xff] }
 0x3a3   :  { %v8631_v49 = vpack.c.bf16 %v3571_v39, %v3569_v44  ;;  %v8659_v44 = vpack.c.bf16 %v3818_v38, %v3814_v18 }
 0x3a5   :  { %8556 = vmatpush1.bf16.msra.mxu0 %v8555_v51  ;;  %v3573_v51 = vld [vmem:[%s19307_s14 + $0x60] sm:$0xff] }
 0x3a6   :  { %8558 = vmatprep.subr.bf16.mxu0 %v8557_v52  ;;  %v3575_v52 = vld [vmem:[%s19307_s14 + $0x70] sm:$0xff] }
 0x3a7   :  { %v8635_v57 = vpack.c.bf16 %v3575_v52, %v3573_v51  ;;  %v8663_v51 = vpack.c.bf16 %v3826_v46, %v3822_v45 }
 0x3a9   :  { %8560 = vmatpush1.bf16.msra.mxu0 %v8559_v42  ;;  %v3577_v42 = vld [vmem:[%s19307_s14 + $0x80] sm:$0xff] }
 0x3aa   :  { %8562 = vmatprep.subr.bf16.mxu0 %v8561_v58  ;;  %v3579_v58 = vld [vmem:[%s19307_s14 + $0x90] sm:$0xff] }
 0x3ad   :  { %8564 = vmatpush1.bf16.msra.mxu0 %v8563_v60  ;;  %v8639_v60 = vpack.c.bf16 %v3579_v58, %v3577_v42  ;;  %v8667_v42 = vpack.c.bf16 %v3834_v56, %v3830_v55 }
 0x3b0   :  { %3341 = vmatmul.mubr.f32.vlgmr.msra.gmra.mrb[8].mxu0 %v2972_v61  ;;  %v8641_v61 = vpack.c.bf16 %v3584_v59, %v3582_v47  ;;  %v3838_v47 = vld [vmem:[%s19310_s17 + $0x100] sm:$0xff] }
 0x3b1   :  { %4888 = vmatprep.mubr.f32.mxu0 %v10195_v7  ;;  %v3842_v59 = vld [vmem:[%s19310_s17 + $0x120] sm:$0xff] }
 0x3b2   :  { %v8671_v32 = vpack.c.bf16 %v3842_v59, %v3838_v47 }
 0x3c8   :  { %v14763_v11 = vpop.f32.mrb[6].mxu1 }
 0x3c9   :  { %v7188_v12 = vpop.f32.mrb[7].mxu1 }
 0x3ca   :  { %v3589_v12 = vld [vmem:[%s19307_s14 + $0xe0] sm:$0xff] }
 0x483   :  { %v3342_v20 = vpop.f32.mrb[8].mxu0 }
 0x484   :  { %v3359_v21 = vadd.f32 %v3352_v15, %v3342_v20  ;;  %v3344_v22 = vpop.f32.mrb[9].mxu0  ;;  %v8651_v15 = vpack.c.bf16 %v3591_v13, %v3589_v12  ;;  %v3811_v20 = vld [vmem:[%s19310_s17 + $0x28] sm:$0xff] }
 0x485   :  { %v3360_v41 = vadd.f32 %v3356_v19, %v3344_v22  ;;  %v3807_v19 = vld [vmem:[%s19310_s17 + $0x8] sm:$0xff] }
 0x486   :  { %v3361_v62 = vmax.f32 %v3359_v21, 0.0  ;;  %v8653_v21 = vpack.c.bf16 %v3811_v20, %v3807_v19  ;;  %v3866_v19 = vld [vmem:[%s19310_s17 + $0x1e0] sm:$0xff]  ;;  %v3809_v20 = vld [vmem:[%s19310_s17 + $0x18] sm:$0xff] }
 0x487   :  { %v3362_v31 = vmax.f32 %v3360_v41, 0.0  ;;  %v7101_v41 = vld [vmem:[%s19306_s13] ss:$0 sm:$0xff] }
 0x489   :  { %3545 = vmatprep.mubr.f32.mxu1 %v3362_v31  ;;  %v3810_v31 = vld [vmem:[%s19310_s17 + $0x20] sm:$0xff] }
 0x48a   :  { %3546 = vmatmul.mubr.f32.vlgmr.msra.gmra.mrb[8].mxu1 %v3361_v62  ;;  %v3819_v62 = vld [vmem:[%s19310_s17 + $0x68] sm:$0xff]  ;;  %v8655_v35 = vpack.c.bf16 %v3810_v31, %v3806_v28  ;;  %v3821_v28 = vld [vmem:[%s19310_s17 + $0x78] sm:$0xff] }
 0x48b   :  { %8624 = vmatpush1.bf16.msra.mxu1 %v8623_v33  ;;  %3669 = vmatprep.mubr.f32.mxu1 %v10195_v7  ;;  %v3815_v33 = vld [vmem:[%s19310_s17 + $0x48] sm:$0xff] }
 0x48c   :  { %8626 = vmatprep.subr.bf16.mxu1 %v8625_v34 }
 0x48f   :  { %8628 = vmatpush1.bf16.msra.mxu1 %v8627_v40  ;;  %v3823_v40 = vld [vmem:[%s19310_s17 + $0x88] sm:$0xff] }
 0x490   :  { %8630 = vmatprep.subr.bf16.mxu1 %v8629_v43  ;;  %v3827_v43 = vld [vmem:[%s19310_s17 + $0xa8] sm:$0xff] }
 0x491   :  { %v8661_v39 = vpack.c.bf16 %v3827_v43, %v3823_v40  ;;  %v3824_v40 = vld [vmem:[%s19310_s17 + $0x90] sm:$0xff] }
 0x492   :  { %v3828_v43 = vld [vmem:[%s19310_s17 + $0xb0] sm:$0xff] }
 0x493   :  { %8632 = vmatpush1.bf16.msra.mxu1 %v8631_v49  ;;  %v3831_v49 = vld [vmem:[%s19310_s17 + $0xc8] sm:$0xff]  ;;  %v8695_v45 = vpack.c.bf16 %v3828_v43, %v3824_v40 }
 0x494   :  { %8634 = vmatprep.subr.bf16.mxu1 %v8633_v50  ;;  %v3835_v50 = vld [vmem:[%s19310_s17 + $0xe8] sm:$0xff] }
 0x495   :  { %v8665_v52 = vpack.c.bf16 %v3835_v50, %v3831_v49  ;;  %v3832_v49 = vld [vmem:[%s19310_s17 + $0xd0] sm:$0xff] }
 0x496   :  { %v3836_v50 = vld [vmem:[%s19310_s17 + $0xf0] sm:$0xff] }
 0x497   :  { %8636 = vmatpush1.bf16.msra.mxu1 %v8635_v57  ;;  %v3839_v57 = vld [vmem:[%s19310_s17 + $0x108] sm:$0xff]  ;;  %v8699_v55 = vpack.c.bf16 %v3836_v50, %v3832_v49 }
 0x498   :  { %8638 = vmatprep.subr.bf16.mxu1 %v8637_v14  ;;  %v3843_v14 = vld [vmem:[%s19310_s17 + $0x128] sm:$0xff] }
 0x499   :  { %v8669_v58 = vpack.c.bf16 %v3843_v14, %v3839_v57  ;;  %v3840_v57 = vld [vmem:[%s19310_s17 + $0x110] sm:$0xff] }
 0x49a   :  { %v3844_v14 = vld [vmem:[%s19310_s17 + $0x130] sm:$0xff] }
 0x49b   :  { %8640 = vmatpush1.bf16.msra.mxu1 %v8639_v60  ;;  %v3847_v60 = vld [vmem:[%s19310_s17 + $0x148] sm:$0xff]  ;;  %v8703_v47 = vpack.c.bf16 %v3844_v14, %v3840_v57 }
 0x49c   :  { %8642 = vmatprep.subr.bf16.mxu1 %v8641_v61  ;;  %v3851_v61 = vld [vmem:[%s19310_s17 + $0x168] sm:$0xff] }
 0x49d   :  { %v8673_v63 = vpack.c.bf16 %v3851_v61, %v3847_v60  ;;  %v3848_v60 = vld [vmem:[%s19310_s17 + $0x150] sm:$0xff] }
 0x49e   :  { %v3852_v61 = vld [vmem:[%s19310_s17 + $0x170] sm:$0xff] }
 0x49f   :  { %8644 = vmatpush1.bf16.msra.mxu1 %v8643_v0  ;;  %v3846_v0 = vld [vmem:[%s19310_s17 + $0x140] sm:$0xff] }
 0x4a0   :  { %8646 = vmatprep.subr.bf16.mxu1 %v8645_v2  ;;  %v3859_v2 = vld [vmem:[%s19310_s17 + $0x1a8] sm:$0xff]  ;;  %v8675_v5 = vpack.c.bf16 %v3850_v1, %v3846_v0  ;;  %v8707_v0 = vpack.c.bf16 %v3852_v61, %v3848_v60 }
 0x4a1   :  { %v8677_v6 = vpack.c.bf16 %v3859_v2, %v3855_v54  ;;  %v3856_v54 = vld [vmem:[%s19310_s17 + $0x190] sm:$0xff] }
 0x4a2   :  { %v3860_v2 = vld [vmem:[%s19310_s17 + $0x1b0] sm:$0xff] }
 0x4a3   :  { %8648 = vmatpush1.bf16.msra.mxu1 %v8647_v8  ;;  %v3854_v8 = vld [vmem:[%s19310_s17 + $0x180] sm:$0xff] }
 0x4a4   :  { %8650 = vmatprep.subr.bf16.mxu1 %v8649_v17  ;;  %v3867_v17 = vld [vmem:[%s19310_s17 + $0x1e8] sm:$0xff]  ;;  %v8679_v12 = vpack.c.bf16 %v3858_v29, %v3854_v8  ;;  %v8711_v8 = vpack.c.bf16 %v3860_v2, %v3856_v54 }
 0x4a5   :  { %v8681_v13 = vpack.c.bf16 %v3867_v17, %v3863_v9  ;;  %v3864_v9 = vld [vmem:[%s19310_s17 + $0x1d0] sm:$0xff] }
 0x4a6   :  { %v3868_v17 = vld [vmem:[%s19310_s17 + $0x1f0] sm:$0xff] }
 0x4a7   :  { %8652 = vmatpush1.bf16.msra.mxu1 %v8651_v15  ;;  %v3862_v15 = vld [vmem:[%s19310_s17 + $0x1c0] sm:$0xff] }
 0x4a8   :  { %8654 = vmatprep.subr.bf16.mxu1 %v8653_v21  ;;  %v3813_v21 = vld [vmem:[%s19310_s17 + $0x38] sm:$0xff] }
 0x55d   :  { %v7151_v22 = vpop.f32.mrb[8].mxu1 }
 0x55e   :  { %v7152_v3 = vpop.f32.mrb[9].mxu1 }
 0x55f   :  { %v7153_v24 = vadd.f32 %v7152_v3, %v7151_v22  ;;  %v8683_v22 = vpack.c.bf16 %v3866_v19, %v3862_v15  ;;  %v8685_v3 = vpack.c.bf16 %v3813_v21, %v3809_v20  ;;  %v8715_v15 = vpack.c.bf16 %v3868_v17, %v3864_v9  ;;  %v3678_v20 = vld [vmem:[%s19309_s16] sm:$0xff] }
 0x560   :  { %v3682_v21 = vld [vmem:[%s19309_s16 + $0x20] sm:$0xff] }
 0x561   :  { %v3548_v27 = vadd.f32 %v7153_v24, %v14763_v11  ;;  %v8657_v11 = vpack.c.bf16 %v3819_v62, %v3815_v33  ;;  %v3808_v24 = vld [vmem:[%s19310_s17 + $0x10] sm:$0xff] }
 0x562   :  { %v3816_v62 = vld [vmem:[%s19310_s17 + $0x50] sm:$0xff] }
 0x563   :  { %v3558_v34 = vadd.f32 %v7101_v41, %v3548_v27  ;;  %v3812_v41 = vld [vmem:[%s19310_s17 + $0x30] sm:$0xff]  ;;  %v3817_v27 = vld [vmem:[%s19310_s17 + $0x58] sm:$0xff] }
 0x564   :  { %v8687_v31 = vpack.c.bf16 %v3812_v41, %v3808_v24  ;;  %v8689_v33 = vpack.c.bf16 %v3821_v28, %v3817_v27  ;;  %v8719_v24 = vpack.c.bf16 %v3682_v21, %v3678_v20  ;;  %v3686_v27 = vld [vmem:[%s19309_s16 + $0x40] sm:$0xff] }
 0x565   :  { %v3559_v36 = vmax.f32 %v3558_v34, 0.0  ;;  %v3820_v34 = vld [vmem:[%s19310_s17 + $0x70] sm:$0xff]  ;;  %v3690_v28 = vld [vmem:[%s19309_s16 + $0x60] sm:$0xff] }
 0x566   :  { %v8691_v18 = vpack.c.bf16 %v3820_v34, %v3816_v62  ;;  %v8723_v62 = vpack.c.bf16 %v3690_v28, %v3686_v27 }
 0x567   :  { %3560 = vst [vmem:[#allocation4] sm:$0x3] %v3559_v36  ;;  %3670 = vmatmul.mubr.f32.vlgmr.msra.gmra.mrb[10].mxu1 %v3559_v36  ;;  %v3829_v36 = vld [vmem:[%s19310_s17 + $0xb8] sm:$0xff] }
 0x568   :  { %8656 = vmatpush1.bf16.msra.mxu1 %v8655_v35  ;;  %3934 = vmatprep.mubr.f32.mxu1 %v10195_v7  ;;  %v3825_v35 = vld [vmem:[%s19310_s17 + $0x98] sm:$0xff] }
 0x569   :  { %8658 = vmatprep.subr.bf16.mxu1 %v8657_v11  ;;  %v14995_v11 = vld [vmem:[%s19341_s28] sm:$0x3]  ;;  %v8693_v38 = vpack.c.bf16 %v3829_v36, %v3825_v35 }
 0x56a   :  { %v3694_v35 = vld [vmem:[%s19309_s16 + $0x80] sm:$0xff] }
 0x56b   :  { %v3698_v36 = vld [vmem:[%s19309_s16 + $0xa0] sm:$0xff] }
 0x56c   :  { %8660 = vmatpush1.bf16.msra.mxu1 %v8659_v44  ;;  %v3833_v44 = vld [vmem:[%s19310_s17 + $0xd8] sm:$0xff]  ;;  %v8727_v40 = vpack.c.bf16 %v3698_v36, %v3694_v35 }
 0x56d   :  { %8662 = vmatprep.subr.bf16.mxu1 %v8661_v39  ;;  %v3837_v39 = vld [vmem:[%s19310_s17 + $0xf8] sm:$0xff] }
 0x56e   :  { %v8697_v46 = vpack.c.bf16 %v3837_v39, %v3833_v44  ;;  %v3702_v44 = vld [vmem:[%s19309_s16 + $0xc0] sm:$0xff] }
 0x56f   :  { %v3706_v39 = vld [vmem:[%s19309_s16 + $0xe0] sm:$0xff] }
 0x570   :  { %8664 = vmatpush1.bf16.msra.mxu1 %v8663_v51  ;;  %v3841_v51 = vld [vmem:[%s19310_s17 + $0x118] sm:$0xff]  ;;  %v8731_v49 = vpack.c.bf16 %v3706_v39, %v3702_v44 }
 0x571   :  { %8666 = vmatprep.subr.bf16.mxu1 %v8665_v52  ;;  %v3845_v52 = vld [vmem:[%s19310_s17 + $0x138] sm:$0xff] }
 0x572   :  { %v8701_v56 = vpack.c.bf16 %v3845_v52, %v3841_v51  ;;  %v3710_v51 = vld [vmem:[%s19309_s16 + $0x100] sm:$0xff] }
 0x573   :  { %v3714_v52 = vld [vmem:[%s19309_s16 + $0x120] sm:$0xff] }
 0x574   :  { %8668 = vmatpush1.bf16.msra.mxu1 %v8667_v42  ;;  %v3849_v42 = vld [vmem:[%s19310_s17 + $0x158] sm:$0xff]  ;;  %v8735_v57 = vpack.c.bf16 %v3714_v52, %v3710_v51 }
 0x575   :  { %8670 = vmatprep.subr.bf16.mxu1 %v8669_v58  ;;  %v3853_v58 = vld [vmem:[%s19310_s17 + $0x178] sm:$0xff] }
 0x576   :  { %v8705_v59 = vpack.c.bf16 %v3853_v58, %v3849_v42  ;;  %v3718_v42 = vld [vmem:[%s19309_s16 + $0x140] sm:$0xff] }
 0x577   :  { %v3722_v58 = vld [vmem:[%s19309_s16 + $0x160] sm:$0xff] }
 0x578   :  { %8672 = vmatpush1.bf16.msra.mxu1 %v8671_v32  ;;  %v3857_v32 = vld [vmem:[%s19310_s17 + $0x198] sm:$0xff]  ;;  %v8739_v60 = vpack.c.bf16 %v3722_v58, %v3718_v42  ;;  %v3790_v58 = vld [vmem:[%s19309_s16 + $0x380] sm:$0xff] }
 0x579   :  { %8674 = vmatprep.subr.bf16.mxu1 %v8673_v63  ;;  %v3861_v63 = vld [vmem:[%s19310_s17 + $0x1b8] sm:$0xff] }
 0x57a   :  { %v8709_v1 = vpack.c.bf16 %v3861_v63, %v3857_v32  ;;  %v3726_v32 = vld [vmem:[%s19309_s16 + $0x180] sm:$0xff] }
 0x57b   :  { %v3730_v63 = vld [vmem:[%s19309_s16 + $0x1a0] sm:$0xff] }
 0x57c   :  { %8676 = vmatpush1.bf16.msra.mxu1 %v8675_v5  ;;  %v3865_v5 = vld [vmem:[%s19310_s17 + $0x1d8] sm:$0xff]  ;;  %v8743_v54 = vpack.c.bf16 %v3730_v63, %v3726_v32  ;;  %v4696_v63 = vld [vmem:[%s19313_s20] sm:$0xff] }
 0x57d   :  { %8678 = vmatprep.subr.bf16.mxu1 %v8677_v6  ;;  %v3869_v6 = vld [vmem:[%s19310_s17 + $0x1f8] sm:$0xff] }
 0x57e   :  { %v8713_v29 = vpack.c.bf16 %v3869_v6, %v3865_v5  ;;  %v3734_v5 = vld [vmem:[%s19309_s16 + $0x1c0] sm:$0xff] }
 0x57f   :  { %v3738_v6 = vld [vmem:[%s19309_s16 + $0x1e0] sm:$0xff] }
 0x580   :  { %8680 = vmatpush1.bf16.msra.mxu1 %v8679_v12  ;;  %v3679_v12 = vld [vmem:[%s19309_s16 + $0x8] sm:$0xff]  ;;  %v8747_v9 = vpack.c.bf16 %v3738_v6, %v3734_v5  ;;  %v3798_v6 = vld [vmem:[%s19309_s16 + $0x3c0] sm:$0xff] }
 0x581   :  { %8682 = vmatprep.subr.bf16.mxu1 %v8681_v13  ;;  %v3683_v13 = vld [vmem:[%s19309_s16 + $0x28] sm:$0xff] }
 0x582   :  { %v8717_v19 = vpack.c.bf16 %v3683_v13, %v3679_v12  ;;  %v3742_v12 = vld [vmem:[%s19309_s16 + $0x200] sm:$0xff] }
 0x583   :  { %v3746_v13 = vld [vmem:[%s19309_s16 + $0x220] sm:$0xff] }
 0x584   :  { %8684 = vmatpush1.bf16.msra.mxu1 %v8683_v22  ;;  %v3687_v22 = vld [vmem:[%s19309_s16 + $0x48] sm:$0xff]  ;;  %v8751_v20 = vpack.c.bf16 %v3746_v13, %v3742_v12  ;;  %v4712_v13 = vld [vmem:[%s19313_s20 + $0x80] sm:$0xff] }
 0x585   :  { %8686 = vmatprep.subr.bf16.mxu1 %v8685_v3  ;;  %v3691_v3 = vld [vmem:[%s19309_s16 + $0x68] sm:$0xff] }
 0x586   :  { %v8721_v41 = vpack.c.bf16 %v3691_v3, %v3687_v22  ;;  %v3750_v22 = vld [vmem:[%s19309_s16 + $0x240] sm:$0xff] }
 0x587   :  { %3935 = vmatmul.mubr.f32.vlgmr.msra.gmra.mrb[12].mxu1 %v14995_v11  ;;  %v3754_v3 = vld [vmem:[%s19309_s16 + $0x260] sm:$0xff] }
 0x588   :  { %8688 = vmatpush1.bf16.msra.mxu1 %v8687_v31  ;;  %4005 = vmatprep.mubr.f32.mxu1 %v10195_v7  ;;  %v3695_v31 = vld [vmem:[%s19309_s16 + $0x88] sm:$0xff]  ;;  %v8755_v27 = vpack.c.bf16 %v3754_v3, %v3750_v22 }
 0x589   :  { %8690 = vmatprep.subr.bf16.mxu1 %v8689_v33  ;;  %v3699_v33 = vld [vmem:[%s19309_s16 + $0xa8] sm:$0xff] }
 0x58a   :  { %v8725_v34 = vpack.c.bf16 %v3699_v33, %v3695_v31  ;;  %v3758_v31 = vld [vmem:[%s19309_s16 + $0x280] sm:$0xff]  ;;  %v4729_v3 = vld [vmem:[%s19313_s20 + $0x108] sm:$0xff] }
 0x58b   :  { %v3762_v33 = vld [vmem:[%s19309_s16 + $0x2a0] sm:$0xff] }
 0x58c   :  { %8692 = vmatpush1.bf16.msra.mxu1 %v8691_v18  ;;  %v3703_v18 = vld [vmem:[%s19309_s16 + $0xc8] sm:$0xff]  ;;  %v8759_v35 = vpack.c.bf16 %v3762_v33, %v3758_v31  ;;  %v4736_v31 = vld [vmem:[%s19313_s20 + $0x140] sm:$0xff] }
 0x58d   :  { %8694 = vmatprep.subr.bf16.mxu1 %v8693_v38  ;;  %v3707_v38 = vld [vmem:[%s19309_s16 + $0xe8] sm:$0xff] }
 0x58e   :  { %v8729_v43 = vpack.c.bf16 %v3707_v38, %v3703_v18  ;;  %v3766_v18 = vld [vmem:[%s19309_s16 + $0x2c0] sm:$0xff] }
 0x58f   :  { %v3770_v38 = vld [vmem:[%s19309_s16 + $0x2e0] sm:$0xff] }
 0x590   :  { %8696 = vmatpush1.bf16.msra.mxu1 %v8695_v45  ;;  %v3711_v45 = vld [vmem:[%s19309_s16 + $0x108] sm:$0xff]  ;;  %v8763_v44 = vpack.c.bf16 %v3770_v38, %v3766_v18  ;;  %v4752_v18 = vld [vmem:[%s19313_s20 + $0x1c0] sm:$0xff] }
 0x591   :  { %8698 = vmatprep.subr.bf16.mxu1 %v8697_v46  ;;  %v3715_v46 = vld [vmem:[%s19309_s16 + $0x128] sm:$0xff] }
 0x592   :  { %v8733_v50 = vpack.c.bf16 %v3715_v46, %v3711_v45  ;;  %v3774_v45 = vld [vmem:[%s19309_s16 + $0x300] sm:$0xff] }
 0x593   :  { %v3778_v46 = vld [vmem:[%s19309_s16 + $0x320] sm:$0xff] }
 0x594   :  { %8700 = vmatpush1.bf16.msra.mxu1 %v8699_v55  ;;  %v3719_v55 = vld [vmem:[%s19309_s16 + $0x148] sm:$0xff]  ;;  %v8767_v51 = vpack.c.bf16 %v3778_v46, %v3774_v45  ;;  %v4768_v45 = vld [vmem:[%s19313_s20 + $0x240] sm:$0xff] }
 0x595   :  { %8702 = vmatprep.subr.bf16.mxu1 %v8701_v56  ;;  %v3723_v56 = vld [vmem:[%s19309_s16 + $0x168] sm:$0xff] }
 0x596   :  { %v8737_v14 = vpack.c.bf16 %v3723_v56, %v3719_v55  ;;  %v3782_v55 = vld [vmem:[%s19309_s16 + $0x340] sm:$0xff] }
 0x597   :  { %v3786_v56 = vld [vmem:[%s19309_s16 + $0x360] sm:$0xff] }
 0x598   :  { %8704 = vmatpush1.bf16.msra.mxu1 %v8703_v47  ;;  %v3727_v47 = vld [vmem:[%s19309_s16 + $0x188] sm:$0xff]  ;;  %v8771_v42 = vpack.c.bf16 %v3786_v56, %v3782_v55  ;;  %v4784_v55 = vld [vmem:[%s19313_s20 + $0x2c0] sm:$0xff] }
 0x599   :  { %8706 = vmatprep.subr.bf16.mxu1 %v8705_v59  ;;  %v3731_v59 = vld [vmem:[%s19309_s16 + $0x1a8] sm:$0xff] }
 0x59a   :  { %v8741_v61 = vpack.c.bf16 %v3731_v59, %v3727_v47  ;;  %v4697_v47 = vld [vmem:[%s19313_s20 + $0x8] sm:$0xff] }
 0x59b   :  { %v4705_v59 = vld [vmem:[%s19313_s20 + $0x48] sm:$0xff] }
 0x59c   :  { %8708 = vmatpush1.bf16.msra.mxu1 %v8707_v0  ;;  %v3735_v0 = vld [vmem:[%s19309_s16 + $0x1c8] sm:$0xff]  ;;  %v8845_v32 = vpack.c.bf16 %v4705_v59, %v4697_v47  ;;  %v4800_v47 = vld [vmem:[%s19313_s20 + $0x340] sm:$0xff] }
 0x59d   :  { %8710 = vmatprep.subr.bf16.mxu1 %v8709_v1  ;;  %v3739_v1 = vld [vmem:[%s19309_s16 + $0x1e8] sm:$0xff] }
 0x59e   :  { %v8745_v2 = vpack.c.bf16 %v3739_v1, %v3735_v0  ;;  %v4704_v0 = vld [vmem:[%s19313_s20 + $0x40] sm:$0xff]  ;;  %v3799_v1 = vld [vmem:[%s19309_s16 + $0x3c8] sm:$0xff]  ;;  %8846 = vmatprep.subr.bf16.mxu0 %v8845_v32 }
 0x5a0   :  { %8712 = vmatpush1.bf16.msra.mxu1 %v8711_v8  ;;  %v3743_v8 = vld [vmem:[%s19309_s16 + $0x208] sm:$0xff] }
 0x5a1   :  { %8714 = vmatprep.subr.bf16.mxu1 %v8713_v29  ;;  %v3747_v29 = vld [vmem:[%s19309_s16 + $0x228] sm:$0xff] }
 0x5a2   :  { %v8749_v17 = vpack.c.bf16 %v3747_v29, %v3743_v8  ;;  %v4713_v8 = vld [vmem:[%s19313_s20 + $0x88] sm:$0xff] }
 0x5a3   :  { %v4721_v29 = vld [vmem:[%s19313_s20 + $0xc8] sm:$0xff] }
 0x5a4   :  { %8716 = vmatpush1.bf16.msra.mxu1 %v8715_v15  ;;  %v3751_v15 = vld [vmem:[%s19309_s16 + $0x248] sm:$0xff]  ;;  %v8849_v12 = vpack.c.bf16 %v4721_v29, %v4713_v8  ;;  %v4706_v8 = vld [vmem:[%s19313_s20 + $0x50] sm:$0xff] }
 0x5a5   :  { %8718 = vmatprep.subr.bf16.mxu1 %v8717_v19  ;;  %v3755_v19 = vld [vmem:[%s19309_s16 + $0x268] sm:$0xff] }
 0x5a6   :  { %v8753_v21 = vpack.c.bf16 %v3755_v19, %v3751_v15  ;;  %v4720_v15 = vld [vmem:[%s19313_s20 + $0xc0] sm:$0xff]  ;;  %v3681_v19 = vld [vmem:[%s19309_s16 + $0x18] sm:$0xff] }
 0x5a7   :  { %4006 = vmatmul.mubr.f32.vlgmr.msra.gmra.mrb[14].mxu1 %v14995_v11 }
 0x5a8   :  { %8720 = vmatpush1.bf16.msra.mxu1 %v8719_v24  ;;  %v3759_v24 = vld [vmem:[%s19309_s16 + $0x288] sm:$0xff] }
 0x5a9   :  { %8722 = vmatprep.subr.bf16.mxu1 %v8721_v41  ;;  %v3763_v41 = vld [vmem:[%s19309_s16 + $0x2a8] sm:$0xff] }
 0x5aa   :  { %v8757_v28 = vpack.c.bf16 %v3763_v41, %v3759_v24  ;;  %v4737_v24 = vld [vmem:[%s19313_s20 + $0x148] sm:$0xff] }
 0x5ac   :  { %8724 = vmatpush1.bf16.msra.mxu1 %v8723_v62  ;;  %v3767_v62 = vld [vmem:[%s19309_s16 + $0x2c8] sm:$0xff] }
 0x5ad   :  { %8726 = vmatprep.subr.bf16.mxu1 %v8725_v34  ;;  %v3771_v34 = vld [vmem:[%s19309_s16 + $0x2e8] sm:$0xff] }
 0x5ae   :  { %v8761_v36 = vpack.c.bf16 %v3771_v34, %v3767_v62  ;;  %v4745_v62 = vld [vmem:[%s19313_s20 + $0x188] sm:$0xff] }
 0x5af   :  { %v4753_v34 = vld [vmem:[%s19313_s20 + $0x1c8] sm:$0xff] }
 0x5b0   :  { %8728 = vmatpush1.bf16.msra.mxu1 %v8727_v40  ;;  %v3775_v40 = vld [vmem:[%s19309_s16 + $0x308] sm:$0xff] }
 0x5b1   :  { %8730 = vmatprep.subr.bf16.mxu1 %v8729_v43  ;;  %v3779_v43 = vld [vmem:[%s19309_s16 + $0x328] sm:$0xff] }
 0x5b2   :  { %v8765_v39 = vpack.c.bf16 %v3779_v43, %v3775_v40  ;;  %v4761_v40 = vld [vmem:[%s19313_s20 + $0x208] sm:$0xff] }
 0x5b3   :  { %v4769_v43 = vld [vmem:[%s19313_s20 + $0x248] sm:$0xff] }
 0x5b4   :  { %8732 = vmatpush1.bf16.msra.mxu1 %v8731_v49  ;;  %v3783_v49 = vld [vmem:[%s19309_s16 + $0x348] sm:$0xff] }
 0x5b5   :  { %8734 = vmatprep.subr.bf16.mxu1 %v8733_v50  ;;  %v3787_v50 = vld [vmem:[%s19309_s16 + $0x368] sm:$0xff] }
 0x5b6   :  { %v8769_v52 = vpack.c.bf16 %v3787_v50, %v3783_v49  ;;  %v4777_v49 = vld [vmem:[%s19313_s20 + $0x288] sm:$0xff] }
 0x5b7   :  { %v4785_v50 = vld [vmem:[%s19313_s20 + $0x2c8] sm:$0xff] }
 0x5b8   :  { %8736 = vmatpush1.bf16.msra.mxu1 %v8735_v57  ;;  %v3791_v57 = vld [vmem:[%s19309_s16 + $0x388] sm:$0xff] }
 0x5b9   :  { %8738 = vmatprep.subr.bf16.mxu1 %v8737_v14  ;;  %v3795_v14 = vld [vmem:[%s19309_s16 + $0x3a8] sm:$0xff] }
 0x5bc   :  { %8740 = vmatpush1.bf16.msra.mxu1 %v8739_v60  ;;  %v8773_v60 = vpack.c.bf16 %v3795_v14, %v3791_v57  ;;  %v4793_v57 = vld [vmem:[%s19313_s20 + $0x308] sm:$0xff] }
 0x5bd   :  { %8742 = vmatprep.subr.bf16.mxu1 %v8741_v61  ;;  %v3794_v61 = vld [vmem:[%s19309_s16 + $0x3a0] sm:$0xff]  ;;  %v4801_v14 = vld [vmem:[%s19313_s20 + $0x348] sm:$0xff] }
 0x5be   :  { %v8775_v5 = vpack.c.bf16 %v3794_v61, %v3790_v58  ;;  %v4792_v58 = vld [vmem:[%s19313_s20 + $0x300] sm:$0xff]  ;;  %v4817_v61 = vld [vmem:[%s19313_s20 + $0x3c8] sm:$0xff] }
 0x5bf   :  { %v8871_v59 = vpack.c.bf16 %v4800_v47, %v4792_v58 }
 0x5c0   :  { %8744 = vmatpush1.bf16.msra.mxu1 %v8743_v54  ;;  %v3803_v54 = vld [vmem:[%s19309_s16 + $0x3e8] sm:$0xff] }
 0x5c1   :  { %8746 = vmatprep.subr.bf16.mxu1 %v8745_v2  ;;  %v8847_v2 = vpack.c.bf16 %v4704_v0, %v4696_v63  ;;  %v4808_v63 = vld [vmem:[%s19313_s20 + $0x380] sm:$0xff] }
 0x5c2   :  { %v4816_v0 = vld [vmem:[%s19313_s20 + $0x3c0] sm:$0xff] }
 0x5c3   :  { %8848 = vmatpush1.bf16.msra.mxu0 %v8847_v2  ;;  %v4707_v2 = vld [vmem:[%s19313_s20 + $0x58] sm:$0xff] }
 0x5c4   :  { %8748 = vmatpush1.bf16.msra.mxu1 %v8747_v9  ;;  %v8777_v9 = vpack.c.bf16 %v3803_v54, %v3799_v1  ;;  %8850 = vmatprep.subr.bf16.mxu0 %v8849_v12  ;;  %v8875_v1 = vpack.c.bf16 %v4816_v0, %v4808_v63  ;;  %v4699_v54 = vld [vmem:[%s19313_s20 + $0x18] sm:$0xff] }
 0x5c5   :  { %8750 = vmatprep.subr.bf16.mxu1 %v8749_v17  ;;  %v3802_v17 = vld [vmem:[%s19309_s16 + $0x3e0] sm:$0xff] }
 0x5c6   :  { %v8779_v22 = vpack.c.bf16 %v3802_v17, %v3798_v6  ;;  %v4698_v6 = vld [vmem:[%s19313_s20 + $0x10] sm:$0xff]  ;;  %v4723_v17 = vld [vmem:[%s19313_s20 + $0xd8] sm:$0xff] }
 0x5c7   :  { %v8879_v29 = vpack.c.bf16 %v4706_v8, %v4698_v6 }
 0x5c8   :  { %8752 = vmatpush1.bf16.msra.mxu1 %v8751_v20  ;;  %v3685_v20 = vld [vmem:[%s19309_s16 + $0x38] sm:$0xff] }
 0x5c9   :  { %8754 = vmatprep.subr.bf16.mxu1 %v8753_v21  ;;  %v8851_v21 = vpack.c.bf16 %v4720_v15, %v4712_v13  ;;  %v8781_v41 = vpack.c.bf16 %v3685_v20, %v3681_v19  ;;  %v4714_v13 = vld [vmem:[%s19313_s20 + $0x90] sm:$0xff]  ;;  %v4731_v20 = vld [vmem:[%s19313_s20 + $0x118] sm:$0xff] }
 0x5ca   :  { %v4722_v15 = vld [vmem:[%s19313_s20 + $0xd0] sm:$0xff] }
 0x5cb   :  { %8852 = vmatpush1.bf16.msra.mxu0 %v8851_v21  ;;  %v8883_v19 = vpack.c.bf16 %v4722_v15, %v4714_v13  ;;  %v4739_v21 = vld [vmem:[%s19313_s20 + $0x158] sm:$0xff] }
 0x5cc   :  { %8756 = vmatpush1.bf16.msra.mxu1 %v8755_v27  ;;  %v8853_v27 = vpack.c.bf16 %v4737_v24, %v4729_v3  ;;  %v4730_v3 = vld [vmem:[%s19313_s20 + $0x110] sm:$0xff] }
 0x5cd   :  { %8758 = vmatprep.subr.bf16.mxu1 %v8757_v28  ;;  %v4728_v28 = vld [vmem:[%s19313_s20 + $0x100] sm:$0xff]  ;;  %v4738_v24 = vld [vmem:[%s19313_s20 + $0x150] sm:$0xff] }
 0x5ce   :  { %v8855_v33 = vpack.c.bf16 %v4736_v31, %v4728_v28  ;;  %8854 = vmatprep.subr.bf16.mxu0 %v8853_v27  ;;  %v8887_v27 = vpack.c.bf16 %v4738_v24, %v4730_v3  ;;  %v4755_v28 = vld [vmem:[%s19313_s20 + $0x1d8] sm:$0xff]  ;;  %v4746_v31 = vld [vmem:[%s19313_s20 + $0x190] sm:$0xff] }
 0x5d0   :  { %8760 = vmatpush1.bf16.msra.mxu1 %v8759_v35  ;;  %8856 = vmatpush1.bf16.msra.mxu0 %v8855_v33  ;;  %v8857_v35 = vpack.c.bf16 %v4753_v34, %v4745_v62  ;;  %v4754_v33 = vld [vmem:[%s19313_s20 + $0x1d0] sm:$0xff]  ;;  %v4763_v34 = vld [vmem:[%s19313_s20 + $0x218] sm:$0xff] }
 0x5d1   :  { %8762 = vmatprep.subr.bf16.mxu1 %v8761_v36  ;;  %v4744_v36 = vld [vmem:[%s19313_s20 + $0x180] sm:$0xff] }
 0x5d2   :  { %v8859_v38 = vpack.c.bf16 %v4752_v18, %v4744_v36  ;;  %8858 = vmatprep.subr.bf16.mxu0 %v8857_v35  ;;  %v4771_v35 = vld [vmem:[%s19313_s20 + $0x258] sm:$0xff]  ;;  %v8891_v36 = vpack.c.bf16 %v4754_v33, %v4746_v31  ;;  %v4773_v31 = vld [vmem:[%s19313_s20 + $0x268] sm:$0xff] }
 0x5d3   :  { %v8893_v18 = vpack.c.bf16 %v4771_v35, %v4763_v34  ;;  %v4764_v34 = vld [vmem:[%s19313_s20 + $0x220] sm:$0xff] }
 0x5d4   :  { %8764 = vmatpush1.bf16.msra.mxu1 %v8763_v44  ;;  %8860 = vmatpush1.bf16.msra.mxu0 %v8859_v38  ;;  %v8861_v44 = vpack.c.bf16 %v4769_v43, %v4761_v40  ;;  %v4762_v38 = vld [vmem:[%s19313_s20 + $0x210] sm:$0xff]  ;;  %v4779_v43 = vld [vmem:[%s19313_s20 + $0x298] sm:$0xff]  ;;  %v4772_v35 = vld [vmem:[%s19313_s20 + $0x260] sm:$0xff] }
 0x5d5   :  { %8766 = vmatprep.subr.bf16.mxu1 %v8765_v39  ;;  %v4760_v39 = vld [vmem:[%s19313_s20 + $0x200] sm:$0xff]  ;;  %v4770_v40 = vld [vmem:[%s19313_s20 + $0x250] sm:$0xff] }
 0x5d6   :  { %v8863_v46 = vpack.c.bf16 %v4768_v45, %v4760_v39  ;;  %8862 = vmatprep.subr.bf16.mxu0 %v8861_v44  ;;  %v4787_v44 = vld [vmem:[%s19313_s20 + $0x2d8] sm:$0xff]  ;;  %v8895_v39 = vpack.c.bf16 %v4770_v40, %v4762_v38  ;;  %v8927_v38 = vpack.c.bf16 %v4772_v35, %v4764_v34 }
 0x5d7   :  { %v8897_v45 = vpack.c.bf16 %v4787_v44, %v4779_v43  ;;  %v4780_v43 = vld [vmem:[%s19313_s20 + $0x2a0] sm:$0xff] }
 0x5d8   :  { %8768 = vmatpush1.bf16.msra.mxu1 %v8767_v51  ;;  %8864 = vmatpush1.bf16.msra.mxu0 %v8863_v46  ;;  %v8865_v51 = vpack.c.bf16 %v4785_v50, %v4777_v49  ;;  %v4778_v46 = vld [vmem:[%s19313_s20 + $0x290] sm:$0xff]  ;;  %v4795_v50 = vld [vmem:[%s19313_s20 + $0x318] sm:$0xff]  ;;  %v4788_v44 = vld [vmem:[%s19313_s20 + $0x2e0] sm:$0xff] }
 0x5d9   :  { %8770 = vmatprep.subr.bf16.mxu1 %v8769_v52  ;;  %v4776_v52 = vld [vmem:[%s19313_s20 + $0x280] sm:$0xff]  ;;  %v4786_v49 = vld [vmem:[%s19313_s20 + $0x2d0] sm:$0xff] }
 0x5da   :  { %v8867_v56 = vpack.c.bf16 %v4784_v55, %v4776_v52  ;;  %8866 = vmatprep.subr.bf16.mxu0 %v8865_v51  ;;  %v4803_v51 = vld [vmem:[%s19313_s20 + $0x358] sm:$0xff]  ;;  %v8899_v52 = vpack.c.bf16 %v4786_v49, %v4778_v46  ;;  %v8931_v46 = vpack.c.bf16 %v4788_v44, %v4780_v43 }
 0x5db   :  { %v8901_v55 = vpack.c.bf16 %v4803_v51, %v4795_v50  ;;  %v4796_v50 = vld [vmem:[%s19313_s20 + $0x320] sm:$0xff] }
 0x5dc   :  { %8772 = vmatpush1.bf16.msra.mxu1 %v8771_v42  ;;  %8868 = vmatpush1.bf16.msra.mxu0 %v8867_v56  ;;  %v8869_v42 = vpack.c.bf16 %v4801_v14, %v4793_v57  ;;  %v4794_v56 = vld [vmem:[%s19313_s20 + $0x310] sm:$0xff]  ;;  %v4811_v14 = vld [vmem:[%s19313_s20 + $0x398] sm:$0xff]  ;;  %v4804_v51 = vld [vmem:[%s19313_s20 + $0x360] sm:$0xff] }
 0x5dd   :  { %8774 = vmatprep.subr.bf16.mxu1 %v8773_v60  ;;  %v4809_v60 = vld [vmem:[%s19313_s20 + $0x388] sm:$0xff]  ;;  %v4802_v57 = vld [vmem:[%s19313_s20 + $0x350] sm:$0xff] }
 0x5de   :  { %8870 = vmatprep.subr.bf16.mxu0 %v8869_v42  ;;  %v8873_v32 = vpack.c.bf16 %v4817_v61, %v4809_v60  ;;  %v4819_v42 = vld [vmem:[%s19313_s20 + $0x3d8] sm:$0xff]  ;;  %v8903_v58 = vpack.c.bf16 %v4802_v57, %v4794_v56  ;;  %v4818_v60 = vld [vmem:[%s19313_s20 + $0x3d0] sm:$0xff]  ;;  %v4701_v61 = vld [vmem:[%s19313_s20 + $0x28] sm:$0xff]  ;;  %v8935_v56 = vpack.c.bf16 %v4804_v51, %v4796_v50 }
 0x5df   :  { %v8905_v47 = vpack.c.bf16 %v4819_v42, %v4811_v14  ;;  %v4812_v14 = vld [vmem:[%s19313_s20 + $0x3a0] sm:$0xff]  ;;  %v4775_v50 = vld [vmem:[%s19313_s20 + $0x278] sm:$0xff] }
 0x5e0   :  { %8776 = vmatpush1.bf16.msra.mxu1 %v8775_v5  ;;  %8872 = vmatpush1.bf16.msra.mxu0 %v8871_v59  ;;  %v8877_v5 = vpack.c.bf16 %v4707_v2, %v4699_v54  ;;  %v4810_v59 = vld [vmem:[%s19313_s20 + $0x390] sm:$0xff]  ;;  %v4708_v54 = vld [vmem:[%s19313_s20 + $0x60] sm:$0xff]  ;;  %v4717_v2 = vld [vmem:[%s19313_s20 + $0xa8] sm:$0xff] }
 0x5e1   :  { %8778 = vmatprep.subr.bf16.mxu1 %v8777_v9  ;;  %8874 = vmatprep.subr.bf16.mxu0 %v8873_v32  ;;  %v4715_v9 = vld [vmem:[%s19313_s20 + $0x98] sm:$0xff]  ;;  %v4709_v32 = vld [vmem:[%s19313_s20 + $0x68] sm:$0xff]  ;;  %v8907_v63 = vpack.c.bf16 %v4818_v60, %v4810_v59  ;;  %v4820_v42 = vld [vmem:[%s19313_s20 + $0x3e0] sm:$0xff] }
 0x5e2   :  { %v8881_v12 = vpack.c.bf16 %v4723_v17, %v4715_v9  ;;  %v8909_v0 = vpack.c.bf16 %v4709_v32, %v4701_v61  ;;  %v4724_v9 = vld [vmem:[%s19313_s20 + $0xe0] sm:$0xff]  ;;  %v4733_v17 = vld [vmem:[%s19313_s20 + $0x128] sm:$0xff]  ;;  %v8939_v60 = vpack.c.bf16 %v4820_v42, %v4812_v14  ;;  %v4702_v32 = vld [vmem:[%s19313_s20 + $0x30] sm:$0xff] }
 0x5e3   :  { %v3593_v59 = vld [vmem:[%s19308_s15] sm:$0x3]  ;;  %s10199_s15 = smov [#allocation4]  }
 0x5e4   :  { %8780 = vmatpush1.bf16.msra.mxu1 %v8779_v22  ;;  %8876 = vmatpush1.bf16.msra.mxu0 %v8875_v1  ;;  %v8885_v22 = vpack.c.bf16 %v4739_v21, %v4731_v20  ;;  %v4700_v1 = vld [vmem:[%s19313_s20 + $0x20] sm:$0xff]  ;;  %v4749_v21 = vld [vmem:[%s19313_s20 + $0x1a8] sm:$0xff]  ;;  %s7089_s3 = sshll.u32 %s10199_s15, 4  ;;  %s7090_s3 = int_to_ptr.vmem [resolvable:$true] %s7089_s3 }
 0x5e5   :  { %8782 = vmatprep.subr.bf16.mxu1 %v8781_v41  ;;  %8878 = vmatprep.subr.bf16.mxu0 %v8877_v5  ;;  %v4747_v41 = vld [vmem:[%s19313_s20 + $0x198] sm:$0xff]  ;;  %v4725_v5 = vld [vmem:[%s19313_s20 + $0xe8] sm:$0xff]  ;;  %v8911_v6 = vpack.c.bf16 %v4708_v54, %v4700_v1  ;;  %v4740_v20 = vld [vmem:[%s19313_s20 + $0x160] sm:$0xff]  ;;  %v3598_v54 = vrot.slane %v3593_v59, %v12884_v48  ;;  %s10147_s8 = scalar_lea.vmem %s7090_s3, 32  ;;  %p10152_p1 = scmp.lt.s32.totalorder %s7090_s3, %s7090_s3 }
 0x5e6   :  { %v8889_v62 = vpack.c.bf16 %v4755_v28, %v4747_v41  ;;  %v8913_v8 = vpack.c.bf16 %v4725_v5, %v4717_v2  ;;  %v4748_v41 = vld [vmem:[%s19313_s20 + $0x1a0] sm:$0xff]  ;;  %v4765_v28 = vld [vmem:[%s19313_s20 + $0x228] sm:$0xff]  ;;  %v4727_v1 = vld [vmem:[%s19313_s20 + $0xf8] sm:$0xff]  ;;  %v3602_v2 = vrot.slane %v3593_v59, %v12887_v25  ;;  %p10148_p0 = scmp.ne.s32.totalorder %s7090_s3, %s10147_s8  ;;  %p10153_p2 = scmp.lt.s32.totalorder %s10147_s8, %s10147_s8 }
 0x5e7   :  { %4889 = vmatmul.mubr.f32.vlgmr.msra.gmra.mrb[10].mxu0 %v14995_v11 }
 0x5e8   :  { %8880 = vmatpush1.bf16.msra.mxu0 %v8879_v29  ;;  %4959 = vmatprep.mubr.f32.mxu0 %v10195_v7  ;;  %v4716_v29 = vld [vmem:[%s19313_s20 + $0xa0] sm:$0xff]  ;;  %p10154_p3 = por %p10153_p2, %p10152_p1 }
 0x5e9   :  { %8882 = vmatprep.subr.bf16.mxu0 %v8881_v12  ;;  %v4741_v12 = vld [vmem:[%s19313_s20 + $0x168] sm:$0xff]  ;;  %v8915_v13 = vpack.c.bf16 %v4724_v9, %v4716_v29  ;;  %v4726_v29 = vld [vmem:[%s19313_s20 + $0xf0] sm:$0xff] }
 0x5ea   :  { %v8917_v15 = vpack.c.bf16 %v4741_v12, %v4733_v17  ;;  %v4735_v17 = vld [vmem:[%s19313_s20 + $0x138] sm:$0xff]  ;;  %p10155_p4 = pnand %p10154_p3, %p10148_p0 }
 0x5eb   :  { %v4743_v12 = vld [vmem:[%s19313_s20 + $0x178] sm:$0xff] }
 0x5ec   :  { %8884 = vmatpush1.bf16.msra.mxu0 %v8883_v19  ;;  %v4732_v19 = vld [vmem:[%s19313_s20 + $0x120] sm:$0xff] }
 0x5ed   :  { %8886 = vmatprep.subr.bf16.mxu0 %v8885_v22  ;;  %v4757_v22 = vld [vmem:[%s19313_s20 + $0x1e8] sm:$0xff]  ;;  %v8919_v3 = vpack.c.bf16 %v4740_v20, %v4732_v19  ;;  %v3680_v19 = vld [vmem:[%s19309_s16 + $0x10] sm:$0xff] }
 0x5ee   :  { %v8921_v24 = vpack.c.bf16 %v4757_v22, %v4749_v21  ;;  %v3684_v20 = vld [vmem:[%s19309_s16 + $0x30] sm:$0xff]  ;;  %v3689_v22 = vld [vmem:[%s19309_s16 + $0x58] sm:$0xff] }
 0x5f0   :  { %8888 = vmatpush1.bf16.msra.mxu0 %v8887_v27  ;;  %v4756_v27 = vld [vmem:[%s19313_s20 + $0x1e0] sm:$0xff] }
 0x5f1   :  { %8890 = vmatprep.subr.bf16.mxu0 %v8889_v62  ;;  %v8923_v33 = vpack.c.bf16 %v4756_v27, %v4748_v41  ;;  %v8925_v62 = vpack.c.bf16 %v4773_v31, %v4765_v28  ;;  %v8949_v41 = vpack.c.bf16 %v4743_v12, %v4735_v17  ;;  %v4734_v27 = vld [vmem:[%s19313_s20 + $0x130] sm:$0xff]  ;;  %v8783_v31 = vpack.c.bf16 %v3684_v20, %v3680_v19  ;;  %v4807_v17 = vld [vmem:[%s19313_s20 + $0x378] sm:$0xff] }
 0x5f2   :  { %v3716_v19 = vld [vmem:[%s19309_s16 + $0x130] sm:$0xff]  ;;  %v3721_v20 = vld [vmem:[%s19309_s16 + $0x158] sm:$0xff] }
 0x5f4   :  { %8892 = vmatpush1.bf16.msra.mxu0 %v8891_v36  ;;  %v4781_v36 = vld [vmem:[%s19313_s20 + $0x2a8] sm:$0xff] }
 0x5f5   :  { %8894 = vmatprep.subr.bf16.mxu0 %v8893_v18  ;;  %v4789_v18 = vld [vmem:[%s19313_s20 + $0x2e8] sm:$0xff] }
 0x5f6   :  { %v8929_v40 = vpack.c.bf16 %v4789_v18, %v4781_v36  ;;  %v3688_v36 = vld [vmem:[%s19309_s16 + $0x50] sm:$0xff] }
 0x5f7   :  { %v3692_v18 = vld [vmem:[%s19309_s16 + $0x70] sm:$0xff] }
 0x5f8   :  { %8896 = vmatpush1.bf16.msra.mxu0 %v8895_v39  ;;  %v4797_v39 = vld [vmem:[%s19313_s20 + $0x328] sm:$0xff] }
 0x5f9   :  { %8898 = vmatprep.subr.bf16.mxu0 %v8897_v45  ;;  %v4805_v45 = vld [vmem:[%s19313_s20 + $0x368] sm:$0xff] }
 0x5fa   :  { %v8933_v49 = vpack.c.bf16 %v4805_v45, %v4797_v39  ;;  %v4750_v39 = vld [vmem:[%s19313_s20 + $0x1b0] sm:$0xff] }
 0x5fb   :  { %v4758_v45 = vld [vmem:[%s19313_s20 + $0x1f0] sm:$0xff] }
 0x5fc   :  { %8900 = vmatpush1.bf16.msra.mxu0 %v8899_v52  ;;  %v4813_v52 = vld [vmem:[%s19313_s20 + $0x3a8] sm:$0xff]  ;;  %v8955_v14 = vpack.c.bf16 %v4758_v45, %v4750_v39 }
 0x5fd   :  { %8902 = vmatprep.subr.bf16.mxu0 %v8901_v55  ;;  %v4821_v55 = vld [vmem:[%s19313_s20 + $0x3e8] sm:$0xff] }
 0x5fe   :  { %v8937_v57 = vpack.c.bf16 %v4821_v55, %v4813_v52  ;;  %v3696_v52 = vld [vmem:[%s19309_s16 + $0x90] sm:$0xff]  ;;  %v4185_v39 = vld [vmem:[%s19312_s19 + $0x8] sm:$0xff] }
 0x5ff   :  { %v3700_v55 = vld [vmem:[%s19309_s16 + $0xb0] sm:$0xff]  ;;  %v4193_v45 = vld [vmem:[%s19312_s19 + $0x48] sm:$0xff] }
 0x600   :  { %8904 = vmatpush1.bf16.msra.mxu0 %v8903_v58  ;;  %v4703_v58 = vld [vmem:[%s19313_s20 + $0x38] sm:$0xff]  ;;  %v8791_v59 = vpack.c.bf16 %v3700_v55, %v3696_v52 }
 0x601   :  { %8906 = vmatprep.subr.bf16.mxu0 %v8905_v47  ;;  %v4711_v47 = vld [vmem:[%s19313_s20 + $0x78] sm:$0xff] }
 0x602   :  { %v8941_v61 = vpack.c.bf16 %v4711_v47, %v4703_v58  ;;  %v4766_v58 = vld [vmem:[%s19313_s20 + $0x230] sm:$0xff]  ;;  %v3741_v52 = vld [vmem:[%s19309_s16 + $0x1f8] sm:$0xff] }
 0x603   :  { %v4774_v47 = vld [vmem:[%s19313_s20 + $0x270] sm:$0xff] }
 0x604   :  { %8908 = vmatpush1.bf16.msra.mxu0 %v8907_v63  ;;  %v4710_v63 = vld [vmem:[%s19313_s20 + $0x70] sm:$0xff] }
 0x605   :  { %8910 = vmatprep.subr.bf16.mxu0 %v8909_v0  ;;  %v4719_v0 = vld [vmem:[%s19313_s20 + $0xb8] sm:$0xff]  ;;  %v8943_v5 = vpack.c.bf16 %v4710_v63, %v4702_v32  ;;  %v3704_v63 = vld [vmem:[%s19309_s16 + $0xd0] sm:$0xff] }
 0x607   :  { %4960 = vmatmul.mubr.f32.vlgmr.msra.gmra.mrb[12].mxu0 %v14995_v11 }
 0x608   :  { %8912 = vmatpush1.bf16.msra.mxu0 %v8911_v6  ;;  %5030 = vmatprep.mubr.f32.mxu0 %v10195_v7  ;;  %v8945_v6 = vpack.c.bf16 %v4727_v1, %v4719_v0  ;;  %v3708_v0 = vld [vmem:[%s19309_s16 + $0xf0] sm:$0xff]  ;;  %v3713_v1 = vld [vmem:[%s19309_s16 + $0x118] sm:$0xff] }
 0x609   :  { %8914 = vmatprep.subr.bf16.mxu0 %v8913_v8  ;;  %v4718_v8 = vld [vmem:[%s19313_s20 + $0xb0] sm:$0xff] }
 0x60c   :  { %8916 = vmatpush1.bf16.msra.mxu0 %v8915_v13 }
 0x60d   :  { %8918 = vmatprep.subr.bf16.mxu0 %v8917_v15 }
 0x610   :  { %8920 = vmatpush1.bf16.msra.mxu0 %v8919_v3  ;;  %v3693_v3 = vld [vmem:[%s19309_s16 + $0x78] sm:$0xff] }
 0x611   :  { %8922 = vmatprep.subr.bf16.mxu0 %v8921_v24  ;;  %v8947_v24 = vpack.c.bf16 %v4726_v29, %v4718_v8  ;;  %v8785_v35 = vpack.c.bf16 %v3693_v3, %v3689_v22  ;;  %v4790_v8 = vld [vmem:[%s19313_s20 + $0x2f0] sm:$0xff]  ;;  %v8795_v29 = vpack.c.bf16 %v3708_v0, %v3704_v63  ;;  %v3749_v63 = vld [vmem:[%s19309_s16 + $0x238] sm:$0xff] }
 0x614   :  { %8924 = vmatpush1.bf16.msra.mxu0 %v8923_v33  ;;  %v4751_v33 = vld [vmem:[%s19313_s20 + $0x1b8] sm:$0xff] }
 0x615   :  { %8926 = vmatprep.subr.bf16.mxu0 %v8925_v62  ;;  %v4759_v62 = vld [vmem:[%s19313_s20 + $0x1f8] sm:$0xff] }
 0x616   :  { %v8953_v44 = vpack.c.bf16 %v4759_v62, %v4751_v33  ;;  %v3720_v33 = vld [vmem:[%s19309_s16 + $0x150] sm:$0xff] }
 0x617   :  { %v3724_v62 = vld [vmem:[%s19309_s16 + $0x170] sm:$0xff] }
 0x618   :  { %8928 = vmatpush1.bf16.msra.mxu0 %v8927_v38  ;;  %v3697_v38 = vld [vmem:[%s19309_s16 + $0x98] sm:$0xff] }
 0x619   :  { %8930 = vmatprep.subr.bf16.mxu0 %v8929_v40  ;;  %v3701_v40 = vld [vmem:[%s19309_s16 + $0xb8] sm:$0xff] }
 0x61a   :  { %v8789_v51 = vpack.c.bf16 %v3701_v40, %v3697_v38  ;;  %v4814_v40 = vld [vmem:[%s19313_s20 + $0x3b0] sm:$0xff] }
 0x61c   :  { %8932 = vmatpush1.bf16.msra.mxu0 %v8931_v46  ;;  %v8787_v46 = vpack.c.bf16 %v3692_v18, %v3688_v36  ;;  %v3733_v36 = vld [vmem:[%s19309_s16 + $0x1b8] sm:$0xff] }
 0x61d   :  { %8934 = vmatprep.subr.bf16.mxu0 %v8933_v49  ;;  %v4767_v49 = vld [vmem:[%s19313_s20 + $0x238] sm:$0xff] }
 0x61e   :  { %v8957_v42 = vpack.c.bf16 %v4775_v50, %v4767_v49  ;;  %v3728_v49 = vld [vmem:[%s19309_s16 + $0x190] sm:$0xff] }
 0x61f   :  { %v3732_v50 = vld [vmem:[%s19309_s16 + $0x1b0] sm:$0xff] }
 0x620   :  { %8936 = vmatpush1.bf16.msra.mxu0 %v8935_v56  ;;  %v3705_v56 = vld [vmem:[%s19309_s16 + $0xd8] sm:$0xff] }
 0x621   :  { %8938 = vmatprep.subr.bf16.mxu0 %v8937_v57  ;;  %v3709_v57 = vld [vmem:[%s19309_s16 + $0xf8] sm:$0xff] }
 0x622   :  { %v8793_v32 = vpack.c.bf16 %v3709_v57, %v3705_v56  ;;  %v8973_v56 = vpack.c.bf16 %v4193_v45, %v4185_v39  ;;  %v4184_v57 = vld [vmem:[%s19312_s19] sm:$0xff]  ;;  %v3760_v45 = vld [vmem:[%s19309_s16 + $0x290] sm:$0xff] }
 0x624   :  { %8940 = vmatpush1.bf16.msra.mxu0 %v8939_v60  ;;  %v4783_v60 = vld [vmem:[%s19313_s20 + $0x2b8] sm:$0xff] }
 0x625   :  { %8942 = vmatprep.subr.bf16.mxu0 %v8941_v61  ;;  %v4791_v61 = vld [vmem:[%s19313_s20 + $0x2f8] sm:$0xff] }
 0x627   :  { %5031 = vmatmul.mubr.f32.vlgmr.msra.gmra.mrb[14].mxu0 %v14995_v11  ;;  %v4742_v11 = vld [vmem:[%s19313_s20 + $0x170] sm:$0xff] }
 0x628   :  { %8944 = vmatpush1.bf16.msra.mxu0 %v8943_v5  ;;  %5101 = vmatprep.mubr.f32.mxu0 %v10195_v7  ;;  %v8951_v43 = vpack.c.bf16 %v4742_v11, %v4734_v27  ;;  %v8961_v5 = vpack.c.bf16 %v4791_v61, %v4783_v60  ;;  %v4815_v11 = vld [vmem:[%s19313_s20 + $0x3b8] sm:$0xff]  ;;  %v3736_v60 = vld [vmem:[%s19309_s16 + $0x1d0] sm:$0xff] }
 0x629   :  { %8946 = vmatprep.subr.bf16.mxu0 %v8945_v6  ;;  %v4782_v6 = vld [vmem:[%s19313_s20 + $0x2b0] sm:$0xff] }
 0x62a   :  { %v8963_v22 = vpack.c.bf16 %v4790_v8, %v4782_v6  ;;  %v3740_v61 = vld [vmem:[%s19309_s16 + $0x1f0] sm:$0xff]  ;;  %v4217_v6 = vld [vmem:[%s19312_s19 + $0x108] sm:$0xff] }
 0x62b   :  { %v4225_v8 = vld [vmem:[%s19312_s19 + $0x148] sm:$0xff] }
 0x62c   :  { %8948 = vmatpush1.bf16.msra.mxu0 %v8947_v24  ;;  %v4798_v24 = vld [vmem:[%s19313_s20 + $0x330] sm:$0xff] }
 0x62d   :  { %8950 = vmatprep.subr.bf16.mxu0 %v8949_v41  ;;  %v4806_v41 = vld [vmem:[%s19313_s20 + $0x370] sm:$0xff] }
 0x62e   :  { %v8967_v18 = vpack.c.bf16 %v4806_v41, %v4798_v24  ;;  %v4233_v41 = vld [vmem:[%s19312_s19 + $0x188] sm:$0xff] }
 0x630   :  { %8952 = vmatpush1.bf16.msra.mxu0 %v8951_v43  ;;  %v4822_v43 = vld [vmem:[%s19313_s20 + $0x3f0] sm:$0xff] }
 0x631   :  { %8954 = vmatprep.subr.bf16.mxu0 %v8953_v44  ;;  %v8803_v44 = vpack.c.bf16 %v3724_v62, %v3720_v33  ;;  %v8971_v55 = vpack.c.bf16 %v4822_v43, %v4814_v40  ;;  %v3761_v33 = vld [vmem:[%s19309_s16 + $0x298] sm:$0xff]  ;;  %v4249_v43 = vld [vmem:[%s19312_s19 + $0x208] sm:$0xff] }
 0x632   :  { %v3765_v62 = vld [vmem:[%s19309_s16 + $0x2b8] sm:$0xff] }
 0x633   :  { %v8821_v39 = vpack.c.bf16 %v3765_v62, %v3761_v33 }
 0x634   :  { %8956 = vmatpush1.bf16.msra.mxu0 %v8955_v14  ;;  %v4192_v14 = vld [vmem:[%s19312_s19 + $0x40] sm:$0xff] }
 0x635   :  { %8958 = vmatprep.subr.bf16.mxu0 %v8957_v42  ;;  %v8807_v42 = vpack.c.bf16 %v3732_v50, %v3728_v49  ;;  %v8975_v0 = vpack.c.bf16 %v4192_v14, %v4184_v57  ;;  %v3769_v49 = vld [vmem:[%s19309_s16 + $0x2d8] sm:$0xff]  ;;  %v4265_v14 = vld [vmem:[%s19312_s19 + $0x288] sm:$0xff] }
 0x636   :  { %v3773_v50 = vld [vmem:[%s19309_s16 + $0x2f8] sm:$0xff] }
 0x63a   :  { %v3671_v9 = vpop.f32.mrb[10].mxu1 }
 0x63b   :  { %v15591_v13 = vadd.f32 %v3671_v9, %v3598_v54  ;;  %v3673_v15 = vpop.f32.mrb[11].mxu1  ;;  %v3717_v54 = vld [vmem:[%s19309_s16 + $0x138] sm:$0xff] }
 0x63c   :  { %v3674_v21 = vadd.f32 %v3673_v15, %v3602_v2  ;;  %v8959_v2 = vpack.c.bf16 %v4774_v47, %v4766_v58  ;;  %v4799_v9 = vld [vmem:[%s19313_s20 + $0x338] sm:$0xff]  ;;  %v8797_v12 = vpack.c.bf16 %v3717_v54, %v3713_v1  ;;  %v3712_v15 = vld [vmem:[%s19309_s16 + $0x110] sm:$0xff]  ;;  %v4201_v58 = vld [vmem:[%s19312_s19 + $0x88] sm:$0xff] }
 0x63d   :  { %v3676_v34 = vmax.f32 %v15591_v13, 0.0  ;;  %v8965_v3 = vpack.c.bf16 %v4807_v17, %v4799_v9  ;;  %v8799_v27 = vpack.c.bf16 %v3716_v19, %v3712_v15  ;;  %v4209_v47 = vld [vmem:[%s19312_s19 + $0xc8] sm:$0xff]  ;;  %v4200_v54 = vld [vmem:[%s19312_s19 + $0x80] sm:$0xff]  ;;  %v3744_v9 = vld [vmem:[%s19309_s16 + $0x210] sm:$0xff] }
 0x63e   :  { %v3677_v28 = vmax.f32 %v3674_v21, 0.0  ;;  %v3725_v21 = vld [vmem:[%s19309_s16 + $0x178] sm:$0xff]  ;;  %8960 = vmatpush1.bf16.msra.mxu0 %v8959_v2  ;;  %v8977_v1 = vpack.c.bf16 %v4209_v47, %v4201_v58  ;;  %v4208_v2 = vld [vmem:[%s19312_s19 + $0xc0] sm:$0xff]  ;;  %v3748_v17 = vld [vmem:[%s19309_s16 + $0x230] sm:$0xff]  ;;  %v8825_v58 = vpack.c.bf16 %v3773_v50, %v3769_v49 }
 0x63f   :  { %8962 = vmatprep.subr.bf16.mxu0 %v8961_v5  ;;  %v8811_v5 = vpack.c.bf16 %v3740_v61, %v3736_v60  ;;  %v3753_v15 = vld [vmem:[%s19309_s16 + $0x258] sm:$0xff]  ;;  %v8815_v24 = vpack.c.bf16 %v3748_v17, %v3744_v9  ;;  %v3768_v47 = vld [vmem:[%s19309_s16 + $0x2d0] sm:$0xff] }
 0x640   :  { %4076 = vmatprep.mubr.f32.mxu1 %v3677_v28  ;;  %v3757_v19 = vld [vmem:[%s19309_s16 + $0x278] sm:$0xff] }
 0x641   :  { %4077 = vmatmul.mubr.f32.vlgmr.msra.gmra.mrb[12].mxu1 %v3676_v34  ;;  %v3777_v60 = vld [vmem:[%s19309_s16 + $0x318] sm:$0xff] }
 0x642   :  { %8784 = vmatpush1.bf16.msra.mxu1 %v8783_v31  ;;  %4147 = vmatprep.mubr.f32.mxu1 %v3677_v28  ;;  %v4823_v28 = vld [vmem:[%s19313_s20 + $0x3f8] sm:$0xff]  ;;  %v8801_v31 = vpack.c.bf16 %v3725_v21, %v3721_v20  ;;  %v8979_v20 = vpack.c.bf16 %v4208_v2, %v4200_v54  ;;  %v8981_v21 = vpack.c.bf16 %v4225_v8, %v4217_v6  ;;  %v4281_v2 = vld [vmem:[%s19312_s19 + $0x308] sm:$0xff]  ;;  %v3776_v8 = vld [vmem:[%s19309_s16 + $0x310] sm:$0xff] }
 0x643   :  { %8786 = vmatprep.subr.bf16.mxu1 %v8785_v35  ;;  %v3729_v35 = vld [vmem:[%s19309_s16 + $0x198] sm:$0xff]  ;;  %8964 = vmatpush1.bf16.msra.mxu0 %v8963_v22  ;;  %v8969_v38 = vpack.c.bf16 %v4823_v28, %v4815_v11  ;;  %v4216_v22 = vld [vmem:[%s19312_s19 + $0x100] sm:$0xff]  ;;  %v8817_v11 = vpack.c.bf16 %v3757_v19, %v3753_v15  ;;  %v3752_v28 = vld [vmem:[%s19309_s16 + $0x250] sm:$0xff] }
 0x644   :  { %8966 = vmatprep.subr.bf16.mxu0 %v8965_v3  ;;  %v4224_v3 = vld [vmem:[%s19312_s19 + $0x140] sm:$0xff]  ;;  %v3781_v61 = vld [vmem:[%s19309_s16 + $0x338] sm:$0xff] }
 0x645   :  { %v8829_v6 = vpack.c.bf16 %v3781_v61, %v3777_v60  ;;  %v3785_v9 = vld [vmem:[%s19309_s16 + $0x358] sm:$0xff]  ;;  %v4328_v60 = vld [vmem:[%s19312_s19 + $0x480] sm:$0xff] }
 0x646   :  { %8788 = vmatpush1.bf16.msra.mxu1 %v8787_v46  ;;  %v8805_v46 = vpack.c.bf16 %v3733_v36, %v3729_v35  ;;  %v8983_v35 = vpack.c.bf16 %v4224_v3, %v4216_v22  ;;  %v3789_v17 = vld [vmem:[%s19309_s16 + $0x378] sm:$0xff]  ;;  %v4297_v3 = vld [vmem:[%s19312_s19 + $0x388] sm:$0xff]  ;;  %v4336_v61 = vld [vmem:[%s19312_s19 + $0x4c0] sm:$0xff] }
 0x647   :  { %8790 = vmatprep.subr.bf16.mxu1 %v8789_v51  ;;  %v3737_v51 = vld [vmem:[%s19309_s16 + $0x1d8] sm:$0xff]  ;;  %8968 = vmatpush1.bf16.msra.mxu0 %v8967_v18  ;;  %v4232_v18 = vld [vmem:[%s19312_s19 + $0x180] sm:$0xff] }
 0x648   :  { %8970 = vmatprep.subr.bf16.mxu0 %v8969_v38  ;;  %v4240_v38 = vld [vmem:[%s19312_s19 + $0x1c0] sm:$0xff] }
 0x64a   :  { %8792 = vmatpush1.bf16.msra.mxu1 %v8791_v59  ;;  %v8809_v59 = vpack.c.bf16 %v3741_v52, %v3737_v51  ;;  %v8987_v51 = vpack.c.bf16 %v4240_v38, %v4232_v18  ;;  %v4313_v38 = vld [vmem:[%s19312_s19 + $0x408] sm:$0xff] }
 0x64b   :  { %8794 = vmatprep.subr.bf16.mxu1 %v8793_v32  ;;  %v3745_v32 = vld [vmem:[%s19309_s16 + $0x218] sm:$0xff]  ;;  %8972 = vmatpush1.bf16.msra.mxu0 %v8971_v55  ;;  %v4248_v55 = vld [vmem:[%s19312_s19 + $0x200] sm:$0xff] }
 0x64c   :  { %8974 = vmatprep.subr.bf16.mxu0 %v8973_v56  ;;  %v4256_v56 = vld [vmem:[%s19312_s19 + $0x240] sm:$0xff] }
 0x64e   :  { %8796 = vmatpush1.bf16.msra.mxu1 %v8795_v29  ;;  %v8813_v29 = vpack.c.bf16 %v3749_v63, %v3745_v32  ;;  %v8991_v32 = vpack.c.bf16 %v4256_v56, %v4248_v55  ;;  %v4329_v56 = vld [vmem:[%s19312_s19 + $0x488] sm:$0xff] }
 0x64f   :  { %8798 = vmatprep.subr.bf16.mxu1 %v8797_v12  ;;  %v15799_v12 = vld [vmem:[%s19341_s28] sm:$0x3] }
 0x650   :  { %5102 = vmatmul.mubr.f32.vlgmr.msra.gmra.mrb[16].mxu0 %v15799_v12 }
 0x651   :  { %8976 = vmatpush1.bf16.msra.mxu0 %v8975_v0  ;;  %v4264_v0 = vld [vmem:[%s19312_s19 + $0x280] sm:$0xff] }
 0x652   :  { %8800 = vmatpush1.bf16.msra.mxu1 %v8799_v27  ;;  %8978 = vmatprep.subr.bf16.mxu0 %v8977_v1  ;;  %v4241_v27 = vld [vmem:[%s19312_s19 + $0x1c8] sm:$0xff]  ;;  %v4272_v1 = vld [vmem:[%s19312_s19 + $0x2c0] sm:$0xff] }
 0x653   :  { %8802 = vmatprep.subr.bf16.mxu1 %v8801_v31  ;;  %v3756_v31 = vld [vmem:[%s19309_s16 + $0x270] sm:$0xff]  ;;  %v8985_v36 = vpack.c.bf16 %v4241_v27, %v4233_v41  ;;  %v8995_v15 = vpack.c.bf16 %v4272_v1, %v4264_v0  ;;  %v8833_v41 = vpack.c.bf16 %v3789_v17, %v3785_v9  ;;  %v4353_v0 = vld [vmem:[%s19312_s19 + $0x548] sm:$0xff]  ;;  %v9011_v1 = vpack.c.bf16 %v4336_v61, %v4328_v60  ;;  %v4360_v17 = vld [vmem:[%s19312_s19 + $0x580] sm:$0xff] }
 0x654   :  { %v8819_v40 = vpack.c.bf16 %v3756_v31, %v3752_v28  ;;  %v3784_v27 = vld [vmem:[%s19309_s16 + $0x350] sm:$0xff]  ;;  %v3793_v28 = vld [vmem:[%s19309_s16 + $0x398] sm:$0xff]  ;;  %v4457_v60 = vld [vmem:[%s19312_s19 + $0x888] sm:$0xff] }
 0x655   :  { %8980 = vmatpush1.bf16.msra.mxu0 %v8979_v20  ;;  %v4280_v20 = vld [vmem:[%s19312_s19 + $0x300] sm:$0xff]  ;;  %v3797_v31 = vld [vmem:[%s19309_s16 + $0x3b8] sm:$0xff]  ;;  %v4465_v61 = vld [vmem:[%s19312_s19 + $0x8c8] sm:$0xff] }
 0x656   :  { %8804 = vmatpush1.bf16.msra.mxu1 %v8803_v44  ;;  %8982 = vmatprep.subr.bf16.mxu0 %v8981_v21  ;;  %v4257_v44 = vld [vmem:[%s19312_s19 + $0x248] sm:$0xff]  ;;  %v4288_v21 = vld [vmem:[%s19312_s19 + $0x340] sm:$0xff] }
 0x657   :  { %8806 = vmatprep.subr.bf16.mxu1 %v8805_v46  ;;  %v3764_v46 = vld [vmem:[%s19309_s16 + $0x2b0] sm:$0xff]  ;;  %v8989_v52 = vpack.c.bf16 %v4257_v44, %v4249_v43  ;;  %v8999_v33 = vpack.c.bf16 %v4288_v21, %v4280_v20  ;;  %v8837_v43 = vpack.c.bf16 %v3797_v31, %v3793_v28  ;;  %v4385_v20 = vld [vmem:[%s19312_s19 + $0x648] sm:$0xff]  ;;  %v4376_v21 = vld [vmem:[%s19312_s19 + $0x600] sm:$0xff] }
 0x658   :  { %v8823_v57 = vpack.c.bf16 %v3764_v46, %v3760_v45  ;;  %v3792_v44 = vld [vmem:[%s19309_s16 + $0x390] sm:$0xff]  ;;  %v3801_v45 = vld [vmem:[%s19309_s16 + $0x3d8] sm:$0xff]  ;;  %v4400_v28 = vld [vmem:[%s19312_s19 + $0x6c0] sm:$0xff] }
 0x659   :  { %8984 = vmatpush1.bf16.msra.mxu0 %v8983_v35  ;;  %v4296_v35 = vld [vmem:[%s19312_s19 + $0x380] sm:$0xff]  ;;  %v3805_v46 = vld [vmem:[%s19309_s16 + $0x3f8] sm:$0xff]  ;;  %v4409_v31 = vld [vmem:[%s19312_s19 + $0x708] sm:$0xff] }
 0x65a   :  { %8808 = vmatpush1.bf16.msra.mxu1 %v8807_v42  ;;  %8986 = vmatprep.subr.bf16.mxu0 %v8985_v36  ;;  %v4273_v42 = vld [vmem:[%s19312_s19 + $0x2c8] sm:$0xff]  ;;  %v4304_v36 = vld [vmem:[%s19312_s19 + $0x3c0] sm:$0xff] }
 0x65b   :  { %8810 = vmatprep.subr.bf16.mxu1 %v8809_v59  ;;  %v3772_v59 = vld [vmem:[%s19309_s16 + $0x2f0] sm:$0xff]  ;;  %v8993_v63 = vpack.c.bf16 %v4273_v42, %v4265_v14  ;;  %v9003_v49 = vpack.c.bf16 %v4304_v36, %v4296_v35  ;;  %v8841_v14 = vpack.c.bf16 %v3805_v46, %v3801_v45  ;;  %v4408_v36 = vld [vmem:[%s19312_s19 + $0x700] sm:$0xff] }
 0x65c   :  { %v8827_v54 = vpack.c.bf16 %v3772_v59, %v3768_v47  ;;  %v3800_v42 = vld [vmem:[%s19309_s16 + $0x3d0] sm:$0xff]  ;;  %v4432_v45 = vld [vmem:[%s19312_s19 + $0x7c0] sm:$0xff] }
 0x65d   :  { %8988 = vmatpush1.bf16.msra.mxu0 %v8987_v51  ;;  %v4312_v51 = vld [vmem:[%s19312_s19 + $0x400] sm:$0xff] }
 0x65e   :  { %8812 = vmatpush1.bf16.msra.mxu1 %v8811_v5  ;;  %8990 = vmatprep.subr.bf16.mxu0 %v8989_v52  ;;  %v4289_v5 = vld [vmem:[%s19312_s19 + $0x348] sm:$0xff]  ;;  %v4320_v52 = vld [vmem:[%s19312_s19 + $0x440] sm:$0xff] }
 0x65f   :  { %8814 = vmatprep.subr.bf16.mxu1 %v8813_v29  ;;  %v3780_v29 = vld [vmem:[%s19309_s16 + $0x330] sm:$0xff]  ;;  %v8997_v19 = vpack.c.bf16 %v4289_v5, %v4281_v2  ;;  %v9007_v47 = vpack.c.bf16 %v4320_v52, %v4312_v51  ;;  %v4344_v2 = vld [vmem:[%s19312_s19 + $0x500] sm:$0xff] }
 0x660   :  { %v8831_v22 = vpack.c.bf16 %v3780_v29, %v3776_v8  ;;  %v4352_v5 = vld [vmem:[%s19312_s19 + $0x540] sm:$0xff]  ;;  %v4369_v8 = vld [vmem:[%s19312_s19 + $0x5c8] sm:$0xff] }
 0x661   :  { %8992 = vmatpush1.bf16.msra.mxu0 %v8991_v32  ;;  %v9015_v29 = vpack.c.bf16 %v4352_v5, %v4344_v2  ;;  %v16060_v52 = vld [vmem:[%s19311_s18] sm:$0xf]  ;;  %v4473_v5 = vld [vmem:[%s19312_s19 + $0x908] sm:$0xff] }
 0x662   :  { %8816 = vmatpush1.bf16.msra.mxu1 %v8815_v24  ;;  %8994 = vmatprep.subr.bf16.mxu0 %v8993_v63  ;;  %v4305_v24 = vld [vmem:[%s19312_s19 + $0x3c8] sm:$0xff]  ;;  %v4464_v2 = vld [vmem:[%s19312_s19 + $0x8c0] sm:$0xff] }
 0x663   :  { %8818 = vmatprep.subr.bf16.mxu1 %v8817_v11  ;;  %v3788_v11 = vld [vmem:[%s19309_s16 + $0x370] sm:$0xff]  ;;  %v9001_v62 = vpack.c.bf16 %v4305_v24, %v4297_v3  ;;  %v4345_v63 = vld [vmem:[%s19312_s19 + $0x508] sm:$0xff] }
 0x664   :  { %v8835_v18 = vpack.c.bf16 %v3788_v11, %v3784_v27  ;;  %v4393_v3 = vld [vmem:[%s19312_s19 + $0x688] sm:$0xff]  ;;  %v4392_v11 = vld [vmem:[%s19312_s19 + $0x680] sm:$0xff] }
 0x665   :  { %8996 = vmatpush1.bf16.msra.mxu0 %v8995_v15  ;;  %v4368_v15 = vld [vmem:[%s19312_s19 + $0x5c0] sm:$0xff]  ;;  %v4401_v24 = vld [vmem:[%s19312_s19 + $0x6c8] sm:$0xff] }
 0x666   :  { %8820 = vmatpush1.bf16.msra.mxu1 %v8819_v40  ;;  %8998 = vmatprep.subr.bf16.mxu0 %v8997_v19  ;;  %v4321_v40 = vld [vmem:[%s19312_s19 + $0x448] sm:$0xff]  ;;  %v9019_v13 = vpack.c.bf16 %v4368_v15, %v4360_v17  ;;  %v9025_v27 = vpack.c.bf16 %v4401_v24, %v4393_v3  ;;  %v4480_v17 = vld [vmem:[%s19312_s19 + $0x940] sm:$0xff] }
 0x667   :  { %8822 = vmatprep.subr.bf16.mxu1 %v8821_v39  ;;  %v3796_v39 = vld [vmem:[%s19309_s16 + $0x3b0] sm:$0xff]  ;;  %v9005_v50 = vpack.c.bf16 %v4321_v40, %v4313_v38  ;;  %v4377_v19 = vld [vmem:[%s19312_s19 + $0x608] sm:$0xff] }
 0x668   :  { %v8839_v55 = vpack.c.bf16 %v3796_v39, %v3792_v44  ;;  %v4425_v40 = vld [vmem:[%s19312_s19 + $0x788] sm:$0xff]  ;;  %v4424_v39 = vld [vmem:[%s19312_s19 + $0x780] sm:$0xff] }
 0x669   :  { %9000 = vmatpush1.bf16.msra.mxu0 %v8999_v33  ;;  %v4417_v33 = vld [vmem:[%s19312_s19 + $0x748] sm:$0xff]  ;;  %v9035_v46 = vpack.c.bf16 %v4432_v45, %v4424_v39  ;;  %v4544_v39 = vld [vmem:[%s19312_s19 + $0xb40] sm:$0xff] }
 0x66a   :  { %8824 = vmatpush1.bf16.msra.mxu1 %v8823_v57  ;;  %9002 = vmatprep.subr.bf16.mxu0 %v9001_v62  ;;  %v4337_v57 = vld [vmem:[%s19312_s19 + $0x4c8] sm:$0xff]  ;;  %v9027_v62 = vpack.c.bf16 %v4400_v28, %v4392_v11  ;;  %v9029_v35 = vpack.c.bf16 %v4417_v33, %v4409_v31  ;;  %v4512_v11 = vld [vmem:[%s19312_s19 + $0xa40] sm:$0xff] }
 0x66b   :  { %8826 = vmatprep.subr.bf16.mxu1 %v8825_v58  ;;  %v3804_v58 = vld [vmem:[%s19309_s16 + $0x3f0] sm:$0xff]  ;;  %v9009_v59 = vpack.c.bf16 %v4337_v57, %v4329_v56  ;;  %v4163_v56 = vrot.slane %v16060_v52, %v12887_v25  ;;  %v4489_v15 = vld [vmem:[%s19312_s19 + $0x988] sm:$0xff] }
 0x66c   :  { %v8843_v32 = vpack.c.bf16 %v3804_v58, %v3800_v42  ;;  %v4440_v58 = vld [vmem:[%s19312_s19 + $0x800] sm:$0xff]  ;;  %v4513_v3 = vld [vmem:[%s19312_s19 + $0xa48] sm:$0xff] }
 0x66d   :  { %9004 = vmatpush1.bf16.msra.mxu0 %v9003_v49  ;;  %v4441_v49 = vld [vmem:[%s19312_s19 + $0x808] sm:$0xff] }
 0x66e   :  { %8828 = vmatpush1.bf16.msra.mxu1 %v8827_v54  ;;  %9006 = vmatprep.subr.bf16.mxu0 %v9005_v50  ;;  %v9013_v54 = vpack.c.bf16 %v4353_v0, %v4345_v63  ;;  %v4449_v50 = vld [vmem:[%s19312_s19 + $0x848] sm:$0xff] }
 0x66f   :  { %8830 = vmatprep.subr.bf16.mxu1 %v8829_v6  ;;  %v4361_v6 = vld [vmem:[%s19312_s19 + $0x588] sm:$0xff]  ;;  %v9037_v51 = vpack.c.bf16 %v4449_v50, %v4441_v49 }
 0x670   :  { %v9017_v9 = vpack.c.bf16 %v4369_v8, %v4361_v6  ;;  %v4481_v6 = vld [vmem:[%s19312_s19 + $0x948] sm:$0xff] }
 0x671   :  { %9008 = vmatpush1.bf16.msra.mxu0 %v9007_v47  ;;  %v4448_v47 = vld [vmem:[%s19312_s19 + $0x840] sm:$0xff]  ;;  %v4521_v28 = vld [vmem:[%s19312_s19 + $0xa88] sm:$0xff] }
 0x672   :  { %8832 = vmatpush1.bf16.msra.mxu1 %v8831_v22  ;;  %9010 = vmatprep.subr.bf16.mxu0 %v9009_v59  ;;  %v4384_v22 = vld [vmem:[%s19312_s19 + $0x640] sm:$0xff]  ;;  %v9039_v63 = vpack.c.bf16 %v4448_v47, %v4440_v58  ;;  %v4529_v31 = vld [vmem:[%s19312_s19 + $0xac8] sm:$0xff] }
 0x673   :  { %8834 = vmatprep.subr.bf16.mxu1 %v8833_v41  ;;  %v9023_v41 = vpack.c.bf16 %v4384_v22, %v4376_v21  ;;  %v4496_v21 = vld [vmem:[%s19312_s19 + $0x9c0] sm:$0xff]  ;;  %v4505_v22 = vld [vmem:[%s19312_s19 + $0xa08] sm:$0xff] }
 0x674   :  { %v4553_v45 = vld [vmem:[%s19312_s19 + $0xb88] sm:$0xff]  ;;  %v6246_v47 = vld [vmem:[%s19316_s23] sm:$0xff] }
 0x675   :  { %9012 = vmatpush1.bf16.msra.mxu0 %v9011_v1  ;;  %v9041_v1 = vpack.c.bf16 %v4465_v61, %v4457_v60 }
 0x676   :  { %8836 = vmatpush1.bf16.msra.mxu1 %v8835_v18  ;;  %9014 = vmatprep.subr.bf16.mxu0 %v9013_v54  ;;  %v4416_v18 = vld [vmem:[%s19312_s19 + $0x740] sm:$0xff] }
 0x677   :  { %8838 = vmatprep.subr.bf16.mxu1 %v8837_v43  ;;  %v9031_v38 = vpack.c.bf16 %v4416_v18, %v4408_v36  ;;  %v4433_v43 = vld [vmem:[%s19312_s19 + $0x7c8] sm:$0xff]  ;;  %v4456_v54 = vld [vmem:[%s19312_s19 + $0x880] sm:$0xff] }
 0x678   :  { %v9033_v44 = vpack.c.bf16 %v4433_v43, %v4425_v40  ;;  %v9043_v8 = vpack.c.bf16 %v4464_v2, %v4456_v54  ;;  %v4528_v36 = vld [vmem:[%s19312_s19 + $0xac0] sm:$0xff]  ;;  %v4537_v18 = vld [vmem:[%s19312_s19 + $0xb08] sm:$0xff] }
 0x679   :  { %9016 = vmatpush1.bf16.msra.mxu0 %v9015_v29  ;;  %v9045_v29 = vpack.c.bf16 %v4481_v6, %v4473_v5  ;;  %v4576_v54 = vld [vmem:[%s19312_s19 + $0xc40] sm:$0xff]  ;;  %v4585_v2 = vld [vmem:[%s19312_s19 + $0xc88] sm:$0xff] }
 0x67a   :  { %8840 = vmatpush1.bf16.msra.mxu1 %v8839_v55  ;;  %9018 = vmatprep.subr.bf16.mxu0 %v9017_v9  ;;  %v4159_v55 = vrot.slane %v16060_v52, %v12884_v48  ;;  %v4472_v9 = vld [vmem:[%s19312_s19 + $0x900] sm:$0xff]  ;;  %v4593_v5 = vld [vmem:[%s19312_s19 + $0xcc8] sm:$0xff] }
 0x67b   :  { %8842 = vmatprep.subr.bf16.mxu1 %v8841_v14  ;;  %v6255_v6 = vld [vmem:[%s19316_s23 + $0x48] sm:$0xff] }
 0x67d   :  { %9020 = vmatpush1.bf16.msra.mxu0 %v9019_v13 }
 0x67e   :  { %8844 = vmatpush1.bf16.msra.mxu1 %v8843_v32 }
 0x681   :  { %4148 = vmatmul.mubr.f32.vlgmr.msra.gmra.mrb[14].mxu1 %v3676_v34  ;;  %v9021_v34 = vpack.c.bf16 %v4385_v20, %v4377_v19  ;;  %v4497_v19 = vld [vmem:[%s19312_s19 + $0x9c8] sm:$0xff]  ;;  %v9047_v20 = vpack.c.bf16 %v4480_v17, %v4472_v9  ;;  %v6254_v9 = vld [vmem:[%s19316_s23 + $0x40] sm:$0xff] }
 0x682   :  { %6374 = vmatprep.mubr.f32.mxu1 %v10195_v7  ;;  %v9049_v13 = vpack.c.bf16 %v4497_v19, %v4489_v15  ;;  %v6258_v17 = vld [vmem:[%s19316_s23 + $0x60] sm:$0xff] }
 0x683   :  { %9022 = vmatprep.subr.bf16.mxu0 %v9021_v34  ;;  %v4488_v34 = vld [vmem:[%s19312_s19 + $0x980] sm:$0xff]  ;;  %v9491_v19 = vpack.c.bf16 %v6258_v17, %v6254_v9 }
 0x684   :  { %9024 = vmatpush1.bf16.msra.mxu0 %v9023_v41  ;;  %v9051_v24 = vpack.c.bf16 %v4496_v21, %v4488_v34  ;;  %v9053_v41 = vpack.c.bf16 %v4513_v3, %v4505_v22  ;;  %v4592_v34 = vld [vmem:[%s19312_s19 + $0xcc0] sm:$0xff]  ;;  %v4601_v21 = vld [vmem:[%s19312_s19 + $0xd08] sm:$0xff] }
 0x685   :  { %9026 = vmatprep.subr.bf16.mxu0 %v9025_v27  ;;  %v4504_v27 = vld [vmem:[%s19312_s19 + $0xa00] sm:$0xff]  ;;  %v4609_v22 = vld [vmem:[%s19312_s19 + $0xd48] sm:$0xff] }
 0x686   :  { %v9055_v33 = vpack.c.bf16 %v4512_v11, %v4504_v27  ;;  %v6263_v3 = vld [vmem:[%s19316_s23 + $0x88] sm:$0xff]  ;;  %v6262_v27 = vld [vmem:[%s19316_s23 + $0x80] sm:$0xff] }
 0x687   :  { %v6266_v11 = vld [vmem:[%s19316_s23 + $0xa0] sm:$0xff] }
 0x688   :  { %9028 = vmatpush1.bf16.msra.mxu0 %v9027_v62  ;;  %v9057_v62 = vpack.c.bf16 %v4529_v31, %v4521_v28  ;;  %v9495_v31 = vpack.c.bf16 %v6266_v11, %v6262_v27  ;;  %v6290_v9 = vld [vmem:[%s19316_s23 + $0x160] sm:$0xff] }
 0x689   :  { %9030 = vmatprep.subr.bf16.mxu0 %v9029_v35  ;;  %v4520_v35 = vld [vmem:[%s19312_s19 + $0xa80] sm:$0xff] }
 0x68a   :  { %v9059_v40 = vpack.c.bf16 %v4528_v36, %v4520_v35  ;;  %v4608_v35 = vld [vmem:[%s19312_s19 + $0xd40] sm:$0xff]  ;;  %v4617_v36 = vld [vmem:[%s19312_s19 + $0xd88] sm:$0xff] }
 0x68b   :  { %v6298_v27 = vld [vmem:[%s19316_s23 + $0x1a0] sm:$0xff] }
 0x68c   :  { %9032 = vmatpush1.bf16.msra.mxu0 %v9031_v38  ;;  %v4545_v38 = vld [vmem:[%s19312_s19 + $0xb48] sm:$0xff] }
 0x68d   :  { %9034 = vmatprep.subr.bf16.mxu0 %v9033_v44  ;;  %v9061_v43 = vpack.c.bf16 %v4545_v38, %v4537_v18  ;;  %v4536_v44 = vld [vmem:[%s19312_s19 + $0xb00] sm:$0xff]  ;;  %v4625_v18 = vld [vmem:[%s19312_s19 + $0xdc8] sm:$0xff] }
 0x68e   :  { %v9063_v49 = vpack.c.bf16 %v4544_v39, %v4536_v44  ;;  %v6271_v38 = vld [vmem:[%s19316_s23 + $0xc8] sm:$0xff]  ;;  %v6270_v44 = vld [vmem:[%s19316_s23 + $0xc0] sm:$0xff] }
 0x68f   :  { %v6274_v39 = vld [vmem:[%s19316_s23 + $0xe0] sm:$0xff] }
 0x690   :  { %9036 = vmatpush1.bf16.msra.mxu0 %v9035_v46  ;;  %v4561_v46 = vld [vmem:[%s19312_s19 + $0xbc8] sm:$0xff] }
 0x691   :  { %9038 = vmatprep.subr.bf16.mxu0 %v9037_v51  ;;  %v9065_v50 = vpack.c.bf16 %v4561_v46, %v4553_v45  ;;  %v4552_v51 = vld [vmem:[%s19312_s19 + $0xb80] sm:$0xff]  ;;  %v9499_v46 = vpack.c.bf16 %v6274_v39, %v6270_v44 }
 0x692   :  { %v6306_v44 = vld [vmem:[%s19316_s23 + $0x1e0] sm:$0xff] }
 0x714   :  { %v4078_v57 = vpop.f32.mrb[12].mxu1 }
 0x715   :  { %v4176_v14 = vadd.f32 %v4159_v55, %v4078_v57  ;;  %v4080_v42 = vpop.f32.mrb[13].mxu1  ;;  %v4560_v55 = vld [vmem:[%s19312_s19 + $0xbc0] sm:$0xff]  ;;  %v4577_v57 = vld [vmem:[%s19312_s19 + $0xc48] sm:$0xff] }
 0x716   :  { %v4177_v59 = vadd.f32 %v4163_v56, %v4080_v42  ;;  %v4569_v56 = vld [vmem:[%s19312_s19 + $0xc08] sm:$0xff]  ;;  %v9067_v60 = vpack.c.bf16 %v4560_v55, %v4552_v51  ;;  %v4624_v51 = vld [vmem:[%s19312_s19 + $0xdc0] sm:$0xff] }
 0x717   :  { %v16080_v0 = vmax.f32 %v4176_v14, 0.0  ;;  %v6247_v14 = vld [vmem:[%s19316_s23 + $0x8] sm:$0xff] }
 0x718   :  { %v16078_v32 = vmax.f32 %v4177_v59, 0.0  ;;  %v6251_v42 = vld [vmem:[%s19316_s23 + $0x28] sm:$0xff]  ;;  %v6250_v59 = vld [vmem:[%s19316_s23 + $0x20] sm:$0xff] }
 0x719   :  { %v9485_v58 = vpack.c.bf16 %v6251_v42, %v6247_v14  ;;  %v9487_v61 = vpack.c.bf16 %v6250_v59, %v6246_v47  ;;  %v4633_v55 = vld [vmem:[%s19312_s19 + $0xe08] sm:$0xff]  ;;  %v6282_v47 = vld [vmem:[%s19316_s23 + $0x120] sm:$0xff] }
 0x71a   :  { %5172 = vmatprep.mubr.f32.mxu0 %v16078_v32  ;;  %v6283_v14 = vld [vmem:[%s19316_s23 + $0x128] sm:$0xff] }
 0x71b   :  { %5173 = vmatmul.mubr.f32.vlgmr.msra.gmra.mrb[10].mxu0 %v16080_v0  ;;  %9486 = vmatprep.subr.bf16.mxu1 %v9485_v58  ;;  %v6278_v58 = vld [vmem:[%s19316_s23 + $0x100] sm:$0xff] }
 0x71c   :  { %9040 = vmatpush1.bf16.msra.mxu0 %v9039_v63  ;;  %v9069_v63 = vpack.c.bf16 %v4577_v57, %v4569_v56  ;;  %9488 = vmatpush1.bf16.msra.mxu1 %v9487_v61  ;;  %v4641_v56 = vld [vmem:[%s19312_s19 + $0xe48] sm:$0xff] }
 0x71d   :  { %9042 = vmatprep.subr.bf16.mxu0 %v9041_v1  ;;  %v4568_v1 = vld [vmem:[%s19312_s19 + $0xc00] sm:$0xff]  ;;  %v6279_v57 = vld [vmem:[%s19316_s23 + $0x108] sm:$0xff]  ;;  %v9085_v61 = vpack.c.bf16 %v4641_v56, %v4633_v55  ;;  %v4187_v55 = vld [vmem:[%s19312_s19 + $0x18] sm:$0xff]  ;;  %v4171_v56 = vrot.slane %v16060_v52, %v12890_v26 }
 0x71e   :  { %v9071_v15 = vpack.c.bf16 %v4576_v54, %v4568_v1  ;;  %v9501_v42 = vpack.c.bf16 %v6283_v14, %v6279_v57  ;;  %v4640_v1 = vld [vmem:[%s19312_s19 + $0xe40] sm:$0xff]  ;;  %v4649_v54 = vld [vmem:[%s19312_s19 + $0xe88] sm:$0xff]  ;;  %v4195_v57 = vld [vmem:[%s19312_s19 + $0x58] sm:$0xff] }
 0x71f   :  { %v6249_v14 = vld [vmem:[%s19316_s23 + $0x18] sm:$0xff] }
 0x720   :  { %9044 = vmatpush1.bf16.msra.mxu0 %v9043_v8  ;;  %v6259_v8 = vld [vmem:[%s19316_s23 + $0x68] sm:$0xff] }
 0x721   :  { %9046 = vmatprep.subr.bf16.mxu0 %v9045_v29  ;;  %v9489_v29 = vpack.c.bf16 %v6259_v8, %v6255_v6  ;;  %v6291_v6 = vld [vmem:[%s19316_s23 + $0x168] sm:$0xff] }
 0x723   :  { %9490 = vmatprep.subr.bf16.mxu1 %v9489_v29  ;;  %v6286_v29 = vld [vmem:[%s19316_s23 + $0x140] sm:$0xff] }
 0x724   :  { %9048 = vmatpush1.bf16.msra.mxu0 %v9047_v20  ;;  %v9073_v20 = vpack.c.bf16 %v4593_v5, %v4585_v2  ;;  %9492 = vmatpush1.bf16.msra.mxu1 %v9491_v19  ;;  %v4657_v2 = vld [vmem:[%s19312_s19 + $0xec8] sm:$0xff] }
 0x725   :  { %9050 = vmatprep.subr.bf16.mxu0 %v9049_v13  ;;  %v4584_v13 = vld [vmem:[%s19312_s19 + $0xc80] sm:$0xff]  ;;  %v6287_v5 = vld [vmem:[%s19316_s23 + $0x148] sm:$0xff]  ;;  %v9089_v19 = vpack.c.bf16 %v4657_v2, %v4649_v54  ;;  %v9101_v54 = vpack.c.bf16 %v4195_v57, %v4187_v55  ;;  %v4186_v2 = vld [vmem:[%s19312_s19 + $0x10] sm:$0xff] }
 0x726   :  { %v9075_v28 = vpack.c.bf16 %v4592_v34, %v4584_v13  ;;  %v9505_v8 = vpack.c.bf16 %v6291_v6, %v6287_v5  ;;  %v4656_v13 = vld [vmem:[%s19312_s19 + $0xec0] sm:$0xff]  ;;  %v4665_v34 = vld [vmem:[%s19312_s19 + $0xf08] sm:$0xff]  ;;  %v4194_v5 = vld [vmem:[%s19312_s19 + $0x50] sm:$0xff] }
 0x727   :  { %v4203_v6 = vld [vmem:[%s19312_s19 + $0x98] sm:$0xff]  ;;  %v4242_v57 = vld [vmem:[%s19312_s19 + $0x1d0] sm:$0xff] }
 0x728   :  { %9052 = vmatpush1.bf16.msra.mxu0 %v9051_v24  ;;  %v6267_v24 = vld [vmem:[%s19316_s23 + $0xa8] sm:$0xff] }
 0x729   :  { %9054 = vmatprep.subr.bf16.mxu0 %v9053_v41  ;;  %v9493_v41 = vpack.c.bf16 %v6267_v24, %v6263_v3  ;;  %v6299_v3 = vld [vmem:[%s19316_s23 + $0x1a8] sm:$0xff] }
 0x72b   :  { %9494 = vmatprep.subr.bf16.mxu1 %v9493_v41  ;;  %v6294_v41 = vld [vmem:[%s19316_s23 + $0x180] sm:$0xff] }
 0x72c   :  { %9056 = vmatpush1.bf16.msra.mxu0 %v9055_v33  ;;  %v9077_v33 = vpack.c.bf16 %v4609_v22, %v4601_v21  ;;  %9496 = vmatpush1.bf16.msra.mxu1 %v9495_v31  ;;  %v4673_v21 = vld [vmem:[%s19312_s19 + $0xf48] sm:$0xff] }
 0x72d   :  { %9058 = vmatprep.subr.bf16.mxu0 %v9057_v62  ;;  %v4600_v62 = vld [vmem:[%s19312_s19 + $0xd00] sm:$0xff]  ;;  %v6295_v22 = vld [vmem:[%s19316_s23 + $0x188] sm:$0xff]  ;;  %v9093_v31 = vpack.c.bf16 %v4673_v21, %v4665_v34 }
 0x72e   :  { %v9079_v45 = vpack.c.bf16 %v4608_v35, %v4600_v62  ;;  %v9509_v24 = vpack.c.bf16 %v6299_v3, %v6295_v22  ;;  %v4672_v62 = vld [vmem:[%s19312_s19 + $0xf40] sm:$0xff]  ;;  %v4681_v35 = vld [vmem:[%s19312_s19 + $0xf88] sm:$0xff]  ;;  %v4202_v3 = vld [vmem:[%s19312_s19 + $0x90] sm:$0xff] }
 0x730   :  { %9060 = vmatpush1.bf16.msra.mxu0 %v9059_v40  ;;  %v6275_v40 = vld [vmem:[%s19316_s23 + $0xe8] sm:$0xff] }
 0x731   :  { %9062 = vmatprep.subr.bf16.mxu0 %v9061_v43  ;;  %v9497_v43 = vpack.c.bf16 %v6275_v40, %v6271_v38  ;;  %v6307_v38 = vld [vmem:[%s19316_s23 + $0x1e8] sm:$0xff] }
 0x733   :  { %9498 = vmatprep.subr.bf16.mxu1 %v9497_v43  ;;  %v6302_v43 = vld [vmem:[%s19316_s23 + $0x1c0] sm:$0xff] }
 0x734   :  { %9064 = vmatpush1.bf16.msra.mxu0 %v9063_v49  ;;  %v9081_v49 = vpack.c.bf16 %v4625_v18, %v4617_v36  ;;  %9500 = vmatpush1.bf16.msra.mxu1 %v9499_v46  ;;  %v4689_v36 = vld [vmem:[%s19312_s19 + $0xfc8] sm:$0xff]  ;;  %v4167_v46 = vrot.slane %v16060_v52, %v13265_v53  ;;  %v6252_v52 = vld [vmem:[%s19316_s23 + $0x30] sm:$0xff] }
 0x735   :  { %9066 = vmatprep.subr.bf16.mxu0 %v9065_v50  ;;  %v4616_v50 = vld [vmem:[%s19312_s19 + $0xd80] sm:$0xff]  ;;  %9502 = vmatprep.subr.bf16.mxu1 %v9501_v42  ;;  %v6303_v18 = vld [vmem:[%s19316_s23 + $0x1c8] sm:$0xff]  ;;  %v6253_v42 = vld [vmem:[%s19316_s23 + $0x38] sm:$0xff] }
 0x736   :  { %v9083_v59 = vpack.c.bf16 %v4624_v51, %v4616_v50  ;;  %v9513_v40 = vpack.c.bf16 %v6307_v38, %v6303_v18  ;;  %v4680_v50 = vld [vmem:[%s19312_s19 + $0xf80] sm:$0xff]  ;;  %v4218_v18 = vld [vmem:[%s19312_s19 + $0x110] sm:$0xff] }
 0x737   :  { %v4688_v51 = vld [vmem:[%s19312_s19 + $0xfc0] sm:$0xff]  ;;  %v4226_v38 = vld [vmem:[%s19312_s19 + $0x150] sm:$0xff] }
 0x738   :  { %9068 = vmatpush1.bf16.msra.mxu0 %v9067_v60  ;;  %v9503_v60 = vpack.c.bf16 %v6282_v47, %v6278_v58  ;;  %v9517_v58 = vpack.c.bf16 %v6253_v42, %v6249_v14  ;;  %v6248_v47 = vld [vmem:[%s19316_s23 + $0x10] sm:$0xff]  ;;  %v4251_v14 = vld [vmem:[%s19312_s19 + $0x218] sm:$0xff] }
 0x739   :  { %9070 = vmatprep.subr.bf16.mxu0 %v9069_v63  ;;  %v4632_v63 = vld [vmem:[%s19312_s19 + $0xe00] sm:$0xff]  ;;  %v4259_v42 = vld [vmem:[%s19312_s19 + $0x258] sm:$0xff] }
 0x73a   :  { %9504 = vmatpush1.bf16.msra.mxu1 %v9503_v60  ;;  %v9087_v17 = vpack.c.bf16 %v4640_v1, %v4632_v63  ;;  %v9099_v60 = vpack.c.bf16 %v4688_v51, %v4680_v50  ;;  %v9111_v50 = vpack.c.bf16 %v4226_v38, %v4218_v18  ;;  %v4299_v18 = vld [vmem:[%s19312_s19 + $0x398] sm:$0xff] }
 0x73b   :  { %9506 = vmatprep.subr.bf16.mxu1 %v9505_v8  ;;  %v4307_v38 = vld [vmem:[%s19312_s19 + $0x3d8] sm:$0xff] }
 0x73c   :  { %9072 = vmatpush1.bf16.msra.mxu0 %v9071_v15  ;;  %v9507_v15 = vpack.c.bf16 %v6290_v9, %v6286_v29  ;;  %v4211_v29 = vld [vmem:[%s19312_s19 + $0xd8] sm:$0xff] }
 0x73d   :  { %9074 = vmatprep.subr.bf16.mxu0 %v9073_v20  ;;  %v4648_v20 = vld [vmem:[%s19312_s19 + $0xe80] sm:$0xff]  ;;  %v6257_v9 = vld [vmem:[%s19316_s23 + $0x58] sm:$0xff]  ;;  %v9105_v22 = vpack.c.bf16 %v4211_v29, %v4203_v6 }
 0x73e   :  { %9508 = vmatpush1.bf16.msra.mxu1 %v9507_v15  ;;  %v9091_v11 = vpack.c.bf16 %v4656_v13, %v4648_v20  ;;  %v6260_v20 = vld [vmem:[%s19316_s23 + $0x70] sm:$0xff]  ;;  %v9103_v13 = vpack.c.bf16 %v4194_v5, %v4186_v2  ;;  %v4267_v5 = vld [vmem:[%s19312_s19 + $0x298] sm:$0xff] }
 0x73f   :  { %9510 = vmatprep.subr.bf16.mxu1 %v9509_v24  ;;  %v4210_v24 = vld [vmem:[%s19312_s19 + $0xd0] sm:$0xff]  ;;  %v4275_v6 = vld [vmem:[%s19312_s19 + $0x2d8] sm:$0xff] }
 0x740   :  { %9076 = vmatpush1.bf16.msra.mxu0 %v9075_v28  ;;  %v9511_v28 = vpack.c.bf16 %v6298_v27, %v6294_v41  ;;  %v4227_v41 = vld [vmem:[%s19312_s19 + $0x158] sm:$0xff]  ;;  %v4258_v2 = vld [vmem:[%s19312_s19 + $0x250] sm:$0xff] }
 0x741   :  { %9078 = vmatprep.subr.bf16.mxu0 %v9077_v33  ;;  %v4664_v33 = vld [vmem:[%s19312_s19 + $0xf00] sm:$0xff]  ;;  %v6265_v27 = vld [vmem:[%s19316_s23 + $0x98] sm:$0xff] }
 0x742   :  { %9512 = vmatpush1.bf16.msra.mxu1 %v9511_v28  ;;  %v9095_v39 = vpack.c.bf16 %v4672_v62, %v4664_v33  ;;  %v6268_v33 = vld [vmem:[%s19316_s23 + $0xb0] sm:$0xff]  ;;  %v9107_v62 = vpack.c.bf16 %v4210_v24, %v4202_v3  ;;  %v6293_v29 = vld [vmem:[%s19316_s23 + $0x178] sm:$0xff] }
 0x743   :  { %9514 = vmatprep.subr.bf16.mxu1 %v9513_v40  ;;  %v4235_v40 = vld [vmem:[%s19312_s19 + $0x198] sm:$0xff] }
 0x744   :  { %9080 = vmatpush1.bf16.msra.mxu0 %v9079_v45  ;;  %v9515_v45 = vpack.c.bf16 %v6306_v44, %v6302_v43  ;;  %v4243_v43 = vld [vmem:[%s19312_s19 + $0x1d8] sm:$0xff] }
 0x745   :  { %9082 = vmatprep.subr.bf16.mxu0 %v9081_v49  ;;  %v9097_v49 = vpack.c.bf16 %v4689_v36, %v4681_v35  ;;  %v6273_v44 = vld [vmem:[%s19316_s23 + $0xd8] sm:$0xff]  ;;  %v9113_v55 = vpack.c.bf16 %v4243_v43, %v4235_v40 }
 0x746   :  { %9516 = vmatpush1.bf16.msra.mxu1 %v9515_v45  ;;  %v4283_v3 = vld [vmem:[%s19312_s19 + $0x318] sm:$0xff] }
 0x747   :  { %9518 = vmatprep.subr.bf16.mxu1 %v9517_v58  ;;  %v6281_v58 = vld [vmem:[%s19316_s23 + $0x118] sm:$0xff] }
 0x748   :  { %9084 = vmatpush1.bf16.msra.mxu0 %v9083_v59  ;;  %v4291_v24 = vld [vmem:[%s19312_s19 + $0x358] sm:$0xff] }
 0x749   :  { %9086 = vmatprep.subr.bf16.mxu0 %v9085_v61  ;;  %v9519_v61 = vpack.c.bf16 %v6252_v52, %v6248_v47  ;;  %6375 = vmatmul.mubr.f32.vlgmr.msra.gmra.mrb[16].mxu1 %v15799_v12  ;;  %v6285_v47 = vld [vmem:[%s19316_s23 + $0x138] sm:$0xff] }
 0x74a   :  { %6445 = vmatprep.mubr.f32.mxu1 %v10195_v7  ;;  %v4219_v7 = vld [vmem:[%s19312_s19 + $0x118] sm:$0xff]  ;;  %v9533_v52 = vpack.c.bf16 %v6285_v47, %v6281_v58  ;;  %v5734_v47 = vld [vmem:[%s19315_s22] sm:$0xff] }
 0x74b   :  { %9520 = vmatpush1.bf16.msra.mxu1 %v9519_v61  ;;  %v9109_v36 = vpack.c.bf16 %v4227_v41, %v4219_v7  ;;  %v6297_v7 = vld [vmem:[%s19316_s23 + $0x198] sm:$0xff] }
 0x74c   :  { %9088 = vmatpush1.bf16.msra.mxu0 %v9087_v17  ;;  %v6261_v17 = vld [vmem:[%s19316_s23 + $0x78] sm:$0xff] }
 0x74d   :  { %9090 = vmatprep.subr.bf16.mxu0 %v9089_v19  ;;  %v9521_v15 = vpack.c.bf16 %v6261_v17, %v6257_v9  ;;  %v6256_v19 = vld [vmem:[%s19316_s23 + $0x50] sm:$0xff]  ;;  %v6301_v41 = vld [vmem:[%s19316_s23 + $0x1b8] sm:$0xff] }
 0x74e   :  { %v9523_v34 = vpack.c.bf16 %v6260_v20, %v6256_v19  ;;  %v6288_v17 = vld [vmem:[%s19316_s23 + $0x150] sm:$0xff]  ;;  %v6305_v40 = vld [vmem:[%s19316_s23 + $0x1d8] sm:$0xff] }
 0x74f   :  { %9522 = vmatprep.subr.bf16.mxu1 %v9521_v15  ;;  %v6292_v15 = vld [vmem:[%s19316_s23 + $0x170] sm:$0xff]  ;;  %v6309_v43 = vld [vmem:[%s19316_s23 + $0x1f8] sm:$0xff] }
 0x750   :  { %9092 = vmatpush1.bf16.msra.mxu0 %v9091_v11  ;;  %v6269_v11 = vld [vmem:[%s19316_s23 + $0xb8] sm:$0xff]  ;;  %9524 = vmatpush1.bf16.msra.mxu1 %v9523_v34  ;;  %v9539_v20 = vpack.c.bf16 %v6292_v15, %v6288_v17  ;;  %v4266_v34 = vld [vmem:[%s19312_s19 + $0x290] sm:$0xff]  ;;  %v5746_v17 = vld [vmem:[%s19315_s22 + $0x60] sm:$0xff] }
 0x751   :  { %9094 = vmatprep.subr.bf16.mxu0 %v9093_v31  ;;  %v9525_v28 = vpack.c.bf16 %v6269_v11, %v6265_v27  ;;  %v6264_v31 = vld [vmem:[%s19316_s23 + $0x90] sm:$0xff]  ;;  %v9541_v27 = vpack.c.bf16 %v6301_v41, %v6297_v7  ;;  %v5755_v7 = vld [vmem:[%s19315_s22 + $0xa8] sm:$0xff] }
 0x752   :  { %v9527_v35 = vpack.c.bf16 %v6268_v33, %v6264_v31  ;;  %v6296_v11 = vld [vmem:[%s19316_s23 + $0x190] sm:$0xff] }
 0x753   :  { %9526 = vmatprep.subr.bf16.mxu1 %v9525_v28  ;;  %v6300_v28 = vld [vmem:[%s19316_s23 + $0x1b0] sm:$0xff] }
 0x754   :  { %v4149_v59 = vpop.f32.mrb[14].mxu1  ;;  %9096 = vmatpush1.bf16.msra.mxu0 %v9095_v39  ;;  %v6277_v39 = vld [vmem:[%s19316_s23 + $0xf8] sm:$0xff]  ;;  %9528 = vmatpush1.bf16.msra.mxu1 %v9527_v35  ;;  %v9543_v33 = vpack.c.bf16 %v6300_v28, %v6296_v11  ;;  %v4282_v35 = vld [vmem:[%s19312_s19 + $0x310] sm:$0xff]  ;;  %v5754_v11 = vld [vmem:[%s19315_s22 + $0xa0] sm:$0xff] }
 0x755   :  { %v4178_v63 = vadd.f32 %v4167_v46, %v4149_v59  ;;  %v4151_v1 = vpop.f32.mrb[15].mxu1  ;;  %9098 = vmatprep.subr.bf16.mxu0 %v9097_v49  ;;  %v9529_v45 = vpack.c.bf16 %v6277_v39, %v6273_v44  ;;  %v6272_v46 = vld [vmem:[%s19316_s23 + $0xd0] sm:$0xff]  ;;  %v9545_v44 = vpack.c.bf16 %v6309_v43, %v6305_v40  ;;  %v5763_v40 = vld [vmem:[%s19315_s22 + $0xe8] sm:$0xff] }
 0x756   :  { %v4179_v8 = vadd.f32 %v4171_v56, %v4151_v1  ;;  %v6276_v49 = vld [vmem:[%s19316_s23 + $0xf0] sm:$0xff]  ;;  %v9117_v1 = vpack.c.bf16 %v4259_v42, %v4251_v14  ;;  %v5735_v14 = vld [vmem:[%s19315_s22 + $0x8] sm:$0xff] }
 0x757   :  { %v16404_v21 = vmax.f32 %v4178_v63, 0.0  ;;  %v9531_v51 = vpack.c.bf16 %v6276_v49, %v6272_v46  ;;  %v4234_v56 = vld [vmem:[%s19312_s19 + $0x190] sm:$0xff]  ;;  %9530 = vmatprep.subr.bf16.mxu1 %v9529_v45  ;;  %v5739_v42 = vld [vmem:[%s19315_s22 + $0x28] sm:$0xff] }
 0x758   :  { %v16402_v12 = vmax.f32 %v4179_v8, 0.0  ;;  %9100 = vmatpush1.bf16.msra.mxu0 %v9099_v60  ;;  %v6280_v59 = vld [vmem:[%s19316_s23 + $0x110] sm:$0xff]  ;;  %v9115_v61 = vpack.c.bf16 %v4242_v57, %v4234_v56  ;;  %v6289_v8 = vld [vmem:[%s19316_s23 + $0x158] sm:$0xff]  ;;  %v9549_v58 = vpack.c.bf16 %v5739_v42, %v5735_v14  ;;  %v5771_v14 = vld [vmem:[%s19315_s22 + $0x128] sm:$0xff] }
 0x759   :  { %9102 = vmatprep.subr.bf16.mxu0 %v9101_v54  ;;  %9532 = vmatpush1.bf16.msra.mxu1 %v9531_v51  ;;  %v6284_v60 = vld [vmem:[%s19316_s23 + $0x130] sm:$0xff]  ;;  %v9537_v9 = vpack.c.bf16 %v6293_v29, %v6289_v8  ;;  %v4315_v56 = vld [vmem:[%s19312_s19 + $0x418] sm:$0xff]  ;;  %v5747_v8 = vld [vmem:[%s19315_s22 + $0x68] sm:$0xff] }
 0x75a   :  { %5243 = vmatprep.mubr.f32.mxu0 %v16402_v12  ;;  %v9535_v63 = vpack.c.bf16 %v6284_v60, %v6280_v59  ;;  %v4250_v54 = vld [vmem:[%s19312_s19 + $0x210] sm:$0xff]  ;;  %9534 = vmatprep.subr.bf16.mxu1 %v9533_v52  ;;  %v4323_v57 = vld [vmem:[%s19312_s19 + $0x458] sm:$0xff]  ;;  %v5738_v52 = vld [vmem:[%s19315_s22 + $0x20] sm:$0xff] }
 0x75b   :  { %5244 = vmatmul.mubr.f32.vlgmr.msra.gmra.mrb[10].mxu0 %v16404_v21  ;;  %v9119_v19 = vpack.c.bf16 %v4258_v2, %v4250_v54  ;;  %v6304_v39 = vld [vmem:[%s19316_s23 + $0x1d0] sm:$0xff]  ;;  %v9551_v60 = vpack.c.bf16 %v5738_v52, %v5734_v47  ;;  %v4331_v54 = vld [vmem:[%s19312_s19 + $0x498] sm:$0xff]  ;;  %v5770_v47 = vld [vmem:[%s19315_s22 + $0x120] sm:$0xff] }
 0x75c   :  { %9104 = vmatpush1.bf16.msra.mxu0 %v9103_v13  ;;  %5314 = vmatprep.mubr.f32.mxu0 %v16078_v32  ;;  %v9121_v13 = vpack.c.bf16 %v4275_v6, %v4267_v5  ;;  %v6308_v45 = vld [vmem:[%s19316_s23 + $0x1f0] sm:$0xff]  ;;  %v4339_v2 = vld [vmem:[%s19312_s19 + $0x4d8] sm:$0xff]  ;;  %v10145_v5 = vld [vmem:[%s19341_s28] sm:$0x3] }
 0x75d   :  { %9106 = vmatprep.subr.bf16.mxu0 %v9105_v22  ;;  %9536 = vmatpush1.bf16.msra.mxu1 %v9535_v63  ;;  %v4274_v22 = vld [vmem:[%s19312_s19 + $0x2d0] sm:$0xff]  ;;  %v9547_v49 = vpack.c.bf16 %v6308_v45, %v6304_v39  ;;  %v5743_v6 = vld [vmem:[%s19315_s22 + $0x48] sm:$0xff]  ;;  %v5762_v39 = vld [vmem:[%s19315_s22 + $0xe0] sm:$0xff] }
 0x75e   :  { %9538 = vmatprep.subr.bf16.mxu1 %v9537_v9  ;;  %v9123_v31 = vpack.c.bf16 %v4274_v22, %v4266_v34  ;;  %v4298_v51 = vld [vmem:[%s19312_s19 + $0x390] sm:$0xff]  ;;  %v9553_v29 = vpack.c.bf16 %v5747_v8, %v5743_v6  ;;  %v5742_v9 = vld [vmem:[%s19315_s22 + $0x40] sm:$0xff]  ;;  %v4347_v22 = vld [vmem:[%s19312_s19 + $0x518] sm:$0xff] }
 0x75f   :  { %v4314_v63 = vld [vmem:[%s19312_s19 + $0x410] sm:$0xff]  ;;  %v5774_v8 = vld [vmem:[%s19315_s22 + $0x140] sm:$0xff] }
 0x760   :  { %9108 = vmatpush1.bf16.msra.mxu0 %v9107_v62  ;;  %v9125_v62 = vpack.c.bf16 %v4291_v24, %v4283_v3  ;;  %v4338_v34 = vld [vmem:[%s19312_s19 + $0x4d0] sm:$0xff]  ;;  %v4355_v3 = vld [vmem:[%s19312_s19 + $0x558] sm:$0xff]  ;;  %v5751_v24 = vld [vmem:[%s19315_s22 + $0x88] sm:$0xff] }
 0x761   :  { %9110 = vmatprep.subr.bf16.mxu0 %v9109_v36  ;;  %9540 = vmatpush1.bf16.msra.mxu1 %v9539_v20  ;;  %v4290_v36 = vld [vmem:[%s19312_s19 + $0x350] sm:$0xff]  ;;  %v9137_v20 = vpack.c.bf16 %v4339_v2, %v4331_v54  ;;  %v9557_v41 = vpack.c.bf16 %v5755_v7, %v5751_v24  ;;  %v4403_v54 = vld [vmem:[%s19312_s19 + $0x6d8] sm:$0xff]  ;;  %v5775_v2 = vld [vmem:[%s19315_s22 + $0x148] sm:$0xff] }
 0x762   :  { %9542 = vmatprep.subr.bf16.mxu1 %v9541_v27  ;;  %v9127_v46 = vpack.c.bf16 %v4290_v36, %v4282_v35  ;;  %v5750_v27 = vld [vmem:[%s19315_s22 + $0x80] sm:$0xff]  ;;  %v4354_v35 = vld [vmem:[%s19312_s19 + $0x550] sm:$0xff]  ;;  %v4363_v36 = vld [vmem:[%s19312_s19 + $0x598] sm:$0xff] }
 0x763   :  { %v5782_v7 = vld [vmem:[%s19315_s22 + $0x180] sm:$0xff] }
 0x764   :  { %9112 = vmatpush1.bf16.msra.mxu0 %v9111_v50  ;;  %v9129_v50 = vpack.c.bf16 %v4307_v38, %v4299_v18  ;;  %v4371_v18 = vld [vmem:[%s19312_s19 + $0x5d8] sm:$0xff]  ;;  %v5759_v38 = vld [vmem:[%s19315_s22 + $0xc8] sm:$0xff] }
 0x765   :  { %9114 = vmatprep.subr.bf16.mxu0 %v9113_v55  ;;  %9544 = vmatpush1.bf16.msra.mxu1 %v9543_v33  ;;  %v4306_v55 = vld [vmem:[%s19312_s19 + $0x3d0] sm:$0xff]  ;;  %v9141_v33 = vpack.c.bf16 %v4355_v3, %v4347_v22  ;;  %v9561_v43 = vpack.c.bf16 %v5763_v40, %v5759_v38  ;;  %v5783_v22 = vld [vmem:[%s19315_s22 + $0x188] sm:$0xff]  ;;  %v5790_v40 = vld [vmem:[%s19315_s22 + $0x1c0] sm:$0xff] }
 0x766   :  { %9546 = vmatprep.subr.bf16.mxu1 %v9545_v44  ;;  %v9131_v59 = vpack.c.bf16 %v4306_v55, %v4298_v51  ;;  %v5758_v44 = vld [vmem:[%s19315_s22 + $0xc0] sm:$0xff]  ;;  %v4370_v51 = vld [vmem:[%s19312_s19 + $0x5d0] sm:$0xff]  ;;  %v4379_v55 = vld [vmem:[%s19312_s19 + $0x618] sm:$0xff] }
 0x767   :  { %v5787_v3 = vld [vmem:[%s19315_s22 + $0x1a8] sm:$0xff] }
 0x768   :  { %9116 = vmatpush1.bf16.msra.mxu0 %v9115_v61  ;;  %v9133_v61 = vpack.c.bf16 %v4323_v57, %v4315_v56  ;;  %v4387_v56 = vld [vmem:[%s19312_s19 + $0x658] sm:$0xff]  ;;  %v5767_v57 = vld [vmem:[%s19315_s22 + $0x108] sm:$0xff]  ;;  %v9573_v24 = vpack.c.bf16 %v5787_v3, %v5783_v22  ;;  %v5814_v3 = vld [vmem:[%s19315_s22 + $0x280] sm:$0xff] }
 0x769   :  { %9118 = vmatprep.subr.bf16.mxu0 %v9117_v1  ;;  %9548 = vmatpush1.bf16.msra.mxu1 %v9547_v49  ;;  %v4322_v1 = vld [vmem:[%s19312_s19 + $0x450] sm:$0xff]  ;;  %v9145_v49 = vpack.c.bf16 %v4371_v18, %v4363_v36  ;;  %v9565_v42 = vpack.c.bf16 %v5771_v14, %v5767_v57  ;;  %v5791_v36 = vld [vmem:[%s19315_s22 + $0x1c8] sm:$0xff]  ;;  %v5798_v14 = vld [vmem:[%s19315_s22 + $0x200] sm:$0xff] }
 0x76a   :  { %9550 = vmatprep.subr.bf16.mxu1 %v9549_v58  ;;  %v9135_v15 = vpack.c.bf16 %v4322_v1, %v4314_v63  ;;  %v5766_v58 = vld [vmem:[%s19315_s22 + $0x100] sm:$0xff]  ;;  %v4386_v63 = vld [vmem:[%s19312_s19 + $0x650] sm:$0xff]  ;;  %v4395_v1 = vld [vmem:[%s19312_s19 + $0x698] sm:$0xff] }
 0x76b   :  { %v5795_v18 = vld [vmem:[%s19315_s22 + $0x1e8] sm:$0xff] }
 0x76c   :  { %9120 = vmatpush1.bf16.msra.mxu0 %v9119_v19  ;;  %6446 = vmatmul.mubr.f32.vlgmr.msra.gmra.mrb[18].mxu1 %v10145_v5  ;;  %v9555_v19 = vpack.c.bf16 %v5746_v17, %v5742_v9  ;;  %v5779_v5 = vld [vmem:[%s19315_s22 + $0x168] sm:$0xff]  ;;  %v9577_v38 = vpack.c.bf16 %v5795_v18, %v5791_v36  ;;  %v5822_v18 = vld [vmem:[%s19315_s22 + $0x2c0] sm:$0xff] }
 0x76d   :  { %9122 = vmatprep.subr.bf16.mxu0 %v9121_v13  ;;  %9552 = vmatpush1.bf16.msra.mxu1 %v9551_v60  ;;  %v4330_v13 = vld [vmem:[%s19312_s19 + $0x490] sm:$0xff]  ;;  %v9149_v60 = vpack.c.bf16 %v4387_v56, %v4379_v55  ;;  %v9569_v6 = vpack.c.bf16 %v5779_v5, %v5775_v2  ;;  %v5799_v55 = vld [vmem:[%s19315_s22 + $0x208] sm:$0xff]  ;;  %v5806_v5 = vld [vmem:[%s19315_s22 + $0x240] sm:$0xff] }
 0x76e   :  { %9554 = vmatprep.subr.bf16.mxu1 %v9553_v29  ;;  %v9139_v28 = vpack.c.bf16 %v4338_v34, %v4330_v13  ;;  %v5778_v29 = vld [vmem:[%s19315_s22 + $0x160] sm:$0xff]  ;;  %v4411_v13 = vld [vmem:[%s19312_s19 + $0x718] sm:$0xff]  ;;  %v5803_v56 = vld [vmem:[%s19315_s22 + $0x228] sm:$0xff] }
 0x76f   :  { %v9571_v17 = vpack.c.bf16 %v5778_v29, %v5774_v8  ;;  %v4419_v34 = vld [vmem:[%s19312_s19 + $0x758] sm:$0xff]  ;;  %v9581_v57 = vpack.c.bf16 %v5803_v56, %v5799_v55  ;;  %v5830_v56 = vld [vmem:[%s19315_s22 + $0x300] sm:$0xff] }
 0x770   :  { %9124 = vmatpush1.bf16.msra.mxu0 %v9123_v31  ;;  %v9559_v31 = vpack.c.bf16 %v5754_v11, %v5750_v27 }
 0x771   :  { %9126 = vmatprep.subr.bf16.mxu0 %v9125_v62  ;;  %9556 = vmatpush1.bf16.msra.mxu1 %v9555_v19  ;;  %v4346_v62 = vld [vmem:[%s19312_s19 + $0x510] sm:$0xff] }
 0x772   :  { %9558 = vmatprep.subr.bf16.mxu1 %v9557_v41  ;;  %v9143_v45 = vpack.c.bf16 %v4354_v35, %v4346_v62  ;;  %v4394_v19 = vld [vmem:[%s19312_s19 + $0x690] sm:$0xff]  ;;  %v5786_v41 = vld [vmem:[%s19315_s22 + $0x1a0] sm:$0xff]  ;;  %v4427_v62 = vld [vmem:[%s19312_s19 + $0x798] sm:$0xff] }
 0x773   :  { %v9575_v11 = vpack.c.bf16 %v5786_v41, %v5782_v7  ;;  %v4435_v35 = vld [vmem:[%s19312_s19 + $0x7d8] sm:$0xff] }
 0x774   :  { %9128 = vmatpush1.bf16.msra.mxu0 %v9127_v46  ;;  %v9563_v46 = vpack.c.bf16 %v5762_v39, %v5758_v44 }
 0x775   :  { %9130 = vmatprep.subr.bf16.mxu0 %v9129_v50  ;;  %9560 = vmatpush1.bf16.msra.mxu1 %v9559_v31  ;;  %v4362_v50 = vld [vmem:[%s19312_s19 + $0x590] sm:$0xff] }
 0x776   :  { %9562 = vmatprep.subr.bf16.mxu1 %v9561_v43  ;;  %v9147_v52 = vpack.c.bf16 %v4370_v51, %v4362_v50  ;;  %v4410_v31 = vld [vmem:[%s19312_s19 + $0x710] sm:$0xff]  ;;  %v5794_v43 = vld [vmem:[%s19315_s22 + $0x1e0] sm:$0xff]  ;;  %v4443_v50 = vld [vmem:[%s19312_s19 + $0x818] sm:$0xff] }
 0x777   :  { %v9579_v39 = vpack.c.bf16 %v5794_v43, %v5790_v40  ;;  %v4451_v51 = vld [vmem:[%s19312_s19 + $0x858] sm:$0xff] }
 0x778   :  { %9132 = vmatpush1.bf16.msra.mxu0 %v9131_v59  ;;  %v9567_v59 = vpack.c.bf16 %v5770_v47, %v5766_v58 }
 0x779   :  { %9134 = vmatprep.subr.bf16.mxu0 %v9133_v61  ;;  %9564 = vmatpush1.bf16.msra.mxu1 %v9563_v46  ;;  %v4378_v61 = vld [vmem:[%s19312_s19 + $0x610] sm:$0xff] }
 0x77a   :  { %9566 = vmatprep.subr.bf16.mxu1 %v9565_v42  ;;  %v9151_v9 = vpack.c.bf16 %v4386_v63, %v4378_v61  ;;  %v4426_v46 = vld [vmem:[%s19312_s19 + $0x790] sm:$0xff]  ;;  %v5802_v42 = vld [vmem:[%s19315_s22 + $0x220] sm:$0xff]  ;;  %v4459_v61 = vld [vmem:[%s19312_s19 + $0x898] sm:$0xff] }
 0x77b   :  { %v9583_v47 = vpack.c.bf16 %v5802_v42, %v5798_v14  ;;  %v4467_v63 = vld [vmem:[%s19312_s19 + $0x8d8] sm:$0xff] }
 0x77c   :  { %9136 = vmatpush1.bf16.msra.mxu0 %v9135_v15  ;;  %v9153_v15 = vpack.c.bf16 %v4403_v54, %v4395_v1  ;;  %v5807_v1 = vld [vmem:[%s19315_s22 + $0x248] sm:$0xff] }
 0x77d   :  { %9138 = vmatprep.subr.bf16.mxu0 %v9137_v20  ;;  %9568 = vmatpush1.bf16.msra.mxu1 %v9567_v59  ;;  %v4402_v20 = vld [vmem:[%s19312_s19 + $0x6d0] sm:$0xff]  ;;  %v5811_v54 = vld [vmem:[%s19315_s22 + $0x268] sm:$0xff] }
 0x77e   :  { %9570 = vmatprep.subr.bf16.mxu1 %v9569_v6  ;;  %v9155_v27 = vpack.c.bf16 %v4402_v20, %v4394_v19  ;;  %v4442_v59 = vld [vmem:[%s19312_s19 + $0x810] sm:$0xff]  ;;  %v9585_v2 = vpack.c.bf16 %v5811_v54, %v5807_v1  ;;  %v5810_v6 = vld [vmem:[%s19315_s22 + $0x260] sm:$0xff]  ;;  %v4475_v19 = vld [vmem:[%s19312_s19 + $0x918] sm:$0xff] }
 0x77f   :  { %v9587_v29 = vpack.c.bf16 %v5810_v6, %v5806_v5  ;;  %v4483_v20 = vld [vmem:[%s19312_s19 + $0x958] sm:$0xff]  ;;  %v5838_v54 = vld [vmem:[%s19315_s22 + $0x340] sm:$0xff] }
 0x780   :  { %9140 = vmatpush1.bf16.msra.mxu0 %v9139_v28  ;;  %v9157_v28 = vpack.c.bf16 %v4419_v34, %v4411_v13  ;;  %v5815_v13 = vld [vmem:[%s19315_s22 + $0x288] sm:$0xff] }
 0x781   :  { %9142 = vmatprep.subr.bf16.mxu0 %v9141_v33  ;;  %9572 = vmatpush1.bf16.msra.mxu1 %v9571_v17  ;;  %v4418_v33 = vld [vmem:[%s19312_s19 + $0x750] sm:$0xff]  ;;  %v5819_v34 = vld [vmem:[%s19315_s22 + $0x2a8] sm:$0xff] }
 0x782   :  { %9574 = vmatprep.subr.bf16.mxu1 %v9573_v24  ;;  %v9159_v44 = vpack.c.bf16 %v4418_v33, %v4410_v31  ;;  %v4458_v17 = vld [vmem:[%s19312_s19 + $0x890] sm:$0xff]  ;;  %v9589_v22 = vpack.c.bf16 %v5819_v34, %v5815_v13  ;;  %v5818_v24 = vld [vmem:[%s19315_s22 + $0x2a0] sm:$0xff]  ;;  %v4491_v31 = vld [vmem:[%s19312_s19 + $0x998] sm:$0xff] }
 0x783   :  { %v9591_v41 = vpack.c.bf16 %v5818_v24, %v5814_v3  ;;  %v4499_v33 = vld [vmem:[%s19312_s19 + $0x9d8] sm:$0xff]  ;;  %v5846_v34 = vld [vmem:[%s19315_s22 + $0x380] sm:$0xff] }
 0x784   :  { %9144 = vmatpush1.bf16.msra.mxu0 %v9143_v45  ;;  %v9161_v45 = vpack.c.bf16 %v4435_v35, %v4427_v62  ;;  %v5823_v62 = vld [vmem:[%s19315_s22 + $0x2c8] sm:$0xff] }
 0x785   :  { %9146 = vmatprep.subr.bf16.mxu0 %v9145_v49  ;;  %9576 = vmatpush1.bf16.msra.mxu1 %v9575_v11  ;;  %v4434_v49 = vld [vmem:[%s19312_s19 + $0x7d0] sm:$0xff]  ;;  %v5827_v35 = vld [vmem:[%s19315_s22 + $0x2e8] sm:$0xff] }
 0x786   :  { %9578 = vmatprep.subr.bf16.mxu1 %v9577_v38  ;;  %v9163_v58 = vpack.c.bf16 %v4434_v49, %v4426_v46  ;;  %v4474_v11 = vld [vmem:[%s19312_s19 + $0x910] sm:$0xff]  ;;  %v9593_v36 = vpack.c.bf16 %v5827_v35, %v5823_v62  ;;  %v5826_v38 = vld [vmem:[%s19315_s22 + $0x2e0] sm:$0xff]  ;;  %v4507_v46 = vld [vmem:[%s19312_s19 + $0xa18] sm:$0xff] }
 0x787   :  { %v9595_v43 = vpack.c.bf16 %v5826_v38, %v5822_v18  ;;  %v4515_v49 = vld [vmem:[%s19312_s19 + $0xa58] sm:$0xff]  ;;  %v5854_v35 = vld [vmem:[%s19315_s22 + $0x3c0] sm:$0xff] }
 0x788   :  { %9148 = vmatpush1.bf16.msra.mxu0 %v9147_v52  ;;  %v9165_v52 = vpack.c.bf16 %v4451_v51, %v4443_v50  ;;  %v5831_v50 = vld [vmem:[%s19315_s22 + $0x308] sm:$0xff] }
 0x789   :  { %9150 = vmatprep.subr.bf16.mxu0 %v9149_v60  ;;  %9580 = vmatpush1.bf16.msra.mxu1 %v9579_v39  ;;  %v4450_v60 = vld [vmem:[%s19312_s19 + $0x850] sm:$0xff]  ;;  %v5835_v51 = vld [vmem:[%s19315_s22 + $0x328] sm:$0xff] }
 0x78a   :  { %9582 = vmatprep.subr.bf16.mxu1 %v9581_v57  ;;  %v9167_v8 = vpack.c.bf16 %v4450_v60, %v4442_v59  ;;  %v4490_v39 = vld [vmem:[%s19312_s19 + $0x990] sm:$0xff]  ;;  %v9597_v55 = vpack.c.bf16 %v5835_v51, %v5831_v50  ;;  %v5834_v57 = vld [vmem:[%s19315_s22 + $0x320] sm:$0xff]  ;;  %v4523_v59 = vld [vmem:[%s19312_s19 + $0xa98] sm:$0xff] }
 0x78b   :  { %v9599_v42 = vpack.c.bf16 %v5834_v57, %v5830_v56  ;;  %v4531_v60 = vld [vmem:[%s19312_s19 + $0xad8] sm:$0xff]  ;;  %v4570_v50 = vld [vmem:[%s19312_s19 + $0xc10] sm:$0xff] }
 0x78c   :  { %9152 = vmatpush1.bf16.msra.mxu0 %v9151_v9  ;;  %v9169_v9 = vpack.c.bf16 %v4467_v63, %v4459_v61  ;;  %v5839_v61 = vld [vmem:[%s19315_s22 + $0x348] sm:$0xff]  ;;  %v4578_v51 = vld [vmem:[%s19312_s19 + $0xc50] sm:$0xff]  ;;  %v4595_v56 = vld [vmem:[%s19312_s19 + $0xcd8] sm:$0xff] }
 0x78d   :  { %9154 = vmatprep.subr.bf16.mxu0 %v9153_v15  ;;  %9584 = vmatpush1.bf16.msra.mxu1 %v9583_v47  ;;  %v4466_v15 = vld [vmem:[%s19312_s19 + $0x8d0] sm:$0xff]  ;;  %v5843_v63 = vld [vmem:[%s19315_s22 + $0x368] sm:$0xff]  ;;  %v9199_v57 = vpack.c.bf16 %v4578_v51, %v4570_v50 }
 0x78e   :  { %9586 = vmatprep.subr.bf16.mxu1 %v9585_v2  ;;  %v9171_v7 = vpack.c.bf16 %v4466_v15, %v4458_v17  ;;  %v4506_v47 = vld [vmem:[%s19312_s19 + $0xa10] sm:$0xff]  ;;  %v9601_v1 = vpack.c.bf16 %v5843_v63, %v5839_v61  ;;  %v5842_v2 = vld [vmem:[%s19315_s22 + $0x360] sm:$0xff]  ;;  %v4539_v17 = vld [vmem:[%s19312_s19 + $0xb18] sm:$0xff] }
 0x78f   :  { %v9603_v6 = vpack.c.bf16 %v5842_v2, %v5838_v54  ;;  %v4547_v15 = vld [vmem:[%s19312_s19 + $0xb58] sm:$0xff]  ;;  %v4602_v61 = vld [vmem:[%s19312_s19 + $0xd10] sm:$0xff]  ;;  %v4205_v50 = vld [vmem:[%s19312_s19 + $0xa8] sm:$0xff] }
 0x790   :  { %9156 = vmatpush1.bf16.msra.mxu0 %v9155_v27  ;;  %v9173_v27 = vpack.c.bf16 %v4483_v20, %v4475_v19  ;;  %v5847_v19 = vld [vmem:[%s19315_s22 + $0x388] sm:$0xff]  ;;  %v4610_v63 = vld [vmem:[%s19312_s19 + $0xd50] sm:$0xff]  ;;  %v4627_v54 = vld [vmem:[%s19312_s19 + $0xdd8] sm:$0xff] }
 0x791   :  { %9158 = vmatprep.subr.bf16.mxu0 %v9157_v28  ;;  %9588 = vmatpush1.bf16.msra.mxu1 %v9587_v29  ;;  %v4482_v28 = vld [vmem:[%s19312_s19 + $0x950] sm:$0xff]  ;;  %v5851_v20 = vld [vmem:[%s19315_s22 + $0x3a8] sm:$0xff]  ;;  %v9207_v2 = vpack.c.bf16 %v4610_v63, %v4602_v61 }
 0x792   :  { %9590 = vmatprep.subr.bf16.mxu1 %v9589_v22  ;;  %v9175_v40 = vpack.c.bf16 %v4482_v28, %v4474_v11  ;;  %v4522_v29 = vld [vmem:[%s19312_s19 + $0xa90] sm:$0xff]  ;;  %v9605_v13 = vpack.c.bf16 %v5851_v20, %v5847_v19  ;;  %v5850_v22 = vld [vmem:[%s19315_s22 + $0x3a0] sm:$0xff]  ;;  %v4555_v11 = vld [vmem:[%s19312_s19 + $0xb98] sm:$0xff] }
 0x793   :  { %v9607_v24 = vpack.c.bf16 %v5850_v22, %v5846_v34  ;;  %v4563_v28 = vld [vmem:[%s19312_s19 + $0xbd8] sm:$0xff]  ;;  %v4634_v19 = vld [vmem:[%s19312_s19 + $0xe10] sm:$0xff]  ;;  %v4213_v51 = vld [vmem:[%s19312_s19 + $0xe8] sm:$0xff] }
 0x794   :  { %9160 = vmatpush1.bf16.msra.mxu0 %v9159_v44  ;;  %v9177_v44 = vpack.c.bf16 %v4499_v33, %v4491_v31  ;;  %v5855_v31 = vld [vmem:[%s19315_s22 + $0x3c8] sm:$0xff]  ;;  %v4642_v20 = vld [vmem:[%s19312_s19 + $0xe50] sm:$0xff]  ;;  %v4659_v34 = vld [vmem:[%s19312_s19 + $0xed8] sm:$0xff] }
 0x795   :  { %9162 = vmatprep.subr.bf16.mxu0 %v9161_v45  ;;  %9592 = vmatpush1.bf16.msra.mxu1 %v9591_v41  ;;  %v4498_v45 = vld [vmem:[%s19312_s19 + $0x9d0] sm:$0xff]  ;;  %v5859_v33 = vld [vmem:[%s19315_s22 + $0x3e8] sm:$0xff]  ;;  %v9215_v22 = vpack.c.bf16 %v4642_v20, %v4634_v19 }
 0x796   :  { %9594 = vmatprep.subr.bf16.mxu1 %v9593_v36  ;;  %v9179_v14 = vpack.c.bf16 %v4498_v45, %v4490_v39  ;;  %v4538_v41 = vld [vmem:[%s19312_s19 + $0xb10] sm:$0xff]  ;;  %v9609_v62 = vpack.c.bf16 %v5859_v33, %v5855_v31  ;;  %v5858_v36 = vld [vmem:[%s19315_s22 + $0x3e0] sm:$0xff]  ;;  %v4571_v39 = vld [vmem:[%s19312_s19 + $0xc18] sm:$0xff] }
 0x797   :  { %v9611_v38 = vpack.c.bf16 %v5858_v36, %v5854_v35  ;;  %v4579_v45 = vld [vmem:[%s19312_s19 + $0xc58] sm:$0xff]  ;;  %v4666_v31 = vld [vmem:[%s19312_s19 + $0xf10] sm:$0xff]  ;;  %v4237_v61 = vld [vmem:[%s19312_s19 + $0x1a8] sm:$0xff] }
 0x798   :  { %9164 = vmatpush1.bf16.msra.mxu0 %v9163_v58  ;;  %v9181_v58 = vpack.c.bf16 %v4515_v49, %v4507_v46  ;;  %v9197_v49 = vpack.c.bf16 %v4579_v45, %v4571_v39  ;;  %v4674_v33 = vld [vmem:[%s19312_s19 + $0xf50] sm:$0xff]  ;;  %v4691_v35 = vld [vmem:[%s19312_s19 + $0xfd8] sm:$0xff]  ;;  %v4245_v63 = vld [vmem:[%s19312_s19 + $0x1e8] sm:$0xff] }
 0x799   :  { %9166 = vmatprep.subr.bf16.mxu0 %v9165_v52  ;;  %9596 = vmatpush1.bf16.msra.mxu1 %v9595_v43  ;;  %v4514_v52 = vld [vmem:[%s19312_s19 + $0xa50] sm:$0xff]  ;;  %v9223_v36 = vpack.c.bf16 %v4674_v33, %v4666_v31  ;;  %v4269_v19 = vld [vmem:[%s19312_s19 + $0x2a8] sm:$0xff] }
 0x79a   :  { %9598 = vmatprep.subr.bf16.mxu1 %v9597_v55  ;;  %v9183_v5 = vpack.c.bf16 %v4514_v52, %v4506_v47  ;;  %v4554_v43 = vld [vmem:[%s19312_s19 + $0xb90] sm:$0xff]  ;;  %v4587_v55 = vld [vmem:[%s19312_s19 + $0xc98] sm:$0xff]  ;;  %v4277_v20 = vld [vmem:[%s19312_s19 + $0x2e8] sm:$0xff] }
 0x79b   :  { %5315 = vmatmul.mubr.f32.vlgmr.msra.gmra.mrb[12].mxu0 %v16080_v0  ;;  %v4603_v47 = vld [vmem:[%s19312_s19 + $0xd18] sm:$0xff]  ;;  %v4301_v31 = vld [vmem:[%s19312_s19 + $0x3a8] sm:$0xff] }
 0x79c   :  { %9168 = vmatpush1.bf16.msra.mxu0 %v9167_v8  ;;  %5385 = vmatprep.mubr.f32.mxu0 %v16402_v12  ;;  %v9185_v8 = vpack.c.bf16 %v4531_v60, %v4523_v59  ;;  %v4611_v52 = vld [vmem:[%s19312_s19 + $0xd58] sm:$0xff]  ;;  %v4309_v33 = vld [vmem:[%s19312_s19 + $0x3e8] sm:$0xff] }
 0x79d   :  { %9170 = vmatprep.subr.bf16.mxu0 %v9169_v9  ;;  %9600 = vmatpush1.bf16.msra.mxu1 %v9599_v42  ;;  %v4530_v9 = vld [vmem:[%s19312_s19 + $0xad0] sm:$0xff]  ;;  %v9205_v60 = vpack.c.bf16 %v4611_v52, %v4603_v47 }
 0x79e   :  { %9602 = vmatprep.subr.bf16.mxu1 %v9601_v1  ;;  %v9187_v3 = vpack.c.bf16 %v4530_v9, %v4522_v29  ;;  %v4586_v42 = vld [vmem:[%s19312_s19 + $0xc90] sm:$0xff]  ;;  %v4619_v1 = vld [vmem:[%s19312_s19 + $0xd98] sm:$0xff] }
 0x79f   :  { %v4635_v29 = vld [vmem:[%s19312_s19 + $0xe18] sm:$0xff] }
 0x7a0   :  { %9172 = vmatpush1.bf16.msra.mxu0 %v9171_v7  ;;  %v9189_v7 = vpack.c.bf16 %v4547_v15, %v4539_v17  ;;  %v4643_v9 = vld [vmem:[%s19312_s19 + $0xe58] sm:$0xff] }
 0x7a1   :  { %9174 = vmatprep.subr.bf16.mxu0 %v9173_v27  ;;  %9604 = vmatpush1.bf16.msra.mxu1 %v9603_v6  ;;  %v4546_v27 = vld [vmem:[%s19312_s19 + $0xb50] sm:$0xff]  ;;  %v9213_v15 = vpack.c.bf16 %v4643_v9, %v4635_v29 }
 0x7a2   :  { %9606 = vmatprep.subr.bf16.mxu1 %v9605_v13  ;;  %v9191_v18 = vpack.c.bf16 %v4546_v27, %v4538_v41  ;;  %v4618_v6 = vld [vmem:[%s19312_s19 + $0xd90] sm:$0xff]  ;;  %v4651_v13 = vld [vmem:[%s19312_s19 + $0xe98] sm:$0xff] }
 0x7a3   :  { %v4667_v41 = vld [vmem:[%s19312_s19 + $0xf18] sm:$0xff] }
 0x7a4   :  { %9176 = vmatpush1.bf16.msra.mxu0 %v9175_v40  ;;  %v9193_v40 = vpack.c.bf16 %v4563_v28, %v4555_v11  ;;  %v4675_v27 = vld [vmem:[%s19312_s19 + $0xf58] sm:$0xff] }
 0x7a5   :  { %9178 = vmatprep.subr.bf16.mxu0 %v9177_v44  ;;  %9608 = vmatpush1.bf16.msra.mxu1 %v9607_v24  ;;  %v4562_v44 = vld [vmem:[%s19312_s19 + $0xbd0] sm:$0xff]  ;;  %v9221_v28 = vpack.c.bf16 %v4675_v27, %v4667_v41 }
 0x7a6   :  { %9610 = vmatprep.subr.bf16.mxu1 %v9609_v62  ;;  %v9195_v46 = vpack.c.bf16 %v4562_v44, %v4554_v43  ;;  %v4650_v24 = vld [vmem:[%s19312_s19 + $0xe90] sm:$0xff]  ;;  %v4683_v62 = vld [vmem:[%s19312_s19 + $0xf98] sm:$0xff]  ;;  %v4189_v43 = vld [vmem:[%s19312_s19 + $0x28] sm:$0xff] }
 0x7a7   :  { %v4197_v44 = vld [vmem:[%s19312_s19 + $0x68] sm:$0xff] }
 0x7a8   :  { %9180 = vmatpush1.bf16.msra.mxu0 %v9179_v14  ;;  %v9201_v14 = vpack.c.bf16 %v4595_v56, %v4587_v55  ;;  %v9229_v45 = vpack.c.bf16 %v4197_v44, %v4189_v43  ;;  %v9233_v56 = vpack.c.bf16 %v4213_v51, %v4205_v50  ;;  %v5863_v43 = vld [vmem:[%s19315_s22 + $0x408] sm:$0xff]  ;;  %v4324_v50 = vld [vmem:[%s19312_s19 + $0x460] sm:$0xff] }
 0x7a9   :  { %9182 = vmatprep.subr.bf16.mxu0 %v9181_v58  ;;  %9612 = vmatpush1.bf16.msra.mxu1 %v9611_v38  ;;  %v4594_v58 = vld [vmem:[%s19312_s19 + $0xcd0] sm:$0xff]  ;;  %v5867_v44 = vld [vmem:[%s19315_s22 + $0x428] sm:$0xff] }
 0x7aa   :  { %v9203_v59 = vpack.c.bf16 %v4594_v58, %v4586_v42  ;;  %v4682_v38 = vld [vmem:[%s19312_s19 + $0xf90] sm:$0xff]  ;;  %v4221_v42 = vld [vmem:[%s19312_s19 + $0x128] sm:$0xff] }
 0x7ab   :  { %v4229_v58 = vld [vmem:[%s19312_s19 + $0x168] sm:$0xff] }
 0x7ac   :  { %9184 = vmatpush1.bf16.msra.mxu0 %v9183_v5  ;;  %v9209_v5 = vpack.c.bf16 %v4627_v54, %v4619_v1  ;;  %v9237_v52 = vpack.c.bf16 %v4229_v58, %v4221_v42  ;;  %v9241_v54 = vpack.c.bf16 %v4245_v63, %v4237_v61  ;;  %v4333_v51 = vld [vmem:[%s19312_s19 + $0x4a8] sm:$0xff]  ;;  %v4340_v42 = vld [vmem:[%s19312_s19 + $0x4e0] sm:$0xff] }
 0x7ad   :  { %9186 = vmatprep.subr.bf16.mxu0 %v9185_v8  ;;  %v4626_v8 = vld [vmem:[%s19312_s19 + $0xdd0] sm:$0xff]  ;;  %v4349_v58 = vld [vmem:[%s19312_s19 + $0x528] sm:$0xff]  ;;  %v4356_v61 = vld [vmem:[%s19312_s19 + $0x560] sm:$0xff] }
 0x7ae   :  { %v9211_v17 = vpack.c.bf16 %v4626_v8, %v4618_v6  ;;  %v4253_v6 = vld [vmem:[%s19312_s19 + $0x228] sm:$0xff] }
 0x7af   :  { %v4261_v8 = vld [vmem:[%s19312_s19 + $0x268] sm:$0xff] }
 0x7b0   :  { %9188 = vmatpush1.bf16.msra.mxu0 %v9187_v3  ;;  %v9217_v3 = vpack.c.bf16 %v4659_v34, %v4651_v13  ;;  %v9245_v9 = vpack.c.bf16 %v4261_v8, %v4253_v6  ;;  %v9249_v34 = vpack.c.bf16 %v4277_v20, %v4269_v19  ;;  %v4365_v63 = vld [vmem:[%s19312_s19 + $0x5a8] sm:$0xff]  ;;  %v4372_v6 = vld [vmem:[%s19312_s19 + $0x5e0] sm:$0xff] }
 0x7b1   :  { %9190 = vmatprep.subr.bf16.mxu0 %v9189_v7  ;;  %v4658_v7 = vld [vmem:[%s19312_s19 + $0xed0] sm:$0xff]  ;;  %v4381_v8 = vld [vmem:[%s19312_s19 + $0x628] sm:$0xff]  ;;  %v4388_v19 = vld [vmem:[%s19312_s19 + $0x660] sm:$0xff] }
 0x7b2   :  { %v9219_v11 = vpack.c.bf16 %v4658_v7, %v4650_v24  ;;  %v4285_v24 = vld [vmem:[%s19312_s19 + $0x328] sm:$0xff] }
 0x7b3   :  { %v4293_v7 = vld [vmem:[%s19312_s19 + $0x368] sm:$0xff] }
 0x7b4   :  { %9192 = vmatpush1.bf16.msra.mxu0 %v9191_v18  ;;  %v9225_v18 = vpack.c.bf16 %v4691_v35, %v4683_v62  ;;  %v9253_v27 = vpack.c.bf16 %v4293_v7, %v4285_v24  ;;  %v9257_v35 = vpack.c.bf16 %v4309_v33, %v4301_v31  ;;  %v4397_v20 = vld [vmem:[%s19312_s19 + $0x6a8] sm:$0xff]  ;;  %v4404_v24 = vld [vmem:[%s19312_s19 + $0x6e0] sm:$0xff] }
 0x7b5   :  { %9194 = vmatprep.subr.bf16.mxu0 %v9193_v40  ;;  %v4690_v40 = vld [vmem:[%s19312_s19 + $0xfd0] sm:$0xff]  ;;  %v4413_v7 = vld [vmem:[%s19312_s19 + $0x728] sm:$0xff]  ;;  %v4420_v31 = vld [vmem:[%s19312_s19 + $0x760] sm:$0xff] }
 0x7b6   :  { %v9227_v39 = vpack.c.bf16 %v4690_v40, %v4682_v38  ;;  %v4317_v38 = vld [vmem:[%s19312_s19 + $0x428] sm:$0xff] }
 0x7b7   :  { %v4325_v40 = vld [vmem:[%s19312_s19 + $0x468] sm:$0xff] }
 0x7b8   :  { %9196 = vmatpush1.bf16.msra.mxu0 %v9195_v46  ;;  %v4188_v46 = vld [vmem:[%s19312_s19 + $0x20] sm:$0xff]  ;;  %v4429_v33 = vld [vmem:[%s19312_s19 + $0x7a8] sm:$0xff] }
 0x7b9   :  { %9198 = vmatprep.subr.bf16.mxu0 %v9197_v49  ;;  %v4196_v49 = vld [vmem:[%s19312_s19 + $0x60] sm:$0xff] }
 0x7ba   :  { %v9231_v55 = vpack.c.bf16 %v4196_v49, %v4188_v46  ;;  %v9261_v46 = vpack.c.bf16 %v4325_v40, %v4317_v38  ;;  %v4316_v49 = vld [vmem:[%s19312_s19 + $0x420] sm:$0xff]  ;;  %v4445_v40 = vld [vmem:[%s19312_s19 + $0x828] sm:$0xff] }
 0x7bb   :  { %v4436_v38 = vld [vmem:[%s19312_s19 + $0x7e0] sm:$0xff] }
 0x7bc   :  { %9200 = vmatpush1.bf16.msra.mxu0 %v9199_v57  ;;  %v4204_v57 = vld [vmem:[%s19312_s19 + $0xa0] sm:$0xff] }
 0x7bd   :  { %9202 = vmatprep.subr.bf16.mxu0 %v9201_v14  ;;  %v4212_v14 = vld [vmem:[%s19312_s19 + $0xe0] sm:$0xff] }
 0x7be   :  { %v9235_v47 = vpack.c.bf16 %v4212_v14, %v4204_v57  ;;  %v4332_v14 = vld [vmem:[%s19312_s19 + $0x4a0] sm:$0xff] }
 0x7c0   :  { %9204 = vmatpush1.bf16.msra.mxu0 %v9203_v59  ;;  %v4220_v59 = vld [vmem:[%s19312_s19 + $0x120] sm:$0xff] }
 0x7c1   :  { %9206 = vmatprep.subr.bf16.mxu0 %v9205_v60  ;;  %v4228_v60 = vld [vmem:[%s19312_s19 + $0x160] sm:$0xff] }
 0x7c2   :  { %v9239_v1 = vpack.c.bf16 %v4228_v60, %v4220_v59  ;;  %v4348_v60 = vld [vmem:[%s19312_s19 + $0x520] sm:$0xff] }
 0x7c4   :  { %9208 = vmatpush1.bf16.msra.mxu0 %v9207_v2  ;;  %v4236_v2 = vld [vmem:[%s19312_s19 + $0x1a0] sm:$0xff] }
 0x7c5   :  { %9210 = vmatprep.subr.bf16.mxu0 %v9209_v5  ;;  %v4244_v5 = vld [vmem:[%s19312_s19 + $0x1e0] sm:$0xff] }
 0x7c6   :  { %v9243_v29 = vpack.c.bf16 %v4244_v5, %v4236_v2  ;;  %v4364_v5 = vld [vmem:[%s19312_s19 + $0x5a0] sm:$0xff] }
 0x7c8   :  { %9212 = vmatpush1.bf16.msra.mxu0 %v9211_v17  ;;  %v4252_v17 = vld [vmem:[%s19312_s19 + $0x220] sm:$0xff] }
 0x7c9   :  { %9214 = vmatprep.subr.bf16.mxu0 %v9213_v15  ;;  %v4260_v15 = vld [vmem:[%s19312_s19 + $0x260] sm:$0xff] }
 0x7ca   :  { %v9247_v13 = vpack.c.bf16 %v4260_v15, %v4252_v17  ;;  %v4380_v15 = vld [vmem:[%s19312_s19 + $0x620] sm:$0xff] }
 0x7cc   :  { %9216 = vmatpush1.bf16.msra.mxu0 %v9215_v22  ;;  %v4268_v22 = vld [vmem:[%s19312_s19 + $0x2a0] sm:$0xff] }
 0x7cd   :  { %9218 = vmatprep.subr.bf16.mxu0 %v9217_v3  ;;  %v4276_v3 = vld [vmem:[%s19312_s19 + $0x2e0] sm:$0xff] }
 0x7ce   :  { %v9251_v41 = vpack.c.bf16 %v4276_v3, %v4268_v22  ;;  %v4396_v3 = vld [vmem:[%s19312_s19 + $0x6a0] sm:$0xff] }
 0x7d0   :  { %9220 = vmatpush1.bf16.msra.mxu0 %v9219_v11  ;;  %v4284_v11 = vld [vmem:[%s19312_s19 + $0x320] sm:$0xff] }
 0x7d1   :  { %9222 = vmatprep.subr.bf16.mxu0 %v9221_v28  ;;  %v4292_v28 = vld [vmem:[%s19312_s19 + $0x360] sm:$0xff] }
 0x7d2   :  { %v9255_v62 = vpack.c.bf16 %v4292_v28, %v4284_v11  ;;  %v4412_v28 = vld [vmem:[%s19312_s19 + $0x720] sm:$0xff] }
 0x7d4   :  { %9224 = vmatpush1.bf16.msra.mxu0 %v9223_v36  ;;  %v4300_v36 = vld [vmem:[%s19312_s19 + $0x3a0] sm:$0xff] }
 0x7d5   :  { %9226 = vmatprep.subr.bf16.mxu0 %v9225_v18  ;;  %v4308_v18 = vld [vmem:[%s19312_s19 + $0x3e0] sm:$0xff] }
 0x7d8   :  { %9228 = vmatpush1.bf16.msra.mxu0 %v9227_v39  ;;  %v9613_v39 = vpack.c.bf16 %v5867_v44, %v5863_v43  ;;  %v4453_v43 = vld [vmem:[%s19312_s19 + $0x868] sm:$0xff] }
 0x7d9   :  { %9230 = vmatprep.subr.bf16.mxu0 %v9229_v45  ;;  %v9259_v45 = vpack.c.bf16 %v4308_v18, %v4300_v36  ;;  %v4428_v18 = vld [vmem:[%s19312_s19 + $0x7a0] sm:$0xff] }
 0x7da   :  { %9614 = vmatprep.subr.bf16.mxu1 %v9613_v39  ;;  %v9291_v44 = vpack.c.bf16 %v4436_v38, %v4428_v18  ;;  %v9293_v39 = vpack.c.bf16 %v4453_v43, %v4445_v40  ;;  %v5862_v40 = vld [vmem:[%s19315_s22 + $0x400] sm:$0xff] }
 0x7db   :  { %5386 = vmatmul.mubr.f32.vlgmr.msra.gmra.mrb[12].mxu0 %v16404_v21  ;;  %v5866_v43 = vld [vmem:[%s19315_s22 + $0x420] sm:$0xff] }
 0x7dc   :  { %9232 = vmatpush1.bf16.msra.mxu0 %v9231_v55  ;;  %5456 = vmatprep.mubr.f32.mxu0 %v16078_v32  ;;  %v4341_v55 = vld [vmem:[%s19312_s19 + $0x4e8] sm:$0xff] }
 0x7dd   :  { %9234 = vmatprep.subr.bf16.mxu0 %v9233_v56  ;;  %v9263_v56 = vpack.c.bf16 %v4324_v50, %v4316_v49  ;;  %v9265_v57 = vpack.c.bf16 %v4341_v55, %v4333_v51  ;;  %v4461_v49 = vld [vmem:[%s19312_s19 + $0x8a8] sm:$0xff] }
 0x7de   :  { %v4469_v50 = vld [vmem:[%s19312_s19 + $0x8e8] sm:$0xff] }
 0x7df   :  { %v9297_v55 = vpack.c.bf16 %v4469_v50, %v4461_v49  ;;  %v4556_v50 = vld [vmem:[%s19312_s19 + $0xba0] sm:$0xff] }
 0x7e0   :  { %9236 = vmatpush1.bf16.msra.mxu0 %v9235_v47  ;;  %v4357_v47 = vld [vmem:[%s19312_s19 + $0x568] sm:$0xff] }
 0x7e1   :  { %9238 = vmatprep.subr.bf16.mxu0 %v9237_v52  ;;  %v9267_v52 = vpack.c.bf16 %v4340_v42, %v4332_v14  ;;  %v9269_v59 = vpack.c.bf16 %v4357_v47, %v4349_v58  ;;  %v4477_v14 = vld [vmem:[%s19312_s19 + $0x928] sm:$0xff] }
 0x7e2   :  { %v4485_v42 = vld [vmem:[%s19312_s19 + $0x968] sm:$0xff] }
 0x7e3   :  { %v9301_v47 = vpack.c.bf16 %v4485_v42, %v4477_v14  ;;  %v9615_v14 = vpack.c.bf16 %v5866_v43, %v5862_v40  ;;  %v4629_v40 = vld [vmem:[%s19312_s19 + $0xde8] sm:$0xff] }
 0x7e4   :  { %9240 = vmatpush1.bf16.msra.mxu0 %v9239_v1  ;;  %v4373_v1 = vld [vmem:[%s19312_s19 + $0x5e8] sm:$0xff] }
 0x7e5   :  { %9242 = vmatprep.subr.bf16.mxu0 %v9241_v54  ;;  %v9271_v54 = vpack.c.bf16 %v4356_v61, %v4348_v60  ;;  %v9273_v2 = vpack.c.bf16 %v4373_v1, %v4365_v63  ;;  %v4493_v60 = vld [vmem:[%s19312_s19 + $0x9a8] sm:$0xff] }
 0x7e6   :  { %v4501_v61 = vld [vmem:[%s19312_s19 + $0x9e8] sm:$0xff] }
 0x7e7   :  { %v9305_v1 = vpack.c.bf16 %v4501_v61, %v4493_v60  ;;  %v5879_v60 = vld [vmem:[%s19315_s22 + $0x488] sm:$0xff] }
 0x7e8   :  { %9244 = vmatpush1.bf16.msra.mxu0 %v9243_v29  ;;  %v4389_v29 = vld [vmem:[%s19312_s19 + $0x668] sm:$0xff] }
 0x7e9   :  { %9246 = vmatprep.subr.bf16.mxu0 %v9245_v9  ;;  %v9275_v9 = vpack.c.bf16 %v4372_v6, %v4364_v5  ;;  %v9277_v17 = vpack.c.bf16 %v4389_v29, %v4381_v8  ;;  %v4509_v5 = vld [vmem:[%s19312_s19 + $0xa28] sm:$0xff] }
 0x7ea   :  { %v4517_v6 = vld [vmem:[%s19312_s19 + $0xa68] sm:$0xff] }
 0x7eb   :  { %v9309_v29 = vpack.c.bf16 %v4517_v6, %v4509_v5  ;;  %v5883_v61 = vld [vmem:[%s19315_s22 + $0x4a8] sm:$0xff] }
 0x7ec   :  { %9248 = vmatpush1.bf16.msra.mxu0 %v9247_v13  ;;  %v4405_v13 = vld [vmem:[%s19312_s19 + $0x6e8] sm:$0xff] }
 0x7ed   :  { %9250 = vmatprep.subr.bf16.mxu0 %v9249_v34  ;;  %v9279_v34 = vpack.c.bf16 %v4388_v19, %v4380_v15  ;;  %v9281_v22 = vpack.c.bf16 %v4405_v13, %v4397_v20  ;;  %v4525_v15 = vld [vmem:[%s19312_s19 + $0xaa8] sm:$0xff]  ;;  %v17315_v13 = vld [vmem:[%s19314_s21] sm:$0xff] }
 0x7ee   :  { %v4533_v19 = vld [vmem:[%s19312_s19 + $0xae8] sm:$0xff] }
 0x7ef   :  { %v4597_v5 = vld [vmem:[%s19312_s19 + $0xce8] sm:$0xff] }
 0x7f0   :  { %9252 = vmatpush1.bf16.msra.mxu0 %v9251_v41  ;;  %v4421_v41 = vld [vmem:[%s19312_s19 + $0x768] sm:$0xff] }
 0x7f1   :  { %9254 = vmatprep.subr.bf16.mxu0 %v9253_v27  ;;  %v9283_v27 = vpack.c.bf16 %v4404_v24, %v4396_v3  ;;  %v9285_v11 = vpack.c.bf16 %v4421_v41, %v4413_v7  ;;  %v4532_v3 = vld [vmem:[%s19312_s19 + $0xae0] sm:$0xff]  ;;  %v4541_v24 = vld [vmem:[%s19312_s19 + $0xb28] sm:$0xff]  ;;  %v5681_v41 = vrot.slane %v17315_v13, %v12884_v48 }
 0x7f2   :  { %v4549_v7 = vld [vmem:[%s19312_s19 + $0xb68] sm:$0xff] }
 0x7f4   :  { %9256 = vmatpush1.bf16.msra.mxu0 %v9255_v62  ;;  %v4437_v62 = vld [vmem:[%s19312_s19 + $0x7e8] sm:$0xff] }
 0x7f5   :  { %9258 = vmatprep.subr.bf16.mxu0 %v9257_v35  ;;  %v9287_v35 = vpack.c.bf16 %v4420_v31, %v4412_v28  ;;  %v9289_v36 = vpack.c.bf16 %v4437_v62, %v4429_v33  ;;  %v9317_v28 = vpack.c.bf16 %v4549_v7, %v4541_v24  ;;  %v4540_v31 = vld [vmem:[%s19312_s19 + $0xb20] sm:$0xff]  ;;  %v4613_v24 = vld [vmem:[%s19312_s19 + $0xd68] sm:$0xff] }
 0x7f6   :  { %v4548_v33 = vld [vmem:[%s19312_s19 + $0xb60] sm:$0xff] }
 0x7f8   :  { %9260 = vmatpush1.bf16.msra.mxu0 %v9259_v45  ;;  %v4444_v45 = vld [vmem:[%s19312_s19 + $0x820] sm:$0xff] }
 0x7f9   :  { %9262 = vmatprep.subr.bf16.mxu0 %v9261_v46  ;;  %v4452_v46 = vld [vmem:[%s19312_s19 + $0x860] sm:$0xff] }
 0x7fa   :  { %v9295_v51 = vpack.c.bf16 %v4452_v46, %v4444_v45  ;;  %v5871_v45 = vld [vmem:[%s19315_s22 + $0x448] sm:$0xff] }
 0x7fb   :  { %v5875_v46 = vld [vmem:[%s19315_s22 + $0x468] sm:$0xff] }
 0x7fc   :  { %9264 = vmatpush1.bf16.msra.mxu0 %v9263_v56  ;;  %v4460_v56 = vld [vmem:[%s19312_s19 + $0x8a0] sm:$0xff] }
 0x7fd   :  { %9266 = vmatprep.subr.bf16.mxu0 %v9265_v57  ;;  %v4468_v57 = vld [vmem:[%s19312_s19 + $0x8e0] sm:$0xff] }
 0x7fe   :  { %v9299_v58 = vpack.c.bf16 %v4468_v57, %v4460_v56  ;;  %v4573_v56 = vld [vmem:[%s19312_s19 + $0xc28] sm:$0xff] }
 0x7ff   :  { %v4581_v57 = vld [vmem:[%s19312_s19 + $0xc68] sm:$0xff] }
 0x800   :  { %9268 = vmatpush1.bf16.msra.mxu0 %v9267_v52  ;;  %v4476_v52 = vld [vmem:[%s19312_s19 + $0x920] sm:$0xff] }
 0x801   :  { %9270 = vmatprep.subr.bf16.mxu0 %v9269_v59  ;;  %v4484_v59 = vld [vmem:[%s19312_s19 + $0x960] sm:$0xff] }
 0x802   :  { %v9303_v63 = vpack.c.bf16 %v4484_v59, %v4476_v52  ;;  %v5874_v52 = vld [vmem:[%s19315_s22 + $0x460] sm:$0xff] }
 0x804   :  { %9272 = vmatpush1.bf16.msra.mxu0 %v9271_v54  ;;  %v4492_v54 = vld [vmem:[%s19312_s19 + $0x9a0] sm:$0xff] }
 0x805   :  { %9274 = vmatprep.subr.bf16.mxu0 %v9273_v2  ;;  %v4500_v2 = vld [vmem:[%s19312_s19 + $0x9e0] sm:$0xff] }
 0x806   :  { %v9307_v8 = vpack.c.bf16 %v4500_v2, %v4492_v54  ;;  %v4580_v54 = vld [vmem:[%s19312_s19 + $0xc60] sm:$0xff]  ;;  %v4589_v2 = vld [vmem:[%s19312_s19 + $0xca8] sm:$0xff] }
 0x808   :  { %9276 = vmatpush1.bf16.msra.mxu0 %v9275_v9  ;;  %v4508_v9 = vld [vmem:[%s19312_s19 + $0xa20] sm:$0xff] }
 0x809   :  { %9278 = vmatprep.subr.bf16.mxu0 %v9277_v17  ;;  %v4516_v17 = vld [vmem:[%s19312_s19 + $0xa60] sm:$0xff] }
 0x80a   :  { %v9311_v20 = vpack.c.bf16 %v4516_v17, %v4508_v9  ;;  %v5882_v9 = vld [vmem:[%s19315_s22 + $0x4a0] sm:$0xff] }
 0x80c   :  { %9280 = vmatpush1.bf16.msra.mxu0 %v9279_v34  ;;  %v9313_v34 = vpack.c.bf16 %v4533_v19, %v4525_v15  ;;  %v5887_v15 = vld [vmem:[%s19315_s22 + $0x4c8] sm:$0xff] }
 0x80d   :  { %9282 = vmatprep.subr.bf16.mxu0 %v9281_v22  ;;  %v4524_v22 = vld [vmem:[%s19312_s19 + $0xaa0] sm:$0xff]  ;;  %v5891_v19 = vld [vmem:[%s19315_s22 + $0x4e8] sm:$0xff] }
 0x810   :  { %9284 = vmatpush1.bf16.msra.mxu0 %v9283_v27  ;;  %v5685_v27 = vrot.slane %v17315_v13, %v12887_v25 }
 0x811   :  { %9286 = vmatprep.subr.bf16.mxu0 %v9285_v11  ;;  %v9315_v11 = vpack.c.bf16 %v4532_v3, %v4524_v22  ;;  %v4596_v22 = vld [vmem:[%s19312_s19 + $0xce0] sm:$0xff]  ;;  %v4605_v3 = vld [vmem:[%s19312_s19 + $0xd28] sm:$0xff] }
 0x814   :  { %9288 = vmatpush1.bf16.msra.mxu0 %v9287_v35  ;;  %v4557_v35 = vld [vmem:[%s19312_s19 + $0xba8] sm:$0xff] }
 0x815   :  { %9290 = vmatprep.subr.bf16.mxu0 %v9289_v36  ;;  %v4565_v36 = vld [vmem:[%s19312_s19 + $0xbe8] sm:$0xff] }
 0x816   :  { %v9321_v49 = vpack.c.bf16 %v4565_v36, %v4557_v35  ;;  %v4604_v35 = vld [vmem:[%s19312_s19 + $0xd20] sm:$0xff] }
 0x817   :  { %v4612_v36 = vld [vmem:[%s19312_s19 + $0xd60] sm:$0xff] }
 0x818   :  { %9292 = vmatpush1.bf16.msra.mxu0 %v9291_v44 }
 0x819   :  { %9294 = vmatprep.subr.bf16.mxu0 %v9293_v39  ;;  %v9319_v39 = vpack.c.bf16 %v4548_v33, %v4540_v31  ;;  %v5895_v31 = vld [vmem:[%s19315_s22 + $0x508] sm:$0xff] }
 0x81a   :  { %v5899_v33 = vld [vmem:[%s19315_s22 + $0x528] sm:$0xff] }
 0x81b   :  { %5457 = vmatmul.mubr.f32.vlgmr.msra.gmra.mrb[14].mxu0 %v16080_v0 }
 0x81c   :  { %9296 = vmatpush1.bf16.msra.mxu0 %v9295_v51  ;;  %5527 = vmatprep.mubr.f32.mxu0 %v16402_v12  ;;  %v4564_v51 = vld [vmem:[%s19312_s19 + $0xbe0] sm:$0xff] }
 0x81d   :  { %9298 = vmatprep.subr.bf16.mxu0 %v9297_v55  ;;  %v9323_v59 = vpack.c.bf16 %v4564_v51, %v4556_v50  ;;  %v5903_v50 = vld [vmem:[%s19315_s22 + $0x548] sm:$0xff] }
 0x81e   :  { %v5907_v51 = vld [vmem:[%s19315_s22 + $0x568] sm:$0xff] }
 0x820   :  { %9300 = vmatpush1.bf16.msra.mxu0 %v9299_v58  ;;  %v9617_v58 = vpack.c.bf16 %v5875_v46, %v5871_v45  ;;  %v5894_v45 = vld [vmem:[%s19315_s22 + $0x500] sm:$0xff] }
 0x821   :  { %9302 = vmatprep.subr.bf16.mxu0 %v9301_v47  ;;  %v5870_v47 = vld [vmem:[%s19315_s22 + $0x440] sm:$0xff] }
 0x822   :  { %v9619_v6 = vpack.c.bf16 %v5874_v52, %v5870_v47  ;;  %v5898_v46 = vld [vmem:[%s19315_s22 + $0x520] sm:$0xff]  ;;  %v4645_v47 = vld [vmem:[%s19312_s19 + $0xe68] sm:$0xff] }
 0x823   :  { %v9631_v52 = vpack.c.bf16 %v5898_v46, %v5894_v45  ;;  %v4693_v45 = vld [vmem:[%s19312_s19 + $0xfe8] sm:$0xff] }
 0x824   :  { %9304 = vmatpush1.bf16.msra.mxu0 %v9303_v63  ;;  %v9325_v63 = vpack.c.bf16 %v4581_v57, %v4573_v56  ;;  %v4620_v57 = vld [vmem:[%s19312_s19 + $0xda0] sm:$0xff] }
 0x825   :  { %9306 = vmatprep.subr.bf16.mxu0 %v9305_v1  ;;  %v4572_v1 = vld [vmem:[%s19312_s19 + $0xc20] sm:$0xff] }
 0x826   :  { %v9327_v17 = vpack.c.bf16 %v4580_v54, %v4572_v1  ;;  %v5911_v1 = vld [vmem:[%s19315_s22 + $0x588] sm:$0xff] }
 0x827   :  { %v5915_v54 = vld [vmem:[%s19315_s22 + $0x5a8] sm:$0xff] }
 0x828   :  { %9308 = vmatpush1.bf16.msra.mxu0 %v9307_v8  ;;  %v9621_v8 = vpack.c.bf16 %v5883_v61, %v5879_v60  ;;  %v5902_v60 = vld [vmem:[%s19315_s22 + $0x540] sm:$0xff] }
 0x829   :  { %9310 = vmatprep.subr.bf16.mxu0 %v9309_v29  ;;  %v5878_v29 = vld [vmem:[%s19315_s22 + $0x480] sm:$0xff] }
 0x82a   :  { %v9623_v7 = vpack.c.bf16 %v5882_v9, %v5878_v29  ;;  %v5906_v61 = vld [vmem:[%s19315_s22 + $0x560] sm:$0xff]  ;;  %v4661_v29 = vld [vmem:[%s19312_s19 + $0xee8] sm:$0xff] }
 0x82b   :  { %v9635_v9 = vpack.c.bf16 %v5906_v61, %v5902_v60  ;;  %v4199_v60 = vld [vmem:[%s19312_s19 + $0x78] sm:$0xff] }
 0x82c   :  { %9312 = vmatpush1.bf16.msra.mxu0 %v9311_v20  ;;  %v9329_v20 = vpack.c.bf16 %v4597_v5, %v4589_v2  ;;  %v4636_v5 = vld [vmem:[%s19312_s19 + $0xe20] sm:$0xff] }
 0x82d   :  { %9314 = vmatprep.subr.bf16.mxu0 %v9313_v34  ;;  %v4588_v34 = vld [vmem:[%s19312_s19 + $0xca0] sm:$0xff] }
 0x82e   :  { %v5245_v62 = vpop.f32.mrb[10].mxu0 }
 0x82f   :  { %v17345_v18 = vadd.f32 %v5681_v41, %v5245_v62  ;;  %v5247_v38 = vpop.f32.mrb[11].mxu0  ;;  %v9625_v41 = vpack.c.bf16 %v5891_v19, %v5887_v15  ;;  %v9333_v62 = vpack.c.bf16 %v4613_v24, %v4605_v3  ;;  %v5910_v15 = vld [vmem:[%s19315_s22 + $0x580] sm:$0xff] }
 0x830   :  { %v17353_v44 = vadd.f32 %v5685_v27, %v5247_v38  ;;  %9316 = vmatpush1.bf16.msra.mxu0 %v9315_v11  ;;  %v5886_v27 = vld [vmem:[%s19315_s22 + $0x4c0] sm:$0xff]  ;;  %v4621_v38 = vld [vmem:[%s19312_s19 + $0xda8] sm:$0xff] }
 0x831   :  { %9318 = vmatprep.subr.bf16.mxu0 %v9317_v28  ;;  %v5726_v42 = vmax.f32 %v17345_v18, 0.0  ;;  %v5890_v11 = vld [vmem:[%s19315_s22 + $0x4e0] sm:$0xff]  ;;  %v9331_v28 = vpack.c.bf16 %v4596_v22, %v4588_v34  ;;  %v9337_v56 = vpack.c.bf16 %v4629_v40, %v4621_v38  ;;  %v5919_v34 = vld [vmem:[%s19315_s22 + $0x5c8] sm:$0xff]  ;;  %v5889_v18 = vld [vmem:[%s19315_s22 + $0x4d8] sm:$0xff] }
 0x832   :  { %v5727_v55 = vmax.f32 %v17353_v44, 0.0  ;;  %v9627_v43 = vpack.c.bf16 %v5890_v11, %v5886_v27  ;;  %v5914_v19 = vld [vmem:[%s19315_s22 + $0x5a0] sm:$0xff]  ;;  %v5923_v22 = vld [vmem:[%s19315_s22 + $0x5e8] sm:$0xff]  ;;  %v5765_v44 = vld [vmem:[%s19315_s22 + $0xf8] sm:$0xff] }
 0x833   :  { %v4652_v24 = vld [vmem:[%s19312_s19 + $0xea0] sm:$0xff]  ;;  %v4677_v27 = vld [vmem:[%s19312_s19 + $0xf68] sm:$0xff]  ;;  %v9639_v11 = vpack.c.bf16 %v5914_v19, %v5910_v15  ;;  %v4215_v15 = vld [vmem:[%s19312_s19 + $0xf8] sm:$0xff] }
 0x834   :  { %9320 = vmatpush1.bf16.msra.mxu0 %v9319_v39  ;;  %6516 = vmatprep.mubr.f32.mxu1 %v5727_v55  ;;  %v9629_v39 = vpack.c.bf16 %v5899_v33, %v5895_v31  ;;  %v5918_v31 = vld [vmem:[%s19315_s22 + $0x5c0] sm:$0xff] }
 0x835   :  { %6517 = vmatmul.mubr.f32.vlgmr.msra.gmra.mrb[16].mxu1 %v5726_v42  ;;  %9322 = vmatprep.subr.bf16.mxu0 %v9321_v49  ;;  %v9335_v49 = vpack.c.bf16 %v4612_v36, %v4604_v35  ;;  %v5922_v33 = vld [vmem:[%s19315_s22 + $0x5e0] sm:$0xff]  ;;  %v5927_v35 = vld [vmem:[%s19315_s22 + $0x608] sm:$0xff] }
 0x836   :  { %9616 = vmatpush1.bf16.msra.mxu1 %v9615_v14  ;;  %v4628_v14 = vld [vmem:[%s19312_s19 + $0xde0] sm:$0xff]  ;;  %v5931_v36 = vld [vmem:[%s19315_s22 + $0x628] sm:$0xff]  ;;  %v9643_v46 = vpack.c.bf16 %v5922_v33, %v5918_v31  ;;  %v4231_v31 = vld [vmem:[%s19312_s19 + $0x178] sm:$0xff] }
 0x837   :  { %9618 = vmatprep.subr.bf16.mxu1 %v9617_v58  ;;  %v4637_v58 = vld [vmem:[%s19312_s19 + $0xe28] sm:$0xff]  ;;  %v4668_v40 = vld [vmem:[%s19312_s19 + $0xf20] sm:$0xff] }
 0x838   :  { %9324 = vmatpush1.bf16.msra.mxu0 %v9323_v59  ;;  %v9633_v59 = vpack.c.bf16 %v5907_v51, %v5903_v50  ;;  %v9341_v2 = vpack.c.bf16 %v4645_v47, %v4637_v58  ;;  %v5926_v50 = vld [vmem:[%s19315_s22 + $0x600] sm:$0xff] }
 0x839   :  { %9326 = vmatprep.subr.bf16.mxu0 %v9325_v63  ;;  %v9339_v63 = vpack.c.bf16 %v4628_v14, %v4620_v57  ;;  %v5930_v51 = vld [vmem:[%s19315_s22 + $0x620] sm:$0xff]  ;;  %v5935_v57 = vld [vmem:[%s19315_s22 + $0x648] sm:$0xff] }
 0x83a   :  { %9620 = vmatpush1.bf16.msra.mxu1 %v9619_v6  ;;  %v4644_v6 = vld [vmem:[%s19312_s19 + $0xe60] sm:$0xff]  ;;  %v5939_v14 = vld [vmem:[%s19315_s22 + $0x668] sm:$0xff]  ;;  %v9647_v61 = vpack.c.bf16 %v5930_v51, %v5926_v50 }
 0x83b   :  { %9622 = vmatprep.subr.bf16.mxu1 %v9621_v8  ;;  %v4653_v8 = vld [vmem:[%s19312_s19 + $0xea8] sm:$0xff]  ;;  %v4684_v47 = vld [vmem:[%s19312_s19 + $0xfa0] sm:$0xff] }
 0x83c   :  { %9328 = vmatpush1.bf16.msra.mxu0 %v9327_v17  ;;  %v9637_v17 = vpack.c.bf16 %v5915_v54, %v5911_v1  ;;  %v9345_v3 = vpack.c.bf16 %v4661_v29, %v4653_v8  ;;  %v5934_v1 = vld [vmem:[%s19315_s22 + $0x640] sm:$0xff]  ;;  %v4190_v29 = vld [vmem:[%s19312_s19 + $0x30] sm:$0xff] }
 0x83d   :  { %9330 = vmatprep.subr.bf16.mxu0 %v9329_v20  ;;  %v9343_v20 = vpack.c.bf16 %v4644_v6, %v4636_v5  ;;  %v5938_v54 = vld [vmem:[%s19315_s22 + $0x660] sm:$0xff]  ;;  %v5943_v5 = vld [vmem:[%s19315_s22 + $0x688] sm:$0xff] }
 0x83e   :  { %9624 = vmatpush1.bf16.msra.mxu1 %v9623_v7  ;;  %v4660_v7 = vld [vmem:[%s19312_s19 + $0xee0] sm:$0xff]  ;;  %v5947_v6 = vld [vmem:[%s19315_s22 + $0x6a8] sm:$0xff]  ;;  %v9651_v19 = vpack.c.bf16 %v5938_v54, %v5934_v1 }
 0x83f   :  { %9626 = vmatprep.subr.bf16.mxu1 %v9625_v41  ;;  %v4669_v41 = vld [vmem:[%s19312_s19 + $0xf28] sm:$0xff] }
 0x840   :  { %9332 = vmatpush1.bf16.msra.mxu0 %v9331_v28  ;;  %v9641_v28 = vpack.c.bf16 %v5923_v22, %v5919_v34  ;;  %v9349_v38 = vpack.c.bf16 %v4677_v27, %v4669_v41  ;;  %v5942_v34 = vld [vmem:[%s19315_s22 + $0x680] sm:$0xff]  ;;  %v4206_v27 = vld [vmem:[%s19312_s19 + $0xb0] sm:$0xff] }
 0x841   :  { %9334 = vmatprep.subr.bf16.mxu0 %v9333_v62  ;;  %v9347_v62 = vpack.c.bf16 %v4660_v7, %v4652_v24  ;;  %v5946_v22 = vld [vmem:[%s19315_s22 + $0x6a0] sm:$0xff]  ;;  %v5951_v24 = vld [vmem:[%s19315_s22 + $0x6c8] sm:$0xff] }
 0x842   :  { %9628 = vmatpush1.bf16.msra.mxu1 %v9627_v43  ;;  %v4676_v43 = vld [vmem:[%s19312_s19 + $0xf60] sm:$0xff]  ;;  %v5955_v7 = vld [vmem:[%s19315_s22 + $0x6e8] sm:$0xff]  ;;  %v9655_v33 = vpack.c.bf16 %v5946_v22, %v5942_v34 }
 0x843   :  { %9630 = vmatprep.subr.bf16.mxu1 %v9629_v39  ;;  %v4685_v39 = vld [vmem:[%s19312_s19 + $0xfa8] sm:$0xff] }
 0x844   :  { %9336 = vmatpush1.bf16.msra.mxu0 %v9335_v49  ;;  %v9645_v49 = vpack.c.bf16 %v5931_v36, %v5927_v35  ;;  %v9353_v58 = vpack.c.bf16 %v4693_v45, %v4685_v39  ;;  %v5950_v35 = vld [vmem:[%s19315_s22 + $0x6c0] sm:$0xff]  ;;  %v4222_v45 = vld [vmem:[%s19312_s19 + $0x130] sm:$0xff] }
 0x845   :  { %9338 = vmatprep.subr.bf16.mxu0 %v9337_v56  ;;  %v9351_v56 = vpack.c.bf16 %v4676_v43, %v4668_v40  ;;  %v5954_v36 = vld [vmem:[%s19315_s22 + $0x6e0] sm:$0xff]  ;;  %v5959_v40 = vld [vmem:[%s19315_s22 + $0x708] sm:$0xff] }
 0x846   :  { %9632 = vmatpush1.bf16.msra.mxu1 %v9631_v52  ;;  %v4692_v52 = vld [vmem:[%s19312_s19 + $0xfe0] sm:$0xff]  ;;  %v5963_v43 = vld [vmem:[%s19315_s22 + $0x728] sm:$0xff]  ;;  %v9659_v50 = vpack.c.bf16 %v5954_v36, %v5950_v35 }
 0x847   :  { %9634 = vmatprep.subr.bf16.mxu1 %v9633_v59  ;;  %v4191_v59 = vld [vmem:[%s19312_s19 + $0x38] sm:$0xff]  ;;  %v9661_v51 = vpack.c.bf16 %v5963_v43, %v5959_v40  ;;  %v5986_v40 = vld [vmem:[%s19315_s22 + $0x7e0] sm:$0xff] }
 0x848   :  { %9340 = vmatpush1.bf16.msra.mxu0 %v9339_v63  ;;  %v9649_v63 = vpack.c.bf16 %v5939_v14, %v5935_v57  ;;  %v9357_v8 = vpack.c.bf16 %v4199_v60, %v4191_v59  ;;  %v5962_v57 = vld [vmem:[%s19315_s22 + $0x720] sm:$0xff]  ;;  %v4238_v59 = vld [vmem:[%s19312_s19 + $0x1b0] sm:$0xff] }
 0x849   :  { %9342 = vmatprep.subr.bf16.mxu0 %v9341_v2  ;;  %v9355_v2 = vpack.c.bf16 %v4692_v52, %v4684_v47  ;;  %v5971_v47 = vld [vmem:[%s19315_s22 + $0x768] sm:$0xff]  ;;  %v4246_v60 = vld [vmem:[%s19312_s19 + $0x1f0] sm:$0xff] }
 0x84a   :  { %9636 = vmatpush1.bf16.msra.mxu1 %v9635_v9  ;;  %v4198_v9 = vld [vmem:[%s19312_s19 + $0x70] sm:$0xff] }
 0x84b   :  { %9638 = vmatprep.subr.bf16.mxu1 %v9637_v17  ;;  %v4207_v17 = vld [vmem:[%s19312_s19 + $0xb8] sm:$0xff] }
 0x84c   :  { %9344 = vmatpush1.bf16.msra.mxu0 %v9343_v20  ;;  %v9653_v20 = vpack.c.bf16 %v5947_v6, %v5943_v5  ;;  %v9361_v41 = vpack.c.bf16 %v4215_v15, %v4207_v17  ;;  %v5970_v5 = vld [vmem:[%s19315_s22 + $0x760] sm:$0xff]  ;;  %v9371_v6 = vpack.c.bf16 %v4246_v60, %v4238_v59  ;;  %v4254_v17 = vld [vmem:[%s19312_s19 + $0x230] sm:$0xff]  ;;  %v4319_v59 = vld [vmem:[%s19312_s19 + $0x438] sm:$0xff] }
 0x84d   :  { %9346 = vmatprep.subr.bf16.mxu0 %v9345_v3  ;;  %v9359_v3 = vpack.c.bf16 %v4198_v9, %v4190_v29  ;;  %v5979_v29 = vld [vmem:[%s19315_s22 + $0x7a8] sm:$0xff]  ;;  %v4262_v15 = vld [vmem:[%s19312_s19 + $0x270] sm:$0xff]  ;;  %v4327_v60 = vld [vmem:[%s19312_s19 + $0x478] sm:$0xff] }
 0x84e   :  { %9640 = vmatpush1.bf16.msra.mxu1 %v9639_v11  ;;  %v4214_v11 = vld [vmem:[%s19312_s19 + $0xf0] sm:$0xff] }
 0x84f   :  { %9642 = vmatprep.subr.bf16.mxu1 %v9641_v28  ;;  %v4223_v28 = vld [vmem:[%s19312_s19 + $0x138] sm:$0xff] }
 0x850   :  { %9348 = vmatpush1.bf16.msra.mxu0 %v9347_v62  ;;  %v9657_v62 = vpack.c.bf16 %v5955_v7, %v5951_v24  ;;  %v9365_v39 = vpack.c.bf16 %v4231_v31, %v4223_v28  ;;  %v5978_v24 = vld [vmem:[%s19315_s22 + $0x7a0] sm:$0xff]  ;;  %v9375_v7 = vpack.c.bf16 %v4262_v15, %v4254_v17  ;;  %v4270_v28 = vld [vmem:[%s19312_s19 + $0x2b0] sm:$0xff]  ;;  %v4351_v17 = vld [vmem:[%s19312_s19 + $0x538] sm:$0xff] }
 0x851   :  { %9350 = vmatprep.subr.bf16.mxu0 %v9349_v38  ;;  %v9363_v38 = vpack.c.bf16 %v4214_v11, %v4206_v27  ;;  %v5987_v27 = vld [vmem:[%s19315_s22 + $0x7e8] sm:$0xff]  ;;  %v4278_v31 = vld [vmem:[%s19312_s19 + $0x2f0] sm:$0xff]  ;;  %v4359_v15 = vld [vmem:[%s19312_s19 + $0x578] sm:$0xff] }
 0x852   :  { %9644 = vmatpush1.bf16.msra.mxu1 %v9643_v46  ;;  %v4230_v46 = vld [vmem:[%s19312_s19 + $0x170] sm:$0xff]  ;;  %v9379_v43 = vpack.c.bf16 %v4278_v31, %v4270_v28  ;;  %v4383_v28 = vld [vmem:[%s19312_s19 + $0x638] sm:$0xff] }
 0x853   :  { %9646 = vmatprep.subr.bf16.mxu1 %v9645_v49  ;;  %v4247_v49 = vld [vmem:[%s19312_s19 + $0x1f8] sm:$0xff]  ;;  %v9367_v14 = vpack.c.bf16 %v4230_v46, %v4222_v45  ;;  %v5995_v45 = vld [vmem:[%s19315_s22 + $0x828] sm:$0xff] }
 0x854   :  { %9352 = vmatpush1.bf16.msra.mxu0 %v9351_v56  ;;  %v5958_v56 = vld [vmem:[%s19315_s22 + $0x700] sm:$0xff]  ;;  %v4391_v31 = vld [vmem:[%s19312_s19 + $0x678] sm:$0xff] }
 0x855   :  { %9354 = vmatprep.subr.bf16.mxu0 %v9353_v58  ;;  %v5967_v58 = vld [vmem:[%s19315_s22 + $0x748] sm:$0xff]  ;;  %v9663_v1 = vpack.c.bf16 %v5962_v57, %v5958_v56 }
 0x856   :  { %9648 = vmatpush1.bf16.msra.mxu1 %v9647_v61  ;;  %v4255_v61 = vld [vmem:[%s19312_s19 + $0x238] sm:$0xff]  ;;  %v9665_v54 = vpack.c.bf16 %v5971_v47, %v5967_v58  ;;  %v4302_v47 = vld [vmem:[%s19312_s19 + $0x3b0] sm:$0xff] }
 0x857   :  { %9650 = vmatprep.subr.bf16.mxu1 %v9649_v63  ;;  %v4263_v63 = vld [vmem:[%s19312_s19 + $0x278] sm:$0xff] }
 0x858   :  { %9356 = vmatpush1.bf16.msra.mxu0 %v9355_v2  ;;  %v5966_v2 = vld [vmem:[%s19315_s22 + $0x740] sm:$0xff]  ;;  %v9373_v9 = vpack.c.bf16 %v4263_v63, %v4255_v61  ;;  %v9389_v63 = vpack.c.bf16 %v4327_v60, %v4319_v59  ;;  %v4430_v59 = vld [vmem:[%s19312_s19 + $0x7b0] sm:$0xff] }
 0x859   :  { %9358 = vmatprep.subr.bf16.mxu0 %v9357_v8  ;;  %v5975_v8 = vld [vmem:[%s19315_s22 + $0x788] sm:$0xff]  ;;  %v9667_v34 = vpack.c.bf16 %v5970_v5, %v5966_v2  ;;  %v4335_v2 = vld [vmem:[%s19312_s19 + $0x4b8] sm:$0xff]  ;;  %v4438_v60 = vld [vmem:[%s19312_s19 + $0x7f0] sm:$0xff] }
 0x85a   :  { %9652 = vmatpush1.bf16.msra.mxu1 %v9651_v19  ;;  %v4271_v19 = vld [vmem:[%s19312_s19 + $0x2b8] sm:$0xff]  ;;  %v9669_v22 = vpack.c.bf16 %v5979_v29, %v5975_v8  ;;  %v4334_v29 = vld [vmem:[%s19312_s19 + $0x4b0] sm:$0xff] }
 0x85b   :  { %5528 = vmatmul.mubr.f32.vlgmr.msra.gmra.mrb[14].mxu0 %v16404_v21  ;;  %9654 = vmatprep.subr.bf16.mxu1 %v9653_v20  ;;  %v4279_v20 = vld [vmem:[%s19312_s19 + $0x2f8] sm:$0xff] }
 0x85c   :  { %9360 = vmatpush1.bf16.msra.mxu0 %v9359_v3  ;;  %5598 = vmatprep.mubr.f32.mxu0 %v16078_v32  ;;  %v4239_v32 = vld [vmem:[%s19312_s19 + $0x1b8] sm:$0xff]  ;;  %v5974_v3 = vld [vmem:[%s19315_s22 + $0x780] sm:$0xff]  ;;  %v9377_v11 = vpack.c.bf16 %v4279_v20, %v4271_v19  ;;  %v9397_v20 = vpack.c.bf16 %v4359_v15, %v4351_v17  ;;  %v4462_v17 = vld [vmem:[%s19312_s19 + $0x8b0] sm:$0xff] }
 0x85d   :  { %9362 = vmatprep.subr.bf16.mxu0 %v9361_v41  ;;  %v9369_v52 = vpack.c.bf16 %v4247_v49, %v4239_v32  ;;  %v5983_v41 = vld [vmem:[%s19315_s22 + $0x7c8] sm:$0xff]  ;;  %v9671_v35 = vpack.c.bf16 %v5978_v24, %v5974_v3  ;;  %v4286_v32 = vld [vmem:[%s19312_s19 + $0x330] sm:$0xff]  ;;  %v4343_v5 = vld [vmem:[%s19312_s19 + $0x4f8] sm:$0xff] }
 0x85e   :  { %9656 = vmatpush1.bf16.msra.mxu1 %v9655_v33  ;;  %v4287_v33 = vld [vmem:[%s19312_s19 + $0x338] sm:$0xff]  ;;  %v9673_v36 = vpack.c.bf16 %v5987_v27, %v5983_v41  ;;  %v4294_v49 = vld [vmem:[%s19312_s19 + $0x370] sm:$0xff]  ;;  %v9393_v8 = vpack.c.bf16 %v4343_v5, %v4335_v2 }
 0x85f   :  { %9658 = vmatprep.subr.bf16.mxu1 %v9657_v62  ;;  %v4295_v62 = vld [vmem:[%s19312_s19 + $0x378] sm:$0xff]  ;;  %v4366_v27 = vld [vmem:[%s19312_s19 + $0x5b0] sm:$0xff] }
 0x860   :  { %9364 = vmatpush1.bf16.msra.mxu0 %v9363_v38  ;;  %v5982_v38 = vld [vmem:[%s19315_s22 + $0x7c0] sm:$0xff]  ;;  %v9381_v46 = vpack.c.bf16 %v4295_v62, %v4287_v33  ;;  %v4367_v3 = vld [vmem:[%s19312_s19 + $0x5b8] sm:$0xff]  ;;  %v9405_v62 = vpack.c.bf16 %v4391_v31, %v4383_v28  ;;  %v4446_v2 = vld [vmem:[%s19312_s19 + $0x830] sm:$0xff] }
 0x861   :  { %9366 = vmatprep.subr.bf16.mxu0 %v9365_v39  ;;  %v5991_v39 = vld [vmem:[%s19315_s22 + $0x808] sm:$0xff]  ;;  %v9675_v56 = vpack.c.bf16 %v5986_v40, %v5982_v38  ;;  %v4375_v24 = vld [vmem:[%s19312_s19 + $0x5f8] sm:$0xff]  ;;  %v4454_v5 = vld [vmem:[%s19312_s19 + $0x870] sm:$0xff] }
 0x862   :  { %9660 = vmatpush1.bf16.msra.mxu1 %v9659_v50  ;;  %v4303_v50 = vld [vmem:[%s19312_s19 + $0x3b8] sm:$0xff]  ;;  %v9677_v57 = vpack.c.bf16 %v5995_v45, %v5991_v39  ;;  %v9401_v41 = vpack.c.bf16 %v4375_v24, %v4367_v3  ;;  %v4398_v45 = vld [vmem:[%s19312_s19 + $0x6b0] sm:$0xff] }
 0x863   :  { %9662 = vmatprep.subr.bf16.mxu1 %v9661_v51  ;;  %v4311_v51 = vld [vmem:[%s19312_s19 + $0x3f8] sm:$0xff]  ;;  %v4470_v15 = vld [vmem:[%s19312_s19 + $0x8f0] sm:$0xff] }
 0x864   :  { %9368 = vmatpush1.bf16.msra.mxu0 %v9367_v14  ;;  %v9383_v14 = vpack.c.bf16 %v4294_v49, %v4286_v32  ;;  %v9385_v58 = vpack.c.bf16 %v4311_v51, %v4303_v50  ;;  %v4399_v38 = vld [vmem:[%s19312_s19 + $0x6b8] sm:$0xff]  ;;  %v4478_v3 = vld [vmem:[%s19312_s19 + $0x930] sm:$0xff] }
 0x865   :  { %9370 = vmatprep.subr.bf16.mxu0 %v9369_v52  ;;  %v4310_v52 = vld [vmem:[%s19312_s19 + $0x3f0] sm:$0xff]  ;;  %v4407_v40 = vld [vmem:[%s19312_s19 + $0x6f8] sm:$0xff] }
 0x866   :  { %9664 = vmatpush1.bf16.msra.mxu1 %v9663_v1  ;;  %v9387_v61 = vpack.c.bf16 %v4310_v52, %v4302_v47  ;;  %v4318_v1 = vld [vmem:[%s19312_s19 + $0x430] sm:$0xff]  ;;  %v9409_v39 = vpack.c.bf16 %v4407_v40, %v4399_v38  ;;  %v4415_v32 = vld [vmem:[%s19312_s19 + $0x738] sm:$0xff] }
 0x867   :  { %9666 = vmatprep.subr.bf16.mxu1 %v9665_v54  ;;  %v4326_v54 = vld [vmem:[%s19312_s19 + $0x470] sm:$0xff]  ;;  %v4423_v49 = vld [vmem:[%s19312_s19 + $0x778] sm:$0xff] }
 0x868   :  { %9372 = vmatpush1.bf16.msra.mxu0 %v9371_v6  ;;  %v9391_v6 = vpack.c.bf16 %v4326_v54, %v4318_v1  ;;  %v9413_v51 = vpack.c.bf16 %v4423_v49, %v4415_v32  ;;  %v9419_v1 = vpack.c.bf16 %v4438_v60, %v4430_v59  ;;  %v4486_v24 = vld [vmem:[%s19312_s19 + $0x970] sm:$0xff]  ;;  %v4511_v28 = vld [vmem:[%s19312_s19 + $0xa38] sm:$0xff] }
 0x869   :  { %9374 = vmatprep.subr.bf16.mxu0 %v9373_v9  ;;  %v4342_v9 = vld [vmem:[%s19312_s19 + $0x4f0] sm:$0xff]  ;;  %v4519_v31 = vld [vmem:[%s19312_s19 + $0xa78] sm:$0xff] }
 0x86a   :  { %9668 = vmatpush1.bf16.msra.mxu1 %v9667_v34  ;;  %v9395_v19 = vpack.c.bf16 %v4342_v9, %v4334_v29  ;;  %v4350_v34 = vld [vmem:[%s19312_s19 + $0x530] sm:$0xff]  ;;  %v9423_v29 = vpack.c.bf16 %v4454_v5, %v4446_v2  ;;  %v4527_v38 = vld [vmem:[%s19312_s19 + $0xab8] sm:$0xff]  ;;  %v5999_v2 = vld [vmem:[%s19315_s22 + $0x848] sm:$0xff] }
 0x86b   :  { %9670 = vmatprep.subr.bf16.mxu1 %v9669_v22  ;;  %v4358_v22 = vld [vmem:[%s19312_s19 + $0x570] sm:$0xff]  ;;  %v4535_v40 = vld [vmem:[%s19312_s19 + $0xaf8] sm:$0xff]  ;;  %v6003_v5 = vld [vmem:[%s19315_s22 + $0x868] sm:$0xff] }
 0x86c   :  { %9376 = vmatpush1.bf16.msra.mxu0 %v9375_v7  ;;  %v9399_v7 = vpack.c.bf16 %v4358_v22, %v4350_v34  ;;  %v9427_v34 = vpack.c.bf16 %v4470_v15, %v4462_v17  ;;  %v4543_v32 = vld [vmem:[%s19312_s19 + $0xb38] sm:$0xff] }
 0x86d   :  { %9378 = vmatprep.subr.bf16.mxu0 %v9377_v11  ;;  %v4374_v11 = vld [vmem:[%s19312_s19 + $0x5f0] sm:$0xff]  ;;  %v4551_v49 = vld [vmem:[%s19312_s19 + $0xb78] sm:$0xff] }
 0x86e   :  { %9672 = vmatpush1.bf16.msra.mxu1 %v9671_v35  ;;  %v9403_v33 = vpack.c.bf16 %v4374_v11, %v4366_v27  ;;  %v4382_v35 = vld [vmem:[%s19312_s19 + $0x630] sm:$0xff]  ;;  %v4575_v17 = vld [vmem:[%s19312_s19 + $0xc38] sm:$0xff] }
 0x86f   :  { %9674 = vmatprep.subr.bf16.mxu1 %v9673_v36  ;;  %v4390_v36 = vld [vmem:[%s19312_s19 + $0x670] sm:$0xff]  ;;  %v4583_v15 = vld [vmem:[%s19312_s19 + $0xc78] sm:$0xff] }
 0x870   :  { %9380 = vmatpush1.bf16.msra.mxu0 %v9379_v43  ;;  %v9407_v43 = vpack.c.bf16 %v4390_v36, %v4382_v35  ;;  %v4494_v27 = vld [vmem:[%s19312_s19 + $0x9b0] sm:$0xff] }
 0x871   :  { %9382 = vmatprep.subr.bf16.mxu0 %v9381_v46  ;;  %v4406_v46 = vld [vmem:[%s19312_s19 + $0x6f0] sm:$0xff] }
 0x872   :  { %9676 = vmatpush1.bf16.msra.mxu1 %v9675_v56  ;;  %v9411_v50 = vpack.c.bf16 %v4406_v46, %v4398_v45  ;;  %v4414_v56 = vld [vmem:[%s19312_s19 + $0x730] sm:$0xff] }
 0x873   :  { %9678 = vmatprep.subr.bf16.mxu1 %v9677_v57  ;;  %v4422_v57 = vld [vmem:[%s19312_s19 + $0x770] sm:$0xff] }
 0x874   :  { %9384 = vmatpush1.bf16.msra.mxu0 %v9383_v14  ;;  %v4431_v14 = vld [vmem:[%s19312_s19 + $0x7b8] sm:$0xff]  ;;  %v9415_v47 = vpack.c.bf16 %v4422_v57, %v4414_v56  ;;  %v4502_v11 = vld [vmem:[%s19312_s19 + $0x9f0] sm:$0xff]  ;;  %v9445_v57 = vpack.c.bf16 %v4551_v49, %v4543_v32 }
 0x875   :  { %9386 = vmatprep.subr.bf16.mxu0 %v9385_v58  ;;  %v4439_v58 = vld [vmem:[%s19312_s19 + $0x7f8] sm:$0xff]  ;;  %v4510_v35 = vld [vmem:[%s19312_s19 + $0xa30] sm:$0xff] }
 0x876   :  { %v9417_v52 = vpack.c.bf16 %v4439_v58, %v4431_v14  ;;  %v4518_v36 = vld [vmem:[%s19312_s19 + $0xa70] sm:$0xff]  ;;  %v4615_v32 = vld [vmem:[%s19312_s19 + $0xd78] sm:$0xff] }
 0x877   :  { %v4526_v45 = vld [vmem:[%s19312_s19 + $0xab0] sm:$0xff] }
 0x878   :  { %9388 = vmatpush1.bf16.msra.mxu0 %v9387_v61  ;;  %v4447_v61 = vld [vmem:[%s19312_s19 + $0x838] sm:$0xff]  ;;  %v4534_v46 = vld [vmem:[%s19312_s19 + $0xaf0] sm:$0xff] }
 0x879   :  { %9390 = vmatprep.subr.bf16.mxu0 %v9389_v63  ;;  %v4455_v63 = vld [vmem:[%s19312_s19 + $0x878] sm:$0xff]  ;;  %v9443_v56 = vpack.c.bf16 %v4534_v46, %v4526_v45  ;;  %v4542_v14 = vld [vmem:[%s19312_s19 + $0xb30] sm:$0xff] }
 0x87a   :  { %v9421_v54 = vpack.c.bf16 %v4455_v63, %v4447_v61  ;;  %v4550_v58 = vld [vmem:[%s19312_s19 + $0xb70] sm:$0xff]  ;;  %v5990_v61 = vld [vmem:[%s19315_s22 + $0x800] sm:$0xff]  ;;  %v4607_v46 = vld [vmem:[%s19312_s19 + $0xd38] sm:$0xff] }
 0x87b   :  { %v5994_v63 = vld [vmem:[%s19315_s22 + $0x820] sm:$0xff]  ;;  %v4598_v45 = vld [vmem:[%s19312_s19 + $0xcf0] sm:$0xff] }
 0x87c   :  { %9392 = vmatpush1.bf16.msra.mxu0 %v9391_v6  ;;  %v4463_v6 = vld [vmem:[%s19312_s19 + $0x8b8] sm:$0xff] }
 0x87d   :  { %9394 = vmatprep.subr.bf16.mxu0 %v9393_v8  ;;  %v4471_v8 = vld [vmem:[%s19312_s19 + $0x8f8] sm:$0xff] }
 0x87e   :  { %v9425_v9 = vpack.c.bf16 %v4471_v8, %v4463_v6  ;;  %v4558_v8 = vld [vmem:[%s19312_s19 + $0xbb0] sm:$0xff] }
 0x880   :  { %9396 = vmatpush1.bf16.msra.mxu0 %v9395_v19  ;;  %v4479_v19 = vld [vmem:[%s19312_s19 + $0x938] sm:$0xff] }
 0x881   :  { %9398 = vmatprep.subr.bf16.mxu0 %v9397_v20  ;;  %v4487_v20 = vld [vmem:[%s19312_s19 + $0x978] sm:$0xff] }
 0x882   :  { %v9429_v22 = vpack.c.bf16 %v4487_v20, %v4479_v19  ;;  %v9679_v19 = vpack.c.bf16 %v5994_v63, %v5990_v61  ;;  %v4631_v61 = vld [vmem:[%s19312_s19 + $0xdf8] sm:$0xff] }
 0x884   :  { %9400 = vmatpush1.bf16.msra.mxu0 %v9399_v7  ;;  %v4495_v7 = vld [vmem:[%s19312_s19 + $0x9b8] sm:$0xff] }
 0x885   :  { %9402 = vmatprep.subr.bf16.mxu0 %v9401_v41 }
 0x888   :  { %9404 = vmatpush1.bf16.msra.mxu0 %v9403_v33  ;;  %v9435_v33 = vpack.c.bf16 %v4502_v11, %v4494_v27  ;;  %v4582_v27 = vld [vmem:[%s19312_s19 + $0xc70] sm:$0xff]  ;;  %v4591_v11 = vld [vmem:[%s19312_s19 + $0xcb8] sm:$0xff] }
 0x889   :  { %9406 = vmatprep.subr.bf16.mxu0 %v9405_v62  ;;  %v9437_v62 = vpack.c.bf16 %v4519_v31, %v4511_v28  ;;  %v4599_v28 = vld [vmem:[%s19312_s19 + $0xcf8] sm:$0xff] }
 0x88c   :  { %9408 = vmatpush1.bf16.msra.mxu0 %v9407_v43  ;;  %v9439_v43 = vpack.c.bf16 %v4518_v36, %v4510_v35  ;;  %v6010_v35 = vld [vmem:[%s19315_s22 + $0x8a0] sm:$0xff] }
 0x88d   :  { %9410 = vmatprep.subr.bf16.mxu0 %v9409_v39  ;;  %v9441_v39 = vpack.c.bf16 %v4535_v40, %v4527_v38  ;;  %v6015_v38 = vld [vmem:[%s19315_s22 + $0x8c8] sm:$0xff] }
 0x88e   :  { %v6019_v40 = vld [vmem:[%s19315_s22 + $0x8e8] sm:$0xff] }
 0x890   :  { %9412 = vmatpush1.bf16.msra.mxu0 %v9411_v50  ;;  %v5689_v50 = vrot.slane %v17315_v13, %v13265_v53 }
 0x891   :  { %9414 = vmatprep.subr.bf16.mxu0 %v9413_v51  ;;  %v5693_v51 = vrot.slane %v17315_v13, %v12890_v26  ;;  %v4567_v13 = vld [vmem:[%s19312_s19 + $0xbf8] sm:$0xff] }
 0x894   :  { %9416 = vmatpush1.bf16.msra.mxu0 %v9415_v47 }
 0x895   :  { %9418 = vmatprep.subr.bf16.mxu0 %v9417_v52  ;;  %v4559_v52 = vld [vmem:[%s19312_s19 + $0xbb8] sm:$0xff] }
 0x896   :  { %v9449_v6 = vpack.c.bf16 %v4567_v13, %v4559_v52  ;;  %v4606_v52 = vld [vmem:[%s19312_s19 + $0xd30] sm:$0xff] }
 0x897   :  { %v4614_v13 = vld [vmem:[%s19312_s19 + $0xd70] sm:$0xff] }
 0x898   :  { %9420 = vmatpush1.bf16.msra.mxu0 %v9419_v1 }
 0x899   :  { %9422 = vmatprep.subr.bf16.mxu0 %v9421_v54  ;;  %v9447_v54 = vpack.c.bf16 %v4550_v58, %v4542_v14  ;;  %v6023_v14 = vld [vmem:[%s19315_s22 + $0x908] sm:$0xff] }
 0x89a   :  { %v6027_v58 = vld [vmem:[%s19315_s22 + $0x928] sm:$0xff] }
 0x89b   :  { %5599 = vmatmul.mubr.f32.vlgmr.msra.gmra.mrb[16].mxu0 %v16080_v0  ;;  %v4503_v0 = vld [vmem:[%s19312_s19 + $0x9f8] sm:$0xff] }
 0x89c   :  { %9424 = vmatpush1.bf16.msra.mxu0 %v9423_v29  ;;  %5669 = vmatprep.mubr.f32.mxu0 %v16402_v12  ;;  %v9431_v12 = vpack.c.bf16 %v4486_v24, %v4478_v3  ;;  %v9433_v41 = vpack.c.bf16 %v4503_v0, %v4495_v7  ;;  %v4566_v29 = vld [vmem:[%s19312_s19 + $0xbf0] sm:$0xff]  ;;  %v6002_v3 = vld [vmem:[%s19315_s22 + $0x860] sm:$0xff]  ;;  %v6007_v7 = vld [vmem:[%s19315_s22 + $0x888] sm:$0xff] }
 0x89d   :  { %9426 = vmatprep.subr.bf16.mxu0 %v9425_v9  ;;  %v9451_v24 = vpack.c.bf16 %v4566_v29, %v4558_v8  ;;  %v6011_v0 = vld [vmem:[%s19315_s22 + $0x8a8] sm:$0xff] }
 0x89e   :  { %v6031_v8 = vld [vmem:[%s19315_s22 + $0x948] sm:$0xff] }
 0x89f   :  { %v6035_v29 = vld [vmem:[%s19315_s22 + $0x968] sm:$0xff] }
 0x8a0   :  { %9428 = vmatpush1.bf16.msra.mxu0 %v9427_v34  ;;  %v9681_v34 = vpack.c.bf16 %v6003_v5, %v5999_v2  ;;  %v6022_v2 = vld [vmem:[%s19315_s22 + $0x900] sm:$0xff] }
 0x8a1   :  { %9430 = vmatprep.subr.bf16.mxu0 %v9429_v22  ;;  %v5998_v22 = vld [vmem:[%s19315_s22 + $0x840] sm:$0xff] }
 0x8a2   :  { %v9683_v31 = vpack.c.bf16 %v6002_v3, %v5998_v22  ;;  %v6026_v5 = vld [vmem:[%s19315_s22 + $0x920] sm:$0xff]  ;;  %v4647_v22 = vld [vmem:[%s19312_s19 + $0xe78] sm:$0xff] }
 0x8a3   :  { %v9695_v3 = vpack.c.bf16 %v6026_v5, %v6022_v2  ;;  %v4695_v2 = vld [vmem:[%s19312_s19 + $0xff8] sm:$0xff] }
 0x8a4   :  { %9432 = vmatpush1.bf16.msra.mxu0 %v9431_v12  ;;  %v9453_v12 = vpack.c.bf16 %v4583_v15, %v4575_v17  ;;  %v4622_v15 = vld [vmem:[%s19312_s19 + $0xdb0] sm:$0xff] }
 0x8a5   :  { %9434 = vmatprep.subr.bf16.mxu0 %v9433_v41  ;;  %v4574_v41 = vld [vmem:[%s19312_s19 + $0xc30] sm:$0xff] }
 0x8a6   :  { %v9455_v36 = vpack.c.bf16 %v4582_v27, %v4574_v41  ;;  %v6039_v41 = vld [vmem:[%s19315_s22 + $0x988] sm:$0xff] }
 0x8a7   :  { %v6043_v27 = vld [vmem:[%s19315_s22 + $0x9a8] sm:$0xff] }
 0x8a8   :  { %9436 = vmatpush1.bf16.msra.mxu0 %v9435_v33  ;;  %v9685_v33 = vpack.c.bf16 %v6011_v0, %v6007_v7  ;;  %v6030_v7 = vld [vmem:[%s19315_s22 + $0x940] sm:$0xff] }
 0x8a9   :  { %9438 = vmatprep.subr.bf16.mxu0 %v9437_v62  ;;  %v6006_v62 = vld [vmem:[%s19315_s22 + $0x880] sm:$0xff] }
 0x8aa   :  { %v9687_v49 = vpack.c.bf16 %v6010_v35, %v6006_v62  ;;  %v6034_v0 = vld [vmem:[%s19315_s22 + $0x960] sm:$0xff]  ;;  %v4663_v62 = vld [vmem:[%s19312_s19 + $0xef8] sm:$0xff] }
 0x8ab   :  { %v9699_v35 = vpack.c.bf16 %v6034_v0, %v6030_v7  ;;  %v6062_v0 = vld [vmem:[%s19315_s22 + $0xa40] sm:$0xff] }
 0x8ac   :  { %9440 = vmatpush1.bf16.msra.mxu0 %v9439_v43  ;;  %v9457_v43 = vpack.c.bf16 %v4599_v28, %v4591_v11  ;;  %v4638_v28 = vld [vmem:[%s19312_s19 + $0xe30] sm:$0xff] }
 0x8ad   :  { %9442 = vmatprep.subr.bf16.mxu0 %v9441_v39  ;;  %v4590_v39 = vld [vmem:[%s19312_s19 + $0xcb0] sm:$0xff] }
 0x8ae   :  { %v5387_v47 = vpop.f32.mrb[12].mxu0 }
 0x8af   :  { %v17939_v59 = vadd.f32 %v5689_v50, %v5387_v47  ;;  %v5389_v60 = vpop.f32.mrb[13].mxu0  ;;  %v9689_v50 = vpack.c.bf16 %v6019_v40, %v6015_v38  ;;  %v9461_v47 = vpack.c.bf16 %v4615_v32, %v4607_v46  ;;  %v6038_v38 = vld [vmem:[%s19315_s22 + $0x980] sm:$0xff]  ;;  %v4654_v32 = vld [vmem:[%s19312_s19 + $0xeb0] sm:$0xff] }
 0x8b0   :  { %v17947_v1 = vadd.f32 %v5693_v51, %v5389_v60  ;;  %9444 = vmatpush1.bf16.msra.mxu0 %v9443_v56  ;;  %v6014_v51 = vld [vmem:[%s19315_s22 + $0x8c0] sm:$0xff]  ;;  %v4623_v60 = vld [vmem:[%s19312_s19 + $0xdb8] sm:$0xff] }
 0x8b1   :  { %9446 = vmatprep.subr.bf16.mxu0 %v9445_v57  ;;  %v5728_v20 = vmax.f32 %v17939_v59, 0.0  ;;  %v6018_v56 = vld [vmem:[%s19315_s22 + $0x8e0] sm:$0xff]  ;;  %v9459_v57 = vpack.c.bf16 %v4598_v45, %v4590_v39  ;;  %v9465_v17 = vpack.c.bf16 %v4631_v61, %v4623_v60  ;;  %v6047_v39 = vld [vmem:[%s19315_s22 + $0x9c8] sm:$0xff]  ;;  %v4670_v61 = vld [vmem:[%s19312_s19 + $0xf30] sm:$0xff] }
 0x8b2   :  { %v5729_v9 = vmax.f32 %v17947_v1, 0.0  ;;  %v9691_v63 = vpack.c.bf16 %v6018_v56, %v6014_v51  ;;  %v6042_v40 = vld [vmem:[%s19315_s22 + $0x9a0] sm:$0xff]  ;;  %v6051_v45 = vld [vmem:[%s19315_s22 + $0x9e8] sm:$0xff]  ;;  %v4679_v51 = vld [vmem:[%s19312_s19 + $0xf78] sm:$0xff] }
 0x8b3   :  { %v9703_v56 = vpack.c.bf16 %v6042_v40, %v6038_v38  ;;  %v6017_v59 = vld [vmem:[%s19315_s22 + $0x8d8] sm:$0xff] }
 0x8b4   :  { %9448 = vmatpush1.bf16.msra.mxu0 %v9447_v54  ;;  %6587 = vmatprep.mubr.f32.mxu1 %v5729_v9  ;;  %v9693_v54 = vpack.c.bf16 %v6027_v58, %v6023_v14  ;;  %v6046_v14 = vld [vmem:[%s19315_s22 + $0x9c0] sm:$0xff] }
 0x8b5   :  { %6588 = vmatmul.mubr.f32.vlgmr.msra.gmra.mrb[16].mxu1 %v5728_v20  ;;  %9450 = vmatprep.subr.bf16.mxu0 %v9449_v6  ;;  %v9463_v6 = vpack.c.bf16 %v4614_v13, %v4606_v52  ;;  %v6050_v58 = vld [vmem:[%s19315_s22 + $0x9e0] sm:$0xff]  ;;  %v6055_v52 = vld [vmem:[%s19315_s22 + $0xa08] sm:$0xff] }
 0x8b6   :  { %9680 = vmatpush1.bf16.msra.mxu1 %v9679_v19  ;;  %v4630_v19 = vld [vmem:[%s19312_s19 + $0xdf0] sm:$0xff]  ;;  %v6059_v13 = vld [vmem:[%s19315_s22 + $0xa28] sm:$0xff]  ;;  %v9707_v5 = vpack.c.bf16 %v6050_v58, %v6046_v14  ;;  %v6094_v58 = vld [vmem:[%s19315_s22 + $0xb40] sm:$0xff] }
 0x8b7   :  { %9682 = vmatprep.subr.bf16.mxu1 %v9681_v34  ;;  %v4639_v34 = vld [vmem:[%s19312_s19 + $0xe38] sm:$0xff] }
 0x8b8   :  { %9452 = vmatpush1.bf16.msra.mxu0 %v9451_v24  ;;  %v9697_v24 = vpack.c.bf16 %v6035_v29, %v6031_v8  ;;  %v9469_v11 = vpack.c.bf16 %v4647_v22, %v4639_v34  ;;  %v6054_v8 = vld [vmem:[%s19315_s22 + $0xa00] sm:$0xff]  ;;  %v4686_v22 = vld [vmem:[%s19312_s19 + $0xfb0] sm:$0xff] }
 0x8b9   :  { %9454 = vmatprep.subr.bf16.mxu0 %v9453_v12  ;;  %v9467_v12 = vpack.c.bf16 %v4630_v19, %v4622_v15  ;;  %v6058_v29 = vld [vmem:[%s19315_s22 + $0xa20] sm:$0xff]  ;;  %v6063_v15 = vld [vmem:[%s19315_s22 + $0xa48] sm:$0xff] }
 0x8ba   :  { %9684 = vmatpush1.bf16.msra.mxu1 %v9683_v31  ;;  %v4646_v31 = vld [vmem:[%s19312_s19 + $0xe70] sm:$0xff]  ;;  %v6067_v19 = vld [vmem:[%s19315_s22 + $0xa68] sm:$0xff] }
 0x8bb   :  { %9686 = vmatprep.subr.bf16.mxu1 %v9685_v33  ;;  %v4655_v33 = vld [vmem:[%s19312_s19 + $0xeb8] sm:$0xff]  ;;  %v9713_v7 = vpack.c.bf16 %v6067_v19, %v6063_v15  ;;  %v6119_v15 = vld [vmem:[%s19315_s22 + $0xc08] sm:$0xff] }
 0x8bc   :  { %9456 = vmatpush1.bf16.msra.mxu0 %v9455_v36  ;;  %v9701_v36 = vpack.c.bf16 %v6043_v27, %v6039_v41  ;;  %v9473_v46 = vpack.c.bf16 %v4663_v62, %v4655_v33  ;;  %v6071_v27 = vld [vmem:[%s19315_s22 + $0xa88] sm:$0xff]  ;;  %v6070_v33 = vld [vmem:[%s19315_s22 + $0xa80] sm:$0xff] }
 0x8bd   :  { %9458 = vmatprep.subr.bf16.mxu0 %v9457_v43  ;;  %v9471_v43 = vpack.c.bf16 %v4646_v31, %v4638_v28  ;;  %v6074_v62 = vld [vmem:[%s19315_s22 + $0xaa0] sm:$0xff]  ;;  %v6123_v19 = vld [vmem:[%s19315_s22 + $0xc28] sm:$0xff] }
 0x8be   :  { %9688 = vmatpush1.bf16.msra.mxu1 %v9687_v49  ;;  %v4662_v49 = vld [vmem:[%s19312_s19 + $0xef0] sm:$0xff]  ;;  %v9719_v38 = vpack.c.bf16 %v6074_v62, %v6070_v33 }
 0x8bf   :  { %9690 = vmatprep.subr.bf16.mxu1 %v9689_v50  ;;  %v4671_v50 = vld [vmem:[%s19312_s19 + $0xf38] sm:$0xff] }
 0x8c0   :  { %9460 = vmatpush1.bf16.msra.mxu0 %v9459_v57  ;;  %v9705_v57 = vpack.c.bf16 %v6051_v45, %v6047_v39  ;;  %v9477_v60 = vpack.c.bf16 %v4679_v51, %v4671_v50  ;;  %v6082_v39 = vld [vmem:[%s19315_s22 + $0xae0] sm:$0xff]  ;;  %v6087_v45 = vld [vmem:[%s19315_s22 + $0xb08] sm:$0xff] }
 0x8c1   :  { %9462 = vmatprep.subr.bf16.mxu0 %v9461_v47  ;;  %v9475_v47 = vpack.c.bf16 %v4662_v49, %v4654_v32  ;;  %v6086_v49 = vld [vmem:[%s19315_s22 + $0xb00] sm:$0xff]  ;;  %v6095_v51 = vld [vmem:[%s19315_s22 + $0xb48] sm:$0xff] }
 0x8c2   :  { %9692 = vmatpush1.bf16.msra.mxu1 %v9691_v63  ;;  %v4678_v63 = vld [vmem:[%s19312_s19 + $0xf70] sm:$0xff]  ;;  %v6090_v50 = vld [vmem:[%s19315_s22 + $0xb20] sm:$0xff] }
 0x8c3   :  { %9694 = vmatprep.subr.bf16.mxu1 %v9693_v54  ;;  %v4687_v54 = vld [vmem:[%s19312_s19 + $0xfb8] sm:$0xff] }
 0x8c4   :  { %9464 = vmatpush1.bf16.msra.mxu0 %v9463_v6  ;;  %v9709_v6 = vpack.c.bf16 %v6059_v13, %v6055_v52  ;;  %v9481_v34 = vpack.c.bf16 %v4695_v2, %v4687_v54  ;;  %v6103_v52 = vld [vmem:[%s19315_s22 + $0xb88] sm:$0xff]  ;;  %v6106_v54 = vld [vmem:[%s19315_s22 + $0xba0] sm:$0xff] }
 0x8c5   :  { %9466 = vmatprep.subr.bf16.mxu0 %v9465_v17  ;;  %v9479_v17 = vpack.c.bf16 %v4678_v63, %v4670_v61  ;;  %v6107_v13 = vld [vmem:[%s19315_s22 + $0xba8] sm:$0xff]  ;;  %v6102_v63 = vld [vmem:[%s19315_s22 + $0xb80] sm:$0xff] }
 0x8c6   :  { %9696 = vmatpush1.bf16.msra.mxu1 %v9695_v3  ;;  %v4694_v3 = vld [vmem:[%s19312_s19 + $0xff0] sm:$0xff]  ;;  %v9733_v61 = vpack.c.bf16 %v6107_v13, %v6103_v52  ;;  %v6111_v2 = vld [vmem:[%s19315_s22 + $0xbc8] sm:$0xff]  ;;  %v6150_v13 = vld [vmem:[%s19315_s22 + $0xd00] sm:$0xff] }
 0x8c7   :  { %9698 = vmatprep.subr.bf16.mxu1 %v9697_v24  ;;  %v9711_v24 = vpack.c.bf16 %v6058_v29, %v6054_v8  ;;  %v9483_v41 = vpack.c.bf16 %v4694_v3, %v4686_v22  ;;  %v6110_v29 = vld [vmem:[%s19315_s22 + $0xbc0] sm:$0xff]  ;;  %v9741_v22 = vpack.c.bf16 %v6123_v19, %v6119_v15 }
 0x8c8   :  { %9468 = vmatpush1.bf16.msra.mxu0 %v9467_v12  ;;  %v6066_v12 = vld [vmem:[%s19315_s22 + $0xa60] sm:$0xff] }
 0x8c9   :  { %9470 = vmatprep.subr.bf16.mxu0 %v9469_v11  ;;  %v6075_v11 = vld [vmem:[%s19315_s22 + $0xaa8] sm:$0xff]  ;;  %v9715_v28 = vpack.c.bf16 %v6066_v12, %v6062_v0  ;;  %v18247_v3 = vld [vmem:[%s19314_s21] sm:$0xff] }
 0x8ca   :  { %9700 = vmatpush1.bf16.msra.mxu1 %v9699_v35  ;;  %v9717_v31 = vpack.c.bf16 %v6075_v11, %v6071_v27  ;;  %v6079_v35 = vld [vmem:[%s19315_s22 + $0xac8] sm:$0xff]  ;;  %v6118_v27 = vld [vmem:[%s19315_s22 + $0xc00] sm:$0xff] }
 0x8cb   :  { %9702 = vmatprep.subr.bf16.mxu1 %v9701_v36  ;;  %v6083_v36 = vld [vmem:[%s19315_s22 + $0xae8] sm:$0xff]  ;;  %v6122_v11 = vld [vmem:[%s19315_s22 + $0xc20] sm:$0xff] }
 0x8cc   :  { %9472 = vmatpush1.bf16.msra.mxu0 %v9471_v43  ;;  %v9721_v40 = vpack.c.bf16 %v6083_v36, %v6079_v35  ;;  %v6078_v43 = vld [vmem:[%s19315_s22 + $0xac0] sm:$0xff]  ;;  %v9743_v33 = vpack.c.bf16 %v6122_v11, %v6118_v27  ;;  %v6183_v11 = vld [vmem:[%s19315_s22 + $0xe08] sm:$0xff] }
 0x8cd   :  { %9474 = vmatprep.subr.bf16.mxu0 %v9473_v46  ;;  %v6091_v46 = vld [vmem:[%s19315_s22 + $0xb28] sm:$0xff]  ;;  %v6126_v36 = vld [vmem:[%s19315_s22 + $0xc40] sm:$0xff] }
 0x8ce   :  { %9704 = vmatpush1.bf16.msra.mxu1 %v9703_v56  ;;  %v9725_v32 = vpack.c.bf16 %v6091_v46, %v6087_v45  ;;  %v6099_v56 = vld [vmem:[%s19315_s22 + $0xb68] sm:$0xff]  ;;  %v6134_v46 = vld [vmem:[%s19315_s22 + $0xc80] sm:$0xff] }
 0x8cf   :  { %9706 = vmatprep.subr.bf16.mxu1 %v9705_v57  ;;  %v9727_v57 = vpack.c.bf16 %v6090_v50, %v6086_v49  ;;  %v9729_v14 = vpack.c.bf16 %v6099_v56, %v6095_v51  ;;  %v6147_v49 = vld [vmem:[%s19315_s22 + $0xce8] sm:$0xff]  ;;  %v6142_v56 = vld [vmem:[%s19315_s22 + $0xcc0] sm:$0xff] }
 0x8d0   :  { %9476 = vmatpush1.bf16.msra.mxu0 %v9475_v47  ;;  %v6098_v47 = vld [vmem:[%s19315_s22 + $0xb60] sm:$0xff] }
 0x8d1   :  { %9478 = vmatprep.subr.bf16.mxu0 %v9477_v60  ;;  %v9731_v60 = vpack.c.bf16 %v6098_v47, %v6094_v58  ;;  %v6155_v58 = vld [vmem:[%s19315_s22 + $0xd28] sm:$0xff]  ;;  %v6166_v19 = vld [vmem:[%s19315_s22 + $0xd80] sm:$0xff] }
 0x8d2   :  { %9708 = vmatpush1.bf16.msra.mxu1 %v9707_v5  ;;  %v6115_v5 = vld [vmem:[%s19315_s22 + $0xbe8] sm:$0xff]  ;;  %v6178_v27 = vld [vmem:[%s19315_s22 + $0xde0] sm:$0xff] }
 0x8d3   :  { %9710 = vmatprep.subr.bf16.mxu1 %v9709_v6  ;;  %v9735_v6 = vpack.c.bf16 %v6106_v54, %v6102_v63  ;;  %v9737_v8 = vpack.c.bf16 %v6115_v5, %v6111_v2  ;;  %v6163_v63 = vld [vmem:[%s19315_s22 + $0xd68] sm:$0xff]  ;;  %v6158_v5 = vld [vmem:[%s19315_s22 + $0xd40] sm:$0xff] }
 0x8d4   :  { %9480 = vmatpush1.bf16.msra.mxu0 %v9479_v17  ;;  %v6114_v17 = vld [vmem:[%s19315_s22 + $0xbe0] sm:$0xff] }
 0x8d5   :  { %9482 = vmatprep.subr.bf16.mxu0 %v9481_v34  ;;  %v9739_v34 = vpack.c.bf16 %v6114_v17, %v6110_v29  ;;  %v6171_v29 = vld [vmem:[%s19315_s22 + $0xda8] sm:$0xff] }
 0x8d6   :  { %9712 = vmatpush1.bf16.msra.mxu1 %v9711_v24  ;;  %v5697_v24 = vrot.slane %v18247_v3, %v1620_v4  ;;  %v6127_v4 = vld [vmem:[%s19315_s22 + $0xc48] sm:$0xff] }
 0x8d7   :  { %9714 = vmatprep.subr.bf16.mxu1 %v9713_v7  ;;  %v5701_v7 = vrot.slane %v18247_v3, %v1624_v37  ;;  %v6131_v37 = vld [vmem:[%s19315_s22 + $0xc68] sm:$0xff] }
 0x8d8   :  { %9484 = vmatpush1.bf16.msra.mxu0 %v9483_v41  ;;  %v9745_v35 = vpack.c.bf16 %v6131_v37, %v6127_v4  ;;  %v6187_v4 = vld [vmem:[%s19315_s22 + $0xe28] sm:$0xff] }
 0x8da   :  { %9716 = vmatpush1.bf16.msra.mxu1 %v9715_v28 }
 0x8db   :  { %5670 = vmatmul.mubr.f32.vlgmr.msra.gmra.mrb[16].mxu0 %v16404_v21  ;;  %9718 = vmatprep.subr.bf16.mxu1 %v9717_v31  ;;  %v9723_v21 = vpack.c.bf16 %v6082_v39, %v6078_v43  ;;  %v6139_v43 = vld [vmem:[%s19315_s22 + $0xca8] sm:$0xff] }
 0x8de   :  { %9720 = vmatpush1.bf16.msra.mxu1 %v9719_v38  ;;  %v6130_v38 = vld [vmem:[%s19315_s22 + $0xc60] sm:$0xff] }
 0x8df   :  { %9722 = vmatprep.subr.bf16.mxu1 %v9721_v40  ;;  %v6135_v40 = vld [vmem:[%s19315_s22 + $0xc88] sm:$0xff]  ;;  %v9747_v39 = vpack.c.bf16 %v6130_v38, %v6126_v36  ;;  %v6186_v36 = vld [vmem:[%s19315_s22 + $0xe20] sm:$0xff] }
 0x8e0   :  { %v9749_v45 = vpack.c.bf16 %v6139_v43, %v6135_v40  ;;  %v6191_v38 = vld [vmem:[%s19315_s22 + $0xe48] sm:$0xff] }
 0x8e1   :  { %v6195_v40 = vld [vmem:[%s19315_s22 + $0xe68] sm:$0xff] }
 0x8e2   :  { %9724 = vmatpush1.bf16.msra.mxu1 %v9723_v21  ;;  %v6138_v21 = vld [vmem:[%s19315_s22 + $0xca0] sm:$0xff] }
 0x8e3   :  { %9726 = vmatprep.subr.bf16.mxu1 %v9725_v32  ;;  %v6143_v32 = vld [vmem:[%s19315_s22 + $0xcc8] sm:$0xff]  ;;  %v9751_v50 = vpack.c.bf16 %v6138_v21, %v6134_v46  ;;  %v6194_v46 = vld [vmem:[%s19315_s22 + $0xe60] sm:$0xff] }
 0x8e4   :  { %v9753_v51 = vpack.c.bf16 %v6147_v49, %v6143_v32  ;;  %v6199_v21 = vld [vmem:[%s19315_s22 + $0xe88] sm:$0xff] }
 0x8e5   :  { %v6203_v32 = vld [vmem:[%s19315_s22 + $0xea8] sm:$0xff] }
 0x8e6   :  { %9728 = vmatpush1.bf16.msra.mxu1 %v9727_v57  ;;  %v6146_v57 = vld [vmem:[%s19315_s22 + $0xce0] sm:$0xff] }
 0x8e7   :  { %9730 = vmatprep.subr.bf16.mxu1 %v9729_v14  ;;  %v6151_v14 = vld [vmem:[%s19315_s22 + $0xd08] sm:$0xff]  ;;  %v9755_v47 = vpack.c.bf16 %v6146_v57, %v6142_v56  ;;  %v6202_v56 = vld [vmem:[%s19315_s22 + $0xea0] sm:$0xff] }
 0x8e8   :  { %v9757_v52 = vpack.c.bf16 %v6155_v58, %v6151_v14  ;;  %v6207_v57 = vld [vmem:[%s19315_s22 + $0xec8] sm:$0xff] }
 0x8e9   :  { %v6211_v14 = vld [vmem:[%s19315_s22 + $0xee8] sm:$0xff] }
 0x8ea   :  { %9732 = vmatpush1.bf16.msra.mxu1 %v9731_v60  ;;  %v6154_v60 = vld [vmem:[%s19315_s22 + $0xd20] sm:$0xff] }
 0x8eb   :  { %9734 = vmatprep.subr.bf16.mxu1 %v9733_v61  ;;  %v6159_v61 = vld [vmem:[%s19315_s22 + $0xd48] sm:$0xff]  ;;  %v9759_v54 = vpack.c.bf16 %v6154_v60, %v6150_v13  ;;  %v6210_v13 = vld [vmem:[%s19315_s22 + $0xee0] sm:$0xff] }
 0x8ec   :  { %v9761_v2 = vpack.c.bf16 %v6163_v63, %v6159_v61  ;;  %v6215_v60 = vld [vmem:[%s19315_s22 + $0xf08] sm:$0xff] }
 0x8ed   :  { %v6219_v61 = vld [vmem:[%s19315_s22 + $0xf28] sm:$0xff] }
 0x8ee   :  { %9736 = vmatpush1.bf16.msra.mxu1 %v9735_v6  ;;  %v6162_v6 = vld [vmem:[%s19315_s22 + $0xd60] sm:$0xff] }
 0x8ef   :  { %9738 = vmatprep.subr.bf16.mxu1 %v9737_v8  ;;  %v6167_v8 = vld [vmem:[%s19315_s22 + $0xd88] sm:$0xff]  ;;  %v9763_v17 = vpack.c.bf16 %v6162_v6, %v6158_v5  ;;  %v6218_v5 = vld [vmem:[%s19315_s22 + $0xf20] sm:$0xff] }
 0x8f0   :  { %v9765_v15 = vpack.c.bf16 %v6171_v29, %v6167_v8  ;;  %v6223_v6 = vld [vmem:[%s19315_s22 + $0xf48] sm:$0xff] }
 0x8f1   :  { %v6227_v8 = vld [vmem:[%s19315_s22 + $0xf68] sm:$0xff] }
 0x8f2   :  { %9740 = vmatpush1.bf16.msra.mxu1 %v9739_v34  ;;  %v6170_v34 = vld [vmem:[%s19315_s22 + $0xda0] sm:$0xff] }
 0x8f3   :  { %9742 = vmatprep.subr.bf16.mxu1 %v9741_v22  ;;  %v6175_v22 = vld [vmem:[%s19315_s22 + $0xdc8] sm:$0xff] }
 0x92e   :  { %v5529_v0 = vpop.f32.mrb[14].mxu0 }
 0x92f   :  { %v18255_v12 = vadd.f32 %v5697_v24, %v5529_v0  ;;  %v5531_v41 = vpop.f32.mrb[15].mxu0  ;;  %v6179_v24 = vld [vmem:[%s19315_s22 + $0xde8] sm:$0xff] }
 0x930   :  { %v18263_v28 = vadd.f32 %v5701_v7, %v5531_v41  ;;  %v9767_v7 = vpack.c.bf16 %v6170_v34, %v6166_v19  ;;  %v9769_v0 = vpack.c.bf16 %v6179_v24, %v6175_v22  ;;  %v6174_v41 = vld [vmem:[%s19315_s22 + $0xdc0] sm:$0xff]  ;;  %v6231_v34 = vld [vmem:[%s19315_s22 + $0xf88] sm:$0xff] }
 0x931   :  { %v5730_v62 = vmax.f32 %v18255_v12, 0.0  ;;  %v9771_v37 = vpack.c.bf16 %v6178_v27, %v6174_v41  ;;  %v6226_v19 = vld [vmem:[%s19315_s22 + $0xf60] sm:$0xff]  ;;  %v6235_v22 = vld [vmem:[%s19315_s22 + $0xfa8] sm:$0xff]  ;;  %v6145_v12 = vld [vmem:[%s19315_s22 + $0xcd8] sm:$0xff] }
 0x932   :  { %v5731_v31 = vmax.f32 %v18263_v28, 0.0  ;;  %v6234_v41 = vld [vmem:[%s19315_s22 + $0xfa0] sm:$0xff]  ;;  %v6239_v27 = vld [vmem:[%s19315_s22 + $0xfc8] sm:$0xff] }
 0x934   :  { %6658 = vmatprep.mubr.f32.mxu1 %v5731_v31 }
 0x935   :  { %6659 = vmatmul.mubr.f32.vlgmr.msra.gmra.mrb[16].mxu1 %v5730_v62 }
 0x936   :  { %9744 = vmatpush1.bf16.msra.mxu1 %v9743_v33  ;;  %v9773_v33 = vpack.c.bf16 %v6187_v4, %v6183_v11  ;;  %v6243_v11 = vld [vmem:[%s19315_s22 + $0xfe8] sm:$0xff] }
 0x937   :  { %9746 = vmatprep.subr.bf16.mxu1 %v9745_v35  ;;  %v6182_v35 = vld [vmem:[%s19315_s22 + $0xe00] sm:$0xff] }
 0x938   :  { %v9775_v43 = vpack.c.bf16 %v6186_v36, %v6182_v35  ;;  %v6242_v35 = vld [vmem:[%s19315_s22 + $0xfe0] sm:$0xff]  ;;  %v5737_v36 = vld [vmem:[%s19315_s22 + $0x18] sm:$0xff] }
 0x93a   :  { %9748 = vmatpush1.bf16.msra.mxu1 %v9747_v39  ;;  %v9777_v39 = vpack.c.bf16 %v6195_v40, %v6191_v38  ;;  %v5741_v38 = vld [vmem:[%s19315_s22 + $0x38] sm:$0xff] }
 0x93b   :  { %9750 = vmatprep.subr.bf16.mxu1 %v9749_v45  ;;  %v6190_v45 = vld [vmem:[%s19315_s22 + $0xe40] sm:$0xff] }
 0x93c   :  { %v9779_v49 = vpack.c.bf16 %v6194_v46, %v6190_v45  ;;  %v5709_v45 = vrot.slane %v18247_v3, %v1632_v30  ;;  %v5749_v30 = vld [vmem:[%s19315_s22 + $0x78] sm:$0xff] }
 0x93e   :  { %9752 = vmatpush1.bf16.msra.mxu1 %v9751_v50  ;;  %v9781_v50 = vpack.c.bf16 %v6203_v32, %v6199_v21 }
 0x93f   :  { %9754 = vmatprep.subr.bf16.mxu1 %v9753_v51  ;;  %v6198_v51 = vld [vmem:[%s19315_s22 + $0xe80] sm:$0xff] }
 0x940   :  { %v9783_v58 = vpack.c.bf16 %v6202_v56, %v6198_v51 }
 0x942   :  { %9756 = vmatpush1.bf16.msra.mxu1 %v9755_v47  ;;  %v9785_v47 = vpack.c.bf16 %v6211_v14, %v6207_v57  ;;  %v9809_v57 = vpack.c.bf16 %v5749_v30, %v5745_v10  ;;  %v5744_v14 = vld [vmem:[%s19315_s22 + $0x50] sm:$0xff] }
 0x943   :  { %9758 = vmatprep.subr.bf16.mxu1 %v9757_v52  ;;  %v6206_v52 = vld [vmem:[%s19315_s22 + $0xec0] sm:$0xff]  ;;  %v5800_v30 = vld [vmem:[%s19315_s22 + $0x210] sm:$0xff] }
 0x944   :  { %v9787_v63 = vpack.c.bf16 %v6210_v13, %v6206_v52  ;;  %v5757_v52 = vld [vmem:[%s19315_s22 + $0xb8] sm:$0xff] }
 0x946   :  { %9760 = vmatpush1.bf16.msra.mxu1 %v9759_v54  ;;  %v9789_v54 = vpack.c.bf16 %v6219_v61, %v6215_v60  ;;  %v5752_v61 = vld [vmem:[%s19315_s22 + $0x90] sm:$0xff] }
 0x947   :  { %9762 = vmatprep.subr.bf16.mxu1 %v9761_v2  ;;  %v6214_v2 = vld [vmem:[%s19315_s22 + $0xf00] sm:$0xff] }
 0x948   :  { %v9791_v29 = vpack.c.bf16 %v6218_v5, %v6214_v2  ;;  %v5760_v5 = vld [vmem:[%s19315_s22 + $0xd0] sm:$0xff] }
 0x94a   :  { %9764 = vmatpush1.bf16.msra.mxu1 %v9763_v17  ;;  %v9793_v17 = vpack.c.bf16 %v6227_v8, %v6223_v6  ;;  %v5764_v6 = vld [vmem:[%s19315_s22 + $0xf0] sm:$0xff]  ;;  %v5769_v8 = vld [vmem:[%s19315_s22 + $0x118] sm:$0xff] }
 0x94b   :  { %9766 = vmatprep.subr.bf16.mxu1 %v9765_v15  ;;  %v6222_v15 = vld [vmem:[%s19315_s22 + $0xf40] sm:$0xff] }
 0x94c   :  { %v9795_v24 = vpack.c.bf16 %v6226_v19, %v6222_v15  ;;  %v5768_v19 = vld [vmem:[%s19315_s22 + $0x110] sm:$0xff] }
 0x94e   :  { %9768 = vmatpush1.bf16.msra.mxu1 %v9767_v7  ;;  %v9797_v7 = vpack.c.bf16 %v6235_v22, %v6231_v34  ;;  %v5772_v34 = vld [vmem:[%s19315_s22 + $0x130] sm:$0xff]  ;;  %v5777_v22 = vld [vmem:[%s19315_s22 + $0x158] sm:$0xff] }
 0x94f   :  { %9770 = vmatprep.subr.bf16.mxu1 %v9769_v0  ;;  %v6230_v0 = vld [vmem:[%s19315_s22 + $0xf80] sm:$0xff] }
 0x950   :  { %v9799_v4 = vpack.c.bf16 %v6234_v41, %v6230_v0  ;;  %v5776_v41 = vld [vmem:[%s19315_s22 + $0x150] sm:$0xff] }
 0x952   :  { %9772 = vmatpush1.bf16.msra.mxu1 %v9771_v37  ;;  %v9801_v37 = vpack.c.bf16 %v6243_v11, %v6239_v27  ;;  %v5780_v27 = vld [vmem:[%s19315_s22 + $0x170] sm:$0xff]  ;;  %v5785_v11 = vld [vmem:[%s19315_s22 + $0x198] sm:$0xff] }
 0x953   :  { %9774 = vmatprep.subr.bf16.mxu1 %v9773_v33  ;;  %v6238_v33 = vld [vmem:[%s19315_s22 + $0xfc0] sm:$0xff] }
 0x954   :  { %v9803_v40 = vpack.c.bf16 %v6242_v35, %v6238_v33  ;;  %v5784_v35 = vld [vmem:[%s19315_s22 + $0x190] sm:$0xff] }
 0x956   :  { %9776 = vmatpush1.bf16.msra.mxu1 %v9775_v43  ;;  %v9805_v43 = vpack.c.bf16 %v5741_v38, %v5737_v36  ;;  %v5788_v36 = vld [vmem:[%s19315_s22 + $0x1b0] sm:$0xff]  ;;  %v5793_v38 = vld [vmem:[%s19315_s22 + $0x1d8] sm:$0xff] }
 0x957   :  { %9778 = vmatprep.subr.bf16.mxu1 %v9777_v39  ;;  %v5705_v39 = vrot.slane %v18247_v3, %v1628_v16 }
 0x95a   :  { %9780 = vmatpush1.bf16.msra.mxu1 %v9779_v49  ;;  %v5736_v49 = vld [vmem:[%s19315_s22 + $0x10] sm:$0xff] }
 0x95b   :  { %9782 = vmatprep.subr.bf16.mxu1 %v9781_v50  ;;  %v5740_v50 = vld [vmem:[%s19315_s22 + $0x30] sm:$0xff] }
 0x95c   :  { %v9807_v3 = vpack.c.bf16 %v5740_v50, %v5736_v49  ;;  %v5805_v49 = vld [vmem:[%s19315_s22 + $0x238] sm:$0xff] }
 0x95e   :  { %9784 = vmatpush1.bf16.msra.mxu1 %v9783_v58  ;;  %v5748_v58 = vld [vmem:[%s19315_s22 + $0x70] sm:$0xff] }
 0x95f   :  { %9786 = vmatprep.subr.bf16.mxu1 %v9785_v47  ;;  %v5753_v47 = vld [vmem:[%s19315_s22 + $0x98] sm:$0xff]  ;;  %v9811_v13 = vpack.c.bf16 %v5748_v58, %v5744_v14 }
 0x960   :  { %v9813_v60 = vpack.c.bf16 %v5757_v52, %v5753_v47  ;;  %v5813_v14 = vld [vmem:[%s19315_s22 + $0x278] sm:$0xff]  ;;  %v5808_v52 = vld [vmem:[%s19315_s22 + $0x250] sm:$0xff] }
 0x962   :  { %9788 = vmatpush1.bf16.msra.mxu1 %v9787_v63  ;;  %v5756_v63 = vld [vmem:[%s19315_s22 + $0xb0] sm:$0xff] }
 0x963   :  { %9790 = vmatprep.subr.bf16.mxu1 %v9789_v54  ;;  %v5761_v54 = vld [vmem:[%s19315_s22 + $0xd8] sm:$0xff] }
 0x964   :  { %v9817_v2 = vpack.c.bf16 %v5765_v44, %v5761_v54  ;;  %v5816_v44 = vld [vmem:[%s19315_s22 + $0x290] sm:$0xff] }
 0x966   :  { %9792 = vmatpush1.bf16.msra.mxu1 %v9791_v29  ;;  %v5773_v29 = vld [vmem:[%s19315_s22 + $0x138] sm:$0xff] }
 0x967   :  { %9794 = vmatprep.subr.bf16.mxu1 %v9793_v17  ;;  %v9819_v17 = vpack.c.bf16 %v5764_v6, %v5760_v5  ;;  %v9821_v15 = vpack.c.bf16 %v5773_v29, %v5769_v8  ;;  %v5829_v5 = vld [vmem:[%s19315_s22 + $0x2f8] sm:$0xff]  ;;  %v5824_v29 = vld [vmem:[%s19315_s22 + $0x2d0] sm:$0xff] }
 0x96a   :  { %9796 = vmatpush1.bf16.msra.mxu1 %v9795_v24  ;;  %v5781_v24 = vld [vmem:[%s19315_s22 + $0x178] sm:$0xff] }
 0x96b   :  { %9798 = vmatprep.subr.bf16.mxu1 %v9797_v7  ;;  %v9823_v7 = vpack.c.bf16 %v5772_v34, %v5768_v19  ;;  %v9825_v0 = vpack.c.bf16 %v5781_v24, %v5777_v22  ;;  %v5837_v19 = vld [vmem:[%s19315_s22 + $0x338] sm:$0xff]  ;;  %v5832_v24 = vld [vmem:[%s19315_s22 + $0x310] sm:$0xff] }
 0x96e   :  { %9800 = vmatpush1.bf16.msra.mxu1 %v9799_v4  ;;  %v5789_v4 = vld [vmem:[%s19315_s22 + $0x1b8] sm:$0xff] }
 0x96f   :  { %9802 = vmatprep.subr.bf16.mxu1 %v9801_v37  ;;  %v9827_v37 = vpack.c.bf16 %v5780_v27, %v5776_v41  ;;  %v9829_v33 = vpack.c.bf16 %v5789_v4, %v5785_v11  ;;  %v5845_v41 = vld [vmem:[%s19315_s22 + $0x378] sm:$0xff]  ;;  %v5840_v4 = vld [vmem:[%s19315_s22 + $0x350] sm:$0xff] }
 0x972   :  { %9804 = vmatpush1.bf16.msra.mxu1 %v9803_v40  ;;  %v5797_v40 = vld [vmem:[%s19315_s22 + $0x1f8] sm:$0xff] }
 0x973   :  { %9806 = vmatprep.subr.bf16.mxu1 %v9805_v43  ;;  %v9831_v43 = vpack.c.bf16 %v5788_v36, %v5784_v35  ;;  %v5853_v35 = vld [vmem:[%s19315_s22 + $0x3b8] sm:$0xff] }
 0x9ae   :  { %v5671_v46 = vpop.f32.mrb[16].mxu0 }
 0x9af   :  { %v18463_v21 = vadd.f32 %v5705_v39, %v5671_v46  ;;  %v5673_v32 = vpop.f32.mrb[17].mxu0  ;;  %v9833_v39 = vpack.c.bf16 %v5797_v40, %v5793_v38  ;;  %v5796_v46 = vld [vmem:[%s19315_s22 + $0x1f0] sm:$0xff] }
 0x9b0   :  { %v18471_v51 = vadd.f32 %v5709_v45, %v5673_v32  ;;  %v5792_v45 = vld [vmem:[%s19315_s22 + $0x1d0] sm:$0xff]  ;;  %v5801_v32 = vld [vmem:[%s19315_s22 + $0x218] sm:$0xff] }
 0x9b1   :  { %v5732_v56 = vmax.f32 %v18463_v21, 0.0  ;;  %v9835_v50 = vpack.c.bf16 %v5796_v46, %v5792_v45  ;;  %v9837_v10 = vpack.c.bf16 %v5805_v49, %v5801_v32  ;;  %v5848_v40 = vld [vmem:[%s19315_s22 + $0x390] sm:$0xff]  ;;  %v5861_v45 = vld [vmem:[%s19315_s22 + $0x3f8] sm:$0xff] }
 0x9b2   :  { %v5733_v16 = vmax.f32 %v18471_v51, 0.0  ;;  %v5856_v49 = vld [vmem:[%s19315_s22 + $0x3d0] sm:$0xff] }
 0x9b4   :  { %6729 = vmatprep.mubr.f32.mxu1 %v5733_v16 }
 0x9b5   :  { %6730 = vmatmul.mubr.f32.vlgmr.msra.gmra.mrb[16].mxu1 %v5732_v56 }
 0x9b6   :  { %9808 = vmatpush1.bf16.msra.mxu1 %v9807_v3  ;;  %6800 = vmatprep.mubr.f32.mxu1 %v5727_v55  ;;  %v9815_v55 = vpack.c.bf16 %v5756_v63, %v5752_v61  ;;  %v5804_v3 = vld [vmem:[%s19315_s22 + $0x230] sm:$0xff]  ;;  %v5821_v61 = vld [vmem:[%s19315_s22 + $0x2b8] sm:$0xff] }
 0x9b7   :  { %9810 = vmatprep.subr.bf16.mxu1 %v9809_v57  ;;  %v5809_v57 = vld [vmem:[%s19315_s22 + $0x258] sm:$0xff]  ;;  %v9839_v58 = vpack.c.bf16 %v5804_v3, %v5800_v30 }
 0x9b8   :  { %v9841_v47 = vpack.c.bf16 %v5813_v14, %v5809_v57  ;;  %v5869_v30 = vld [vmem:[%s19315_s22 + $0x438] sm:$0xff]  ;;  %v5864_v14 = vld [vmem:[%s19315_s22 + $0x410] sm:$0xff] }
 0x9ba   :  { %9812 = vmatpush1.bf16.msra.mxu1 %v9811_v13  ;;  %v5812_v13 = vld [vmem:[%s19315_s22 + $0x270] sm:$0xff] }
 0x9bb   :  { %9814 = vmatprep.subr.bf16.mxu1 %v9813_v60  ;;  %v5817_v60 = vld [vmem:[%s19315_s22 + $0x298] sm:$0xff]  ;;  %v9843_v63 = vpack.c.bf16 %v5812_v13, %v5808_v52 }
 0x9bc   :  { %v9845_v54 = vpack.c.bf16 %v5821_v61, %v5817_v60  ;;  %v5877_v52 = vld [vmem:[%s19315_s22 + $0x478] sm:$0xff]  ;;  %v5872_v61 = vld [vmem:[%s19315_s22 + $0x450] sm:$0xff] }
 0x9be   :  { %9816 = vmatpush1.bf16.msra.mxu1 %v9815_v55  ;;  %v5820_v55 = vld [vmem:[%s19315_s22 + $0x2b0] sm:$0xff] }
 0x9bf   :  { %9818 = vmatprep.subr.bf16.mxu1 %v9817_v2  ;;  %v5825_v2 = vld [vmem:[%s19315_s22 + $0x2d8] sm:$0xff]  ;;  %v9847_v6 = vpack.c.bf16 %v5820_v55, %v5816_v44 }
 0x9c0   :  { %v9849_v8 = vpack.c.bf16 %v5829_v5, %v5825_v2  ;;  %v5885_v44 = vld [vmem:[%s19315_s22 + $0x4b8] sm:$0xff]  ;;  %v5880_v5 = vld [vmem:[%s19315_s22 + $0x490] sm:$0xff] }
 0x9c2   :  { %9820 = vmatpush1.bf16.msra.mxu1 %v9819_v17  ;;  %v5828_v17 = vld [vmem:[%s19315_s22 + $0x2f0] sm:$0xff] }
 0x9c3   :  { %9822 = vmatprep.subr.bf16.mxu1 %v9821_v15  ;;  %v5833_v15 = vld [vmem:[%s19315_s22 + $0x318] sm:$0xff]  ;;  %v9851_v34 = vpack.c.bf16 %v5828_v17, %v5824_v29  ;;  %v5892_v29 = vld [vmem:[%s19315_s22 + $0x4f0] sm:$0xff] }
 0x9c4   :  { %v9853_v22 = vpack.c.bf16 %v5837_v19, %v5833_v15  ;;  %v5897_v17 = vld [vmem:[%s19315_s22 + $0x518] sm:$0xff] }
 0x9c5   :  { %v5901_v15 = vld [vmem:[%s19315_s22 + $0x538] sm:$0xff] }
 0x9c6   :  { %9824 = vmatpush1.bf16.msra.mxu1 %v9823_v7  ;;  %v5836_v7 = vld [vmem:[%s19315_s22 + $0x330] sm:$0xff] }
 0x9c7   :  { %9826 = vmatprep.subr.bf16.mxu1 %v9825_v0  ;;  %v5841_v0 = vld [vmem:[%s19315_s22 + $0x358] sm:$0xff]  ;;  %v9855_v27 = vpack.c.bf16 %v5836_v7, %v5832_v24  ;;  %v5900_v24 = vld [vmem:[%s19315_s22 + $0x530] sm:$0xff] }
 0x9c8   :  { %v9857_v11 = vpack.c.bf16 %v5845_v41, %v5841_v0  ;;  %v5905_v7 = vld [vmem:[%s19315_s22 + $0x558] sm:$0xff] }
 0x9c9   :  { %v5909_v0 = vld [vmem:[%s19315_s22 + $0x578] sm:$0xff] }
 0x9ca   :  { %9828 = vmatpush1.bf16.msra.mxu1 %v9827_v37  ;;  %v5844_v37 = vld [vmem:[%s19315_s22 + $0x370] sm:$0xff] }
 0x9cb   :  { %9830 = vmatprep.subr.bf16.mxu1 %v9829_v33  ;;  %v5849_v33 = vld [vmem:[%s19315_s22 + $0x398] sm:$0xff]  ;;  %v9859_v36 = vpack.c.bf16 %v5844_v37, %v5840_v4  ;;  %v5908_v4 = vld [vmem:[%s19315_s22 + $0x570] sm:$0xff] }
 0x9cc   :  { %v9861_v38 = vpack.c.bf16 %v5853_v35, %v5849_v33  ;;  %v5913_v37 = vld [vmem:[%s19315_s22 + $0x598] sm:$0xff] }
 0x9cd   :  { %v5917_v33 = vld [vmem:[%s19315_s22 + $0x5b8] sm:$0xff] }
 0x9ce   :  { %9832 = vmatpush1.bf16.msra.mxu1 %v9831_v43  ;;  %v5852_v43 = vld [vmem:[%s19315_s22 + $0x3b0] sm:$0xff] }
 0x9cf   :  { %9834 = vmatprep.subr.bf16.mxu1 %v9833_v39  ;;  %v5857_v39 = vld [vmem:[%s19315_s22 + $0x3d8] sm:$0xff]  ;;  %v9863_v46 = vpack.c.bf16 %v5852_v43, %v5848_v40  ;;  %v5916_v40 = vld [vmem:[%s19315_s22 + $0x5b0] sm:$0xff] }
 0x9d0   :  { %v9865_v32 = vpack.c.bf16 %v5861_v45, %v5857_v39  ;;  %v5921_v43 = vld [vmem:[%s19315_s22 + $0x5d8] sm:$0xff] }
 0x9d1   :  { %v5925_v39 = vld [vmem:[%s19315_s22 + $0x5f8] sm:$0xff] }
 0x9d2   :  { %9836 = vmatpush1.bf16.msra.mxu1 %v9835_v50  ;;  %v5860_v50 = vld [vmem:[%s19315_s22 + $0x3f0] sm:$0xff] }
 0x9d3   :  { %9838 = vmatprep.subr.bf16.mxu1 %v9837_v10  ;;  %v5865_v10 = vld [vmem:[%s19315_s22 + $0x418] sm:$0xff]  ;;  %v9867_v3 = vpack.c.bf16 %v5860_v50, %v5856_v49  ;;  %v5924_v49 = vld [vmem:[%s19315_s22 + $0x5f0] sm:$0xff] }
 0x9d4   :  { %v9869_v57 = vpack.c.bf16 %v5869_v30, %v5865_v10  ;;  %v5929_v50 = vld [vmem:[%s19315_s22 + $0x618] sm:$0xff] }
 0x9d5   :  { %v5933_v10 = vld [vmem:[%s19315_s22 + $0x638] sm:$0xff] }
 0x9d6   :  { %9840 = vmatpush1.bf16.msra.mxu1 %v9839_v58  ;;  %v5868_v58 = vld [vmem:[%s19315_s22 + $0x430] sm:$0xff] }
 0x9d7   :  { %9842 = vmatprep.subr.bf16.mxu1 %v9841_v47  ;;  %v5873_v47 = vld [vmem:[%s19315_s22 + $0x458] sm:$0xff]  ;;  %v9871_v13 = vpack.c.bf16 %v5868_v58, %v5864_v14  ;;  %v5932_v14 = vld [vmem:[%s19315_s22 + $0x630] sm:$0xff] }
 0x9d8   :  { %v9873_v60 = vpack.c.bf16 %v5877_v52, %v5873_v47  ;;  %v5937_v58 = vld [vmem:[%s19315_s22 + $0x658] sm:$0xff] }
 0x9d9   :  { %v5941_v47 = vld [vmem:[%s19315_s22 + $0x678] sm:$0xff] }
 0x9da   :  { %9844 = vmatpush1.bf16.msra.mxu1 %v9843_v63  ;;  %v5876_v63 = vld [vmem:[%s19315_s22 + $0x470] sm:$0xff] }
 0x9db   :  { %9846 = vmatprep.subr.bf16.mxu1 %v9845_v54  ;;  %v5881_v54 = vld [vmem:[%s19315_s22 + $0x498] sm:$0xff]  ;;  %v9875_v55 = vpack.c.bf16 %v5876_v63, %v5872_v61  ;;  %v5940_v61 = vld [vmem:[%s19315_s22 + $0x670] sm:$0xff] }
 0x9dc   :  { %v9877_v2 = vpack.c.bf16 %v5885_v44, %v5881_v54  ;;  %v5945_v63 = vld [vmem:[%s19315_s22 + $0x698] sm:$0xff] }
 0x9dd   :  { %v5949_v54 = vld [vmem:[%s19315_s22 + $0x6b8] sm:$0xff] }
 0x9de   :  { %9848 = vmatpush1.bf16.msra.mxu1 %v9847_v6  ;;  %v5884_v6 = vld [vmem:[%s19315_s22 + $0x4b0] sm:$0xff] }
 0x9df   :  { %9850 = vmatprep.subr.bf16.mxu1 %v9849_v8  ;;  %v9879_v1 = vpack.c.bf16 %v5884_v6, %v5880_v5  ;;  %v5888_v8 = vld [vmem:[%s19315_s22 + $0x4d0] sm:$0xff]  ;;  %v5953_v6 = vld [vmem:[%s19315_s22 + $0x6d8] sm:$0xff] }
 0x9e0   :  { %v9883_v19 = vpack.c.bf16 %v5892_v29, %v5888_v8  ;;  %v5948_v5 = vld [vmem:[%s19315_s22 + $0x6b0] sm:$0xff]  ;;  %v5961_v29 = vld [vmem:[%s19315_s22 + $0x718] sm:$0xff] }
 0x9e1   :  { %v5956_v8 = vld [vmem:[%s19315_s22 + $0x6f0] sm:$0xff] }
 0x9e2   :  { %9852 = vmatpush1.bf16.msra.mxu1 %v9851_v34  ;;  %v9885_v34 = vpack.c.bf16 %v5901_v15, %v5897_v17  ;;  %v5965_v17 = vld [vmem:[%s19315_s22 + $0x738] sm:$0xff] }
 0x9e3   :  { %9854 = vmatprep.subr.bf16.mxu1 %v9853_v22  ;;  %v5896_v22 = vld [vmem:[%s19315_s22 + $0x510] sm:$0xff] }
 0x9e4   :  { %v9887_v41 = vpack.c.bf16 %v5900_v24, %v5896_v22  ;;  %v5964_v22 = vld [vmem:[%s19315_s22 + $0x730] sm:$0xff]  ;;  %v5969_v24 = vld [vmem:[%s19315_s22 + $0x758] sm:$0xff] }
 0x9e6   :  { %9856 = vmatpush1.bf16.msra.mxu1 %v9855_v27  ;;  %v9889_v27 = vpack.c.bf16 %v5909_v0, %v5905_v7  ;;  %v5973_v7 = vld [vmem:[%s19315_s22 + $0x778] sm:$0xff] }
 0x9e7   :  { %9858 = vmatprep.subr.bf16.mxu1 %v9857_v11  ;;  %v5904_v11 = vld [vmem:[%s19315_s22 + $0x550] sm:$0xff] }
 0x9e8   :  { %v9891_v35 = vpack.c.bf16 %v5908_v4, %v5904_v11  ;;  %v5972_v11 = vld [vmem:[%s19315_s22 + $0x770] sm:$0xff]  ;;  %v5977_v4 = vld [vmem:[%s19315_s22 + $0x798] sm:$0xff] }
 0x9ea   :  { %9860 = vmatpush1.bf16.msra.mxu1 %v9859_v36  ;;  %v9893_v36 = vpack.c.bf16 %v5917_v33, %v5913_v37  ;;  %v5981_v37 = vld [vmem:[%s19315_s22 + $0x7b8] sm:$0xff] }
 0x9eb   :  { %9862 = vmatprep.subr.bf16.mxu1 %v9861_v38  ;;  %v5912_v38 = vld [vmem:[%s19315_s22 + $0x590] sm:$0xff] }
 0x9ec   :  { %v9895_v45 = vpack.c.bf16 %v5916_v40, %v5912_v38  ;;  %v5980_v38 = vld [vmem:[%s19315_s22 + $0x7b0] sm:$0xff]  ;;  %v5985_v40 = vld [vmem:[%s19315_s22 + $0x7d8] sm:$0xff] }
 0x9ee   :  { %9864 = vmatpush1.bf16.msra.mxu1 %v9863_v46  ;;  %v9897_v46 = vpack.c.bf16 %v5925_v39, %v5921_v43  ;;  %v5989_v43 = vld [vmem:[%s19315_s22 + $0x7f8] sm:$0xff] }
 0x9ef   :  { %9866 = vmatprep.subr.bf16.mxu1 %v9865_v32  ;;  %v5920_v32 = vld [vmem:[%s19315_s22 + $0x5d0] sm:$0xff] }
 0x9f0   :  { %v9899_v30 = vpack.c.bf16 %v5924_v49, %v5920_v32  ;;  %v5988_v32 = vld [vmem:[%s19315_s22 + $0x7f0] sm:$0xff]  ;;  %v5993_v49 = vld [vmem:[%s19315_s22 + $0x818] sm:$0xff] }
 0x9f2   :  { %9868 = vmatpush1.bf16.msra.mxu1 %v9867_v3  ;;  %v9901_v3 = vpack.c.bf16 %v5933_v10, %v5929_v50  ;;  %v5997_v50 = vld [vmem:[%s19315_s22 + $0x838] sm:$0xff] }
 0x9f3   :  { %9870 = vmatprep.subr.bf16.mxu1 %v9869_v57  ;;  %v5928_v57 = vld [vmem:[%s19315_s22 + $0x610] sm:$0xff] }
 0x9f4   :  { %v9903_v52 = vpack.c.bf16 %v5932_v14, %v5928_v57  ;;  %v5996_v57 = vld [vmem:[%s19315_s22 + $0x830] sm:$0xff]  ;;  %v6001_v14 = vld [vmem:[%s19315_s22 + $0x858] sm:$0xff] }
 0x9f5   :  { %6801 = vmatmul.mubr.f32.vlgmr.msra.gmra.mrb[18].mxu1 %v5726_v42  ;;  %v5893_v42 = vld [vmem:[%s19315_s22 + $0x4f8] sm:$0xff] }
 0x9f6   :  { %9872 = vmatpush1.bf16.msra.mxu1 %v9871_v13  ;;  %6871 = vmatprep.mubr.f32.mxu1 %v5729_v9  ;;  %v9881_v9 = vpack.c.bf16 %v5893_v42, %v5889_v18  ;;  %v9905_v13 = vpack.c.bf16 %v5941_v47, %v5937_v58  ;;  %v5957_v18 = vld [vmem:[%s19315_s22 + $0x6f8] sm:$0xff] }
 0x9f7   :  { %9874 = vmatprep.subr.bf16.mxu1 %v9873_v60  ;;  %v5936_v60 = vld [vmem:[%s19315_s22 + $0x650] sm:$0xff]  ;;  %v6005_v58 = vld [vmem:[%s19315_s22 + $0x878] sm:$0xff] }
 0x9f8   :  { %v9907_v44 = vpack.c.bf16 %v5940_v61, %v5936_v60  ;;  %v6004_v60 = vld [vmem:[%s19315_s22 + $0x870] sm:$0xff]  ;;  %v6009_v61 = vld [vmem:[%s19315_s22 + $0x898] sm:$0xff] }
 0x9fa   :  { %9876 = vmatpush1.bf16.msra.mxu1 %v9875_v55  ;;  %v9909_v55 = vpack.c.bf16 %v5949_v54, %v5945_v63  ;;  %v6013_v63 = vld [vmem:[%s19315_s22 + $0x8b8] sm:$0xff] }
 0x9fb   :  { %9878 = vmatprep.subr.bf16.mxu1 %v9877_v2  ;;  %v5944_v2 = vld [vmem:[%s19315_s22 + $0x690] sm:$0xff] }
 0x9fc   :  { %v9911_v42 = vpack.c.bf16 %v5948_v5, %v5944_v2  ;;  %v6012_v2 = vld [vmem:[%s19315_s22 + $0x8b0] sm:$0xff] }
 0x9fd   :  { %v6016_v5 = vld [vmem:[%s19315_s22 + $0x8d0] sm:$0xff] }
 0x9fe   :  { %9880 = vmatpush1.bf16.msra.mxu1 %v9879_v1  ;;  %v9913_v1 = vpack.c.bf16 %v5957_v18, %v5953_v6  ;;  %v6020_v6 = vld [vmem:[%s19315_s22 + $0x8f0] sm:$0xff]  ;;  %v6025_v18 = vld [vmem:[%s19315_s22 + $0x918] sm:$0xff] }
 0x9ff   :  { %9882 = vmatprep.subr.bf16.mxu1 %v9881_v9  ;;  %v5952_v9 = vld [vmem:[%s19315_s22 + $0x6d0] sm:$0xff] }
 0xa00   :  { %v9915_v15 = vpack.c.bf16 %v5956_v8, %v5952_v9  ;;  %v6024_v8 = vld [vmem:[%s19315_s22 + $0x910] sm:$0xff] }
 0xa02   :  { %9884 = vmatpush1.bf16.msra.mxu1 %v9883_v19  ;;  %v9917_v19 = vpack.c.bf16 %v5965_v17, %v5961_v29  ;;  %v6028_v29 = vld [vmem:[%s19315_s22 + $0x930] sm:$0xff]  ;;  %v6033_v17 = vld [vmem:[%s19315_s22 + $0x958] sm:$0xff] }
 0xa03   :  { %9886 = vmatprep.subr.bf16.mxu1 %v9885_v34  ;;  %v5960_v34 = vld [vmem:[%s19315_s22 + $0x710] sm:$0xff] }
 0xa04   :  { %v9919_v0 = vpack.c.bf16 %v5964_v22, %v5960_v34  ;;  %v6032_v22 = vld [vmem:[%s19315_s22 + $0x950] sm:$0xff] }
 0xa06   :  { %9888 = vmatpush1.bf16.msra.mxu1 %v9887_v41  ;;  %v9921_v41 = vpack.c.bf16 %v5973_v7, %v5969_v24  ;;  %v6036_v24 = vld [vmem:[%s19315_s22 + $0x970] sm:$0xff]  ;;  %v6041_v7 = vld [vmem:[%s19315_s22 + $0x998] sm:$0xff] }
 0xa07   :  { %9890 = vmatprep.subr.bf16.mxu1 %v9889_v27  ;;  %v5968_v27 = vld [vmem:[%s19315_s22 + $0x750] sm:$0xff] }
 0xa08   :  { %v9923_v33 = vpack.c.bf16 %v5972_v11, %v5968_v27  ;;  %v6040_v11 = vld [vmem:[%s19315_s22 + $0x990] sm:$0xff] }
 0xa0a   :  { %9892 = vmatpush1.bf16.msra.mxu1 %v9891_v35  ;;  %v9925_v35 = vpack.c.bf16 %v5981_v37, %v5977_v4  ;;  %v6044_v4 = vld [vmem:[%s19315_s22 + $0x9b0] sm:$0xff]  ;;  %v6049_v37 = vld [vmem:[%s19315_s22 + $0x9d8] sm:$0xff] }
 0xa0b   :  { %9894 = vmatprep.subr.bf16.mxu1 %v9893_v36  ;;  %v5976_v36 = vld [vmem:[%s19315_s22 + $0x790] sm:$0xff] }
 0xa0c   :  { %v9927_v39 = vpack.c.bf16 %v5980_v38, %v5976_v36  ;;  %v6048_v38 = vld [vmem:[%s19315_s22 + $0x9d0] sm:$0xff] }
 0xa0e   :  { %9896 = vmatpush1.bf16.msra.mxu1 %v9895_v45  ;;  %v9929_v45 = vpack.c.bf16 %v5989_v43, %v5985_v40  ;;  %v6052_v40 = vld [vmem:[%s19315_s22 + $0x9f0] sm:$0xff]  ;;  %v6057_v43 = vld [vmem:[%s19315_s22 + $0xa18] sm:$0xff] }
 0xa0f   :  { %9898 = vmatprep.subr.bf16.mxu1 %v9897_v46  ;;  %v5984_v46 = vld [vmem:[%s19315_s22 + $0x7d0] sm:$0xff] }
 0xa10   :  { %v9931_v10 = vpack.c.bf16 %v5988_v32, %v5984_v46  ;;  %v6056_v32 = vld [vmem:[%s19315_s22 + $0xa10] sm:$0xff] }
 0xa12   :  { %9900 = vmatpush1.bf16.msra.mxu1 %v9899_v30  ;;  %v9933_v30 = vpack.c.bf16 %v5997_v50, %v5993_v49  ;;  %v6060_v49 = vld [vmem:[%s19315_s22 + $0xa30] sm:$0xff]  ;;  %v6065_v50 = vld [vmem:[%s19315_s22 + $0xa58] sm:$0xff] }
 0xa13   :  { %9902 = vmatprep.subr.bf16.mxu1 %v9901_v3  ;;  %v5992_v3 = vld [vmem:[%s19315_s22 + $0x810] sm:$0xff] }
 0xa14   :  { %v9935_v47 = vpack.c.bf16 %v5996_v57, %v5992_v3  ;;  %v6064_v57 = vld [vmem:[%s19315_s22 + $0xa50] sm:$0xff] }
 0xa16   :  { %9904 = vmatpush1.bf16.msra.mxu1 %v9903_v52  ;;  %v9937_v52 = vpack.c.bf16 %v6005_v58, %v6001_v14  ;;  %v6068_v14 = vld [vmem:[%s19315_s22 + $0xa70] sm:$0xff]  ;;  %v6073_v58 = vld [vmem:[%s19315_s22 + $0xa98] sm:$0xff] }
 0xa17   :  { %9906 = vmatprep.subr.bf16.mxu1 %v9905_v13  ;;  %v6000_v13 = vld [vmem:[%s19315_s22 + $0x850] sm:$0xff] }
 0xa18   :  { %v9939_v54 = vpack.c.bf16 %v6004_v60, %v6000_v13  ;;  %v6072_v60 = vld [vmem:[%s19315_s22 + $0xa90] sm:$0xff] }
 0xa1a   :  { %9908 = vmatpush1.bf16.msra.mxu1 %v9907_v44  ;;  %v9941_v44 = vpack.c.bf16 %v6013_v63, %v6009_v61  ;;  %v6076_v61 = vld [vmem:[%s19315_s22 + $0xab0] sm:$0xff]  ;;  %v6081_v63 = vld [vmem:[%s19315_s22 + $0xad8] sm:$0xff] }
 0xa1b   :  { %9910 = vmatprep.subr.bf16.mxu1 %v9909_v55  ;;  %v6008_v55 = vld [vmem:[%s19315_s22 + $0x890] sm:$0xff] }
 0xa1c   :  { %v9943_v28 = vpack.c.bf16 %v6012_v2, %v6008_v55  ;;  %v6080_v2 = vld [vmem:[%s19315_s22 + $0xad0] sm:$0xff] }
 0xa1e   :  { %9912 = vmatpush1.bf16.msra.mxu1 %v9911_v42  ;;  %v6029_v42 = vld [vmem:[%s19315_s22 + $0x938] sm:$0xff] }
 0xa1f   :  { %9914 = vmatprep.subr.bf16.mxu1 %v9913_v1  ;;  %v9947_v1 = vpack.c.bf16 %v6020_v6, %v6016_v5  ;;  %v9949_v9 = vpack.c.bf16 %v6029_v42, %v6025_v18  ;;  %v6088_v6 = vld [vmem:[%s19315_s22 + $0xb10] sm:$0xff]  ;;  %v6097_v42 = vld [vmem:[%s19315_s22 + $0xb58] sm:$0xff] }
 0xa20   :  { %v6092_v18 = vld [vmem:[%s19315_s22 + $0xb30] sm:$0xff] }
 0xa22   :  { %9916 = vmatpush1.bf16.msra.mxu1 %v9915_v15  ;;  %v6037_v15 = vld [vmem:[%s19315_s22 + $0x978] sm:$0xff] }
 0xa23   :  { %9918 = vmatprep.subr.bf16.mxu1 %v9917_v19  ;;  %v9951_v19 = vpack.c.bf16 %v6028_v29, %v6024_v8  ;;  %v9953_v34 = vpack.c.bf16 %v6037_v15, %v6033_v17  ;;  %v6096_v29 = vld [vmem:[%s19315_s22 + $0xb50] sm:$0xff]  ;;  %v6105_v15 = vld [vmem:[%s19315_s22 + $0xb98] sm:$0xff] }
 0xa24   :  { %v6100_v17 = vld [vmem:[%s19315_s22 + $0xb70] sm:$0xff] }
 0xa26   :  { %9920 = vmatpush1.bf16.msra.mxu1 %v9919_v0  ;;  %v6045_v0 = vld [vmem:[%s19315_s22 + $0x9b8] sm:$0xff] }
 0xa27   :  { %9922 = vmatprep.subr.bf16.mxu1 %v9921_v41  ;;  %v9955_v41 = vpack.c.bf16 %v6036_v24, %v6032_v22  ;;  %v9957_v27 = vpack.c.bf16 %v6045_v0, %v6041_v7  ;;  %v6104_v24 = vld [vmem:[%s19315_s22 + $0xb90] sm:$0xff]  ;;  %v6113_v0 = vld [vmem:[%s19315_s22 + $0xbd8] sm:$0xff] }
 0xa28   :  { %v6108_v7 = vld [vmem:[%s19315_s22 + $0xbb0] sm:$0xff] }
 0xa2a   :  { %9924 = vmatpush1.bf16.msra.mxu1 %v9923_v33  ;;  %v6053_v33 = vld [vmem:[%s19315_s22 + $0x9f8] sm:$0xff] }
 0xa2b   :  { %9926 = vmatprep.subr.bf16.mxu1 %v9925_v35  ;;  %v9959_v35 = vpack.c.bf16 %v6044_v4, %v6040_v11  ;;  %v9961_v36 = vpack.c.bf16 %v6053_v33, %v6049_v37  ;;  %v6112_v4 = vld [vmem:[%s19315_s22 + $0xbd0] sm:$0xff]  ;;  %v6121_v33 = vld [vmem:[%s19315_s22 + $0xc18] sm:$0xff] }
 0xa2c   :  { %v6116_v37 = vld [vmem:[%s19315_s22 + $0xbf0] sm:$0xff] }
 0xa2e   :  { %9928 = vmatpush1.bf16.msra.mxu1 %v9927_v39  ;;  %v6061_v39 = vld [vmem:[%s19315_s22 + $0xa38] sm:$0xff] }
 0xa2f   :  { %9930 = vmatprep.subr.bf16.mxu1 %v9929_v45  ;;  %v9963_v45 = vpack.c.bf16 %v6052_v40, %v6048_v38  ;;  %v9965_v46 = vpack.c.bf16 %v6061_v39, %v6057_v43  ;;  %v6120_v40 = vld [vmem:[%s19315_s22 + $0xc10] sm:$0xff]  ;;  %v6129_v39 = vld [vmem:[%s19315_s22 + $0xc58] sm:$0xff] }
 0xa30   :  { %v6124_v43 = vld [vmem:[%s19315_s22 + $0xc30] sm:$0xff] }
 0xa32   :  { %9932 = vmatpush1.bf16.msra.mxu1 %v9931_v10  ;;  %v6069_v10 = vld [vmem:[%s19315_s22 + $0xa78] sm:$0xff] }
 0xa33   :  { %9934 = vmatprep.subr.bf16.mxu1 %v9933_v30  ;;  %v9967_v30 = vpack.c.bf16 %v6060_v49, %v6056_v32  ;;  %v9969_v3 = vpack.c.bf16 %v6069_v10, %v6065_v50  ;;  %v6128_v49 = vld [vmem:[%s19315_s22 + $0xc50] sm:$0xff]  ;;  %v6137_v10 = vld [vmem:[%s19315_s22 + $0xc98] sm:$0xff] }
 0xa34   :  { %v6132_v50 = vld [vmem:[%s19315_s22 + $0xc70] sm:$0xff] }
 0xa35   :  { %6872 = vmatmul.mubr.f32.vlgmr.msra.gmra.mrb[18].mxu1 %v5728_v20  ;;  %v6021_v20 = vld [vmem:[%s19315_s22 + $0x8f8] sm:$0xff] }
 0xa36   :  { %9936 = vmatpush1.bf16.msra.mxu1 %v9935_v47  ;;  %6942 = vmatprep.mubr.f32.mxu1 %v5731_v31  ;;  %v9945_v31 = vpack.c.bf16 %v6021_v20, %v6017_v59  ;;  %v6077_v47 = vld [vmem:[%s19315_s22 + $0xab8] sm:$0xff]  ;;  %v6084_v59 = vld [vmem:[%s19315_s22 + $0xaf0] sm:$0xff] }
 0xa37   :  { %9938 = vmatprep.subr.bf16.mxu1 %v9937_v52  ;;  %v9971_v52 = vpack.c.bf16 %v6068_v14, %v6064_v57  ;;  %v9973_v13 = vpack.c.bf16 %v6077_v47, %v6073_v58  ;;  %v6089_v20 = vld [vmem:[%s19315_s22 + $0xb18] sm:$0xff]  ;;  %v6136_v14 = vld [vmem:[%s19315_s22 + $0xc90] sm:$0xff] }
 0xa38   :  { %v6140_v58 = vld [vmem:[%s19315_s22 + $0xcb0] sm:$0xff] }
 0xa39   :  { %v10007_v51 = vpack.c.bf16 %v6140_v58, %v6136_v14  ;;  %v6144_v47 = vld [vmem:[%s19315_s22 + $0xcd0] sm:$0xff]  ;;  %v6209_v58 = vld [vmem:[%s19315_s22 + $0xed8] sm:$0xff] }
 0xa3a   :  { %9940 = vmatpush1.bf16.msra.mxu1 %v9939_v54  ;;  %v6085_v54 = vld [vmem:[%s19315_s22 + $0xaf8] sm:$0xff]  ;;  %v6204_v14 = vld [vmem:[%s19315_s22 + $0xeb0] sm:$0xff] }
 0xa3b   :  { %9942 = vmatprep.subr.bf16.mxu1 %v9941_v44  ;;  %v9975_v44 = vpack.c.bf16 %v6076_v61, %v6072_v60  ;;  %v9977_v55 = vpack.c.bf16 %v6085_v54, %v6081_v63  ;;  %v6157_v60 = vld [vmem:[%s19315_s22 + $0xd38] sm:$0xff]  ;;  %v6152_v54 = vld [vmem:[%s19315_s22 + $0xd10] sm:$0xff] }
 0xa3e   :  { %9944 = vmatpush1.bf16.msra.mxu1 %v9943_v28  ;;  %v6093_v28 = vld [vmem:[%s19315_s22 + $0xb38] sm:$0xff] }
 0xa3f   :  { %9946 = vmatprep.subr.bf16.mxu1 %v9945_v31  ;;  %v9979_v31 = vpack.c.bf16 %v6084_v59, %v6080_v2  ;;  %v9981_v5 = vpack.c.bf16 %v6093_v28, %v6089_v20  ;;  %v6165_v2 = vld [vmem:[%s19315_s22 + $0xd78] sm:$0xff]  ;;  %v19126_v20 = vld [vmem:[%s19317_s24] sm:$0xf] }
 0xa42   :  { %9948 = vmatpush1.bf16.msra.mxu1 %v9947_v1  ;;  %v6101_v1 = vld [vmem:[%s19315_s22 + $0xb78] sm:$0xff] }
 0xa43   :  { %9950 = vmatprep.subr.bf16.mxu1 %v9949_v9  ;;  %v9983_v9 = vpack.c.bf16 %v6092_v18, %v6088_v6  ;;  %v9985_v8 = vpack.c.bf16 %v6101_v1, %v6097_v42  ;;  %v6169_v6 = vld [vmem:[%s19315_s22 + $0xd98] sm:$0xff]  ;;  %v7025_v42 = vrot.slane %v19126_v20, %v12884_v48  ;;  %v7029_v1 = vrot.slane %v19126_v20, %v12887_v25 }
 0xa44   :  { %v6173_v18 = vld [vmem:[%s19315_s22 + $0xdb8] sm:$0xff] }
 0xa45   :  { %v6177_v48 = vld [vmem:[%s19315_s22 + $0xdd8] sm:$0xff] }
 0xa46   :  { %9952 = vmatpush1.bf16.msra.mxu1 %v9951_v19  ;;  %v6109_v19 = vld [vmem:[%s19315_s22 + $0xbb8] sm:$0xff] }
 0xa47   :  { %9954 = vmatprep.subr.bf16.mxu1 %v9953_v34  ;;  %v9987_v34 = vpack.c.bf16 %v6100_v17, %v6096_v29  ;;  %v9989_v22 = vpack.c.bf16 %v6109_v19, %v6105_v15  ;;  %v6168_v29 = vld [vmem:[%s19315_s22 + $0xd90] sm:$0xff]  ;;  %v6181_v25 = vld [vmem:[%s19315_s22 + $0xdf8] sm:$0xff] }
 0xa48   :  { %v6172_v17 = vld [vmem:[%s19315_s22 + $0xdb0] sm:$0xff] }
 0xa4a   :  { %9956 = vmatpush1.bf16.msra.mxu1 %v9955_v41  ;;  %v6117_v41 = vld [vmem:[%s19315_s22 + $0xbf8] sm:$0xff] }
 0xa4b   :  { %9958 = vmatprep.subr.bf16.mxu1 %v9957_v27  ;;  %v9991_v27 = vpack.c.bf16 %v6108_v7, %v6104_v24  ;;  %v9993_v11 = vpack.c.bf16 %v6117_v41, %v6113_v0  ;;  %v10023_v24 = vpack.c.bf16 %v6172_v17, %v6168_v29  ;;  %v10025_v0 = vpack.c.bf16 %v6181_v25, %v6177_v48  ;;  %v6176_v41 = vld [vmem:[%s19315_s22 + $0xdd0] sm:$0xff]  ;;  %v6245_v29 = vld [vmem:[%s19315_s22 + $0xff8] sm:$0xff] }
 0xa4c   :  { %v6240_v48 = vld [vmem:[%s19315_s22 + $0xfd0] sm:$0xff] }
 0xa4d   :  { %v6244_v25 = vld [vmem:[%s19315_s22 + $0xff0] sm:$0xff] }
 0xa4e   :  { %9960 = vmatpush1.bf16.msra.mxu1 %v9959_v35  ;;  %v6125_v35 = vld [vmem:[%s19315_s22 + $0xc38] sm:$0xff] }
 0xa4f   :  { %9962 = vmatprep.subr.bf16.mxu1 %v9961_v36  ;;  %v9995_v36 = vpack.c.bf16 %v6116_v37, %v6112_v4  ;;  %v9997_v38 = vpack.c.bf16 %v6125_v35, %v6121_v33  ;;  %v6185_v4 = vld [vmem:[%s19315_s22 + $0xe18] sm:$0xff] }
 0xa50   :  { %v6189_v37 = vld [vmem:[%s19315_s22 + $0xe38] sm:$0xff] }
 0xa52   :  { %9964 = vmatpush1.bf16.msra.mxu1 %v9963_v45  ;;  %v6133_v45 = vld [vmem:[%s19315_s22 + $0xc78] sm:$0xff] }
 0xa53   :  { %9966 = vmatprep.subr.bf16.mxu1 %v9965_v46  ;;  %v9999_v46 = vpack.c.bf16 %v6124_v43, %v6120_v40  ;;  %v10001_v32 = vpack.c.bf16 %v6133_v45, %v6129_v39  ;;  %v6188_v40 = vld [vmem:[%s19315_s22 + $0xe30] sm:$0xff]  ;;  %v6193_v43 = vld [vmem:[%s19315_s22 + $0xe58] sm:$0xff] }
 0xa54   :  { %v6197_v39 = vld [vmem:[%s19315_s22 + $0xe78] sm:$0xff] }
 0xa56   :  { %9968 = vmatpush1.bf16.msra.mxu1 %v9967_v30  ;;  %v6141_v30 = vld [vmem:[%s19315_s22 + $0xcb8] sm:$0xff] }
 0xa57   :  { %9970 = vmatprep.subr.bf16.mxu1 %v9969_v3  ;;  %v10003_v3 = vpack.c.bf16 %v6132_v50, %v6128_v49  ;;  %v10005_v57 = vpack.c.bf16 %v6141_v30, %v6137_v10  ;;  %v6196_v49 = vld [vmem:[%s19315_s22 + $0xe70] sm:$0xff]  ;;  %v6201_v50 = vld [vmem:[%s19315_s22 + $0xe98] sm:$0xff] }
 0xa58   :  { %v6205_v10 = vld [vmem:[%s19315_s22 + $0xeb8] sm:$0xff] }
 0xa5a   :  { %9972 = vmatpush1.bf16.msra.mxu1 %v9971_v52  ;;  %v6148_v52 = vld [vmem:[%s19315_s22 + $0xcf0] sm:$0xff] }
 0xa5b   :  { %9974 = vmatprep.subr.bf16.mxu1 %v9973_v13  ;;  %v6153_v13 = vld [vmem:[%s19315_s22 + $0xd18] sm:$0xff]  ;;  %v10011_v61 = vpack.c.bf16 %v6148_v52, %v6144_v47  ;;  %v6212_v47 = vld [vmem:[%s19315_s22 + $0xef0] sm:$0xff] }
 0xa5c   :  { %v10013_v63 = vpack.c.bf16 %v6157_v60, %v6153_v13  ;;  %v6217_v52 = vld [vmem:[%s19315_s22 + $0xf18] sm:$0xff] }
 0xa5d   :  { %v6221_v13 = vld [vmem:[%s19315_s22 + $0xf38] sm:$0xff] }
 0xa5e   :  { %9976 = vmatpush1.bf16.msra.mxu1 %v9975_v44  ;;  %v6156_v44 = vld [vmem:[%s19315_s22 + $0xd30] sm:$0xff] }
 0xa5f   :  { %9978 = vmatprep.subr.bf16.mxu1 %v9977_v55  ;;  %v6161_v55 = vld [vmem:[%s19315_s22 + $0xd58] sm:$0xff]  ;;  %v10015_v59 = vpack.c.bf16 %v6156_v44, %v6152_v54  ;;  %v6220_v54 = vld [vmem:[%s19315_s22 + $0xf30] sm:$0xff] }
 0xa60   :  { %v10017_v28 = vpack.c.bf16 %v6165_v2, %v6161_v55  ;;  %v6225_v44 = vld [vmem:[%s19315_s22 + $0xf58] sm:$0xff] }
 0xa61   :  { %v6229_v55 = vld [vmem:[%s19315_s22 + $0xf78] sm:$0xff] }
 0xa62   :  { %9980 = vmatpush1.bf16.msra.mxu1 %v9979_v31  ;;  %v6160_v31 = vld [vmem:[%s19315_s22 + $0xd50] sm:$0xff] }
 0xa63   :  { %9982 = vmatprep.subr.bf16.mxu1 %v9981_v5  ;;  %v6164_v5 = vld [vmem:[%s19315_s22 + $0xd70] sm:$0xff] }
 0xa66   :  { %9984 = vmatpush1.bf16.msra.mxu1 %v9983_v9  ;;  %v10019_v9 = vpack.c.bf16 %v6164_v5, %v6160_v31  ;;  %v6228_v31 = vld [vmem:[%s19315_s22 + $0xf70] sm:$0xff]  ;;  %v6233_v5 = vld [vmem:[%s19315_s22 + $0xf98] sm:$0xff] }
 0xa67   :  { %9986 = vmatprep.subr.bf16.mxu1 %v9985_v8  ;;  %v10021_v8 = vpack.c.bf16 %v6173_v18, %v6169_v6  ;;  %v6237_v6 = vld [vmem:[%s19315_s22 + $0xfb8] sm:$0xff] }
 0xa6a   :  { %9988 = vmatpush1.bf16.msra.mxu1 %v9987_v34 }
 0xa6b   :  { %9990 = vmatprep.subr.bf16.mxu1 %v9989_v22 }
 0xa6e   :  { %9992 = vmatpush1.bf16.msra.mxu1 %v9991_v27  ;;  %v6180_v27 = vld [vmem:[%s19315_s22 + $0xdf0] sm:$0xff] }
 0xa6f   :  { %9994 = vmatprep.subr.bf16.mxu1 %v9993_v11  ;;  %v10027_v35 = vpack.c.bf16 %v6180_v27, %v6176_v41 }
 0xa72   :  { %9996 = vmatpush1.bf16.msra.mxu1 %v9995_v36  ;;  %v10029_v36 = vpack.c.bf16 %v6189_v37, %v6185_v4 }
 0xa73   :  { %9998 = vmatprep.subr.bf16.mxu1 %v9997_v38  ;;  %v6184_v38 = vld [vmem:[%s19315_s22 + $0xe10] sm:$0xff] }
 0xa74   :  { %v10031_v45 = vpack.c.bf16 %v6188_v40, %v6184_v38 }
 0xa75   :  { %6943 = vmatmul.mubr.f32.vlgmr.msra.gmra.mrb[18].mxu1 %v5730_v62  ;;  %v6149_v62 = vld [vmem:[%s19315_s22 + $0xcf8] sm:$0xff] }
 0xa76   :  { %10000 = vmatpush1.bf16.msra.mxu1 %v9999_v46  ;;  %7013 = vmatprep.mubr.f32.mxu1 %v5733_v16  ;;  %v10009_v16 = vpack.c.bf16 %v6149_v62, %v6145_v12  ;;  %v10033_v46 = vpack.c.bf16 %v6197_v39, %v6193_v43  ;;  %v6213_v12 = vld [vmem:[%s19315_s22 + $0xef8] sm:$0xff] }
 0xa77   :  { %10002 = vmatprep.subr.bf16.mxu1 %v10001_v32  ;;  %v6192_v32 = vld [vmem:[%s19315_s22 + $0xe50] sm:$0xff] }
 0xa78   :  { %v10035_v30 = vpack.c.bf16 %v6196_v49, %v6192_v32 }
 0xa7a   :  { %10004 = vmatpush1.bf16.msra.mxu1 %v10003_v3  ;;  %v10037_v3 = vpack.c.bf16 %v6205_v10, %v6201_v50 }
 0xa7b   :  { %10006 = vmatprep.subr.bf16.mxu1 %v10005_v57  ;;  %v6200_v57 = vld [vmem:[%s19315_s22 + $0xe90] sm:$0xff] }
 0xa7c   :  { %v10039_v62 = vpack.c.bf16 %v6204_v14, %v6200_v57 }
 0xa7e   :  { %10008 = vmatpush1.bf16.msra.mxu1 %v10007_v51  ;;  %v10041_v51 = vpack.c.bf16 %v6213_v12, %v6209_v58 }
 0xa7f   :  { %10010 = vmatprep.subr.bf16.mxu1 %v10009_v16  ;;  %v6208_v16 = vld [vmem:[%s19315_s22 + $0xed0] sm:$0xff] }
 0xa80   :  { %v10043_v60 = vpack.c.bf16 %v6212_v47, %v6208_v16 }
 0xa82   :  { %10012 = vmatpush1.bf16.msra.mxu1 %v10011_v61  ;;  %v10045_v61 = vpack.c.bf16 %v6221_v13, %v6217_v52 }
 0xa83   :  { %10014 = vmatprep.subr.bf16.mxu1 %v10013_v63  ;;  %v6216_v63 = vld [vmem:[%s19315_s22 + $0xf10] sm:$0xff] }
 0xa84   :  { %v10047_v2 = vpack.c.bf16 %v6220_v54, %v6216_v63 }
 0xa86   :  { %10016 = vmatpush1.bf16.msra.mxu1 %v10015_v59  ;;  %v10049_v59 = vpack.c.bf16 %v6229_v55, %v6225_v44 }
 0xa87   :  { %10018 = vmatprep.subr.bf16.mxu1 %v10017_v28  ;;  %v6224_v28 = vld [vmem:[%s19315_s22 + $0xf50] sm:$0xff] }
 0xa88   :  { %v6731_v15 = vpop.f32.mrb[16].mxu1  ;;  %v10051_v18 = vpack.c.bf16 %v6228_v31, %v6224_v28 }
 0xa89   :  { %v7042_v19 = vadd.f32 %v7025_v42, %v6731_v15  ;;  %v6733_v34 = vpop.f32.mrb[17].mxu1  ;;  %v10053_v42 = vpack.c.bf16 %v6237_v6, %v6233_v5 }
 0xa8a   :  { %v7043_v22 = vadd.f32 %v7029_v1, %v6733_v34  ;;  %10020 = vmatpush1.bf16.msra.mxu1 %v10019_v9  ;;  %v6232_v1 = vld [vmem:[%s19315_s22 + $0xf90] sm:$0xff] }
 0xa8b   :  { %v7046_v7 = vmax.f32 %v7042_v19, 0.0  ;;  %10022 = vmatprep.subr.bf16.mxu1 %v10021_v8  ;;  %v6236_v9 = vld [vmem:[%s19315_s22 + $0xfb0] sm:$0xff]  ;;  %v6241_v8 = vld [vmem:[%s19315_s22 + $0xfd8] sm:$0xff]  ;;  %v10059_v19 = vpack.c.bf16 %v6244_v25, %v6240_v48 }
 0xa8c   :  { %v7047_v11 = vmax.f32 %v7043_v22, 0.0  ;;  %v10055_v17 = vpack.c.bf16 %v6236_v9, %v6232_v1  ;;  %v10057_v15 = vpack.c.bf16 %v6245_v29, %v6241_v8 }
 0xa8e   :  { %v19168_v33 = vcombine.low %v7046_v7, %v7047_v11  ;;  %10024 = vmatpush1.bf16.msra.mxu1 %v10023_v24 }
 0xa8f   :  { %10026 = vmatprep.subr.bf16.mxu1 %v10025_v0 }
 0xa92   :  { %10028 = vmatpush1.bf16.msra.mxu1 %v10027_v35 }
 0xa93   :  { %10030 = vmatprep.subr.bf16.mxu1 %v10029_v36 }
 0xa96   :  { %10032 = vmatpush1.bf16.msra.mxu1 %v10031_v45 }
 0xa97   :  { %10034 = vmatprep.subr.bf16.mxu1 %v10033_v46 }
 0xa9a   :  { %10036 = vmatpush1.bf16.msra.mxu1 %v10035_v30 }
 0xa9b   :  { %10038 = vmatprep.subr.bf16.mxu1 %v10037_v3 }
 0xa9e   :  { %10040 = vmatpush1.bf16.msra.mxu1 %v10039_v62 }
 0xa9f   :  { %10042 = vmatprep.subr.bf16.mxu1 %v10041_v51 }
 0xaa2   :  { %10044 = vmatpush1.bf16.msra.mxu1 %v10043_v60 }
 0xaa3   :  { %10046 = vmatprep.subr.bf16.mxu1 %v10045_v61 }
 0xaa6   :  { %10048 = vmatpush1.bf16.msra.mxu1 %v10047_v2 }
 0xaa7   :  { %10050 = vmatprep.subr.bf16.mxu1 %v10049_v59 }
 0xaaa   :  { %10052 = vmatpush1.bf16.msra.mxu1 %v10051_v18 }
 0xaab   :  { %10054 = vmatprep.subr.bf16.mxu1 %v10053_v42 }
 0xaae   :  { %10056 = vmatpush1.bf16.msra.mxu1 %v10055_v17 }
 0xaaf   :  { %10058 = vmatprep.subr.bf16.mxu1 %v10057_v15 }
 0xab2   :  { %10060 = vmatpush1.bf16.msra.mxu1 %v10059_v19 }
 0xab5   :  { %7014 = vmatmul.mubr.f32.vlgmr.msra.gmra.mrb[18].mxu1 %v5732_v56 }
 0xab6   :  { %10158 = shalt.err (!%p10155_p4)
}
 0xab7   :  { %s10159_s22 = scalar_lea.hbm %s19319_s26, 32 }
 0xab8   :  { %p10160_p5 = scmp.ne.s32.totalorder %s19319_s26, %s10159_s22  ;;  %p10163_p6 = scmp.lt.u32.totalorder %s10159_s22, %s19319_s26 }
 0xaba   :  { %p10165_p7 = pnand %p10163_p6, %p10160_p5 }
 0xabc   :  { %10168 = shalt.err (!%p10165_p7)
}
 0xabd   :  { %7092 = dma.vmem_to_hbm [thread:$0]  %s7090_s3, 32, %s19319_s26, [#allocation5]   ;;  %v7033_v21 = vrot.slane %v19126_v20, %v13265_v53  ;;  %v7037_v56 = vrot.slane %v19126_v20, %v12890_v26  ;;  %v7062_v11 = vrot.slane %v19168_v33, %v10763_v23 }
 0xabe   :  { %s10200_s0 = smov [#allocation2]  }
 0xabf   :  { %s7079_s9 = sshll.u32 %s10200_s0, 4  ;;  %s7080_s9 = int_to_ptr.vmem [resolvable:$true] %s7079_s9 }
 0xac0   :  { %s10169_s26 = scalar_lea.vmem %s7080_s9, 128  ;;  %p10174_p9 = scmp.lt.s32.totalorder %s7080_s9, %s7080_s9 }
 0xac1   :  { %p10170_p8 = scmp.ne.s32.totalorder %s7080_s9, %s10169_s26  ;;  %p10175_p10 = scmp.lt.s32.totalorder %s10169_s26, %s10169_s26 }
 0xac3   :  { %p10176_p11 = por %p10175_p10, %p10174_p9 }
 0xac5   :  { %p10177_p12 = pnand %p10176_p11, %p10170_p8 }
 0xb88   :  { %v7015_v34 = vpop.f32.mrb[18].mxu1 }
 0xb89   :  { %v7044_v22 = vadd.f32 %v7033_v21, %v7015_v34  ;;  %v7017_v24 = vpop.f32.mrb[19].mxu1 }
 0xb8a   :  { %v7045_v7 = vadd.f32 %v7037_v56, %v7017_v24 }
 0xb8b   :  { %v7048_v0 = vmax.f32 %v7044_v22, 0.0 }
 0xb8c   :  { %v7049_v41 = vmax.f32 %v7045_v7, 0.0 }
 0xb8e   :  { %v7055_v27 = vcombine.low %v7048_v0, %v7049_v41 }
 0xb90   :  { %v7069_v4 = vrot.slane %v7055_v27, %v10763_v23 }
 0xb92   :  { %v7070_v37 = vcombine.low %v7062_v11, %v7069_v4 }
 0xb94   :  { %7072 = vst [vmem:[#allocation2] sm:$0xff] %v7070_v37 }
 0xb95   :  { %10180 = shalt.err (!%p10177_p12)
}
 0xb96   :  { %s10181_s19 = scalar_lea.hbm %s19318_s25, 128 }
 0xb97   :  { %p10182_p13 = scmp.ne.s32.totalorder %s19318_s25, %s10181_s19  ;;  %p10185_p0 = scmp.lt.u32.totalorder %s10181_s19, %s19318_s25 }
 0xb99   :  { %p10187_p1 = pnand %p10185_p0, %p10182_p13 }
 0xb9b   :  { %10190 = shalt.err (!%p10187_p1)
}
 0xb9c   :  { %7082 = dma.vmem_to_hbm [thread:$0]  %s7080_s9, 128, %s19318_s25, [#allocation3]  }
 0xb9d   :  { %10191 = dma.done.wait [#allocation3], 128  }
 0xb9e   :  { %10192 = vsyncadd [#allocation3], 4294967168 }
 0xb9f   :  { %10193 = dma.done.wait [#allocation5], 32  }
 0xba0   :  { %10194 = vsyncadd [#allocation5], 4294967264 }
 0xba1   :  { %7099 = vsyncpa [#allocation3], 1 }
 0xba2   :  { %7100 = vsyncpa [#allocation5], 1 }

</bundles_post_ra>
